<compile_context>
chip_gen: v7x
topology: tpu7x:2x2x1
jax: 0.10.0
libtpu: 0.0.40
codegen_flags: <defaults>
</compile_context>

<pallas_src>
import functools

import jax
import jax.numpy as jnp
from jax.experimental import pallas as pl
from jax.experimental.pallas import tpu as pltpu

EPS = 1e-5
ACT_DTYPE = jnp.bfloat16

TM = 512                        # output-row tile for the flat matmul kernel
VMEM_LIMIT = 32 * 1024 * 1024   # safe scoped-VMEM cap on v5e/v6e/v7x


def _round_up(x, m):
    return (x + m - 1) // m * m


# ---------------------------------------------------------------------------
# Pallas kernels
# ---------------------------------------------------------------------------
def _matmul_fused_kernel(x_ref, w_ref, b_ref, *rest, relu, has_residual):
    """out = maybe_relu(x @ W_folded + bias [+ residual]); full-K/full-N block."""
    if has_residual:
        r_ref, o_ref = rest
    else:
        (o_ref,) = rest
    y = jnp.dot(x_ref[...], w_ref[...], preferred_element_type=jnp.float32)
    y = y + b_ref[...]
    if has_residual:
        y = y + r_ref[...].astype(jnp.float32)
    if relu:
        y = jnp.maximum(y, 0.0)
    o_ref[...] = y.astype(o_ref.dtype)


def _conv3x3_kernel(x_ref, w_ref, b_ref, o_ref, *, ho, wo, wp, relu):
    """Direct 3x3 / stride-1 conv on one image: 9 shifted dots, no im2col.

    x_ref : (1, ho+3, wp, cin)   spatially zero-padded, wp % 8 == 0
    w_ref : (9, cin, cout)       BN-folded taps, row-major (di, dj)
    b_ref : (1, cout)
    o_ref : (1, ho, wo, cout)

    Padded-width trick: flattening to (hp*wp, cin) makes every tap (di, dj) a
    *contiguous* row slice starting at di*wp + dj.  Output columns wo..wp-1 of
    each row compute wrap-around garbage and are sliced off before the store.
    """
    cin = w_ref.shape[1]
    nc = w_ref.shape[2]
    xf = x_ref[0].reshape(-1, cin)          # layout-trivial: wp%8==0, cin%128==0
    acc = None
    for di in range(3):
        for dj in range(3):
            off = di * wp + dj
            d = jnp.dot(xf[off:off + ho * wp, :], w_ref[di * 3 + dj],
                        preferred_element_type=jnp.float32)
            acc = d if acc is None else acc + d
    y = acc + b_ref[...]
    if relu:
        y = jnp.maximum(y, 0.0)
    y = y.reshape(ho, wp, nc)[:, :wo, :]    # drop wrap-around columns
    o_ref[0] = y.astype(o_ref.dtype)


# ---------------------------------------------------------------------------
# Pallas wrappers
# ---------------------------------------------------------------------------
def matmul_bn_act(x2d, w, b, residual=None, relu=True):
    """x2d:(M,K) @ w:(K,Np) + b (+residual) (+ReLU).

    Weight/bias are pre-folded, pre-padded (K, Np multiples of 128) and fully
    VMEM-resident (constant index_map => fetched from HBM exactly once).  Only
    M is tiled; the last block may be ragged (cdiv grid), no activation pads.
    """
    M, K = x2d.shape
    Kw, Np = w.shape
    assert K == Kw, (K, Kw)
    tm = min(TM, _round_up(M, 8))
    has_residual = residual is not None

    inputs = [x2d.astype(ACT_DTYPE), w, b]
    in_specs = [
        pl.BlockSpec((tm, K), lambda i: (i, 0)),
        pl.BlockSpec((K, Np), lambda i: (0, 0)),   # whole weight, fetched once
        pl.BlockSpec((1, Np), lambda i: (0, 0)),
    ]
    if has_residual:
        inputs.append(residual.astype(ACT_DTYPE))
        in_specs.append(pl.BlockSpec((tm, Np), lambda i: (i, 0)))

    return pl.pallas_call(
        functools.partial(_matmul_fused_kernel, relu=relu,
                          has_residual=has_residual),
        out_shape=jax.ShapeDtypeStruct((M, Np), ACT_DTYPE),
        grid=(pl.cdiv(M, tm),),
        in_specs=in_specs,
        out_specs=pl.BlockSpec((tm, Np), lambda i: (i, 0)),
        compiler_params=pltpu.CompilerParams(
            dimension_semantics=("parallel",),
            vmem_limit_bytes=VMEM_LIMIT),
    )(*inputs)


def conv3x3_s1(x, w9, b, relu=True):
    """3x3, stride 1, pad 1 conv with folded BN; x NHWC bf16, C % 128 == 0."""
    n, h, w_, cin = x.shape
    ho, wo = h, w_
    wp = _round_up(wo + 2, 8)               # padded width, 8-aligned
    hp = ho + 3                             # 1 top + 2 bottom pad rows
    nc = w9.shape[2]
    xpad = jnp.pad(x, ((0, 0), (1, 2), (1, wp - wo - 1), (0, 0)))
    return pl.pallas_call(
        functools.partial(_conv3x3_kernel, ho=ho, wo=wo, wp=wp, relu=relu),
        out_shape=jax.ShapeDtypeStruct((n, ho, wo, nc), ACT_DTYPE),
        grid=(n,),
        in_specs=[
            pl.BlockSpec((1, hp, wp, cin), lambda i: (i, 0, 0, 0)),
            pl.BlockSpec((9, cin, nc), lambda i: (0, 0, 0)),   # resident weight
            pl.BlockSpec((1, nc), lambda i: (0, 0)),
        ],
        out_specs=pl.BlockSpec((1, ho, wo, nc), lambda i: (i, 0, 0, 0)),
        compiler_params=pltpu.CompilerParams(
            dimension_semantics=("parallel",),
            vmem_limit_bytes=VMEM_LIMIT),
    )(xpad, w9, b)


def maxpool_nhwc(x, k=3, stride=2, pad=1):
    """3x3/s2/p1 max pool (PyTorch semantics, -inf padding).

    Fused plain-JAX maximum tree over the 9 strided windows (per review: no
    (9, M, C) HBM stack; channels are already padded to 128 => lane-dense)."""
    n, h, w, c = x.shape
    xp = jnp.pad(x, ((0, 0), (pad, pad), (pad, pad), (0, 0)),
                 constant_values=-jnp.inf)
    ho = (h + 2 * pad - k) // stride + 1
    wo = (w + 2 * pad - k) // stride + 1
    out = None
    for i in range(k):
        for j in range(k):
            win = xp[:, i:i + stride * ho:stride, j:j + stride * wo:stride, :]
            out = win if out is None else jnp.maximum(out, win)
    return out


# ---------------------------------------------------------------------------
# im2col glue (only for the stem 7x7/s2 and the single 3x3/s2 conv)
# ---------------------------------------------------------------------------
def _extract_patches(x, kh, kw, stride, pad, kpad):
    n, h, w, c = x.shape
    xp = jnp.pad(x, ((0, 0), (pad, pad), (pad, pad), (0, 0)))
    ho = (h + 2 * pad - kh) // stride + 1
    wo = (w + 2 * pad - kw) // stride + 1
    cols = []
    for i in range(kh):
        for j in range(kw):
            cols.append(xp[:, i:i + stride * ho:stride,
                           j:j + stride * wo:stride, :])
    if kpad:  # 128-align K inside the same concatenate (no extra pad pass)
        cols.append(jnp.zeros((n, ho, wo, kpad), x.dtype))
    patches = jnp.concatenate(cols, axis=-1)
    return patches.reshape(n * ho * wo, kh * kw * c + kpad), (n, ho, wo)


def conv_bn(x, p, stride, relu, residual=None):
    """Folded conv+BN (+residual) (+ReLU); x NHWC bf16 with lane-padded C."""
    if 'w_tap' in p:                         # 3x3 / stride-1 -> direct tap conv
        return conv3x3_s1(x, p['w_tap'], p['b'], relu=relu)

    n = x.shape[0]
    kh, kw = p['kh'], p['kw']
    if kh == 1 and kw == 1:
        if stride > 1:
            x = x[:, ::stride, ::stride, :]
        ho, wo = x.shape[1], x.shape[2]
        patches = x.reshape(n * ho * wo, x.shape[3])
    else:
        patches, (n, ho, wo) = _extract_patches(x, kh, kw, stride,
                                                (kh - 1) // 2, p['kpad'])
    res2d = None if residual is None else residual.reshape(patches.shape[0], -1)
    out = matmul_bn_act(patches, p['w_mm'], p['b'], res2d, relu)
    return out.reshape(n, ho, wo, -1)


# ---------------------------------------------------------------------------
# parameter preparation (BN folding + channel padding, done ONCE)
# ---------------------------------------------------------------------------
def _fold_bn(p):
    scale = p['gamma'] / jnp.sqrt(p['var'] + EPS)
    bias = p['beta'] - p['mean'] * scale
    return p['w'] * scale[None, None, None, :], bias


def prep_conv(p, kind):
    w, bias = _fold_bn(p)
    kh, kw, cin, cout = w.shape
    cinp = cin if cin == 3 else _round_up(cin, 128)   # input image keeps 3 ch
    coutp = _round_up(cout, 128)
    w = jnp.pad(w, ((0, 0), (0, 0), (0, cinp - cin), (0, coutp - cout)))
    out = dict(kh=kh, kw=kw,
               b=jnp.pad(bias, (0, coutp - cout)).astype(jnp.float32)[None, :])
    if kind == 'tap':                                  # 3x3 stride-1 kernel
        out['w_tap'] = w.reshape(kh * kw, cinp, coutp).astype(ACT_DTYPE)
    else:                                              # flat matmul kernel
        k = kh * kw * cinp
        kpad = _round_up(k, 128) - k
        wm = jnp.pad(w.reshape(k, coutp), ((0, kpad), (0, 0)))
        out['w_mm'] = wm.astype(ACT_DTYPE)
        out['kpad'] = kpad
    return out


def prep_bottleneck(p):
    s = p['stride']
    out = dict(stride=s,
               conv1=prep_conv(p['conv1'], 'mm'),
               conv2=prep_conv(p['conv2'], 'tap' if s == 1 else 'mm'),
               conv3=prep_conv(p['conv3'], 'mm'))
    if 'down' in p:
        out['down'] = prep_conv(p['down'], 'mm')
    return out


def prep_backbone(params):
    return dict(stem=prep_conv(params['stem'], 'mm'),
                layer1=[prep_bottleneck(b) for b in params['layer1']],
                layer2=[prep_bottleneck(b) for b in params['layer2']],
                layer3=[prep_bottleneck(b) for b in params['layer3']])


# ---------------------------------------------------------------------------
# deterministic parameter init (synthetic; shapes follow torchvision resnet50)
# ---------------------------------------------------------------------------
def init_conv_bn(key, kh, kw, cin, cout):
    k1, k2, k3, k4, k5 = jax.random.split(key, 5)
    fan_in = kh * kw * cin
    return dict(
        w=jax.random.normal(k1, (kh, kw, cin, cout), jnp.float32)
        * (2.0 / fan_in) ** 0.5,
        gamma=1.0 + 0.1 * jax.random.normal(k2, (cout,), jnp.float32),
        beta=0.1 * jax.random.normal(k3, (cout,), jnp.float32),
        mean=0.1 * jax.random.normal(k4, (cout,), jnp.float32),
        var=jnp.abs(1.0 + 0.1 * jax.random.normal(k5, (cout,), jnp.float32)),
    )


def init_bottleneck(key, cin, planes, stride, downsample):
    ks = jax.random.split(key, 4)
    p = dict(
        conv1=init_conv_bn(ks[0], 1, 1, cin, planes),
        conv2=init_conv_bn(ks[1], 3, 3, planes, planes),
        conv3=init_conv_bn(ks[2], 1, 1, planes, planes * 4),
        stride=stride,
    )
    if downsample:
        p['down'] = init_conv_bn(ks[3], 1, 1, cin, planes * 4)
    return p


def init_resnet50_backbone(key):
    ks = jax.random.split(key, 4)

    def make_layer(k, cin, planes, n_blocks, stride):
        bks = jax.random.split(k, n_blocks)
        blocks = [init_bottleneck(bks[0], cin, planes, stride, True)]
        for i in range(1, n_blocks):
            blocks.append(init_bottleneck(bks[i], planes * 4, planes, 1, False))
        return blocks

    return dict(
        stem=init_conv_bn(ks[0], 7, 7, 3, 64),
        layer1=make_layer(ks[1], 64, 64, 3, 1),
        layer2=make_layer(ks[2], 256, 128, 4, 2),
        # SSD modification: conv4_block1 strides forced to (1,1) -> stride=1
        layer3=make_layer(ks[3], 512, 256, 6, 1),
    )


# ---------------------------------------------------------------------------
# forward (== nn.Sequential(*list(resnet50.children())[:7]))
# ---------------------------------------------------------------------------
def bottleneck(x, p):
    s = p['stride']
    out = conv_bn(x, p['conv1'], 1, True)
    out = conv_bn(out, p['conv2'], s, True)
    identity = conv_bn(x, p['down'], s, False) if 'down' in p else x
    # conv3 + bn3 + residual-add + ReLU fused in the matmul epilogue
    return conv_bn(out, p['conv3'], 1, True, residual=identity)


def resnet_backbone_forward(x_nchw, prep):
    x = jnp.transpose(x_nchw, (0, 2, 3, 1)).astype(ACT_DTYPE)  # NCHW -> NHWC
    x = conv_bn(x, prep['stem'], stride=2, relu=True)
    x = maxpool_nhwc(x, k=3, stride=2, pad=1)
    for name in ('layer1', 'layer2', 'layer3'):
        for blk in prep[name]:
            x = bottleneck(x, blk)
    # back to NCHW / f32 like the PyTorch module (1024 out-channels, no pad)
    return jnp.transpose(x, (0, 3, 1, 2)).astype(jnp.float32)


if __name__ == "__main__":
    key = jax.random.PRNGKey(0)
    pkey, xkey = jax.random.split(key)
    raw_params = init_resnet50_backbone(pkey)
    params = prep_backbone(raw_params)      # fold BN + pad/reshape once
    x = jax.random.normal(xkey, (2, 3, 32, 32), jnp.float32)

    fwd = jax.jit(lambda inp: resnet_backbone_forward(inp, params))
    out = jax.block_until_ready(fwd(x))

    # 32x32 -> conv1/s2 16 -> maxpool/s2 8 -> layer2/s2 4 -> layer3 (s forced 1) 4
    assert out.shape == (2, 1024, 4, 4), out.shape
    assert out.dtype == jnp.float32
    print("KERNEL_OK")
</pallas_src>

<mosaic_0001>
module attributes {stable_mosaic.version = 11 : i64} {
  func.func @_matmul_fused_kernel(%arg0: i32, %arg1: memref<512x256xbf16, #tpu.memory_space<vmem>>, %arg2: memref<256x128xbf16, #tpu.memory_space<vmem>>, %arg3: memref<1x128xf32, #tpu.memory_space<vmem>>, %arg4: memref<512x128xbf16, #tpu.memory_space<vmem>>) attributes {dimension_semantics = [#tpu.dimension_semantics<parallel>], iteration_bounds = array<i64: 1>, scalar_prefetch = 0 : i64, scratch_operands = 0 : i64, tpu.core_type = #tpu.core_type<tc>, window_params = [{transform_indices = @transform_0, window_bounds = array<i64: 512, 256>}, {pipeline_mode = #tpu.pipeline_mode<synchronous>, transform_indices = @transform_1, window_bounds = array<i64: 256, 128>}, {pipeline_mode = #tpu.pipeline_mode<synchronous>, transform_indices = @transform_2, window_bounds = array<i64: 1, 128>}, {transform_indices = @transform_3, window_bounds = array<i64: 512, 128>}]} {
    %c0 = arith.constant 0 : index
    %c0_0 = arith.constant 0 : index
    %0 = vector.load %arg1[%c0, %c0_0] : memref<512x256xbf16, #tpu.memory_space<vmem>>, vector<512x256xbf16>
    %c0_1 = arith.constant 0 : index
    %c0_2 = arith.constant 0 : index
    %1 = vector.load %arg2[%c0_1, %c0_2] : memref<256x128xbf16, #tpu.memory_space<vmem>>, vector<256x128xbf16>
    %cst = arith.constant dense<0.000000e+00> : vector<512x128xf32>
    %2 = tpu.matmul %0, %1, %cst {dimension_numbers = #tpu.dot_dimension_numbers<[1], [0], [0], [1], [0, 0, 1, 1], [], []>} : vector<512x256xbf16>, vector<256x128xbf16>, vector<512x128xf32> -> vector<512x128xf32>
    %c0_3 = arith.constant 0 : index
    %c0_4 = arith.constant 0 : index
    %3 = vector.load %arg3[%c0_3, %c0_4] : memref<1x128xf32, #tpu.memory_space<vmem>>, vector<1x128xf32>
    %4 = vector.broadcast %3 : vector<1x128xf32> to vector<512x128xf32>
    %5 = arith.addf %2, %4 : vector<512x128xf32>
    %cst_5 = arith.constant 0.000000e+00 : f32
    %6 = vector.broadcast %cst_5 : f32 to vector<512x128xf32>
    %7 = arith.maximumf %5, %6 : vector<512x128xf32>
    %8 = arith.truncf %7 : vector<512x128xf32> to vector<512x128xbf16>
    %c0_6 = arith.constant 0 : index
    %c0_7 = arith.constant 0 : index
    %9 = vector.load %arg4[%c0_6, %c0_7] : memref<512x128xbf16, #tpu.memory_space<vmem>>, vector<512x128xbf16>
    tpu.vector_store %arg4[%c0_6, %c0_7], %8 {strides = array<i32>} : memref<512x128xbf16, #tpu.memory_space<vmem>>, vector<512x128xbf16>,
    return
  }
  func.func @transform_0(%arg0: i32) -> (i32, i32) {
    %c0_i32 = arith.constant 0 : i32
    %c0_i32_0 = arith.constant 0 : i32
    return %arg0, %c0_i32 : i32, i32
  }
  func.func @transform_1(%arg0: i32) -> (i32, i32) {
    %c0_i32 = arith.constant 0 : i32
    %c0_i32_0 = arith.constant 0 : i32
    %c0_i32_1 = arith.constant 0 : i32
    return %c0_i32, %c0_i32_0 : i32, i32
  }
  func.func @transform_2(%arg0: i32) -> (i32, i32) {
    %c0_i32 = arith.constant 0 : i32
    %c0_i32_0 = arith.constant 0 : i32
    %c0_i32_1 = arith.constant 0 : i32
    return %c0_i32, %c0_i32_0 : i32, i32
  }
  func.func @transform_3(%arg0: i32) -> (i32, i32) {
    %c0_i32 = arith.constant 0 : i32
    %c0_i32_0 = arith.constant 0 : i32
    return %arg0, %c0_i32 : i32, i32
  }
}

module attributes {stable_mosaic.version = 11 : i64} {
  func.func @_matmul_fused_kernel(%arg0: i32, %arg1: memref<128x128xbf16, #tpu.memory_space<vmem>>, %arg2: memref<128x128xbf16, #tpu.memory_space<vmem>>, %arg3: memref<1x128xf32, #tpu.memory_space<vmem>>, %arg4: memref<128x128xbf16, #tpu.memory_space<vmem>>) attributes {dimension_semantics = [#tpu.dimension_semantics<parallel>], iteration_bounds = array<i64: 1>, scalar_prefetch = 0 : i64, scratch_operands = 0 : i64, tpu.core_type = #tpu.core_type<tc>, window_params = [{transform_indices = @transform_0, window_bounds = array<i64: 128, 128>}, {pipeline_mode = #tpu.pipeline_mode<synchronous>, transform_indices = @transform_1, window_bounds = array<i64: 128, 128>}, {pipeline_mode = #tpu.pipeline_mode<synchronous>, transform_indices = @transform_2, window_bounds = array<i64: 1, 128>}, {transform_indices = @transform_3, window_bounds = array<i64: 128, 128>}]} {
    %c0 = arith.constant 0 : index
    %c0_0 = arith.constant 0 : index
    %0 = vector.load %arg1[%c0, %c0_0] : memref<128x128xbf16, #tpu.memory_space<vmem>>, vector<128x128xbf16>
    %c0_1 = arith.constant 0 : index
    %c0_2 = arith.constant 0 : index
    %1 = vector.load %arg2[%c0_1, %c0_2] : memref<128x128xbf16, #tpu.memory_space<vmem>>, vector<128x128xbf16>
    %cst = arith.constant dense<0.000000e+00> : vector<128x128xf32>
    %2 = tpu.matmul %0, %1, %cst {dimension_numbers = #tpu.dot_dimension_numbers<[1], [0], [0], [1], [0, 0, 1, 1], [], []>} : vector<128x128xbf16>, vector<128x128xbf16>, vector<128x128xf32> -> vector<128x128xf32>
    %c0_3 = arith.constant 0 : index
    %c0_4 = arith.constant 0 : index
    %3 = vector.load %arg3[%c0_3, %c0_4] : memref<1x128xf32, #tpu.memory_space<vmem>>, vector<1x128xf32>
    %4 = vector.broadcast %3 : vector<1x128xf32> to vector<128x128xf32>
    %5 = arith.addf %2, %4 : vector<128x128xf32>
    %cst_5 = arith.constant 0.000000e+00 : f32
    %6 = vector.broadcast %cst_5 : f32 to vector<128x128xf32>
    %7 = arith.maximumf %5, %6 : vector<128x128xf32>
    %8 = arith.truncf %7 : vector<128x128xf32> to vector<128x128xbf16>
    %c0_6 = arith.constant 0 : index
    %c0_7 = arith.constant 0 : index
    %9 = vector.load %arg4[%c0_6, %c0_7] : memref<128x128xbf16, #tpu.memory_space<vmem>>, vector<128x128xbf16>
    tpu.vector_store %arg4[%c0_6, %c0_7], %8 {strides = array<i32>} : memref<128x128xbf16, #tpu.memory_space<vmem>>, vector<128x128xbf16>,
    return
  }
  func.func @transform_0(%arg0: i32) -> (i32, i32) {
    %c0_i32 = arith.constant 0 : i32
    %c0_i32_0 = arith.constant 0 : i32
    return %arg0, %c0_i32 : i32, i32
  }
  func.func @transform_1(%arg0: i32) -> (i32, i32) {
    %c0_i32 = arith.constant 0 : i32
    %c0_i32_0 = arith.constant 0 : i32
    %c0_i32_1 = arith.constant 0 : i32
    return %c0_i32, %c0_i32_0 : i32, i32
  }
  func.func @transform_2(%arg0: i32) -> (i32, i32) {
    %c0_i32 = arith.constant 0 : i32
    %c0_i32_0 = arith.constant 0 : i32
    %c0_i32_1 = arith.constant 0 : i32
    return %c0_i32, %c0_i32_0 : i32, i32
  }
  func.func @transform_3(%arg0: i32) -> (i32, i32) {
    %c0_i32 = arith.constant 0 : i32
    %c0_i32_0 = arith.constant 0 : i32
    return %arg0, %c0_i32 : i32, i32
  }
}

module attributes {stable_mosaic.version = 11 : i64} {
  func.func @_conv3x3_kernel(%arg0: i32, %arg1: memref<1x11x16x128xbf16, #tpu.memory_space<vmem>>, %arg2: memref<9x128x128xbf16, #tpu.memory_space<vmem>>, %arg3: memref<1x128xf32, #tpu.memory_space<vmem>>, %arg4: memref<1x8x8x128xbf16, #tpu.memory_space<vmem>>) attributes {dimension_semantics = [#tpu.dimension_semantics<parallel>], iteration_bounds = array<i64: 2>, scalar_prefetch = 0 : i64, scratch_operands = 0 : i64, tpu.core_type = #tpu.core_type<tc>, window_params = [{transform_indices = @transform_0, window_bounds = array<i64: 1, 11, 16, 128>}, {pipeline_mode = #tpu.pipeline_mode<synchronous>, transform_indices = @transform_1, window_bounds = array<i64: 9, 128, 128>}, {pipeline_mode = #tpu.pipeline_mode<synchronous>, transform_indices = @transform_2, window_bounds = array<i64: 1, 128>}, {transform_indices = @transform_3, window_bounds = array<i64: 1, 8, 8, 128>}]} {
    %c0 = arith.constant 0 : index
    %c0_0 = arith.constant 0 : index
    %c0_1 = arith.constant 0 : index
    %c0_2 = arith.constant 0 : index
    %0 = vector.load %arg1[%c0, %c0_0, %c0_1, %c0_2] : memref<1x11x16x128xbf16, #tpu.memory_space<vmem>>, vector<1x11x16x128xbf16>
    %1 = vector.shape_cast %0 : vector<1x11x16x128xbf16> to vector<11x16x128xbf16>
    %2 = vector.shape_cast %1 : vector<11x16x128xbf16> to vector<176x128xbf16>
    %3 = vector.extract_strided_slice %2 {offsets = [0, 0], sizes = [128, 128], strides = [1, 1]} : vector<176x128xbf16> to vector<128x128xbf16>
    %c0_3 = arith.constant 0 : index
    %c0_4 = arith.constant 0 : index
    %c0_5 = arith.constant 0 : index
    %4 = vector.load %arg2[%c0_3, %c0_4, %c0_5] : memref<9x128x128xbf16, #tpu.memory_space<vmem>>, vector<1x128x128xbf16>
    %5 = vector.shape_cast %4 : vector<1x128x128xbf16> to vector<128x128xbf16>
    %cst = arith.constant dense<0.000000e+00> : vector<128x128xf32>
    %6 = tpu.matmul %3, %5, %cst {dimension_numbers = #tpu.dot_dimension_numbers<[1], [0], [0], [1], [0, 0, 1, 1], [], []>} : vector<128x128xbf16>, vector<128x128xbf16>, vector<128x128xf32> -> vector<128x128xf32>
    %7 = vector.extract_strided_slice %2 {offsets = [1, 0], sizes = [128, 128], strides = [1, 1]} : vector<176x128xbf16> to vector<128x128xbf16>
    %c1 = arith.constant 1 : index
    %c0_6 = arith.constant 0 : index
    %c0_7 = arith.constant 0 : index
    %8 = vector.load %arg2[%c1, %c0_6, %c0_7] : memref<9x128x128xbf16, #tpu.memory_space<vmem>>, vector<1x128x128xbf16>
    %9 = vector.shape_cast %8 : vector<1x128x128xbf16> to vector<128x128xbf16>
    %cst_8 = arith.constant dense<0.000000e+00> : vector<128x128xf32>
    %10 = tpu.matmul %7, %9, %cst_8 {dimension_numbers = #tpu.dot_dimension_numbers<[1], [0], [0], [1], [0, 0, 1, 1], [], []>} : vector<128x128xbf16>, vector<128x128xbf16>, vector<128x128xf32> -> vector<128x128xf32>
    %11 = arith.addf %6, %10 : vector<128x128xf32>
    %12 = vector.extract_strided_slice %2 {offsets = [2, 0], sizes = [128, 128], strides = [1, 1]} : vector<176x128xbf16> to vector<128x128xbf16>
    %c2 = arith.constant 2 : index
    %c0_9 = arith.constant 0 : index
    %c0_10 = arith.constant 0 : index
    %13 = vector.load %arg2[%c2, %c0_9, %c0_10] : memref<9x128x128xbf16, #tpu.memory_space<vmem>>, vector<1x128x128xbf16>
    %14 = vector.shape_cast %13 : vector<1x128x128xbf16> to vector<128x128xbf16>
    %cst_11 = arith.constant dense<0.000000e+00> : vector<128x128xf32>
    %15 = tpu.matmul %12, %14, %cst_11 {dimension_numbers = #tpu.dot_dimension_numbers<[1], [0], [0], [1], [0, 0, 1, 1], [], []>} : vector<128x128xbf16>, vector<128x128xbf16>, vector<128x128xf32> -> vector<128x128xf32>
    %16 = arith.addf %11, %15 : vector<128x128xf32>
    %17 = vector.extract_strided_slice %2 {offsets = [16, 0], sizes = [128, 128], strides = [1, 1]} : vector<176x128xbf16> to vector<128x128xbf16>
    %c3 = arith.constant 3 : index
    %c0_12 = arith.constant 0 : index
    %c0_13 = arith.constant 0 : index
    %18 = vector.load %arg2[%c3, %c0_12, %c0_13] : memref<9x128x128xbf16, #tpu.memory_space<vmem>>, vector<1x128x128xbf16>
    %19 = vector.shape_cast %18 : vector<1x128x128xbf16> to vector<128x128xbf16>
    %cst_14 = arith.constant dense<0.000000e+00> : vector<128x128xf32>
    %20 = tpu.matmul %17, %19, %cst_14 {dimension_numbers = #tpu.dot_dimension_numbers<[1], [0], [0], [1], [0, 0, 1, 1], [], []>} : vector<128x128xbf16>, vector<128x128xbf16>, vector<128x128xf32> -> vector<128x128xf32>
    %21 = arith.addf %16, %20 : vector<128x128xf32>
    %22 = vector.extract_strided_slice %2 {offsets = [17, 0], sizes = [128, 128], strides = [1, 1]} : vector<176x128xbf16> to vector<128x128xbf16>
    %c4 = arith.constant 4 : index
    %c0_15 = arith.constant 0 : index
    %c0_16 = arith.constant 0 : index
    %23 = vector.load %arg2[%c4, %c0_15, %c0_16] : memref<9x128x128xbf16, #tpu.memory_space<vmem>>, vector<1x128x128xbf16>
    %24 = vector.shape_cast %23 : vector<1x128x128xbf16> to vector<128x128xbf16>
    %cst_17 = arith.constant dense<0.000000e+00> : vector<128x128xf32>
    %25 = tpu.matmul %22, %24, %cst_17 {dimension_numbers = #tpu.dot_dimension_numbers<[1], [0], [0], [1], [0, 0, 1, 1], [], []>} : vector<128x128xbf16>, vector<128x128xbf16>, vector<128x128xf32> -> vector<128x128xf32>
    %26 = arith.addf %21, %25 : vector<128x128xf32>
    %27 = vector.extract_strided_slice %2 {offsets = [18, 0], sizes = [128, 128], strides = [1, 1]} : vector<176x128xbf16> to vector<128x128xbf16>
    %c5 = arith.constant 5 : index
    %c0_18 = arith.constant 0 : index
    %c0_19 = arith.constant 0 : index
    %28 = vector.load %arg2[%c5, %c0_18, %c0_19] : memref<9x128x128xbf16, #tpu.memory_space<vmem>>, vector<1x128x128xbf16>
    %29 = vector.shape_cast %28 : vector<1x128x128xbf16> to vector<128x128xbf16>
    %cst_20 = arith.constant dense<0.000000e+00> : vector<128x128xf32>
    %30 = tpu.matmul %27, %29, %cst_20 {dimension_numbers = #tpu.dot_dimension_numbers<[1], [0], [0], [1], [0, 0, 1, 1], [], []>} : vector<128x128xbf16>, vector<128x128xbf16>, vector<128x128xf32> -> vector<128x128xf32>
    %31 = arith.addf %26, %30 : vector<128x128xf32>
    %32 = vector.extract_strided_slice %2 {offsets = [32, 0], sizes = [128, 128], strides = [1, 1]} : vector<176x128xbf16> to vector<128x128xbf16>
    %c6 = arith.constant 6 : index
    %c0_21 = arith.constant 0 : index
    %c0_22 = arith.constant 0 : index
    %33 = vector.load %arg2[%c6, %c0_21, %c0_22] : memref<9x128x128xbf16, #tpu.memory_space<vmem>>, vector<1x128x128xbf16>
    %34 = vector.shape_cast %33 : vector<1x128x128xbf16> to vector<128x128xbf16>
    %cst_23 = arith.constant dense<0.000000e+00> : vector<128x128xf32>
    %35 = tpu.matmul %32, %34, %cst_23 {dimension_numbers = #tpu.dot_dimension_numbers<[1], [0], [0], [1], [0, 0, 1, 1], [], []>} : vector<128x128xbf16>, vector<128x128xbf16>, vector<128x128xf32> -> vector<128x128xf32>
    %36 = arith.addf %31, %35 : vector<128x128xf32>
    %37 = vector.extract_strided_slice %2 {offsets = [33, 0], sizes = [128, 128], strides = [1, 1]} : vector<176x128xbf16> to vector<128x128xbf16>
    %c7 = arith.constant 7 : index
    %c0_24 = arith.constant 0 : index
    %c0_25 = arith.constant 0 : index
    %38 = vector.load %arg2[%c7, %c0_24, %c0_25] : memref<9x128x128xbf16, #tpu.memory_space<vmem>>, vector<1x128x128xbf16>
    %39 = vector.shape_cast %38 : vector<1x128x128xbf16> to vector<128x128xbf16>
    %cst_26 = arith.constant dense<0.000000e+00> : vector<128x128xf32>
    %40 = tpu.matmul %37, %39, %cst_26 {dimension_numbers = #tpu.dot_dimension_numbers<[1], [0], [0], [1], [0, 0, 1, 1], [], []>} : vector<128x128xbf16>, vector<128x128xbf16>, vector<128x128xf32> -> vector<128x128xf32>
    %41 = arith.addf %36, %40 : vector<128x128xf32>
    %42 = vector.extract_strided_slice %2 {offsets = [34, 0], sizes = [128, 128], strides = [1, 1]} : vector<176x128xbf16> to vector<128x128xbf16>
    %c8 = arith.constant 8 : index
    %c0_27 = arith.constant 0 : index
    %c0_28 = arith.constant 0 : index
    %43 = vector.load %arg2[%c8, %c0_27, %c0_28] : memref<9x128x128xbf16, #tpu.memory_space<vmem>>, vector<1x128x128xbf16>
    %44 = vector.shape_cast %43 : vector<1x128x128xbf16> to vector<128x128xbf16>
    %cst_29 = arith.constant dense<0.000000e+00> : vector<128x128xf32>
    %45 = tpu.matmul %42, %44, %cst_29 {dimension_numbers = #tpu.dot_dimension_numbers<[1], [0], [0], [1], [0, 0, 1, 1], [], []>} : vector<128x128xbf16>, vector<128x128xbf16>, vector<128x128xf32> -> vector<128x128xf32>
    %46 = arith.addf %41, %45 : vector<128x128xf32>
    %c0_30 = arith.constant 0 : index
    %c0_31 = arith.constant 0 : index
    %47 = vector.load %arg3[%c0_30, %c0_31] : memref<1x128xf32, #tpu.memory_space<vmem>>, vector<1x128xf32>
    %48 = vector.broadcast %47 : vector<1x128xf32> to vector<128x128xf32>
    %49 = arith.addf %46, %48 : vector<128x128xf32>
    %cst_32 = arith.constant 0.000000e+00 : f32
    %50 = vector.broadcast %cst_32 : f32 to vector<128x128xf32>
    %51 = arith.maximumf %49, %50 : vector<128x128xf32>
    %52 = vector.shape_cast %51 : vector<128x128xf32> to vector<8x16x128xf32>
    %53 = vector.extract_strided_slice %52 {offsets = [0, 0, 0], sizes = [8, 8, 128], strides = [1, 1, 1]} : vector<8x16x128xf32> to vector<8x8x128xf32>
    %54 = arith.truncf %53 : vector<8x8x128xf32> to vector<8x8x128xbf16>
    %c0_33 = arith.constant 0 : index
    %c0_34 = arith.constant 0 : index
    %c0_35 = arith.constant 0 : index
    %c0_36 = arith.constant 0 : index
    %55 = vector.load %arg4[%c0_33, %c0_34, %c0_35, %c0_36] : memref<1x8x8x128xbf16, #tpu.memory_space<vmem>>, vector<1x8x8x128xbf16>
    %56 = vector.shape_cast %55 : vector<1x8x8x128xbf16> to vector<8x8x128xbf16>
    %57 = vector.shape_cast %54 : vector<8x8x128xbf16> to vector<1x8x8x128xbf16>
    tpu.vector_store %arg4[%c0_33, %c0_34, %c0_35, %c0_36], %57 {strides = array<i32>} : memref<1x8x8x128xbf16, #tpu.memory_space<vmem>>, vector<1x8x8x128xbf16>,
    return
  }
  func.func @transform_0(%arg0: i32) -> (i32, i32, i32, i32) {
    %c0_i32 = arith.constant 0 : i32
    %c0_i32_0 = arith.constant 0 : i32
    %c0_i32_1 = arith.constant 0 : i32
    %c0_i32_2 = arith.constant 0 : i32
    return %arg0, %c0_i32, %c0_i32_0, %c0_i32_1 : i32, i32, i32, i32
  }
  func.func @transform_1(%arg0: i32) -> (i32, i32, i32) {
    %c0_i32 = arith.constant 0 : i32
    %c0_i32_0 = arith.constant 0 : i32
    %c0_i32_1 = arith.constant 0 : i32
    %c0_i32_2 = arith.constant 0 : i32
    return %c0_i32, %c0_i32_0, %c0_i32_1 : i32, i32, i32
  }
  func.func @transform_2(%arg0: i32) -> (i32, i32) {
    %c0_i32 = arith.constant 0 : i32
    %c0_i32_0 = arith.constant 0 : i32
    %c0_i32_1 = arith.constant 0 : i32
    return %c0_i32, %c0_i32_0 : i32, i32
  }
  func.func @transform_3(%arg0: i32) -> (i32, i32, i32, i32) {
    %c0_i32 = arith.constant 0 : i32
    %c0_i32_0 = arith.constant 0 : i32
    %c0_i32_1 = arith.constant 0 : i32
    %c0_i32_2 = arith.constant 0 : i32
    return %arg0, %c0_i32, %c0_i32_0, %c0_i32_1 : i32, i32, i32, i32
  }
}

module attributes {stable_mosaic.version = 11 : i64} {
  func.func @_matmul_fused_kernel(%arg0: i32, %arg1: memref<128x128xbf16, #tpu.memory_space<vmem>>, %arg2: memref<128x256xbf16, #tpu.memory_space<vmem>>, %arg3: memref<1x256xf32, #tpu.memory_space<vmem>>, %arg4: memref<128x256xbf16, #tpu.memory_space<vmem>>) attributes {dimension_semantics = [#tpu.dimension_semantics<parallel>], iteration_bounds = array<i64: 1>, scalar_prefetch = 0 : i64, scratch_operands = 0 : i64, tpu.core_type = #tpu.core_type<tc>, window_params = [{transform_indices = @transform_0, window_bounds = array<i64: 128, 128>}, {pipeline_mode = #tpu.pipeline_mode<synchronous>, transform_indices = @transform_1, window_bounds = array<i64: 128, 256>}, {pipeline_mode = #tpu.pipeline_mode<synchronous>, transform_indices = @transform_2, window_bounds = array<i64: 1, 256>}, {transform_indices = @transform_3, window_bounds = array<i64: 128, 256>}]} {
    %c0 = arith.constant 0 : index
    %c0_0 = arith.constant 0 : index
    %0 = vector.load %arg1[%c0, %c0_0] : memref<128x128xbf16, #tpu.memory_space<vmem>>, vector<128x128xbf16>
    %c0_1 = arith.constant 0 : index
    %c0_2 = arith.constant 0 : index
    %1 = vector.load %arg2[%c0_1, %c0_2] : memref<128x256xbf16, #tpu.memory_space<vmem>>, vector<128x256xbf16>
    %cst = arith.constant dense<0.000000e+00> : vector<128x256xf32>
    %2 = tpu.matmul %0, %1, %cst {dimension_numbers = #tpu.dot_dimension_numbers<[1], [0], [0], [1], [0, 0, 1, 1], [], []>} : vector<128x128xbf16>, vector<128x256xbf16>, vector<128x256xf32> -> vector<128x256xf32>
    %c0_3 = arith.constant 0 : index
    %c0_4 = arith.constant 0 : index
    %3 = vector.load %arg3[%c0_3, %c0_4] : memref<1x256xf32, #tpu.memory_space<vmem>>, vector<1x256xf32>
    %4 = vector.broadcast %3 : vector<1x256xf32> to vector<128x256xf32>
    %5 = arith.addf %2, %4 : vector<128x256xf32>
    %6 = arith.truncf %5 : vector<128x256xf32> to vector<128x256xbf16>
    %c0_5 = arith.constant 0 : index
    %c0_6 = arith.constant 0 : index
    %7 = vector.load %arg4[%c0_5, %c0_6] : memref<128x256xbf16, #tpu.memory_space<vmem>>, vector<128x256xbf16>
    tpu.vector_store %arg4[%c0_5, %c0_6], %6 {strides = array<i32>} : memref<128x256xbf16, #tpu.memory_space<vmem>>, vector<128x256xbf16>,
    return
  }
  func.func @transform_0(%arg0: i32) -> (i32, i32) {
    %c0_i32 = arith.constant 0 : i32
    %c0_i32_0 = arith.constant 0 : i32
    return %arg0, %c0_i32 : i32, i32
  }
  func.func @transform_1(%arg0: i32) -> (i32, i32) {
    %c0_i32 = arith.constant 0 : i32
    %c0_i32_0 = arith.constant 0 : i32
    %c0_i32_1 = arith.constant 0 : i32
    return %c0_i32, %c0_i32_0 : i32, i32
  }
  func.func @transform_2(%arg0: i32) -> (i32, i32) {
    %c0_i32 = arith.constant 0 : i32
    %c0_i32_0 = arith.constant 0 : i32
    %c0_i32_1 = arith.constant 0 : i32
    return %c0_i32, %c0_i32_0 : i32, i32
  }
  func.func @transform_3(%arg0: i32) -> (i32, i32) {
    %c0_i32 = arith.constant 0 : i32
    %c0_i32_0 = arith.constant 0 : i32
    return %arg0, %c0_i32 : i32, i32
  }
}

module attributes {stable_mosaic.version = 11 : i64} {
  func.func @_matmul_fused_kernel(%arg0: i32, %arg1: memref<128x128xbf16, #tpu.memory_space<vmem>>, %arg2: memref<128x256xbf16, #tpu.memory_space<vmem>>, %arg3: memref<1x256xf32, #tpu.memory_space<vmem>>, %arg4: memref<128x256xbf16, #tpu.memory_space<vmem>>, %arg5: memref<128x256xbf16, #tpu.memory_space<vmem>>) attributes {dimension_semantics = [#tpu.dimension_semantics<parallel>], iteration_bounds = array<i64: 1>, scalar_prefetch = 0 : i64, scratch_operands = 0 : i64, tpu.core_type = #tpu.core_type<tc>, window_params = [{transform_indices = @transform_0, window_bounds = array<i64: 128, 128>}, {pipeline_mode = #tpu.pipeline_mode<synchronous>, transform_indices = @transform_1, window_bounds = array<i64: 128, 256>}, {pipeline_mode = #tpu.pipeline_mode<synchronous>, transform_indices = @transform_2, window_bounds = array<i64: 1, 256>}, {transform_indices = @transform_3, window_bounds = array<i64: 128, 256>}, {transform_indices = @transform_4, window_bounds = array<i64: 128, 256>}]} {
    %c0 = arith.constant 0 : index
    %c0_0 = arith.constant 0 : index
    %0 = vector.load %arg1[%c0, %c0_0] : memref<128x128xbf16, #tpu.memory_space<vmem>>, vector<128x128xbf16>
    %c0_1 = arith.constant 0 : index
    %c0_2 = arith.constant 0 : index
    %1 = vector.load %arg2[%c0_1, %c0_2] : memref<128x256xbf16, #tpu.memory_space<vmem>>, vector<128x256xbf16>
    %cst = arith.constant dense<0.000000e+00> : vector<128x256xf32>
    %2 = tpu.matmul %0, %1, %cst {dimension_numbers = #tpu.dot_dimension_numbers<[1], [0], [0], [1], [0, 0, 1, 1], [], []>} : vector<128x128xbf16>, vector<128x256xbf16>, vector<128x256xf32> -> vector<128x256xf32>
    %c0_3 = arith.constant 0 : index
    %c0_4 = arith.constant 0 : index
    %3 = vector.load %arg3[%c0_3, %c0_4] : memref<1x256xf32, #tpu.memory_space<vmem>>, vector<1x256xf32>
    %4 = vector.broadcast %3 : vector<1x256xf32> to vector<128x256xf32>
    %5 = arith.addf %2, %4 : vector<128x256xf32>
    %c0_5 = arith.constant 0 : index
    %c0_6 = arith.constant 0 : index
    %6 = vector.load %arg4[%c0_5, %c0_6] : memref<128x256xbf16, #tpu.memory_space<vmem>>, vector<128x256xbf16>
    %7 = arith.extf %6 : vector<128x256xbf16> to vector<128x256xf32>
    %8 = arith.addf %5, %7 : vector<128x256xf32>
    %cst_7 = arith.constant 0.000000e+00 : f32
    %9 = vector.broadcast %cst_7 : f32 to vector<128x256xf32>
    %10 = arith.maximumf %8, %9 : vector<128x256xf32>
    %11 = arith.truncf %10 : vector<128x256xf32> to vector<128x256xbf16>
    %c0_8 = arith.constant 0 : index
    %c0_9 = arith.constant 0 : index
    %12 = vector.load %arg5[%c0_8, %c0_9] : memref<128x256xbf16, #tpu.memory_space<vmem>>, vector<128x256xbf16>
    tpu.vector_store %arg5[%c0_8, %c0_9], %11 {strides = array<i32>} : memref<128x256xbf16, #tpu.memory_space<vmem>>, vector<128x256xbf16>,
    return
  }
  func.func @transform_0(%arg0: i32) -> (i32, i32) {
    %c0_i32 = arith.constant 0 : i32
    %c0_i32_0 = arith.constant 0 : i32
    return %arg0, %c0_i32 : i32, i32
  }
  func.func @transform_1(%arg0: i32) -> (i32, i32) {
    %c0_i32 = arith.constant 0 : i32
    %c0_i32_0 = arith.constant 0 : i32
    %c0_i32_1 = arith.constant 0 : i32
    return %c0_i32, %c0_i32_0 : i32, i32
  }
  func.func @transform_2(%arg0: i32) -> (i32, i32) {
    %c0_i32 = arith.constant 0 : i32
    %c0_i32_0 = arith.constant 0 : i32
    %c0_i32_1 = arith.constant 0 : i32
    return %c0_i32, %c0_i32_0 : i32, i32
  }
  func.func @transform_3(%arg0: i32) -> (i32, i32) {
    %c0_i32 = arith.constant 0 : i32
    %c0_i32_0 = arith.constant 0 : i32
    return %arg0, %c0_i32 : i32, i32
  }
  func.func @transform_4(%arg0: i32) -> (i32, i32) {
    %c0_i32 = arith.constant 0 : i32
    %c0_i32_0 = arith.constant 0 : i32
    return %arg0, %c0_i32 : i32, i32
  }
}

module attributes {stable_mosaic.version = 11 : i64} {
  func.func @_matmul_fused_kernel(%arg0: i32, %arg1: memref<128x256xbf16, #tpu.memory_space<vmem>>, %arg2: memref<256x128xbf16, #tpu.memory_space<vmem>>, %arg3: memref<1x128xf32, #tpu.memory_space<vmem>>, %arg4: memref<128x128xbf16, #tpu.memory_space<vmem>>) attributes {dimension_semantics = [#tpu.dimension_semantics<parallel>], iteration_bounds = array<i64: 1>, scalar_prefetch = 0 : i64, scratch_operands = 0 : i64, tpu.core_type = #tpu.core_type<tc>, window_params = [{transform_indices = @transform_0, window_bounds = array<i64: 128, 256>}, {pipeline_mode = #tpu.pipeline_mode<synchronous>, transform_indices = @transform_1, window_bounds = array<i64: 256, 128>}, {pipeline_mode = #tpu.pipeline_mode<synchronous>, transform_indices = @transform_2, window_bounds = array<i64: 1, 128>}, {transform_indices = @transform_3, window_bounds = array<i64: 128, 128>}]} {
    %c0 = arith.constant 0 : index
    %c0_0 = arith.constant 0 : index
    %0 = vector.load %arg1[%c0, %c0_0] : memref<128x256xbf16, #tpu.memory_space<vmem>>, vector<128x256xbf16>
    %c0_1 = arith.constant 0 : index
    %c0_2 = arith.constant 0 : index
    %1 = vector.load %arg2[%c0_1, %c0_2] : memref<256x128xbf16, #tpu.memory_space<vmem>>, vector<256x128xbf16>
    %cst = arith.constant dense<0.000000e+00> : vector<128x128xf32>
    %2 = tpu.matmul %0, %1, %cst {dimension_numbers = #tpu.dot_dimension_numbers<[1], [0], [0], [1], [0, 0, 1, 1], [], []>} : vector<128x256xbf16>, vector<256x128xbf16>, vector<128x128xf32> -> vector<128x128xf32>
    %c0_3 = arith.constant 0 : index
    %c0_4 = arith.constant 0 : index
    %3 = vector.load %arg3[%c0_3, %c0_4] : memref<1x128xf32, #tpu.memory_space<vmem>>, vector<1x128xf32>
    %4 = vector.broadcast %3 : vector<1x128xf32> to vector<128x128xf32>
    %5 = arith.addf %2, %4 : vector<128x128xf32>
    %cst_5 = arith.constant 0.000000e+00 : f32
    %6 = vector.broadcast %cst_5 : f32 to vector<128x128xf32>
    %7 = arith.maximumf %5, %6 : vector<128x128xf32>
    %8 = arith.truncf %7 : vector<128x128xf32> to vector<128x128xbf16>
    %c0_6 = arith.constant 0 : index
    %c0_7 = arith.constant 0 : index
    %9 = vector.load %arg4[%c0_6, %c0_7] : memref<128x128xbf16, #tpu.memory_space<vmem>>, vector<128x128xbf16>
    tpu.vector_store %arg4[%c0_6, %c0_7], %8 {strides = array<i32>} : memref<128x128xbf16, #tpu.memory_space<vmem>>, vector<128x128xbf16>,
    return
  }
  func.func @transform_0(%arg0: i32) -> (i32, i32) {
    %c0_i32 = arith.constant 0 : i32
    %c0_i32_0 = arith.constant 0 : i32
    return %arg0, %c0_i32 : i32, i32
  }
  func.func @transform_1(%arg0: i32) -> (i32, i32) {
    %c0_i32 = arith.constant 0 : i32
    %c0_i32_0 = arith.constant 0 : i32
    %c0_i32_1 = arith.constant 0 : i32
    return %c0_i32, %c0_i32_0 : i32, i32
  }
  func.func @transform_2(%arg0: i32) -> (i32, i32) {
    %c0_i32 = arith.constant 0 : i32
    %c0_i32_0 = arith.constant 0 : i32
    %c0_i32_1 = arith.constant 0 : i32
    return %c0_i32, %c0_i32_0 : i32, i32
  }
  func.func @transform_3(%arg0: i32) -> (i32, i32) {
    %c0_i32 = arith.constant 0 : i32
    %c0_i32_0 = arith.constant 0 : i32
    return %arg0, %c0_i32 : i32, i32
  }
}

module attributes {stable_mosaic.version = 11 : i64} {
  func.func @_matmul_fused_kernel(%arg0: i32, %arg1: memref<32x1152xbf16, #tpu.memory_space<vmem>>, %arg2: memref<1152x128xbf16, #tpu.memory_space<vmem>>, %arg3: memref<1x128xf32, #tpu.memory_space<vmem>>, %arg4: memref<32x128xbf16, #tpu.memory_space<vmem>>) attributes {dimension_semantics = [#tpu.dimension_semantics<parallel>], iteration_bounds = array<i64: 1>, scalar_prefetch = 0 : i64, scratch_operands = 0 : i64, tpu.core_type = #tpu.core_type<tc>, window_params = [{transform_indices = @transform_0, window_bounds = array<i64: 32, 1152>}, {pipeline_mode = #tpu.pipeline_mode<synchronous>, transform_indices = @transform_1, window_bounds = array<i64: 1152, 128>}, {pipeline_mode = #tpu.pipeline_mode<synchronous>, transform_indices = @transform_2, window_bounds = array<i64: 1, 128>}, {transform_indices = @transform_3, window_bounds = array<i64: 32, 128>}]} {
    %c0 = arith.constant 0 : index
    %c0_0 = arith.constant 0 : index
    %0 = vector.load %arg1[%c0, %c0_0] : memref<32x1152xbf16, #tpu.memory_space<vmem>>, vector<32x1152xbf16>
    %c0_1 = arith.constant 0 : index
    %c0_2 = arith.constant 0 : index
    %1 = vector.load %arg2[%c0_1, %c0_2] : memref<1152x128xbf16, #tpu.memory_space<vmem>>, vector<1152x128xbf16>
    %cst = arith.constant dense<0.000000e+00> : vector<32x128xf32>
    %2 = tpu.matmul %0, %1, %cst {dimension_numbers = #tpu.dot_dimension_numbers<[1], [0], [0], [1], [0, 0, 1, 1], [], []>} : vector<32x1152xbf16>, vector<1152x128xbf16>, vector<32x128xf32> -> vector<32x128xf32>
    %c0_3 = arith.constant 0 : index
    %c0_4 = arith.constant 0 : index
    %3 = vector.load %arg3[%c0_3, %c0_4] : memref<1x128xf32, #tpu.memory_space<vmem>>, vector<1x128xf32>
    %4 = vector.broadcast %3 : vector<1x128xf32> to vector<32x128xf32>
    %5 = arith.addf %2, %4 : vector<32x128xf32>
    %cst_5 = arith.constant 0.000000e+00 : f32
    %6 = vector.broadcast %cst_5 : f32 to vector<32x128xf32>
    %7 = arith.maximumf %5, %6 : vector<32x128xf32>
    %8 = arith.truncf %7 : vector<32x128xf32> to vector<32x128xbf16>
    %c0_6 = arith.constant 0 : index
    %c0_7 = arith.constant 0 : index
    %9 = vector.load %arg4[%c0_6, %c0_7] : memref<32x128xbf16, #tpu.memory_space<vmem>>, vector<32x128xbf16>
    tpu.vector_store %arg4[%c0_6, %c0_7], %8 {strides = array<i32>} : memref<32x128xbf16, #tpu.memory_space<vmem>>, vector<32x128xbf16>,
    return
  }
  func.func @transform_0(%arg0: i32) -> (i32, i32) {
    %c0_i32 = arith.constant 0 : i32
    %c0_i32_0 = arith.constant 0 : i32
    return %arg0, %c0_i32 : i32, i32
  }
  func.func @transform_1(%arg0: i32) -> (i32, i32) {
    %c0_i32 = arith.constant 0 : i32
    %c0_i32_0 = arith.constant 0 : i32
    %c0_i32_1 = arith.constant 0 : i32
    return %c0_i32, %c0_i32_0 : i32, i32
  }
  func.func @transform_2(%arg0: i32) -> (i32, i32) {
    %c0_i32 = arith.constant 0 : i32
    %c0_i32_0 = arith.constant 0 : i32
    %c0_i32_1 = arith.constant 0 : i32
    return %c0_i32, %c0_i32_0 : i32, i32
  }
  func.func @transform_3(%arg0: i32) -> (i32, i32) {
    %c0_i32 = arith.constant 0 : i32
    %c0_i32_0 = arith.constant 0 : i32
    return %arg0, %c0_i32 : i32, i32
  }
}

module attributes {stable_mosaic.version = 11 : i64} {
  func.func @_matmul_fused_kernel(%arg0: i32, %arg1: memref<32x256xbf16, #tpu.memory_space<vmem>>, %arg2: memref<256x512xbf16, #tpu.memory_space<vmem>>, %arg3: memref<1x512xf32, #tpu.memory_space<vmem>>, %arg4: memref<32x512xbf16, #tpu.memory_space<vmem>>) attributes {dimension_semantics = [#tpu.dimension_semantics<parallel>], iteration_bounds = array<i64: 1>, scalar_prefetch = 0 : i64, scratch_operands = 0 : i64, tpu.core_type = #tpu.core_type<tc>, window_params = [{transform_indices = @transform_0, window_bounds = array<i64: 32, 256>}, {pipeline_mode = #tpu.pipeline_mode<synchronous>, transform_indices = @transform_1, window_bounds = array<i64: 256, 512>}, {pipeline_mode = #tpu.pipeline_mode<synchronous>, transform_indices = @transform_2, window_bounds = array<i64: 1, 512>}, {transform_indices = @transform_3, window_bounds = array<i64: 32, 512>}]} {
    %c0 = arith.constant 0 : index
    %c0_0 = arith.constant 0 : index
    %0 = vector.load %arg1[%c0, %c0_0] : memref<32x256xbf16, #tpu.memory_space<vmem>>, vector<32x256xbf16>
    %c0_1 = arith.constant 0 : index
    %c0_2 = arith.constant 0 : index
    %1 = vector.load %arg2[%c0_1, %c0_2] : memref<256x512xbf16, #tpu.memory_space<vmem>>, vector<256x512xbf16>
    %cst = arith.constant dense<0.000000e+00> : vector<32x512xf32>
    %2 = tpu.matmul %0, %1, %cst {dimension_numbers = #tpu.dot_dimension_numbers<[1], [0], [0], [1], [0, 0, 1, 1], [], []>} : vector<32x256xbf16>, vector<256x512xbf16>, vector<32x512xf32> -> vector<32x512xf32>
    %c0_3 = arith.constant 0 : index
    %c0_4 = arith.constant 0 : index
    %3 = vector.load %arg3[%c0_3, %c0_4] : memref<1x512xf32, #tpu.memory_space<vmem>>, vector<1x512xf32>
    %4 = vector.broadcast %3 : vector<1x512xf32> to vector<32x512xf32>
    %5 = arith.addf %2, %4 : vector<32x512xf32>
    %6 = arith.truncf %5 : vector<32x512xf32> to vector<32x512xbf16>
    %c0_5 = arith.constant 0 : index
    %c0_6 = arith.constant 0 : index
    %7 = vector.load %arg4[%c0_5, %c0_6] : memref<32x512xbf16, #tpu.memory_space<vmem>>, vector<32x512xbf16>
    tpu.vector_store %arg4[%c0_5, %c0_6], %6 {strides = array<i32>} : memref<32x512xbf16, #tpu.memory_space<vmem>>, vector<32x512xbf16>,
    return
  }
  func.func @transform_0(%arg0: i32) -> (i32, i32) {
    %c0_i32 = arith.constant 0 : i32
    %c0_i32_0 = arith.constant 0 : i32
    return %arg0, %c0_i32 : i32, i32
  }
  func.func @transform_1(%arg0: i32) -> (i32, i32) {
    %c0_i32 = arith.constant 0 : i32
    %c0_i32_0 = arith.constant 0 : i32
    %c0_i32_1 = arith.constant 0 : i32
    return %c0_i32, %c0_i32_0 : i32, i32
  }
  func.func @transform_2(%arg0: i32) -> (i32, i32) {
    %c0_i32 = arith.constant 0 : i32
    %c0_i32_0 = arith.constant 0 : i32
    %c0_i32_1 = arith.constant 0 : i32
    return %c0_i32, %c0_i32_0 : i32, i32
  }
  func.func @transform_3(%arg0: i32) -> (i32, i32) {
    %c0_i32 = arith.constant 0 : i32
    %c0_i32_0 = arith.constant 0 : i32
    return %arg0, %c0_i32 : i32, i32
  }
}

module attributes {stable_mosaic.version = 11 : i64} {
  func.func @_matmul_fused_kernel(%arg0: i32, %arg1: memref<32x128xbf16, #tpu.memory_space<vmem>>, %arg2: memref<128x512xbf16, #tpu.memory_space<vmem>>, %arg3: memref<1x512xf32, #tpu.memory_space<vmem>>, %arg4: memref<32x512xbf16, #tpu.memory_space<vmem>>, %arg5: memref<32x512xbf16, #tpu.memory_space<vmem>>) attributes {dimension_semantics = [#tpu.dimension_semantics<parallel>], iteration_bounds = array<i64: 1>, scalar_prefetch = 0 : i64, scratch_operands = 0 : i64, tpu.core_type = #tpu.core_type<tc>, window_params = [{transform_indices = @transform_0, window_bounds = array<i64: 32, 128>}, {pipeline_mode = #tpu.pipeline_mode<synchronous>, transform_indices = @transform_1, window_bounds = array<i64: 128, 512>}, {pipeline_mode = #tpu.pipeline_mode<synchronous>, transform_indices = @transform_2, window_bounds = array<i64: 1, 512>}, {transform_indices = @transform_3, window_bounds = array<i64: 32, 512>}, {transform_indices = @transform_4, window_bounds = array<i64: 32, 512>}]} {
    %c0 = arith.constant 0 : index
    %c0_0 = arith.constant 0 : index
    %0 = vector.load %arg1[%c0, %c0_0] : memref<32x128xbf16, #tpu.memory_space<vmem>>, vector<32x128xbf16>
    %c0_1 = arith.constant 0 : index
    %c0_2 = arith.constant 0 : index
    %1 = vector.load %arg2[%c0_1, %c0_2] : memref<128x512xbf16, #tpu.memory_space<vmem>>, vector<128x512xbf16>
    %cst = arith.constant dense<0.000000e+00> : vector<32x512xf32>
    %2 = tpu.matmul %0, %1, %cst {dimension_numbers = #tpu.dot_dimension_numbers<[1], [0], [0], [1], [0, 0, 1, 1], [], []>} : vector<32x128xbf16>, vector<128x512xbf16>, vector<32x512xf32> -> vector<32x512xf32>
    %c0_3 = arith.constant 0 : index
    %c0_4 = arith.constant 0 : index
    %3 = vector.load %arg3[%c0_3, %c0_4] : memref<1x512xf32, #tpu.memory_space<vmem>>, vector<1x512xf32>
    %4 = vector.broadcast %3 : vector<1x512xf32> to vector<32x512xf32>
    %5 = arith.addf %2, %4 : vector<32x512xf32>
    %c0_5 = arith.constant 0 : index
    %c0_6 = arith.constant 0 : index
    %6 = vector.load %arg4[%c0_5, %c0_6] : memref<32x512xbf16, #tpu.memory_space<vmem>>, vector<32x512xbf16>
    %7 = arith.extf %6 : vector<32x512xbf16> to vector<32x512xf32>
    %8 = arith.addf %5, %7 : vector<32x512xf32>
    %cst_7 = arith.constant 0.000000e+00 : f32
    %9 = vector.broadcast %cst_7 : f32 to vector<32x512xf32>
    %10 = arith.maximumf %8, %9 : vector<32x512xf32>
    %11 = arith.truncf %10 : vector<32x512xf32> to vector<32x512xbf16>
    %c0_8 = arith.constant 0 : index
    %c0_9 = arith.constant 0 : index
    %12 = vector.load %arg5[%c0_8, %c0_9] : memref<32x512xbf16, #tpu.memory_space<vmem>>, vector<32x512xbf16>
    tpu.vector_store %arg5[%c0_8, %c0_9], %11 {strides = array<i32>} : memref<32x512xbf16, #tpu.memory_space<vmem>>, vector<32x512xbf16>,
    return
  }
  func.func @transform_0(%arg0: i32) -> (i32, i32) {
    %c0_i32 = arith.constant 0 : i32
    %c0_i32_0 = arith.constant 0 : i32
    return %arg0, %c0_i32 : i32, i32
  }
  func.func @transform_1(%arg0: i32) -> (i32, i32) {
    %c0_i32 = arith.constant 0 : i32
    %c0_i32_0 = arith.constant 0 : i32
    %c0_i32_1 = arith.constant 0 : i32
    return %c0_i32, %c0_i32_0 : i32, i32
  }
  func.func @transform_2(%arg0: i32) -> (i32, i32) {
    %c0_i32 = arith.constant 0 : i32
    %c0_i32_0 = arith.constant 0 : i32
    %c0_i32_1 = arith.constant 0 : i32
    return %c0_i32, %c0_i32_0 : i32, i32
  }
  func.func @transform_3(%arg0: i32) -> (i32, i32) {
    %c0_i32 = arith.constant 0 : i32
    %c0_i32_0 = arith.constant 0 : i32
    return %arg0, %c0_i32 : i32, i32
  }
  func.func @transform_4(%arg0: i32) -> (i32, i32) {
    %c0_i32 = arith.constant 0 : i32
    %c0_i32_0 = arith.constant 0 : i32
    return %arg0, %c0_i32 : i32, i32
  }
}

module attributes {stable_mosaic.version = 11 : i64} {
  func.func @_matmul_fused_kernel(%arg0: i32, %arg1: memref<32x512xbf16, #tpu.memory_space<vmem>>, %arg2: memref<512x128xbf16, #tpu.memory_space<vmem>>, %arg3: memref<1x128xf32, #tpu.memory_space<vmem>>, %arg4: memref<32x128xbf16, #tpu.memory_space<vmem>>) attributes {dimension_semantics = [#tpu.dimension_semantics<parallel>], iteration_bounds = array<i64: 1>, scalar_prefetch = 0 : i64, scratch_operands = 0 : i64, tpu.core_type = #tpu.core_type<tc>, window_params = [{transform_indices = @transform_0, window_bounds = array<i64: 32, 512>}, {pipeline_mode = #tpu.pipeline_mode<synchronous>, transform_indices = @transform_1, window_bounds = array<i64: 512, 128>}, {pipeline_mode = #tpu.pipeline_mode<synchronous>, transform_indices = @transform_2, window_bounds = array<i64: 1, 128>}, {transform_indices = @transform_3, window_bounds = array<i64: 32, 128>}]} {
    %c0 = arith.constant 0 : index
    %c0_0 = arith.constant 0 : index
    %0 = vector.load %arg1[%c0, %c0_0] : memref<32x512xbf16, #tpu.memory_space<vmem>>, vector<32x512xbf16>
    %c0_1 = arith.constant 0 : index
    %c0_2 = arith.constant 0 : index
    %1 = vector.load %arg2[%c0_1, %c0_2] : memref<512x128xbf16, #tpu.memory_space<vmem>>, vector<512x128xbf16>
    %cst = arith.constant dense<0.000000e+00> : vector<32x128xf32>
    %2 = tpu.matmul %0, %1, %cst {dimension_numbers = #tpu.dot_dimension_numbers<[1], [0], [0], [1], [0, 0, 1, 1], [], []>} : vector<32x512xbf16>, vector<512x128xbf16>, vector<32x128xf32> -> vector<32x128xf32>
    %c0_3 = arith.constant 0 : index
    %c0_4 = arith.constant 0 : index
    %3 = vector.load %arg3[%c0_3, %c0_4] : memref<1x128xf32, #tpu.memory_space<vmem>>, vector<1x128xf32>
    %4 = vector.broadcast %3 : vector<1x128xf32> to vector<32x128xf32>
    %5 = arith.addf %2, %4 : vector<32x128xf32>
    %cst_5 = arith.constant 0.000000e+00 : f32
    %6 = vector.broadcast %cst_5 : f32 to vector<32x128xf32>
    %7 = arith.maximumf %5, %6 : vector<32x128xf32>
    %8 = arith.truncf %7 : vector<32x128xf32> to vector<32x128xbf16>
    %c0_6 = arith.constant 0 : index
    %c0_7 = arith.constant 0 : index
    %9 = vector.load %arg4[%c0_6, %c0_7] : memref<32x128xbf16, #tpu.memory_space<vmem>>, vector<32x128xbf16>
    tpu.vector_store %arg4[%c0_6, %c0_7], %8 {strides = array<i32>} : memref<32x128xbf16, #tpu.memory_space<vmem>>, vector<32x128xbf16>,
    return
  }
  func.func @transform_0(%arg0: i32) -> (i32, i32) {
    %c0_i32 = arith.constant 0 : i32
    %c0_i32_0 = arith.constant 0 : i32
    return %arg0, %c0_i32 : i32, i32
  }
  func.func @transform_1(%arg0: i32) -> (i32, i32) {
    %c0_i32 = arith.constant 0 : i32
    %c0_i32_0 = arith.constant 0 : i32
    %c0_i32_1 = arith.constant 0 : i32
    return %c0_i32, %c0_i32_0 : i32, i32
  }
  func.func @transform_2(%arg0: i32) -> (i32, i32) {
    %c0_i32 = arith.constant 0 : i32
    %c0_i32_0 = arith.constant 0 : i32
    %c0_i32_1 = arith.constant 0 : i32
    return %c0_i32, %c0_i32_0 : i32, i32
  }
  func.func @transform_3(%arg0: i32) -> (i32, i32) {
    %c0_i32 = arith.constant 0 : i32
    %c0_i32_0 = arith.constant 0 : i32
    return %arg0, %c0_i32 : i32, i32
  }
}

module attributes {stable_mosaic.version = 11 : i64} {
  func.func @_conv3x3_kernel(%arg0: i32, %arg1: memref<1x7x8x128xbf16, #tpu.memory_space<vmem>>, %arg2: memref<9x128x128xbf16, #tpu.memory_space<vmem>>, %arg3: memref<1x128xf32, #tpu.memory_space<vmem>>, %arg4: memref<1x4x4x128xbf16, #tpu.memory_space<vmem>>) attributes {dimension_semantics = [#tpu.dimension_semantics<parallel>], iteration_bounds = array<i64: 2>, scalar_prefetch = 0 : i64, scratch_operands = 0 : i64, tpu.core_type = #tpu.core_type<tc>, window_params = [{transform_indices = @transform_0, window_bounds = array<i64: 1, 7, 8, 128>}, {pipeline_mode = #tpu.pipeline_mode<synchronous>, transform_indices = @transform_1, window_bounds = array<i64: 9, 128, 128>}, {pipeline_mode = #tpu.pipeline_mode<synchronous>, transform_indices = @transform_2, window_bounds = array<i64: 1, 128>}, {transform_indices = @transform_3, window_bounds = array<i64: 1, 4, 4, 128>}]} {
    %c0 = arith.constant 0 : index
    %c0_0 = arith.constant 0 : index
    %c0_1 = arith.constant 0 : index
    %c0_2 = arith.constant 0 : index
    %0 = vector.load %arg1[%c0, %c0_0, %c0_1, %c0_2] : memref<1x7x8x128xbf16, #tpu.memory_space<vmem>>, vector<1x7x8x128xbf16>
    %1 = vector.shape_cast %0 : vector<1x7x8x128xbf16> to vector<7x8x128xbf16>
    %2 = vector.shape_cast %1 : vector<7x8x128xbf16> to vector<56x128xbf16>
    %3 = vector.extract_strided_slice %2 {offsets = [0, 0], sizes = [32, 128], strides = [1, 1]} : vector<56x128xbf16> to vector<32x128xbf16>
    %c0_3 = arith.constant 0 : index
    %c0_4 = arith.constant 0 : index
    %c0_5 = arith.constant 0 : index
    %4 = vector.load %arg2[%c0_3, %c0_4, %c0_5] : memref<9x128x128xbf16, #tpu.memory_space<vmem>>, vector<1x128x128xbf16>
    %5 = vector.shape_cast %4 : vector<1x128x128xbf16> to vector<128x128xbf16>
    %cst = arith.constant dense<0.000000e+00> : vector<32x128xf32>
    %6 = tpu.matmul %3, %5, %cst {dimension_numbers = #tpu.dot_dimension_numbers<[1], [0], [0], [1], [0, 0, 1, 1], [], []>} : vector<32x128xbf16>, vector<128x128xbf16>, vector<32x128xf32> -> vector<32x128xf32>
    %7 = vector.extract_strided_slice %2 {offsets = [1, 0], sizes = [32, 128], strides = [1, 1]} : vector<56x128xbf16> to vector<32x128xbf16>
    %c1 = arith.constant 1 : index
    %c0_6 = arith.constant 0 : index
    %c0_7 = arith.constant 0 : index
    %8 = vector.load %arg2[%c1, %c0_6, %c0_7] : memref<9x128x128xbf16, #tpu.memory_space<vmem>>, vector<1x128x128xbf16>
    %9 = vector.shape_cast %8 : vector<1x128x128xbf16> to vector<128x128xbf16>
    %cst_8 = arith.constant dense<0.000000e+00> : vector<32x128xf32>
    %10 = tpu.matmul %7, %9, %cst_8 {dimension_numbers = #tpu.dot_dimension_numbers<[1], [0], [0], [1], [0, 0, 1, 1], [], []>} : vector<32x128xbf16>, vector<128x128xbf16>, vector<32x128xf32> -> vector<32x128xf32>
    %11 = arith.addf %6, %10 : vector<32x128xf32>
    %12 = vector.extract_strided_slice %2 {offsets = [2, 0], sizes = [32, 128], strides = [1, 1]} : vector<56x128xbf16> to vector<32x128xbf16>
    %c2 = arith.constant 2 : index
    %c0_9 = arith.constant 0 : index
    %c0_10 = arith.constant 0 : index
    %13 = vector.load %arg2[%c2, %c0_9, %c0_10] : memref<9x128x128xbf16, #tpu.memory_space<vmem>>, vector<1x128x128xbf16>
    %14 = vector.shape_cast %13 : vector<1x128x128xbf16> to vector<128x128xbf16>
    %cst_11 = arith.constant dense<0.000000e+00> : vector<32x128xf32>
    %15 = tpu.matmul %12, %14, %cst_11 {dimension_numbers = #tpu.dot_dimension_numbers<[1], [0], [0], [1], [0, 0, 1, 1], [], []>} : vector<32x128xbf16>, vector<128x128xbf16>, vector<32x128xf32> -> vector<32x128xf32>
    %16 = arith.addf %11, %15 : vector<32x128xf32>
    %17 = vector.extract_strided_slice %2 {offsets = [8, 0], sizes = [32, 128], strides = [1, 1]} : vector<56x128xbf16> to vector<32x128xbf16>
    %c3 = arith.constant 3 : index
    %c0_12 = arith.constant 0 : index
    %c0_13 = arith.constant 0 : index
    %18 = vector.load %arg2[%c3, %c0_12, %c0_13] : memref<9x128x128xbf16, #tpu.memory_space<vmem>>, vector<1x128x128xbf16>
    %19 = vector.shape_cast %18 : vector<1x128x128xbf16> to vector<128x128xbf16>
    %cst_14 = arith.constant dense<0.000000e+00> : vector<32x128xf32>
    %20 = tpu.matmul %17, %19, %cst_14 {dimension_numbers = #tpu.dot_dimension_numbers<[1], [0], [0], [1], [0, 0, 1, 1], [], []>} : vector<32x128xbf16>, vector<128x128xbf16>, vector<32x128xf32> -> vector<32x128xf32>
    %21 = arith.addf %16, %20 : vector<32x128xf32>
    %22 = vector.extract_strided_slice %2 {offsets = [9, 0], sizes = [32, 128], strides = [1, 1]} : vector<56x128xbf16> to vector<32x128xbf16>
    %c4 = arith.constant 4 : index
    %c0_15 = arith.constant 0 : index
    %c0_16 = arith.constant 0 : index
    %23 = vector.load %arg2[%c4, %c0_15, %c0_16] : memref<9x128x128xbf16, #tpu.memory_space<vmem>>, vector<1x128x128xbf16>
    %24 = vector.shape_cast %23 : vector<1x128x128xbf16> to vector<128x128xbf16>
    %cst_17 = arith.constant dense<0.000000e+00> : vector<32x128xf32>
    %25 = tpu.matmul %22, %24, %cst_17 {dimension_numbers = #tpu.dot_dimension_numbers<[1], [0], [0], [1], [0, 0, 1, 1], [], []>} : vector<32x128xbf16>, vector<128x128xbf16>, vector<32x128xf32> -> vector<32x128xf32>
    %26 = arith.addf %21, %25 : vector<32x128xf32>
    %27 = vector.extract_strided_slice %2 {offsets = [10, 0], sizes = [32, 128], strides = [1, 1]} : vector<56x128xbf16> to vector<32x128xbf16>
    %c5 = arith.constant 5 : index
    %c0_18 = arith.constant 0 : index
    %c0_19 = arith.constant 0 : index
    %28 = vector.load %arg2[%c5, %c0_18, %c0_19] : memref<9x128x128xbf16, #tpu.memory_space<vmem>>, vector<1x128x128xbf16>
    %29 = vector.shape_cast %28 : vector<1x128x128xbf16> to vector<128x128xbf16>
    %cst_20 = arith.constant dense<0.000000e+00> : vector<32x128xf32>
    %30 = tpu.matmul %27, %29, %cst_20 {dimension_numbers = #tpu.dot_dimension_numbers<[1], [0], [0], [1], [0, 0, 1, 1], [], []>} : vector<32x128xbf16>, vector<128x128xbf16>, vector<32x128xf32> -> vector<32x128xf32>
    %31 = arith.addf %26, %30 : vector<32x128xf32>
    %32 = vector.extract_strided_slice %2 {offsets = [16, 0], sizes = [32, 128], strides = [1, 1]} : vector<56x128xbf16> to vector<32x128xbf16>
    %c6 = arith.constant 6 : index
    %c0_21 = arith.constant 0 : index
    %c0_22 = arith.constant 0 : index
    %33 = vector.load %arg2[%c6, %c0_21, %c0_22] : memref<9x128x128xbf16, #tpu.memory_space<vmem>>, vector<1x128x128xbf16>
    %34 = vector.shape_cast %33 : vector<1x128x128xbf16> to vector<128x128xbf16>
    %cst_23 = arith.constant dense<0.000000e+00> : vector<32x128xf32>
    %35 = tpu.matmul %32, %34, %cst_23 {dimension_numbers = #tpu.dot_dimension_numbers<[1], [0], [0], [1], [0, 0, 1, 1], [], []>} : vector<32x128xbf16>, vector<128x128xbf16>, vector<32x128xf32> -> vector<32x128xf32>
    %36 = arith.addf %31, %35 : vector<32x128xf32>
    %37 = vector.extract_strided_slice %2 {offsets = [17, 0], sizes = [32, 128], strides = [1, 1]} : vector<56x128xbf16> to vector<32x128xbf16>
    %c7 = arith.constant 7 : index
    %c0_24 = arith.constant 0 : index
    %c0_25 = arith.constant 0 : index
    %38 = vector.load %arg2[%c7, %c0_24, %c0_25] : memref<9x128x128xbf16, #tpu.memory_space<vmem>>, vector<1x128x128xbf16>
    %39 = vector.shape_cast %38 : vector<1x128x128xbf16> to vector<128x128xbf16>
    %cst_26 = arith.constant dense<0.000000e+00> : vector<32x128xf32>
    %40 = tpu.matmul %37, %39, %cst_26 {dimension_numbers = #tpu.dot_dimension_numbers<[1], [0], [0], [1], [0, 0, 1, 1], [], []>} : vector<32x128xbf16>, vector<128x128xbf16>, vector<32x128xf32> -> vector<32x128xf32>
    %41 = arith.addf %36, %40 : vector<32x128xf32>
    %42 = vector.extract_strided_slice %2 {offsets = [18, 0], sizes = [32, 128], strides = [1, 1]} : vector<56x128xbf16> to vector<32x128xbf16>
    %c8 = arith.constant 8 : index
    %c0_27 = arith.constant 0 : index
    %c0_28 = arith.constant 0 : index
    %43 = vector.load %arg2[%c8, %c0_27, %c0_28] : memref<9x128x128xbf16, #tpu.memory_space<vmem>>, vector<1x128x128xbf16>
    %44 = vector.shape_cast %43 : vector<1x128x128xbf16> to vector<128x128xbf16>
    %cst_29 = arith.constant dense<0.000000e+00> : vector<32x128xf32>
    %45 = tpu.matmul %42, %44, %cst_29 {dimension_numbers = #tpu.dot_dimension_numbers<[1], [0], [0], [1], [0, 0, 1, 1], [], []>} : vector<32x128xbf16>, vector<128x128xbf16>, vector<32x128xf32> -> vector<32x128xf32>
    %46 = arith.addf %41, %45 : vector<32x128xf32>
    %c0_30 = arith.constant 0 : index
    %c0_31 = arith.constant 0 : index
    %47 = vector.load %arg3[%c0_30, %c0_31] : memref<1x128xf32, #tpu.memory_space<vmem>>, vector<1x128xf32>
    %48 = vector.broadcast %47 : vector<1x128xf32> to vector<32x128xf32>
    %49 = arith.addf %46, %48 : vector<32x128xf32>
    %cst_32 = arith.constant 0.000000e+00 : f32
    %50 = vector.broadcast %cst_32 : f32 to vector<32x128xf32>
    %51 = arith.maximumf %49, %50 : vector<32x128xf32>
    %52 = vector.shape_cast %51 : vector<32x128xf32> to vector<4x8x128xf32>
    %53 = vector.extract_strided_slice %52 {offsets = [0, 0, 0], sizes = [4, 4, 128], strides = [1, 1, 1]} : vector<4x8x128xf32> to vector<4x4x128xf32>
    %54 = arith.truncf %53 : vector<4x4x128xf32> to vector<4x4x128xbf16>
    %c0_33 = arith.constant 0 : index
    %c0_34 = arith.constant 0 : index
    %c0_35 = arith.constant 0 : index
    %c0_36 = arith.constant 0 : index
    %55 = vector.load %arg4[%c0_33, %c0_34, %c0_35, %c0_36] : memref<1x4x4x128xbf16, #tpu.memory_space<vmem>>, vector<1x4x4x128xbf16>
    %56 = vector.shape_cast %55 : vector<1x4x4x128xbf16> to vector<4x4x128xbf16>
    %57 = vector.shape_cast %54 : vector<4x4x128xbf16> to vector<1x4x4x128xbf16>
    tpu.vector_store %arg4[%c0_33, %c0_34, %c0_35, %c0_36], %57 {strides = array<i32>} : memref<1x4x4x128xbf16, #tpu.memory_space<vmem>>, vector<1x4x4x128xbf16>,
    return
  }
  func.func @transform_0(%arg0: i32) -> (i32, i32, i32, i32) {
    %c0_i32 = arith.constant 0 : i32
    %c0_i32_0 = arith.constant 0 : i32
    %c0_i32_1 = arith.constant 0 : i32
    %c0_i32_2 = arith.constant 0 : i32
    return %arg0, %c0_i32, %c0_i32_0, %c0_i32_1 : i32, i32, i32, i32
  }
  func.func @transform_1(%arg0: i32) -> (i32, i32, i32) {
    %c0_i32 = arith.constant 0 : i32
    %c0_i32_0 = arith.constant 0 : i32
    %c0_i32_1 = arith.constant 0 : i32
    %c0_i32_2 = arith.constant 0 : i32
    return %c0_i32, %c0_i32_0, %c0_i32_1 : i32, i32, i32
  }
  func.func @transform_2(%arg0: i32) -> (i32, i32) {
    %c0_i32 = arith.constant 0 : i32
    %c0_i32_0 = arith.constant 0 : i32
    %c0_i32_1 = arith.constant 0 : i32
    return %c0_i32, %c0_i32_0 : i32, i32
  }
  func.func @transform_3(%arg0: i32) -> (i32, i32, i32, i32) {
    %c0_i32 = arith.constant 0 : i32
    %c0_i32_0 = arith.constant 0 : i32
    %c0_i32_1 = arith.constant 0 : i32
    %c0_i32_2 = arith.constant 0 : i32
    return %arg0, %c0_i32, %c0_i32_0, %c0_i32_1 : i32, i32, i32, i32
  }
}

module attributes {stable_mosaic.version = 11 : i64} {
  func.func @_matmul_fused_kernel(%arg0: i32, %arg1: memref<32x512xbf16, #tpu.memory_space<vmem>>, %arg2: memref<512x256xbf16, #tpu.memory_space<vmem>>, %arg3: memref<1x256xf32, #tpu.memory_space<vmem>>, %arg4: memref<32x256xbf16, #tpu.memory_space<vmem>>) attributes {dimension_semantics = [#tpu.dimension_semantics<parallel>], iteration_bounds = array<i64: 1>, scalar_prefetch = 0 : i64, scratch_operands = 0 : i64, tpu.core_type = #tpu.core_type<tc>, window_params = [{transform_indices = @transform_0, window_bounds = array<i64: 32, 512>}, {pipeline_mode = #tpu.pipeline_mode<synchronous>, transform_indices = @transform_1, window_bounds = array<i64: 512, 256>}, {pipeline_mode = #tpu.pipeline_mode<synchronous>, transform_indices = @transform_2, window_bounds = array<i64: 1, 256>}, {transform_indices = @transform_3, window_bounds = array<i64: 32, 256>}]} {
    %c0 = arith.constant 0 : index
    %c0_0 = arith.constant 0 : index
    %0 = vector.load %arg1[%c0, %c0_0] : memref<32x512xbf16, #tpu.memory_space<vmem>>, vector<32x512xbf16>
    %c0_1 = arith.constant 0 : index
    %c0_2 = arith.constant 0 : index
    %1 = vector.load %arg2[%c0_1, %c0_2] : memref<512x256xbf16, #tpu.memory_space<vmem>>, vector<512x256xbf16>
    %cst = arith.constant dense<0.000000e+00> : vector<32x256xf32>
    %2 = tpu.matmul %0, %1, %cst {dimension_numbers = #tpu.dot_dimension_numbers<[1], [0], [0], [1], [0, 0, 1, 1], [], []>} : vector<32x512xbf16>, vector<512x256xbf16>, vector<32x256xf32> -> vector<32x256xf32>
    %c0_3 = arith.constant 0 : index
    %c0_4 = arith.constant 0 : index
    %3 = vector.load %arg3[%c0_3, %c0_4] : memref<1x256xf32, #tpu.memory_space<vmem>>, vector<1x256xf32>
    %4 = vector.broadcast %3 : vector<1x256xf32> to vector<32x256xf32>
    %5 = arith.addf %2, %4 : vector<32x256xf32>
    %cst_5 = arith.constant 0.000000e+00 : f32
    %6 = vector.broadcast %cst_5 : f32 to vector<32x256xf32>
    %7 = arith.maximumf %5, %6 : vector<32x256xf32>
    %8 = arith.truncf %7 : vector<32x256xf32> to vector<32x256xbf16>
    %c0_6 = arith.constant 0 : index
    %c0_7 = arith.constant 0 : index
    %9 = vector.load %arg4[%c0_6, %c0_7] : memref<32x256xbf16, #tpu.memory_space<vmem>>, vector<32x256xbf16>
    tpu.vector_store %arg4[%c0_6, %c0_7], %8 {strides = array<i32>} : memref<32x256xbf16, #tpu.memory_space<vmem>>, vector<32x256xbf16>,
    return
  }
  func.func @transform_0(%arg0: i32) -> (i32, i32) {
    %c0_i32 = arith.constant 0 : i32
    %c0_i32_0 = arith.constant 0 : i32
    return %arg0, %c0_i32 : i32, i32
  }
  func.func @transform_1(%arg0: i32) -> (i32, i32) {
    %c0_i32 = arith.constant 0 : i32
    %c0_i32_0 = arith.constant 0 : i32
    %c0_i32_1 = arith.constant 0 : i32
    return %c0_i32, %c0_i32_0 : i32, i32
  }
  func.func @transform_2(%arg0: i32) -> (i32, i32) {
    %c0_i32 = arith.constant 0 : i32
    %c0_i32_0 = arith.constant 0 : i32
    %c0_i32_1 = arith.constant 0 : i32
    return %c0_i32, %c0_i32_0 : i32, i32
  }
  func.func @transform_3(%arg0: i32) -> (i32, i32) {
    %c0_i32 = arith.constant 0 : i32
    %c0_i32_0 = arith.constant 0 : i32
    return %arg0, %c0_i32 : i32, i32
  }
}

module attributes {stable_mosaic.version = 11 : i64} {
  func.func @_conv3x3_kernel(%arg0: i32, %arg1: memref<1x7x8x256xbf16, #tpu.memory_space<vmem>>, %arg2: memref<9x256x256xbf16, #tpu.memory_space<vmem>>, %arg3: memref<1x256xf32, #tpu.memory_space<vmem>>, %arg4: memref<1x4x4x256xbf16, #tpu.memory_space<vmem>>) attributes {dimension_semantics = [#tpu.dimension_semantics<parallel>], iteration_bounds = array<i64: 2>, scalar_prefetch = 0 : i64, scratch_operands = 0 : i64, tpu.core_type = #tpu.core_type<tc>, window_params = [{transform_indices = @transform_0, window_bounds = array<i64: 1, 7, 8, 256>}, {pipeline_mode = #tpu.pipeline_mode<synchronous>, transform_indices = @transform_1, window_bounds = array<i64: 9, 256, 256>}, {pipeline_mode = #tpu.pipeline_mode<synchronous>, transform_indices = @transform_2, window_bounds = array<i64: 1, 256>}, {transform_indices = @transform_3, window_bounds = array<i64: 1, 4, 4, 256>}]} {
    %c0 = arith.constant 0 : index
    %c0_0 = arith.constant 0 : index
    %c0_1 = arith.constant 0 : index
    %c0_2 = arith.constant 0 : index
    %0 = vector.load %arg1[%c0, %c0_0, %c0_1, %c0_2] : memref<1x7x8x256xbf16, #tpu.memory_space<vmem>>, vector<1x7x8x256xbf16>
    %1 = vector.shape_cast %0 : vector<1x7x8x256xbf16> to vector<7x8x256xbf16>
    %2 = vector.shape_cast %1 : vector<7x8x256xbf16> to vector<56x256xbf16>
    %3 = vector.extract_strided_slice %2 {offsets = [0, 0], sizes = [32, 256], strides = [1, 1]} : vector<56x256xbf16> to vector<32x256xbf16>
    %c0_3 = arith.constant 0 : index
    %c0_4 = arith.constant 0 : index
    %c0_5 = arith.constant 0 : index
    %4 = vector.load %arg2[%c0_3, %c0_4, %c0_5] : memref<9x256x256xbf16, #tpu.memory_space<vmem>>, vector<1x256x256xbf16>
    %5 = vector.shape_cast %4 : vector<1x256x256xbf16> to vector<256x256xbf16>
    %cst = arith.constant dense<0.000000e+00> : vector<32x256xf32>
    %6 = tpu.matmul %3, %5, %cst {dimension_numbers = #tpu.dot_dimension_numbers<[1], [0], [0], [1], [0, 0, 1, 1], [], []>} : vector<32x256xbf16>, vector<256x256xbf16>, vector<32x256xf32> -> vector<32x256xf32>
    %7 = vector.extract_strided_slice %2 {offsets = [1, 0], sizes = [32, 256], strides = [1, 1]} : vector<56x256xbf16> to vector<32x256xbf16>
    %c1 = arith.constant 1 : index
    %c0_6 = arith.constant 0 : index
    %c0_7 = arith.constant 0 : index
    %8 = vector.load %arg2[%c1, %c0_6, %c0_7] : memref<9x256x256xbf16, #tpu.memory_space<vmem>>, vector<1x256x256xbf16>
    %9 = vector.shape_cast %8 : vector<1x256x256xbf16> to vector<256x256xbf16>
    %cst_8 = arith.constant dense<0.000000e+00> : vector<32x256xf32>
    %10 = tpu.matmul %7, %9, %cst_8 {dimension_numbers = #tpu.dot_dimension_numbers<[1], [0], [0], [1], [0, 0, 1, 1], [], []>} : vector<32x256xbf16>, vector<256x256xbf16>, vector<32x256xf32> -> vector<32x256xf32>
    %11 = arith.addf %6, %10 : vector<32x256xf32>
    %12 = vector.extract_strided_slice %2 {offsets = [2, 0], sizes = [32, 256], strides = [1, 1]} : vector<56x256xbf16> to vector<32x256xbf16>
    %c2 = arith.constant 2 : index
    %c0_9 = arith.constant 0 : index
    %c0_10 = arith.constant 0 : index
    %13 = vector.load %arg2[%c2, %c0_9, %c0_10] : memref<9x256x256xbf16, #tpu.memory_space<vmem>>, vector<1x256x256xbf16>
    %14 = vector.shape_cast %13 : vector<1x256x256xbf16> to vector<256x256xbf16>
    %cst_11 = arith.constant dense<0.000000e+00> : vector<32x256xf32>
    %15 = tpu.matmul %12, %14, %cst_11 {dimension_numbers = #tpu.dot_dimension_numbers<[1], [0], [0], [1], [0, 0, 1, 1], [], []>} : vector<32x256xbf16>, vector<256x256xbf16>, vector<32x256xf32> -> vector<32x256xf32>
    %16 = arith.addf %11, %15 : vector<32x256xf32>
    %17 = vector.extract_strided_slice %2 {offsets = [8, 0], sizes = [32, 256], strides = [1, 1]} : vector<56x256xbf16> to vector<32x256xbf16>
    %c3 = arith.constant 3 : index
    %c0_12 = arith.constant 0 : index
    %c0_13 = arith.constant 0 : index
    %18 = vector.load %arg2[%c3, %c0_12, %c0_13] : memref<9x256x256xbf16, #tpu.memory_space<vmem>>, vector<1x256x256xbf16>
    %19 = vector.shape_cast %18 : vector<1x256x256xbf16> to vector<256x256xbf16>
    %cst_14 = arith.constant dense<0.000000e+00> : vector<32x256xf32>
    %20 = tpu.matmul %17, %19, %cst_14 {dimension_numbers = #tpu.dot_dimension_numbers<[1], [0], [0], [1], [0, 0, 1, 1], [], []>} : vector<32x256xbf16>, vector<256x256xbf16>, vector<32x256xf32> -> vector<32x256xf32>
    %21 = arith.addf %16, %20 : vector<32x256xf32>
    %22 = vector.extract_strided_slice %2 {offsets = [9, 0], sizes = [32, 256], strides = [1, 1]} : vector<56x256xbf16> to vector<32x256xbf16>
    %c4 = arith.constant 4 : index
    %c0_15 = arith.constant 0 : index
    %c0_16 = arith.constant 0 : index
    %23 = vector.load %arg2[%c4, %c0_15, %c0_16] : memref<9x256x256xbf16, #tpu.memory_space<vmem>>, vector<1x256x256xbf16>
    %24 = vector.shape_cast %23 : vector<1x256x256xbf16> to vector<256x256xbf16>
    %cst_17 = arith.constant dense<0.000000e+00> : vector<32x256xf32>
    %25 = tpu.matmul %22, %24, %cst_17 {dimension_numbers = #tpu.dot_dimension_numbers<[1], [0], [0], [1], [0, 0, 1, 1], [], []>} : vector<32x256xbf16>, vector<256x256xbf16>, vector<32x256xf32> -> vector<32x256xf32>
    %26 = arith.addf %21, %25 : vector<32x256xf32>
    %27 = vector.extract_strided_slice %2 {offsets = [10, 0], sizes = [32, 256], strides = [1, 1]} : vector<56x256xbf16> to vector<32x256xbf16>
    %c5 = arith.constant 5 : index
    %c0_18 = arith.constant 0 : index
    %c0_19 = arith.constant 0 : index
    %28 = vector.load %arg2[%c5, %c0_18, %c0_19] : memref<9x256x256xbf16, #tpu.memory_space<vmem>>, vector<1x256x256xbf16>
    %29 = vector.shape_cast %28 : vector<1x256x256xbf16> to vector<256x256xbf16>
    %cst_20 = arith.constant dense<0.000000e+00> : vector<32x256xf32>
    %30 = tpu.matmul %27, %29, %cst_20 {dimension_numbers = #tpu.dot_dimension_numbers<[1], [0], [0], [1], [0, 0, 1, 1], [], []>} : vector<32x256xbf16>, vector<256x256xbf16>, vector<32x256xf32> -> vector<32x256xf32>
    %31 = arith.addf %26, %30 : vector<32x256xf32>
    %32 = vector.extract_strided_slice %2 {offsets = [16, 0], sizes = [32, 256], strides = [1, 1]} : vector<56x256xbf16> to vector<32x256xbf16>
    %c6 = arith.constant 6 : index
    %c0_21 = arith.constant 0 : index
    %c0_22 = arith.constant 0 : index
    %33 = vector.load %arg2[%c6, %c0_21, %c0_22] : memref<9x256x256xbf16, #tpu.memory_space<vmem>>, vector<1x256x256xbf16>
    %34 = vector.shape_cast %33 : vector<1x256x256xbf16> to vector<256x256xbf16>
    %cst_23 = arith.constant dense<0.000000e+00> : vector<32x256xf32>
    %35 = tpu.matmul %32, %34, %cst_23 {dimension_numbers = #tpu.dot_dimension_numbers<[1], [0], [0], [1], [0, 0, 1, 1], [], []>} : vector<32x256xbf16>, vector<256x256xbf16>, vector<32x256xf32> -> vector<32x256xf32>
    %36 = arith.addf %31, %35 : vector<32x256xf32>
    %37 = vector.extract_strided_slice %2 {offsets = [17, 0], sizes = [32, 256], strides = [1, 1]} : vector<56x256xbf16> to vector<32x256xbf16>
    %c7 = arith.constant 7 : index
    %c0_24 = arith.constant 0 : index
    %c0_25 = arith.constant 0 : index
    %38 = vector.load %arg2[%c7, %c0_24, %c0_25] : memref<9x256x256xbf16, #tpu.memory_space<vmem>>, vector<1x256x256xbf16>
    %39 = vector.shape_cast %38 : vector<1x256x256xbf16> to vector<256x256xbf16>
    %cst_26 = arith.constant dense<0.000000e+00> : vector<32x256xf32>
    %40 = tpu.matmul %37, %39, %cst_26 {dimension_numbers = #tpu.dot_dimension_numbers<[1], [0], [0], [1], [0, 0, 1, 1], [], []>} : vector<32x256xbf16>, vector<256x256xbf16>, vector<32x256xf32> -> vector<32x256xf32>
    %41 = arith.addf %36, %40 : vector<32x256xf32>
    %42 = vector.extract_strided_slice %2 {offsets = [18, 0], sizes = [32, 256], strides = [1, 1]} : vector<56x256xbf16> to vector<32x256xbf16>
    %c8 = arith.constant 8 : index
    %c0_27 = arith.constant 0 : index
    %c0_28 = arith.constant 0 : index
    %43 = vector.load %arg2[%c8, %c0_27, %c0_28] : memref<9x256x256xbf16, #tpu.memory_space<vmem>>, vector<1x256x256xbf16>
    %44 = vector.shape_cast %43 : vector<1x256x256xbf16> to vector<256x256xbf16>
    %cst_29 = arith.constant dense<0.000000e+00> : vector<32x256xf32>
    %45 = tpu.matmul %42, %44, %cst_29 {dimension_numbers = #tpu.dot_dimension_numbers<[1], [0], [0], [1], [0, 0, 1, 1], [], []>} : vector<32x256xbf16>, vector<256x256xbf16>, vector<32x256xf32> -> vector<32x256xf32>
    %46 = arith.addf %41, %45 : vector<32x256xf32>
    %c0_30 = arith.constant 0 : index
    %c0_31 = arith.constant 0 : index
    %47 = vector.load %arg3[%c0_30, %c0_31] : memref<1x256xf32, #tpu.memory_space<vmem>>, vector<1x256xf32>
    %48 = vector.broadcast %47 : vector<1x256xf32> to vector<32x256xf32>
    %49 = arith.addf %46, %48 : vector<32x256xf32>
    %cst_32 = arith.constant 0.000000e+00 : f32
    %50 = vector.broadcast %cst_32 : f32 to vector<32x256xf32>
    %51 = arith.maximumf %49, %50 : vector<32x256xf32>
    %52 = vector.shape_cast %51 : vector<32x256xf32> to vector<4x8x256xf32>
    %53 = vector.extract_strided_slice %52 {offsets = [0, 0, 0], sizes = [4, 4, 256], strides = [1, 1, 1]} : vector<4x8x256xf32> to vector<4x4x256xf32>
    %54 = arith.truncf %53 : vector<4x4x256xf32> to vector<4x4x256xbf16>
    %c0_33 = arith.constant 0 : index
    %c0_34 = arith.constant 0 : index
    %c0_35 = arith.constant 0 : index
    %c0_36 = arith.constant 0 : index
    %55 = vector.load %arg4[%c0_33, %c0_34, %c0_35, %c0_36] : memref<1x4x4x256xbf16, #tpu.memory_space<vmem>>, vector<1x4x4x256xbf16>
    %56 = vector.shape_cast %55 : vector<1x4x4x256xbf16> to vector<4x4x256xbf16>
    %57 = vector.shape_cast %54 : vector<4x4x256xbf16> to vector<1x4x4x256xbf16>
    tpu.vector_store %arg4[%c0_33, %c0_34, %c0_35, %c0_36], %57 {strides = array<i32>} : memref<1x4x4x256xbf16, #tpu.memory_space<vmem>>, vector<1x4x4x256xbf16>,
    return
  }
  func.func @transform_0(%arg0: i32) -> (i32, i32, i32, i32) {
    %c0_i32 = arith.constant 0 : i32
    %c0_i32_0 = arith.constant 0 : i32
    %c0_i32_1 = arith.constant 0 : i32
    %c0_i32_2 = arith.constant 0 : i32
    return %arg0, %c0_i32, %c0_i32_0, %c0_i32_1 : i32, i32, i32, i32
  }
  func.func @transform_1(%arg0: i32) -> (i32, i32, i32) {
    %c0_i32 = arith.constant 0 : i32
    %c0_i32_0 = arith.constant 0 : i32
    %c0_i32_1 = arith.constant 0 : i32
    %c0_i32_2 = arith.constant 0 : i32
    return %c0_i32, %c0_i32_0, %c0_i32_1 : i32, i32, i32
  }
  func.func @transform_2(%arg0: i32) -> (i32, i32) {
    %c0_i32 = arith.constant 0 : i32
    %c0_i32_0 = arith.constant 0 : i32
    %c0_i32_1 = arith.constant 0 : i32
    return %c0_i32, %c0_i32_0 : i32, i32
  }
  func.func @transform_3(%arg0: i32) -> (i32, i32, i32, i32) {
    %c0_i32 = arith.constant 0 : i32
    %c0_i32_0 = arith.constant 0 : i32
    %c0_i32_1 = arith.constant 0 : i32
    %c0_i32_2 = arith.constant 0 : i32
    return %arg0, %c0_i32, %c0_i32_0, %c0_i32_1 : i32, i32, i32, i32
  }
}

module attributes {stable_mosaic.version = 11 : i64} {
  func.func @_matmul_fused_kernel(%arg0: i32, %arg1: memref<32x512xbf16, #tpu.memory_space<vmem>>, %arg2: memref<512x1024xbf16, #tpu.memory_space<vmem>>, %arg3: memref<1x1024xf32, #tpu.memory_space<vmem>>, %arg4: memref<32x1024xbf16, #tpu.memory_space<vmem>>) attributes {dimension_semantics = [#tpu.dimension_semantics<parallel>], iteration_bounds = array<i64: 1>, scalar_prefetch = 0 : i64, scratch_operands = 0 : i64, tpu.core_type = #tpu.core_type<tc>, window_params = [{transform_indices = @transform_0, window_bounds = array<i64: 32, 512>}, {pipeline_mode = #tpu.pipeline_mode<synchronous>, transform_indices = @transform_1, window_bounds = array<i64: 512, 1024>}, {pipeline_mode = #tpu.pipeline_mode<synchronous>, transform_indices = @transform_2, window_bounds = array<i64: 1, 1024>}, {transform_indices = @transform_3, window_bounds = array<i64: 32, 1024>}]} {
    %c0 = arith.constant 0 : index
    %c0_0 = arith.constant 0 : index
    %0 = vector.load %arg1[%c0, %c0_0] : memref<32x512xbf16, #tpu.memory_space<vmem>>, vector<32x512xbf16>
    %c0_1 = arith.constant 0 : index
    %c0_2 = arith.constant 0 : index
    %1 = vector.load %arg2[%c0_1, %c0_2] : memref<512x1024xbf16, #tpu.memory_space<vmem>>, vector<512x1024xbf16>
    %cst = arith.constant dense<0.000000e+00> : vector<32x1024xf32>
    %2 = tpu.matmul %0, %1, %cst {dimension_numbers = #tpu.dot_dimension_numbers<[1], [0], [0], [1], [0, 0, 1, 1], [], []>} : vector<32x512xbf16>, vector<512x1024xbf16>, vector<32x1024xf32> -> vector<32x1024xf32>
    %c0_3 = arith.constant 0 : index
    %c0_4 = arith.constant 0 : index
    %3 = vector.load %arg3[%c0_3, %c0_4] : memref<1x1024xf32, #tpu.memory_space<vmem>>, vector<1x1024xf32>
    %4 = vector.broadcast %3 : vector<1x1024xf32> to vector<32x1024xf32>
    %5 = arith.addf %2, %4 : vector<32x1024xf32>
    %6 = arith.truncf %5 : vector<32x1024xf32> to vector<32x1024xbf16>
    %c0_5 = arith.constant 0 : index
    %c0_6 = arith.constant 0 : index
    %7 = vector.load %arg4[%c0_5, %c0_6] : memref<32x1024xbf16, #tpu.memory_space<vmem>>, vector<32x1024xbf16>
    tpu.vector_store %arg4[%c0_5, %c0_6], %6 {strides = array<i32>} : memref<32x1024xbf16, #tpu.memory_space<vmem>>, vector<32x1024xbf16>,
    return
  }
  func.func @transform_0(%arg0: i32) -> (i32, i32) {
    %c0_i32 = arith.constant 0 : i32
    %c0_i32_0 = arith.constant 0 : i32
    return %arg0, %c0_i32 : i32, i32
  }
  func.func @transform_1(%arg0: i32) -> (i32, i32) {
    %c0_i32 = arith.constant 0 : i32
    %c0_i32_0 = arith.constant 0 : i32
    %c0_i32_1 = arith.constant 0 : i32
    return %c0_i32, %c0_i32_0 : i32, i32
  }
  func.func @transform_2(%arg0: i32) -> (i32, i32) {
    %c0_i32 = arith.constant 0 : i32
    %c0_i32_0 = arith.constant 0 : i32
    %c0_i32_1 = arith.constant 0 : i32
    return %c0_i32, %c0_i32_0 : i32, i32
  }
  func.func @transform_3(%arg0: i32) -> (i32, i32) {
    %c0_i32 = arith.constant 0 : i32
    %c0_i32_0 = arith.constant 0 : i32
    return %arg0, %c0_i32 : i32, i32
  }
}

module attributes {stable_mosaic.version = 11 : i64} {
  func.func @_matmul_fused_kernel(%arg0: i32, %arg1: memref<32x256xbf16, #tpu.memory_space<vmem>>, %arg2: memref<256x1024xbf16, #tpu.memory_space<vmem>>, %arg3: memref<1x1024xf32, #tpu.memory_space<vmem>>, %arg4: memref<32x1024xbf16, #tpu.memory_space<vmem>>, %arg5: memref<32x1024xbf16, #tpu.memory_space<vmem>>) attributes {dimension_semantics = [#tpu.dimension_semantics<parallel>], iteration_bounds = array<i64: 1>, scalar_prefetch = 0 : i64, scratch_operands = 0 : i64, tpu.core_type = #tpu.core_type<tc>, window_params = [{transform_indices = @transform_0, window_bounds = array<i64: 32, 256>}, {pipeline_mode = #tpu.pipeline_mode<synchronous>, transform_indices = @transform_1, window_bounds = array<i64: 256, 1024>}, {pipeline_mode = #tpu.pipeline_mode<synchronous>, transform_indices = @transform_2, window_bounds = array<i64: 1, 1024>}, {transform_indices = @transform_3, window_bounds = array<i64: 32, 1024>}, {transform_indices = @transform_4, window_bounds = array<i64: 32, 1024>}]} {
    %c0 = arith.constant 0 : index
    %c0_0 = arith.constant 0 : index
    %0 = vector.load %arg1[%c0, %c0_0] : memref<32x256xbf16, #tpu.memory_space<vmem>>, vector<32x256xbf16>
    %c0_1 = arith.constant 0 : index
    %c0_2 = arith.constant 0 : index
    %1 = vector.load %arg2[%c0_1, %c0_2] : memref<256x1024xbf16, #tpu.memory_space<vmem>>, vector<256x1024xbf16>
    %cst = arith.constant dense<0.000000e+00> : vector<32x1024xf32>
    %2 = tpu.matmul %0, %1, %cst {dimension_numbers = #tpu.dot_dimension_numbers<[1], [0], [0], [1], [0, 0, 1, 1], [], []>} : vector<32x256xbf16>, vector<256x1024xbf16>, vector<32x1024xf32> -> vector<32x1024xf32>
    %c0_3 = arith.constant 0 : index
    %c0_4 = arith.constant 0 : index
    %3 = vector.load %arg3[%c0_3, %c0_4] : memref<1x1024xf32, #tpu.memory_space<vmem>>, vector<1x1024xf32>
    %4 = vector.broadcast %3 : vector<1x1024xf32> to vector<32x1024xf32>
    %5 = arith.addf %2, %4 : vector<32x1024xf32>
    %c0_5 = arith.constant 0 : index
    %c0_6 = arith.constant 0 : index
    %6 = vector.load %arg4[%c0_5, %c0_6] : memref<32x1024xbf16, #tpu.memory_space<vmem>>, vector<32x1024xbf16>
    %7 = arith.extf %6 : vector<32x1024xbf16> to vector<32x1024xf32>
    %8 = arith.addf %5, %7 : vector<32x1024xf32>
    %cst_7 = arith.constant 0.000000e+00 : f32
    %9 = vector.broadcast %cst_7 : f32 to vector<32x1024xf32>
    %10 = arith.maximumf %8, %9 : vector<32x1024xf32>
    %11 = arith.truncf %10 : vector<32x1024xf32> to vector<32x1024xbf16>
    %c0_8 = arith.constant 0 : index
    %c0_9 = arith.constant 0 : index
    %12 = vector.load %arg5[%c0_8, %c0_9] : memref<32x1024xbf16, #tpu.memory_space<vmem>>, vector<32x1024xbf16>
    tpu.vector_store %arg5[%c0_8, %c0_9], %11 {strides = array<i32>} : memref<32x1024xbf16, #tpu.memory_space<vmem>>, vector<32x1024xbf16>,
    return
  }
  func.func @transform_0(%arg0: i32) -> (i32, i32) {
    %c0_i32 = arith.constant 0 : i32
    %c0_i32_0 = arith.constant 0 : i32
    return %arg0, %c0_i32 : i32, i32
  }
  func.func @transform_1(%arg0: i32) -> (i32, i32) {
    %c0_i32 = arith.constant 0 : i32
    %c0_i32_0 = arith.constant 0 : i32
    %c0_i32_1 = arith.constant 0 : i32
    return %c0_i32, %c0_i32_0 : i32, i32
  }
  func.func @transform_2(%arg0: i32) -> (i32, i32) {
    %c0_i32 = arith.constant 0 : i32
    %c0_i32_0 = arith.constant 0 : i32
    %c0_i32_1 = arith.constant 0 : i32
    return %c0_i32, %c0_i32_0 : i32, i32
  }
  func.func @transform_3(%arg0: i32) -> (i32, i32) {
    %c0_i32 = arith.constant 0 : i32
    %c0_i32_0 = arith.constant 0 : i32
    return %arg0, %c0_i32 : i32, i32
  }
  func.func @transform_4(%arg0: i32) -> (i32, i32) {
    %c0_i32 = arith.constant 0 : i32
    %c0_i32_0 = arith.constant 0 : i32
    return %arg0, %c0_i32 : i32, i32
  }
}

module attributes {stable_mosaic.version = 11 : i64} {
  func.func @_matmul_fused_kernel(%arg0: i32, %arg1: memref<32x1024xbf16, #tpu.memory_space<vmem>>, %arg2: memref<1024x256xbf16, #tpu.memory_space<vmem>>, %arg3: memref<1x256xf32, #tpu.memory_space<vmem>>, %arg4: memref<32x256xbf16, #tpu.memory_space<vmem>>) attributes {dimension_semantics = [#tpu.dimension_semantics<parallel>], iteration_bounds = array<i64: 1>, scalar_prefetch = 0 : i64, scratch_operands = 0 : i64, tpu.core_type = #tpu.core_type<tc>, window_params = [{transform_indices = @transform_0, window_bounds = array<i64: 32, 1024>}, {pipeline_mode = #tpu.pipeline_mode<synchronous>, transform_indices = @transform_1, window_bounds = array<i64: 1024, 256>}, {pipeline_mode = #tpu.pipeline_mode<synchronous>, transform_indices = @transform_2, window_bounds = array<i64: 1, 256>}, {transform_indices = @transform_3, window_bounds = array<i64: 32, 256>}]} {
    %c0 = arith.constant 0 : index
    %c0_0 = arith.constant 0 : index
    %0 = vector.load %arg1[%c0, %c0_0] : memref<32x1024xbf16, #tpu.memory_space<vmem>>, vector<32x1024xbf16>
    %c0_1 = arith.constant 0 : index
    %c0_2 = arith.constant 0 : index
    %1 = vector.load %arg2[%c0_1, %c0_2] : memref<1024x256xbf16, #tpu.memory_space<vmem>>, vector<1024x256xbf16>
    %cst = arith.constant dense<0.000000e+00> : vector<32x256xf32>
    %2 = tpu.matmul %0, %1, %cst {dimension_numbers = #tpu.dot_dimension_numbers<[1], [0], [0], [1], [0, 0, 1, 1], [], []>} : vector<32x1024xbf16>, vector<1024x256xbf16>, vector<32x256xf32> -> vector<32x256xf32>
    %c0_3 = arith.constant 0 : index
    %c0_4 = arith.constant 0 : index
    %3 = vector.load %arg3[%c0_3, %c0_4] : memref<1x256xf32, #tpu.memory_space<vmem>>, vector<1x256xf32>
    %4 = vector.broadcast %3 : vector<1x256xf32> to vector<32x256xf32>
    %5 = arith.addf %2, %4 : vector<32x256xf32>
    %cst_5 = arith.constant 0.000000e+00 : f32
    %6 = vector.broadcast %cst_5 : f32 to vector<32x256xf32>
    %7 = arith.maximumf %5, %6 : vector<32x256xf32>
    %8 = arith.truncf %7 : vector<32x256xf32> to vector<32x256xbf16>
    %c0_6 = arith.constant 0 : index
    %c0_7 = arith.constant 0 : index
    %9 = vector.load %arg4[%c0_6, %c0_7] : memref<32x256xbf16, #tpu.memory_space<vmem>>, vector<32x256xbf16>
    tpu.vector_store %arg4[%c0_6, %c0_7], %8 {strides = array<i32>} : memref<32x256xbf16, #tpu.memory_space<vmem>>, vector<32x256xbf16>,
    return
  }
  func.func @transform_0(%arg0: i32) -> (i32, i32) {
    %c0_i32 = arith.constant 0 : i32
    %c0_i32_0 = arith.constant 0 : i32
    return %arg0, %c0_i32 : i32, i32
  }
  func.func @transform_1(%arg0: i32) -> (i32, i32) {
    %c0_i32 = arith.constant 0 : i32
    %c0_i32_0 = arith.constant 0 : i32
    %c0_i32_1 = arith.constant 0 : i32
    return %c0_i32, %c0_i32_0 : i32, i32
  }
  func.func @transform_2(%arg0: i32) -> (i32, i32) {
    %c0_i32 = arith.constant 0 : i32
    %c0_i32_0 = arith.constant 0 : i32
    %c0_i32_1 = arith.constant 0 : i32
    return %c0_i32, %c0_i32_0 : i32, i32
  }
  func.func @transform_3(%arg0: i32) -> (i32, i32) {
    %c0_i32 = arith.constant 0 : i32
    %c0_i32_0 = arith.constant 0 : i32
    return %arg0, %c0_i32 : i32, i32
  }
}

</mosaic_0001>

<bundles_post_ra>
// kernel: _lambda_.43
= control target key start
LH: loop header
LB: loop body
LE: loop exit
PB: predicated region body
PF: predicated region fallthrough
CT: control target
= control target key end

     0   :  { %v1756_v0 = vmov 0   ;;  %s2214_s1 = inlined_call_operand.vmem [shape: bf16[256,128], index: 1, kind: input, shape index: {}]   ;;  %s2215_s0 = inlined_call_operand.vmem [shape: bf16[512,256], index: 0, kind: input, shape index: {}]   ;;  %s2216_s2 = inlined_call_operand.vmem [shape: f32[1,128], index: 2, kind: input, shape index: {}]   ;;  %s2217_s3 = inlined_call_operand.vmem [shape: bf16[512,128], index: 3, kind: output, shape index: {}]  }
   0x1   :  { %534 = vmatprep.subr.bf16.mxu0 %v1756_v0  ;;  %1611 = vmatprep.subr.bf16.mxu1 %v1756_v0  ;;  %v1644_v1 = vld [vmem:[%s2214_s1] sm:$0xff]   ;;  %v1645_v2 = vld [vmem:[%s2214_s1 + $0x8] sm:$0xff]   ;;  %v1646_v3 = vld [vmem:[%s2214_s1 + $0x10] sm:$0xff]  }
   0x2   :  { %535 = vmatpush1.bf16.msra.mxu0 %v1644_v1  ;;  %1627 = vmatpush1.bf16.msra.mxu1 %v1644_v1  ;;  %v1647_v4 = vld [vmem:[%s2214_s1 + $0x18] sm:$0xff]   ;;  %v1648_v5 = vld [vmem:[%s2214_s1 + $0x20] sm:$0xff]   ;;  %v1649_v7 = vld [vmem:[%s2214_s1 + $0x28] sm:$0xff]  }
   0x3   :  { %536 = vmatprep.subr.bf16.mxu0 %v1756_v0  ;;  %1612 = vmatprep.subr.bf16.mxu1 %v1756_v0  ;;  %v1662_v6 = vld [vmem:[%s2215_s0 + $0x4] ss:$8 sps:$4 sm:$0xff]   ;;  %v1650_v9 = vld [vmem:[%s2214_s1 + $0x30] sm:$0xff]   ;;  %v1651_v10 = vld [vmem:[%s2214_s1 + $0x38] sm:$0xff]  }
   0x4   :  { %v1665_v8 = vld [vmem:[%s2215_s0 + $0x104] ss:$8 sps:$4 sm:$0xff]   ;;  %566 = vmatprep.mubr.bf16.mxu0 %v1662_v6  ;;  %v1654_v13 = vld [vmem:[%s2214_s1 + $0x50] sm:$0xff]   ;;  %v1655_v14 = vld [vmem:[%s2214_s1 + $0x58] sm:$0xff]  }
   0x5   :  { %694 = vmatprep.mubr.bf16.mxu1 %v1665_v8  ;;  %v1652_v11 = vld [vmem:[%s2214_s1 + $0x40] sm:$0xff]   ;;  %v1653_v12 = vld [vmem:[%s2214_s1 + $0x48] sm:$0xff]   ;;  %v1658_v17 = vld [vmem:[%s2214_s1 + $0x70] sm:$0xff]  }
   0x6   :  { %537 = vmatpush1.bf16.msra.mxu0 %v1645_v2  ;;  %1628 = vmatpush1.bf16.msra.mxu1 %v1645_v2  ;;  %v1656_v15 = vld [vmem:[%s2214_s1 + $0x60] sm:$0xff]   ;;  %v1657_v16 = vld [vmem:[%s2214_s1 + $0x68] sm:$0xff]   ;;  %v1659_v18 = vld [vmem:[%s2214_s1 + $0x78] sm:$0xff]  }
   0x7   :  { %538 = vmatprep.subr.bf16.mxu0 %v1756_v0  ;;  %1613 = vmatprep.subr.bf16.mxu1 %v1756_v0  ;;  %v1660_v19 = vld [vmem:[%s2215_s0] ss:$8 sps:$4 sm:$0xff]   ;;  %v1666_v21 = vld [vmem:[%s2215_s0 + $0x14] ss:$8 sps:$4 sm:$0xff]   ;;  %v1670_v23 = vld [vmem:[%s2215_s0 + $0x10] ss:$8 sps:$4 sm:$0xff]  }
   0x8   :  { %v1663_v20 = vld [vmem:[%s2215_s0 + $0x100] ss:$8 sps:$4 sm:$0xff]   ;;  %v1668_v22 = vld [vmem:[%s2215_s0 + $0x114] ss:$8 sps:$4 sm:$0xff]   ;;  %v1671_v24 = vld [vmem:[%s2215_s0 + $0x110] ss:$8 sps:$4 sm:$0xff]  }
   0x9   :  { %v1672_v25 = vld [vmem:[%s2215_s0 + $0x24] ss:$8 sps:$4 sm:$0xff]   ;;  %v1676_v27 = vld [vmem:[%s2215_s0 + $0x20] ss:$8 sps:$4 sm:$0xff]   ;;  %v1678_v29 = vld [vmem:[%s2215_s0 + $0x34] ss:$8 sps:$4 sm:$0xff]  }
   0xa   :  { %539 = vmatpush1.bf16.msra.mxu0 %v1646_v3  ;;  %1629 = vmatpush1.bf16.msra.mxu1 %v1646_v3  ;;  %v1674_v26 = vld [vmem:[%s2215_s0 + $0x124] ss:$8 sps:$4 sm:$0xff]   ;;  %v1677_v28 = vld [vmem:[%s2215_s0 + $0x120] ss:$8 sps:$4 sm:$0xff]   ;;  %v1680_v30 = vld [vmem:[%s2215_s0 + $0x134] ss:$8 sps:$4 sm:$0xff]  }
   0xb   :  { %540 = vmatprep.subr.bf16.mxu0 %v1756_v0  ;;  %1614 = vmatprep.subr.bf16.mxu1 %v1756_v0  ;;  %v1682_v31 = vld [vmem:[%s2215_s0 + $0x30] ss:$8 sps:$4 sm:$0xff]   ;;  %v1684_v33 = vld [vmem:[%s2215_s0 + $0x44] ss:$8 sps:$4 sm:$0xff]   ;;  %v1688_v35 = vld [vmem:[%s2215_s0 + $0x40] ss:$8 sps:$4 sm:$0xff]  }
   0xc   :  { %v1683_v32 = vld [vmem:[%s2215_s0 + $0x130] ss:$8 sps:$4 sm:$0xff]   ;;  %v1686_v34 = vld [vmem:[%s2215_s0 + $0x144] ss:$8 sps:$4 sm:$0xff]   ;;  %v1689_v36 = vld [vmem:[%s2215_s0 + $0x140] ss:$8 sps:$4 sm:$0xff]  }
   0xd   :  { %v1690_v37 = vld [vmem:[%s2215_s0 + $0x54] ss:$8 sps:$4 sm:$0xff]   ;;  %v1694_v39 = vld [vmem:[%s2215_s0 + $0x50] ss:$8 sps:$4 sm:$0xff]   ;;  %v1696_v41 = vld [vmem:[%s2215_s0 + $0x64] ss:$8 sps:$4 sm:$0xff]  }
   0xe   :  { %541 = vmatpush1.bf16.msra.mxu0 %v1647_v4  ;;  %1630 = vmatpush1.bf16.msra.mxu1 %v1647_v4  ;;  %v1692_v38 = vld [vmem:[%s2215_s0 + $0x154] ss:$8 sps:$4 sm:$0xff]   ;;  %v1695_v40 = vld [vmem:[%s2215_s0 + $0x150] ss:$8 sps:$4 sm:$0xff]   ;;  %v1698_v42 = vld [vmem:[%s2215_s0 + $0x164] ss:$8 sps:$4 sm:$0xff]  }
   0xf   :  { %542 = vmatprep.subr.bf16.mxu0 %v1756_v0  ;;  %1615 = vmatprep.subr.bf16.mxu1 %v1756_v0  ;;  %v1700_v43 = vld [vmem:[%s2215_s0 + $0x60] ss:$8 sps:$4 sm:$0xff]   ;;  %v1702_v45 = vld [vmem:[%s2215_s0 + $0x74] ss:$8 sps:$4 sm:$0xff]   ;;  %v1706_v47 = vld [vmem:[%s2215_s0 + $0x70] ss:$8 sps:$4 sm:$0xff]  }
  0x10   :  { %v1701_v44 = vld [vmem:[%s2215_s0 + $0x160] ss:$8 sps:$4 sm:$0xff]   ;;  %v1704_v46 = vld [vmem:[%s2215_s0 + $0x174] ss:$8 sps:$4 sm:$0xff]   ;;  %v1707_v48 = vld [vmem:[%s2215_s0 + $0x170] ss:$8 sps:$4 sm:$0xff]  }
  0x11   :  { %v1708_v49 = vld [vmem:[%s2215_s0 + $0x84] ss:$8 sps:$4 sm:$0xff]   ;;  %v1712_v51 = vld [vmem:[%s2215_s0 + $0x80] ss:$8 sps:$4 sm:$0xff]   ;;  %v1714_v53 = vld [vmem:[%s2215_s0 + $0x94] ss:$8 sps:$4 sm:$0xff]  }
  0x12   :  { %543 = vmatpush1.bf16.msra.mxu0 %v1648_v5  ;;  %1631 = vmatpush1.bf16.msra.mxu1 %v1648_v5  ;;  %v1710_v50 = vld [vmem:[%s2215_s0 + $0x184] ss:$8 sps:$4 sm:$0xff]   ;;  %v1713_v52 = vld [vmem:[%s2215_s0 + $0x180] ss:$8 sps:$4 sm:$0xff]   ;;  %v1716_v54 = vld [vmem:[%s2215_s0 + $0x194] ss:$8 sps:$4 sm:$0xff]  }
  0x13   :  { %544 = vmatprep.subr.bf16.mxu0 %v1756_v0  ;;  %1616 = vmatprep.subr.bf16.mxu1 %v1756_v0  ;;  %v1718_v55 = vld [vmem:[%s2215_s0 + $0x90] ss:$8 sps:$4 sm:$0xff]   ;;  %v1720_v57 = vld [vmem:[%s2215_s0 + $0xa4] ss:$8 sps:$4 sm:$0xff]   ;;  %v1724_v59 = vld [vmem:[%s2215_s0 + $0xa0] ss:$8 sps:$4 sm:$0xff]  }
  0x14   :  { %v1719_v56 = vld [vmem:[%s2215_s0 + $0x190] ss:$8 sps:$4 sm:$0xff]   ;;  %v1722_v58 = vld [vmem:[%s2215_s0 + $0x1a4] ss:$8 sps:$4 sm:$0xff]   ;;  %v1725_v60 = vld [vmem:[%s2215_s0 + $0x1a0] ss:$8 sps:$4 sm:$0xff]  }
  0x15   :  { %v1726_v61 = vld [vmem:[%s2215_s0 + $0xb4] ss:$8 sps:$4 sm:$0xff]   ;;  %v1730_v63 = vld [vmem:[%s2215_s0 + $0xb0] ss:$8 sps:$4 sm:$0xff]   ;;  %v1732_v1 = vld [vmem:[%s2215_s0 + $0xc4] ss:$8 sps:$4 sm:$0xff]  }
  0x16   :  { %545 = vmatpush1.bf16.msra.mxu0 %v1649_v7  ;;  %1632 = vmatpush1.bf16.msra.mxu1 %v1649_v7  ;;  %v1728_v62 = vld [vmem:[%s2215_s0 + $0x1b4] ss:$8 sps:$4 sm:$0xff]   ;;  %v1734_v2 = vld [vmem:[%s2215_s0 + $0x1c4] ss:$8 sps:$4 sm:$0xff]   ;;  %v1736_v3 = vld [vmem:[%s2215_s0 + $0xc0] ss:$8 sps:$4 sm:$0xff]  }
  0x17   :  { %546 = vmatprep.subr.bf16.mxu0 %v1756_v0  ;;  %1617 = vmatprep.subr.bf16.mxu1 %v1756_v0  ;;  %v1737_v4 = vld [vmem:[%s2215_s0 + $0x1c0] ss:$8 sps:$4 sm:$0xff]   ;;  %v1738_v5 = vld [vmem:[%s2215_s0 + $0xd4] ss:$8 sps:$4 sm:$0xff]   ;;  %v1742_v7 = vld [vmem:[%s2215_s0 + $0xd0] ss:$8 sps:$4 sm:$0xff]  }
  0x18   :  { %v1740_v6 = vld [vmem:[%s2215_s0 + $0x1d4] ss:$8 sps:$4 sm:$0xff]   ;;  %v1743_v8 = vld [vmem:[%s2215_s0 + $0x1d0] ss:$8 sps:$4 sm:$0xff]  }
  0x1a   :  { %547 = vmatpush1.bf16.msra.mxu0 %v1650_v9  ;;  %1633 = vmatpush1.bf16.msra.mxu1 %v1650_v9  ;;  %v1744_v9 = vld [vmem:[%s2215_s0 + $0xe4] ss:$8 sps:$4 sm:$0xff]  }
  0x1b   :  { %548 = vmatprep.subr.bf16.mxu0 %v1756_v0  ;;  %1618 = vmatprep.subr.bf16.mxu1 %v1756_v0 }
  0x1e   :  { %549 = vmatpush1.bf16.msra.mxu0 %v1651_v10  ;;  %1634 = vmatpush1.bf16.msra.mxu1 %v1651_v10  ;;  %v1746_v10 = vld [vmem:[%s2215_s0 + $0x1e4] ss:$8 sps:$4 sm:$0xff]  }
  0x1f   :  { %550 = vmatprep.subr.bf16.mxu0 %v1756_v0  ;;  %1619 = vmatprep.subr.bf16.mxu1 %v1756_v0 }
  0x22   :  { %551 = vmatpush1.bf16.msra.mxu0 %v1652_v11  ;;  %1635 = vmatpush1.bf16.msra.mxu1 %v1652_v11  ;;  %v1748_v11 = vld [vmem:[%s2215_s0 + $0xe0] ss:$8 sps:$4 sm:$0xff]  }
  0x23   :  { %552 = vmatprep.subr.bf16.mxu0 %v1756_v0  ;;  %1620 = vmatprep.subr.bf16.mxu1 %v1756_v0 }
  0x26   :  { %553 = vmatpush1.bf16.msra.mxu0 %v1653_v12  ;;  %1636 = vmatpush1.bf16.msra.mxu1 %v1653_v12  ;;  %v1749_v12 = vld [vmem:[%s2215_s0 + $0x1e0] ss:$8 sps:$4 sm:$0xff]  }
  0x27   :  { %554 = vmatprep.subr.bf16.mxu0 %v1756_v0  ;;  %1621 = vmatprep.subr.bf16.mxu1 %v1756_v0 }
  0x2a   :  { %555 = vmatpush1.bf16.msra.mxu0 %v1654_v13  ;;  %1637 = vmatpush1.bf16.msra.mxu1 %v1654_v13  ;;  %v1750_v13 = vld [vmem:[%s2215_s0 + $0xf4] ss:$8 sps:$4 sm:$0xff]  }
  0x2b   :  { %556 = vmatprep.subr.bf16.mxu0 %v1756_v0  ;;  %1622 = vmatprep.subr.bf16.mxu1 %v1756_v0 }
  0x2e   :  { %557 = vmatpush1.bf16.msra.mxu0 %v1655_v14  ;;  %1638 = vmatpush1.bf16.msra.mxu1 %v1655_v14  ;;  %v1752_v14 = vld [vmem:[%s2215_s0 + $0x1f4] ss:$8 sps:$4 sm:$0xff]  }
  0x2f   :  { %558 = vmatprep.subr.bf16.mxu0 %v1756_v0  ;;  %1623 = vmatprep.subr.bf16.mxu1 %v1756_v0 }
  0x32   :  { %559 = vmatpush1.bf16.msra.mxu0 %v1656_v15  ;;  %1639 = vmatpush1.bf16.msra.mxu1 %v1656_v15  ;;  %v1754_v15 = vld [vmem:[%s2215_s0 + $0xf0] ss:$8 sps:$4 sm:$0xff]  }
  0x33   :  { %560 = vmatprep.subr.bf16.mxu0 %v1756_v0  ;;  %1624 = vmatprep.subr.bf16.mxu1 %v1756_v0 }
  0x36   :  { %561 = vmatpush1.bf16.msra.mxu0 %v1657_v16  ;;  %1640 = vmatpush1.bf16.msra.mxu1 %v1657_v16  ;;  %v1755_v16 = vld [vmem:[%s2215_s0 + $0x1f0] ss:$8 sps:$4 sm:$0xff]  }
  0x37   :  { %562 = vmatprep.subr.bf16.mxu0 %v1756_v0  ;;  %1625 = vmatprep.subr.bf16.mxu1 %v1756_v0 }
  0x3a   :  { %563 = vmatpush1.bf16.msra.mxu0 %v1658_v17  ;;  %1641 = vmatpush1.bf16.msra.mxu1 %v1658_v17  ;;  %v2052_v17 = vld [vmem:[%s2216_s2] ss:$0 sm:$0xff] }
  0x3b   :  { %564 = vmatprep.subr.bf16.mxu0 %v1756_v0  ;;  %1626 = vmatprep.subr.bf16.mxu1 %v1756_v0  ;;  %v1731_v0 = vld [vmem:[%s2215_s0 + $0x1b0] ss:$8 sps:$4 sm:$0xff]  }
  0x3e   :  { %565 = vmatpush1.bf16.msra.mxu0 %v1659_v18  ;;  %1642 = vmatpush1.bf16.msra.mxu1 %v1659_v18 }
  0x41   :  { %567 = vmatmul.mubr.bf16.vlgmr.msra.gmra.mrb[0].mxu0 %v1660_v19  ;;  %695 = vmatmul.mubr.bf16.vlgmr.msra.gmra.mrb[0].mxu1 %v1663_v20 }
  0x42   :  { %574 = vmatprep.mubr.bf16.mxu0 %v1666_v21  ;;  %702 = vmatprep.mubr.bf16.mxu1 %v1668_v22 }
  0x49   :  { %575 = vmatmul.mubr.bf16.gmra.mrb[4].mxu0 %v1670_v23  ;;  %703 = vmatmul.mubr.bf16.gmra.mrb[4].mxu1 %v1671_v24 }
  0x4a   :  { %582 = vmatprep.mubr.bf16.mxu0 %v1672_v25  ;;  %710 = vmatprep.mubr.bf16.mxu1 %v1674_v26 }
  0x51   :  { %583 = vmatmul.mubr.bf16.gmra.mrb[8].mxu0 %v1676_v27  ;;  %711 = vmatmul.mubr.bf16.gmra.mrb[8].mxu1 %v1677_v28 }
  0x52   :  { %590 = vmatprep.mubr.bf16.mxu0 %v1678_v29  ;;  %718 = vmatprep.mubr.bf16.mxu1 %v1680_v30 }
  0x59   :  { %591 = vmatmul.mubr.bf16.gmra.mrb[12].mxu0 %v1682_v31  ;;  %719 = vmatmul.mubr.bf16.gmra.mrb[12].mxu1 %v1683_v32 }
  0x5a   :  { %598 = vmatprep.mubr.bf16.mxu0 %v1684_v33  ;;  %726 = vmatprep.mubr.bf16.mxu1 %v1686_v34 }
  0x61   :  { %599 = vmatmul.mubr.bf16.gmra.mrb[16].mxu0 %v1688_v35  ;;  %727 = vmatmul.mubr.bf16.gmra.mrb[16].mxu1 %v1689_v36 }
  0x62   :  { %606 = vmatprep.mubr.bf16.mxu0 %v1690_v37  ;;  %734 = vmatprep.mubr.bf16.mxu1 %v1692_v38 }
  0x69   :  { %607 = vmatmul.mubr.bf16.gmra.mrb[20].mxu0 %v1694_v39  ;;  %735 = vmatmul.mubr.bf16.gmra.mrb[20].mxu1 %v1695_v40 }
  0x6a   :  { %614 = vmatprep.mubr.bf16.mxu0 %v1696_v41  ;;  %742 = vmatprep.mubr.bf16.mxu1 %v1698_v42 }
  0x71   :  { %615 = vmatmul.mubr.bf16.gmra.mrb[24].mxu0 %v1700_v43  ;;  %743 = vmatmul.mubr.bf16.gmra.mrb[24].mxu1 %v1701_v44 }
  0x72   :  { %622 = vmatprep.mubr.bf16.mxu0 %v1702_v45  ;;  %750 = vmatprep.mubr.bf16.mxu1 %v1704_v46 }
  0x79   :  { %623 = vmatmul.mubr.bf16.gmra.mrb[28].mxu0 %v1706_v47  ;;  %751 = vmatmul.mubr.bf16.gmra.mrb[28].mxu1 %v1707_v48 }
  0x7a   :  { %630 = vmatprep.mubr.bf16.mxu0 %v1708_v49  ;;  %758 = vmatprep.mubr.bf16.mxu1 %v1710_v50 }
  0x81   :  { %631 = vmatmul.mubr.bf16.gmra.mrb[32].mxu0 %v1712_v51  ;;  %759 = vmatmul.mubr.bf16.gmra.mrb[32].mxu1 %v1713_v52 }
  0x82   :  { %638 = vmatprep.mubr.bf16.mxu0 %v1714_v53  ;;  %766 = vmatprep.mubr.bf16.mxu1 %v1716_v54 }
  0x89   :  { %639 = vmatmul.mubr.bf16.gmra.mrb[36].mxu0 %v1718_v55  ;;  %767 = vmatmul.mubr.bf16.gmra.mrb[36].mxu1 %v1719_v56 }
  0x8a   :  { %646 = vmatprep.mubr.bf16.mxu0 %v1720_v57  ;;  %774 = vmatprep.mubr.bf16.mxu1 %v1722_v58 }
  0x91   :  { %647 = vmatmul.mubr.bf16.gmra.mrb[40].mxu0 %v1724_v59  ;;  %775 = vmatmul.mubr.bf16.gmra.mrb[40].mxu1 %v1725_v60 }
  0x92   :  { %654 = vmatprep.mubr.bf16.mxu0 %v1726_v61  ;;  %782 = vmatprep.mubr.bf16.mxu1 %v1728_v62 }
  0x99   :  { %655 = vmatmul.mubr.bf16.gmra.mrb[44].mxu0 %v1730_v63  ;;  %783 = vmatmul.mubr.bf16.gmra.mrb[44].mxu1 %v1731_v0 }
  0x9a   :  { %662 = vmatprep.mubr.bf16.mxu0 %v1732_v1  ;;  %790 = vmatprep.mubr.bf16.mxu1 %v1734_v2 }
  0xa1   :  { %663 = vmatmul.mubr.bf16.gmra.mrb[48].mxu0 %v1736_v3  ;;  %791 = vmatmul.mubr.bf16.gmra.mrb[48].mxu1 %v1737_v4 }
  0xa2   :  { %670 = vmatprep.mubr.bf16.mxu0 %v1738_v5  ;;  %798 = vmatprep.mubr.bf16.mxu1 %v1740_v6 }
  0xa9   :  { %671 = vmatmul.mubr.bf16.gmra.mrb[52].mxu0 %v1742_v7  ;;  %799 = vmatmul.mubr.bf16.gmra.mrb[52].mxu1 %v1743_v8 }
  0xaa   :  { %678 = vmatprep.mubr.bf16.mxu0 %v1744_v9  ;;  %806 = vmatprep.mubr.bf16.mxu1 %v1746_v10 }
  0xb1   :  { %679 = vmatmul.mubr.bf16.gmra.mrb[56].mxu0 %v1748_v11  ;;  %807 = vmatmul.mubr.bf16.gmra.mrb[56].mxu1 %v1749_v12 }
  0xb2   :  { %686 = vmatprep.mubr.bf16.mxu0 %v1750_v13  ;;  %814 = vmatprep.mubr.bf16.mxu1 %v1752_v14 }
  0xb9   :  { %687 = vmatmul.mubr.bf16.gmra.mrb[60].mxu0 %v1754_v15  ;;  %815 = vmatmul.mubr.bf16.gmra.mrb[60].mxu1 %v1755_v16 }
 0x114   :  { %v568_v18 = vpop.f32.mrb[0].mxu0  ;;  %v696_v19 = vpop.f32.mrb[0].mxu1 }
 0x115   :  { %v569_v20 = vadd.f32 %v2052_v17, %v568_v18  ;;  %v697_v21 = vadd.f32 %v2052_v17, %v696_v19  ;;  %v570_v22 = vpop.f32.mrb[1].mxu0  ;;  %v698_v23 = vpop.f32.mrb[1].mxu1 }
 0x116   :  { %v571_v24 = vpop.f32.mrb[2].mxu0  ;;  %v699_v25 = vpop.f32.mrb[2].mxu1 }
 0x117   :  { %v572_v26 = vadd.f32 %v2052_v17, %v571_v24  ;;  %v700_v27 = vadd.f32 %v2052_v17, %v699_v25  ;;  %v573_v28 = vpop.f32.mrb[3].mxu0  ;;  %v701_v29 = vpop.f32.mrb[3].mxu1  ;;  %v823_v30 = vmax.f32 %v569_v20, 0.0  ;;  %v855_v31 = vmax.f32 %v697_v21, 0.0 }
 0x119   :  { %v824_v32 = vmax.f32 %v572_v26, 0.0  ;;  %v856_v33 = vmax.f32 %v700_v27, 0.0 }
 0x11b   :  { %v1423_v34 = vpack.c.bf16 %v824_v32, %v823_v30  ;;  %v1503_v35 = vpack.c.bf16 %v856_v33, %v855_v31 }
 0x11c   :  { %v576_v36 = vpop.f32.mrb[4].mxu0  ;;  %v704_v37 = vpop.f32.mrb[4].mxu1 }
 0x11d   :  { %1424 = vst [vmem:[%s2217_s3] sm:$0xff] %v1423_v34   ;;  %1595 = vst [vmem:[%s2217_s3 + $0x80] sm:$0xff] %v1503_v35   ;;  %v577_v38 = vadd.f32 %v2052_v17, %v576_v36  ;;  %v705_v39 = vadd.f32 %v2052_v17, %v704_v37  ;;  %v578_v40 = vpop.f32.mrb[5].mxu0  ;;  %v706_v41 = vpop.f32.mrb[5].mxu1 }
 0x11e   :  { %v579_v42 = vpop.f32.mrb[6].mxu0  ;;  %v707_v43 = vpop.f32.mrb[6].mxu1 }
 0x11f   :  { %v580_v44 = vadd.f32 %v2052_v17, %v579_v42  ;;  %v708_v45 = vadd.f32 %v2052_v17, %v707_v43  ;;  %v581_v46 = vpop.f32.mrb[7].mxu0  ;;  %v709_v47 = vpop.f32.mrb[7].mxu1  ;;  %v825_v48 = vmax.f32 %v577_v38, 0.0  ;;  %v857_v49 = vmax.f32 %v705_v39, 0.0 }
 0x121   :  { %v826_v50 = vmax.f32 %v580_v44, 0.0  ;;  %v858_v51 = vmax.f32 %v708_v45, 0.0 }
 0x123   :  { %v1428_v52 = vpack.c.bf16 %v826_v50, %v825_v48  ;;  %v1508_v53 = vpack.c.bf16 %v858_v51, %v857_v49 }
 0x124   :  { %v584_v54 = vpop.f32.mrb[8].mxu0  ;;  %v712_v55 = vpop.f32.mrb[8].mxu1 }
 0x125   :  { %1580 = vst [vmem:[%s2217_s3 + $0x8] sm:$0xff] %v1428_v52   ;;  %1596 = vst [vmem:[%s2217_s3 + $0x88] sm:$0xff] %v1508_v53   ;;  %v585_v56 = vadd.f32 %v2052_v17, %v584_v54  ;;  %v713_v57 = vadd.f32 %v2052_v17, %v712_v55  ;;  %v586_v58 = vpop.f32.mrb[9].mxu0  ;;  %v714_v59 = vpop.f32.mrb[9].mxu1 }
 0x126   :  { %v587_v60 = vpop.f32.mrb[10].mxu0  ;;  %v715_v61 = vpop.f32.mrb[10].mxu1 }
 0x127   :  { %v588_v62 = vadd.f32 %v2052_v17, %v587_v60  ;;  %v716_v63 = vadd.f32 %v2052_v17, %v715_v61  ;;  %v589_v0 = vpop.f32.mrb[11].mxu0  ;;  %v717_v1 = vpop.f32.mrb[11].mxu1  ;;  %v827_v2 = vmax.f32 %v585_v56, 0.0  ;;  %v859_v3 = vmax.f32 %v713_v57, 0.0 }
 0x129   :  { %v828_v4 = vmax.f32 %v588_v62, 0.0  ;;  %v860_v5 = vmax.f32 %v716_v63, 0.0 }
 0x12b   :  { %v1433_v6 = vpack.c.bf16 %v828_v4, %v827_v2  ;;  %v1513_v7 = vpack.c.bf16 %v860_v5, %v859_v3 }
 0x12c   :  { %v592_v8 = vpop.f32.mrb[12].mxu0  ;;  %v720_v9 = vpop.f32.mrb[12].mxu1 }
 0x12d   :  { %1581 = vst [vmem:[%s2217_s3 + $0x10] sm:$0xff] %v1433_v6   ;;  %1597 = vst [vmem:[%s2217_s3 + $0x90] sm:$0xff] %v1513_v7   ;;  %v593_v10 = vadd.f32 %v2052_v17, %v592_v8  ;;  %v721_v11 = vadd.f32 %v2052_v17, %v720_v9  ;;  %v594_v12 = vpop.f32.mrb[13].mxu0  ;;  %v722_v13 = vpop.f32.mrb[13].mxu1 }
 0x12e   :  { %v595_v14 = vpop.f32.mrb[14].mxu0  ;;  %v723_v15 = vpop.f32.mrb[14].mxu1 }
 0x12f   :  { %v596_v16 = vadd.f32 %v2052_v17, %v595_v14  ;;  %v724_v18 = vadd.f32 %v2052_v17, %v723_v15  ;;  %v597_v19 = vpop.f32.mrb[15].mxu0  ;;  %v725_v20 = vpop.f32.mrb[15].mxu1  ;;  %v829_v21 = vmax.f32 %v593_v10, 0.0  ;;  %v861_v22 = vmax.f32 %v721_v11, 0.0 }
 0x131   :  { %v830_v23 = vmax.f32 %v596_v16, 0.0  ;;  %v862_v24 = vmax.f32 %v724_v18, 0.0 }
 0x133   :  { %v1438_v25 = vpack.c.bf16 %v830_v23, %v829_v21  ;;  %v1518_v26 = vpack.c.bf16 %v862_v24, %v861_v22 }
 0x134   :  { %v600_v27 = vpop.f32.mrb[16].mxu0  ;;  %v728_v28 = vpop.f32.mrb[16].mxu1 }
 0x135   :  { %1582 = vst [vmem:[%s2217_s3 + $0x18] sm:$0xff] %v1438_v25   ;;  %1598 = vst [vmem:[%s2217_s3 + $0x98] sm:$0xff] %v1518_v26   ;;  %v601_v29 = vadd.f32 %v2052_v17, %v600_v27  ;;  %v729_v30 = vadd.f32 %v2052_v17, %v728_v28  ;;  %v602_v31 = vpop.f32.mrb[17].mxu0  ;;  %v730_v32 = vpop.f32.mrb[17].mxu1 }
 0x136   :  { %v603_v33 = vpop.f32.mrb[18].mxu0  ;;  %v731_v34 = vpop.f32.mrb[18].mxu1 }
 0x137   :  { %v604_v35 = vadd.f32 %v2052_v17, %v603_v33  ;;  %v732_v36 = vadd.f32 %v2052_v17, %v731_v34  ;;  %v605_v37 = vpop.f32.mrb[19].mxu0  ;;  %v733_v38 = vpop.f32.mrb[19].mxu1  ;;  %v831_v39 = vmax.f32 %v601_v29, 0.0  ;;  %v863_v40 = vmax.f32 %v729_v30, 0.0 }
 0x139   :  { %v832_v41 = vmax.f32 %v604_v35, 0.0  ;;  %v864_v42 = vmax.f32 %v732_v36, 0.0 }
 0x13b   :  { %v1443_v43 = vpack.c.bf16 %v832_v41, %v831_v39  ;;  %v1523_v44 = vpack.c.bf16 %v864_v42, %v863_v40 }
 0x13c   :  { %v608_v45 = vpop.f32.mrb[20].mxu0  ;;  %v736_v46 = vpop.f32.mrb[20].mxu1 }
 0x13d   :  { %1583 = vst [vmem:[%s2217_s3 + $0x20] sm:$0xff] %v1443_v43   ;;  %1599 = vst [vmem:[%s2217_s3 + $0xa0] sm:$0xff] %v1523_v44   ;;  %v609_v47 = vadd.f32 %v2052_v17, %v608_v45  ;;  %v737_v48 = vadd.f32 %v2052_v17, %v736_v46  ;;  %v610_v49 = vpop.f32.mrb[21].mxu0  ;;  %v738_v50 = vpop.f32.mrb[21].mxu1 }
 0x13e   :  { %v611_v51 = vpop.f32.mrb[22].mxu0  ;;  %v739_v52 = vpop.f32.mrb[22].mxu1 }
 0x13f   :  { %v612_v53 = vadd.f32 %v2052_v17, %v611_v51  ;;  %v740_v54 = vadd.f32 %v2052_v17, %v739_v52  ;;  %v613_v55 = vpop.f32.mrb[23].mxu0  ;;  %v741_v56 = vpop.f32.mrb[23].mxu1  ;;  %v833_v57 = vmax.f32 %v609_v47, 0.0  ;;  %v865_v58 = vmax.f32 %v737_v48, 0.0 }
 0x141   :  { %v834_v59 = vmax.f32 %v612_v53, 0.0  ;;  %v866_v60 = vmax.f32 %v740_v54, 0.0 }
 0x143   :  { %v1448_v61 = vpack.c.bf16 %v834_v59, %v833_v57  ;;  %v1528_v62 = vpack.c.bf16 %v866_v60, %v865_v58 }
 0x144   :  { %v616_v63 = vpop.f32.mrb[24].mxu0  ;;  %v744_v0 = vpop.f32.mrb[24].mxu1 }
 0x145   :  { %1584 = vst [vmem:[%s2217_s3 + $0x28] sm:$0xff] %v1448_v61   ;;  %1600 = vst [vmem:[%s2217_s3 + $0xa8] sm:$0xff] %v1528_v62   ;;  %v617_v1 = vadd.f32 %v2052_v17, %v616_v63  ;;  %v745_v2 = vadd.f32 %v2052_v17, %v744_v0  ;;  %v618_v3 = vpop.f32.mrb[25].mxu0  ;;  %v746_v4 = vpop.f32.mrb[25].mxu1 }
 0x146   :  { %v619_v5 = vpop.f32.mrb[26].mxu0  ;;  %v747_v6 = vpop.f32.mrb[26].mxu1 }
 0x147   :  { %v620_v7 = vadd.f32 %v2052_v17, %v619_v5  ;;  %v748_v8 = vadd.f32 %v2052_v17, %v747_v6  ;;  %v621_v9 = vpop.f32.mrb[27].mxu0  ;;  %v749_v10 = vpop.f32.mrb[27].mxu1  ;;  %v835_v11 = vmax.f32 %v617_v1, 0.0  ;;  %v867_v12 = vmax.f32 %v745_v2, 0.0 }
 0x149   :  { %v836_v13 = vmax.f32 %v620_v7, 0.0  ;;  %v868_v14 = vmax.f32 %v748_v8, 0.0 }
 0x14b   :  { %v1453_v15 = vpack.c.bf16 %v836_v13, %v835_v11  ;;  %v1533_v16 = vpack.c.bf16 %v868_v14, %v867_v12 }
 0x14c   :  { %v624_v18 = vpop.f32.mrb[28].mxu0  ;;  %v752_v19 = vpop.f32.mrb[28].mxu1 }
 0x14d   :  { %1585 = vst [vmem:[%s2217_s3 + $0x30] sm:$0xff] %v1453_v15   ;;  %1601 = vst [vmem:[%s2217_s3 + $0xb0] sm:$0xff] %v1533_v16   ;;  %v625_v20 = vadd.f32 %v2052_v17, %v624_v18  ;;  %v753_v21 = vadd.f32 %v2052_v17, %v752_v19  ;;  %v626_v22 = vpop.f32.mrb[29].mxu0  ;;  %v754_v23 = vpop.f32.mrb[29].mxu1 }
 0x14e   :  { %v627_v24 = vpop.f32.mrb[30].mxu0  ;;  %v755_v25 = vpop.f32.mrb[30].mxu1 }
 0x14f   :  { %v628_v26 = vadd.f32 %v2052_v17, %v627_v24  ;;  %v756_v27 = vadd.f32 %v2052_v17, %v755_v25  ;;  %v629_v28 = vpop.f32.mrb[31].mxu0  ;;  %v757_v29 = vpop.f32.mrb[31].mxu1  ;;  %v837_v30 = vmax.f32 %v625_v20, 0.0  ;;  %v869_v31 = vmax.f32 %v753_v21, 0.0 }
 0x151   :  { %v838_v32 = vmax.f32 %v628_v26, 0.0  ;;  %v870_v33 = vmax.f32 %v756_v27, 0.0 }
 0x153   :  { %v1458_v34 = vpack.c.bf16 %v838_v32, %v837_v30  ;;  %v1538_v35 = vpack.c.bf16 %v870_v33, %v869_v31 }
 0x154   :  { %v632_v36 = vpop.f32.mrb[32].mxu0  ;;  %v760_v37 = vpop.f32.mrb[32].mxu1 }
 0x155   :  { %1586 = vst [vmem:[%s2217_s3 + $0x38] sm:$0xff] %v1458_v34   ;;  %1602 = vst [vmem:[%s2217_s3 + $0xb8] sm:$0xff] %v1538_v35   ;;  %v633_v38 = vadd.f32 %v2052_v17, %v632_v36  ;;  %v761_v39 = vadd.f32 %v2052_v17, %v760_v37  ;;  %v634_v40 = vpop.f32.mrb[33].mxu0  ;;  %v762_v41 = vpop.f32.mrb[33].mxu1 }
 0x156   :  { %v635_v42 = vpop.f32.mrb[34].mxu0  ;;  %v763_v43 = vpop.f32.mrb[34].mxu1 }
 0x157   :  { %v636_v44 = vadd.f32 %v2052_v17, %v635_v42  ;;  %v764_v45 = vadd.f32 %v2052_v17, %v763_v43  ;;  %v637_v46 = vpop.f32.mrb[35].mxu0  ;;  %v765_v47 = vpop.f32.mrb[35].mxu1  ;;  %v839_v48 = vmax.f32 %v633_v38, 0.0  ;;  %v871_v49 = vmax.f32 %v761_v39, 0.0 }
 0x159   :  { %v840_v50 = vmax.f32 %v636_v44, 0.0  ;;  %v872_v51 = vmax.f32 %v764_v45, 0.0 }
 0x15b   :  { %v1463_v52 = vpack.c.bf16 %v840_v50, %v839_v48  ;;  %v1543_v53 = vpack.c.bf16 %v872_v51, %v871_v49 }
 0x15c   :  { %v640_v54 = vpop.f32.mrb[36].mxu0  ;;  %v768_v55 = vpop.f32.mrb[36].mxu1 }
 0x15d   :  { %1587 = vst [vmem:[%s2217_s3 + $0x40] sm:$0xff] %v1463_v52   ;;  %1603 = vst [vmem:[%s2217_s3 + $0xc0] sm:$0xff] %v1543_v53   ;;  %v641_v56 = vadd.f32 %v2052_v17, %v640_v54  ;;  %v769_v57 = vadd.f32 %v2052_v17, %v768_v55  ;;  %v642_v58 = vpop.f32.mrb[37].mxu0  ;;  %v770_v59 = vpop.f32.mrb[37].mxu1 }
 0x15e   :  { %v643_v60 = vpop.f32.mrb[38].mxu0  ;;  %v771_v61 = vpop.f32.mrb[38].mxu1 }
 0x15f   :  { %v644_v62 = vadd.f32 %v2052_v17, %v643_v60  ;;  %v772_v63 = vadd.f32 %v2052_v17, %v771_v61  ;;  %v645_v0 = vpop.f32.mrb[39].mxu0  ;;  %v773_v1 = vpop.f32.mrb[39].mxu1  ;;  %v841_v2 = vmax.f32 %v641_v56, 0.0  ;;  %v873_v3 = vmax.f32 %v769_v57, 0.0 }
 0x161   :  { %v842_v4 = vmax.f32 %v644_v62, 0.0  ;;  %v874_v5 = vmax.f32 %v772_v63, 0.0 }
 0x163   :  { %v1468_v6 = vpack.c.bf16 %v842_v4, %v841_v2  ;;  %v1548_v7 = vpack.c.bf16 %v874_v5, %v873_v3 }
 0x164   :  { %v648_v8 = vpop.f32.mrb[40].mxu0  ;;  %v776_v9 = vpop.f32.mrb[40].mxu1 }
 0x165   :  { %1588 = vst [vmem:[%s2217_s3 + $0x48] sm:$0xff] %v1468_v6   ;;  %1604 = vst [vmem:[%s2217_s3 + $0xc8] sm:$0xff] %v1548_v7   ;;  %v649_v10 = vadd.f32 %v2052_v17, %v648_v8  ;;  %v777_v11 = vadd.f32 %v2052_v17, %v776_v9  ;;  %v650_v12 = vpop.f32.mrb[41].mxu0  ;;  %v778_v13 = vpop.f32.mrb[41].mxu1 }
 0x166   :  { %v651_v14 = vpop.f32.mrb[42].mxu0  ;;  %v779_v15 = vpop.f32.mrb[42].mxu1 }
 0x167   :  { %v652_v16 = vadd.f32 %v2052_v17, %v651_v14  ;;  %v780_v18 = vadd.f32 %v2052_v17, %v779_v15  ;;  %v653_v19 = vpop.f32.mrb[43].mxu0  ;;  %v781_v20 = vpop.f32.mrb[43].mxu1  ;;  %v843_v21 = vmax.f32 %v649_v10, 0.0  ;;  %v875_v22 = vmax.f32 %v777_v11, 0.0 }
 0x169   :  { %v844_v23 = vmax.f32 %v652_v16, 0.0  ;;  %v876_v24 = vmax.f32 %v780_v18, 0.0 }
 0x16b   :  { %v1473_v25 = vpack.c.bf16 %v844_v23, %v843_v21  ;;  %v1553_v26 = vpack.c.bf16 %v876_v24, %v875_v22 }
 0x16c   :  { %v656_v27 = vpop.f32.mrb[44].mxu0  ;;  %v784_v28 = vpop.f32.mrb[44].mxu1 }
 0x16d   :  { %1589 = vst [vmem:[%s2217_s3 + $0x50] sm:$0xff] %v1473_v25   ;;  %1605 = vst [vmem:[%s2217_s3 + $0xd0] sm:$0xff] %v1553_v26   ;;  %v657_v29 = vadd.f32 %v2052_v17, %v656_v27  ;;  %v785_v30 = vadd.f32 %v2052_v17, %v784_v28  ;;  %v658_v31 = vpop.f32.mrb[45].mxu0  ;;  %v786_v32 = vpop.f32.mrb[45].mxu1 }
 0x16e   :  { %v659_v33 = vpop.f32.mrb[46].mxu0  ;;  %v787_v34 = vpop.f32.mrb[46].mxu1 }
 0x16f   :  { %v660_v35 = vadd.f32 %v2052_v17, %v659_v33  ;;  %v788_v36 = vadd.f32 %v2052_v17, %v787_v34  ;;  %v661_v37 = vpop.f32.mrb[47].mxu0  ;;  %v789_v38 = vpop.f32.mrb[47].mxu1  ;;  %v845_v39 = vmax.f32 %v657_v29, 0.0  ;;  %v877_v40 = vmax.f32 %v785_v30, 0.0 }
 0x171   :  { %v846_v41 = vmax.f32 %v660_v35, 0.0  ;;  %v878_v42 = vmax.f32 %v788_v36, 0.0 }
 0x173   :  { %v1478_v43 = vpack.c.bf16 %v846_v41, %v845_v39  ;;  %v1558_v44 = vpack.c.bf16 %v878_v42, %v877_v40 }
 0x174   :  { %v664_v45 = vpop.f32.mrb[48].mxu0  ;;  %v792_v46 = vpop.f32.mrb[48].mxu1 }
 0x175   :  { %1590 = vst [vmem:[%s2217_s3 + $0x58] sm:$0xff] %v1478_v43   ;;  %1606 = vst [vmem:[%s2217_s3 + $0xd8] sm:$0xff] %v1558_v44   ;;  %v665_v47 = vadd.f32 %v2052_v17, %v664_v45  ;;  %v793_v48 = vadd.f32 %v2052_v17, %v792_v46  ;;  %v666_v49 = vpop.f32.mrb[49].mxu0  ;;  %v794_v50 = vpop.f32.mrb[49].mxu1 }
 0x176   :  { %v667_v51 = vpop.f32.mrb[50].mxu0  ;;  %v795_v52 = vpop.f32.mrb[50].mxu1 }
 0x177   :  { %v668_v53 = vadd.f32 %v2052_v17, %v667_v51  ;;  %v796_v54 = vadd.f32 %v2052_v17, %v795_v52  ;;  %v669_v55 = vpop.f32.mrb[51].mxu0  ;;  %v797_v56 = vpop.f32.mrb[51].mxu1  ;;  %v847_v57 = vmax.f32 %v665_v47, 0.0  ;;  %v879_v58 = vmax.f32 %v793_v48, 0.0 }
 0x179   :  { %v848_v59 = vmax.f32 %v668_v53, 0.0  ;;  %v880_v60 = vmax.f32 %v796_v54, 0.0 }
 0x17b   :  { %v1483_v61 = vpack.c.bf16 %v848_v59, %v847_v57  ;;  %v1563_v62 = vpack.c.bf16 %v880_v60, %v879_v58 }
 0x17c   :  { %v672_v63 = vpop.f32.mrb[52].mxu0  ;;  %v800_v0 = vpop.f32.mrb[52].mxu1 }
 0x17d   :  { %1591 = vst [vmem:[%s2217_s3 + $0x60] sm:$0xff] %v1483_v61   ;;  %1607 = vst [vmem:[%s2217_s3 + $0xe0] sm:$0xff] %v1563_v62   ;;  %v673_v1 = vadd.f32 %v2052_v17, %v672_v63  ;;  %v801_v2 = vadd.f32 %v2052_v17, %v800_v0  ;;  %v674_v3 = vpop.f32.mrb[53].mxu0  ;;  %v802_v4 = vpop.f32.mrb[53].mxu1 }
 0x17e   :  { %v675_v5 = vpop.f32.mrb[54].mxu0  ;;  %v803_v6 = vpop.f32.mrb[54].mxu1 }
 0x17f   :  { %v676_v7 = vadd.f32 %v2052_v17, %v675_v5  ;;  %v804_v8 = vadd.f32 %v2052_v17, %v803_v6  ;;  %v677_v9 = vpop.f32.mrb[55].mxu0  ;;  %v805_v10 = vpop.f32.mrb[55].mxu1  ;;  %v849_v11 = vmax.f32 %v673_v1, 0.0  ;;  %v881_v12 = vmax.f32 %v801_v2, 0.0 }
 0x181   :  { %v850_v13 = vmax.f32 %v676_v7, 0.0  ;;  %v882_v14 = vmax.f32 %v804_v8, 0.0 }
 0x183   :  { %v1488_v15 = vpack.c.bf16 %v850_v13, %v849_v11  ;;  %v1568_v16 = vpack.c.bf16 %v882_v14, %v881_v12 }
 0x184   :  { %v680_v18 = vpop.f32.mrb[56].mxu0  ;;  %v808_v19 = vpop.f32.mrb[56].mxu1 }
 0x185   :  { %1592 = vst [vmem:[%s2217_s3 + $0x68] sm:$0xff] %v1488_v15   ;;  %1608 = vst [vmem:[%s2217_s3 + $0xe8] sm:$0xff] %v1568_v16   ;;  %v681_v20 = vadd.f32 %v2052_v17, %v680_v18  ;;  %v809_v21 = vadd.f32 %v2052_v17, %v808_v19  ;;  %v682_v22 = vpop.f32.mrb[57].mxu0  ;;  %v810_v23 = vpop.f32.mrb[57].mxu1 }
 0x186   :  { %v683_v24 = vpop.f32.mrb[58].mxu0  ;;  %v811_v25 = vpop.f32.mrb[58].mxu1 }
 0x187   :  { %v684_v26 = vadd.f32 %v2052_v17, %v683_v24  ;;  %v812_v27 = vadd.f32 %v2052_v17, %v811_v25  ;;  %v685_v28 = vpop.f32.mrb[59].mxu0  ;;  %v813_v29 = vpop.f32.mrb[59].mxu1  ;;  %v851_v30 = vmax.f32 %v681_v20, 0.0  ;;  %v883_v31 = vmax.f32 %v809_v21, 0.0 }
 0x189   :  { %v852_v32 = vmax.f32 %v684_v26, 0.0  ;;  %v884_v33 = vmax.f32 %v812_v27, 0.0 }
 0x18b   :  { %v1493_v34 = vpack.c.bf16 %v852_v32, %v851_v30  ;;  %v1573_v35 = vpack.c.bf16 %v884_v33, %v883_v31 }
 0x18c   :  { %v688_v36 = vpop.f32.mrb[60].mxu0  ;;  %v816_v37 = vpop.f32.mrb[60].mxu1 }
 0x18d   :  { %1593 = vst [vmem:[%s2217_s3 + $0x70] sm:$0xff] %v1493_v34   ;;  %1609 = vst [vmem:[%s2217_s3 + $0xf0] sm:$0xff] %v1573_v35   ;;  %v689_v38 = vadd.f32 %v2052_v17, %v688_v36  ;;  %v817_v39 = vadd.f32 %v2052_v17, %v816_v37  ;;  %v690_v40 = vpop.f32.mrb[61].mxu0  ;;  %v818_v41 = vpop.f32.mrb[61].mxu1 }
 0x18e   :  { %v691_v42 = vpop.f32.mrb[62].mxu0  ;;  %v819_v43 = vpop.f32.mrb[62].mxu1 }
 0x18f   :  { %v692_v44 = vadd.f32 %v2052_v17, %v691_v42  ;;  %v820_v45 = vadd.f32 %v2052_v17, %v819_v43  ;;  %v693_v46 = vpop.f32.mrb[63].mxu0  ;;  %v821_v47 = vpop.f32.mrb[63].mxu1  ;;  %v853_v48 = vmax.f32 %v689_v38, 0.0  ;;  %v885_v49 = vmax.f32 %v817_v39, 0.0 }
 0x191   :  { %v854_v50 = vmax.f32 %v692_v44, 0.0  ;;  %v886_v51 = vmax.f32 %v820_v45, 0.0 }
 0x193   :  { %v1498_v52 = vpack.c.bf16 %v854_v50, %v853_v48  ;;  %v1578_v53 = vpack.c.bf16 %v886_v51, %v885_v49 }
 0x195   :  { %1594 = vst [vmem:[%s2217_s3 + $0x78] sm:$0xff] %v1498_v52   ;;  %1610 = vst [vmem:[%s2217_s3 + $0xf8] sm:$0xff] %v1578_v53  }

// kernel: _lambda_.44
= control target key start
LH: loop header
LB: loop body
LE: loop exit
PB: predicated region body
PF: predicated region fallthrough
CT: control target
= control target key end

     0   :  { %s618_s1 = inlined_call_operand.vmem [shape: bf16[128,128], index: 1, kind: input, shape index: {}]   ;;  %s619_s0 = inlined_call_operand.vmem [shape: bf16[128,128], index: 0, kind: input, shape index: {}]   ;;  %s620_s2 = inlined_call_operand.vmem [shape: f32[1,128], index: 2, kind: input, shape index: {}]   ;;  %s621_s3 = inlined_call_operand.vmem [shape: bf16[128,128], index: 3, kind: output, shape index: {}]  }
   0x1   :  { %v507_v0 = vld [vmem:[%s618_s1] sm:$0xff]   ;;  %v508_v1 = vld [vmem:[%s618_s1 + $0x8] sm:$0xff]   ;;  %v509_v2 = vld [vmem:[%s618_s1 + $0x10] sm:$0xff]  }
   0x2   :  { %459 = vmatprep.subr.bf16.mxu0 %v507_v0  ;;  %491 = vmatprep.subr.bf16.mxu1 %v507_v0  ;;  %v510_v3 = vld [vmem:[%s618_s1 + $0x18] sm:$0xff]   ;;  %v515_v4 = vld [vmem:[%s619_s0] sm:$0xff]   ;;  %v512_v7 = vld [vmem:[%s618_s1 + $0x28] sm:$0xff]  }
   0x3   :  { %460 = vmatpush3.bf16.msra.mxu0 %v507_v0  ;;  %499 = vmatpush3.bf16.msra.mxu1 %v507_v0  ;;  %v516_v5 = vld [vmem:[%s619_s0 + $0x20] sm:$0xff]   ;;  %v513_v8 = vld [vmem:[%s618_s1 + $0x30] sm:$0xff]   ;;  %v514_v9 = vld [vmem:[%s618_s1 + $0x38] sm:$0xff]  }
   0x4   :  { %461 = vmatprep.subr.bf16.mxu0 %v508_v1  ;;  %492 = vmatprep.subr.bf16.mxu1 %v508_v1  ;;  %v511_v6 = vld [vmem:[%s618_s1 + $0x20] sm:$0xff]   ;;  %v517_v10 = vld [vmem:[%s619_s0 + $0x8] sm:$0xff]   ;;  %v519_v12 = vld [vmem:[%s619_s0 + $0x10] sm:$0xff]  }
   0x5   :  { %475 = vmatprep.mubr.bf16.mxu0 %v515_v4  ;;  %483 = vmatprep.mubr.bf16.mxu1 %v516_v5  ;;  %v518_v11 = vld [vmem:[%s619_s0 + $0x28] sm:$0xff]   ;;  %v520_v13 = vld [vmem:[%s619_s0 + $0x30] sm:$0xff]   ;;  %v521_v14 = vld [vmem:[%s619_s0 + $0x18] sm:$0xff]  }
   0x6   :  { %v522_v15 = vld [vmem:[%s619_s0 + $0x38] sm:$0xff]   ;;  %v347_v16 = vld [vmem:[%s620_s2] ss:$0 sm:$0xff] }
   0x7   :  { %462 = vmatpush3.bf16.msra.mxu0 %v508_v1  ;;  %500 = vmatpush3.bf16.msra.mxu1 %v508_v1 }
   0x8   :  { %463 = vmatprep.subr.bf16.mxu0 %v509_v2  ;;  %493 = vmatprep.subr.bf16.mxu1 %v509_v2 }
   0xb   :  { %464 = vmatpush3.bf16.msra.mxu0 %v509_v2  ;;  %501 = vmatpush3.bf16.msra.mxu1 %v509_v2 }
   0xc   :  { %465 = vmatprep.subr.bf16.mxu0 %v510_v3  ;;  %494 = vmatprep.subr.bf16.mxu1 %v510_v3 }
   0xf   :  { %466 = vmatpush3.bf16.msra.mxu0 %v510_v3  ;;  %502 = vmatpush3.bf16.msra.mxu1 %v510_v3 }
  0x10   :  { %467 = vmatprep.subr.bf16.mxu0 %v511_v6  ;;  %495 = vmatprep.subr.bf16.mxu1 %v511_v6 }
  0x13   :  { %468 = vmatpush3.bf16.msra.mxu0 %v511_v6  ;;  %503 = vmatpush3.bf16.msra.mxu1 %v511_v6 }
  0x14   :  { %469 = vmatprep.subr.bf16.mxu0 %v512_v7  ;;  %496 = vmatprep.subr.bf16.mxu1 %v512_v7 }
  0x17   :  { %470 = vmatpush3.bf16.msra.mxu0 %v512_v7  ;;  %504 = vmatpush3.bf16.msra.mxu1 %v512_v7 }
  0x18   :  { %471 = vmatprep.subr.bf16.mxu0 %v513_v8  ;;  %497 = vmatprep.subr.bf16.mxu1 %v513_v8 }
  0x1b   :  { %472 = vmatpush3.bf16.msra.mxu0 %v513_v8  ;;  %505 = vmatpush3.bf16.msra.mxu1 %v513_v8 }
  0x1c   :  { %473 = vmatprep.subr.bf16.mxu0 %v514_v9  ;;  %498 = vmatprep.subr.bf16.mxu1 %v514_v9 }
  0x1f   :  { %474 = vmatpush3.bf16.msra.mxu0 %v514_v9  ;;  %506 = vmatpush3.bf16.msra.mxu1 %v514_v9 }
  0x22   :  { %476 = vmatmul.mubr.bf16.vlgmr.msra.gmra.mrb[0].mxu0 %v517_v10  ;;  %484 = vmatmul.mubr.bf16.vlgmr.msra.gmra.mrb[0].mxu1 %v518_v11 }
  0x23   :  { %479 = vmatprep.mubr.bf16.mxu0 %v519_v12  ;;  %487 = vmatprep.mubr.bf16.mxu1 %v520_v13 }
  0x2a   :  { %480 = vmatmul.mubr.bf16.gmra.mrb[4].mxu0 %v521_v14  ;;  %488 = vmatmul.mubr.bf16.gmra.mrb[4].mxu1 %v522_v15 }
  0xf5   :  { %v477_v17 = vpop.f32.mrb[0].mxu0  ;;  %v485_v18 = vpop.f32.mrb[0].mxu1 }
  0xf6   :  { %v193_v19 = vadd.f32 %v477_v17, %v347_v16  ;;  %v225_v20 = vadd.f32 %v485_v18, %v347_v16  ;;  %v184_v21 = vpop.f32.mrb[1].mxu0  ;;  %v216_v22 = vpop.f32.mrb[1].mxu1 }
  0xf7   :  { %v185_v23 = vadd.f32 %v347_v16, %v184_v21  ;;  %v217_v24 = vadd.f32 %v347_v16, %v216_v22  ;;  %v478_v25 = vpop.f32.mrb[2].mxu0  ;;  %v486_v26 = vpop.f32.mrb[2].mxu1 }
  0xf8   :  { %v196_v27 = vadd.f32 %v478_v25, %v347_v16  ;;  %v228_v28 = vadd.f32 %v486_v26, %v347_v16  ;;  %v187_v29 = vpop.f32.mrb[3].mxu0  ;;  %v219_v30 = vpop.f32.mrb[3].mxu1  ;;  %v249_v33 = vmax.f32 %v193_v19, 0.0  ;;  %v257_v34 = vmax.f32 %v225_v20, 0.0 }
  0xf9   :  { %v188_v31 = vadd.f32 %v347_v16, %v187_v29  ;;  %v220_v32 = vadd.f32 %v347_v16, %v219_v30  ;;  %v247_v37 = vmax.f32 %v185_v23, 0.0  ;;  %v255_v38 = vmax.f32 %v217_v24, 0.0 }
  0xfa   :  { %v250_v35 = vmax.f32 %v196_v27, 0.0  ;;  %v258_v36 = vmax.f32 %v228_v28, 0.0 }
  0xfb   :  { %v248_v39 = vmax.f32 %v188_v31, 0.0  ;;  %v256_v40 = vmax.f32 %v220_v32, 0.0 }
  0xfc   :  { %v404_v41 = vpack.c.bf16 %v250_v35, %v249_v33  ;;  %v424_v42 = vpack.c.bf16 %v258_v36, %v257_v34 }
  0xfd   :  { %v399_v43 = vpack.c.bf16 %v248_v39, %v247_v37  ;;  %v419_v44 = vpack.c.bf16 %v256_v40, %v255_v38  ;;  %v481_v45 = vpop.f32.mrb[4].mxu0  ;;  %v489_v46 = vpop.f32.mrb[4].mxu1 }
  0xfe   :  { %436 = vst [vmem:[%s621_s3 + $0x8] sm:$0xff] %v404_v41   ;;  %440 = vst [vmem:[%s621_s3 + $0x28] sm:$0xff] %v424_v42   ;;  %v209_v47 = vadd.f32 %v481_v45, %v347_v16  ;;  %v241_v48 = vadd.f32 %v489_v46, %v347_v16  ;;  %v200_v49 = vpop.f32.mrb[5].mxu0  ;;  %v232_v50 = vpop.f32.mrb[5].mxu1 }
  0xff   :  { %400 = vst [vmem:[%s621_s3] sm:$0xff] %v399_v43   ;;  %439 = vst [vmem:[%s621_s3 + $0x20] sm:$0xff] %v419_v44   ;;  %v201_v51 = vadd.f32 %v347_v16, %v200_v49  ;;  %v233_v52 = vadd.f32 %v347_v16, %v232_v50  ;;  %v482_v53 = vpop.f32.mrb[6].mxu0  ;;  %v490_v54 = vpop.f32.mrb[6].mxu1 }
 0x100   :  { %v212_v55 = vadd.f32 %v482_v53, %v347_v16  ;;  %v244_v56 = vadd.f32 %v490_v54, %v347_v16  ;;  %v203_v57 = vpop.f32.mrb[7].mxu0  ;;  %v235_v58 = vpop.f32.mrb[7].mxu1  ;;  %v253_v61 = vmax.f32 %v209_v47, 0.0  ;;  %v261_v62 = vmax.f32 %v241_v48, 0.0 }
 0x101   :  { %v204_v59 = vadd.f32 %v347_v16, %v203_v57  ;;  %v236_v60 = vadd.f32 %v347_v16, %v235_v58  ;;  %v251_v1 = vmax.f32 %v201_v51, 0.0  ;;  %v259_v2 = vmax.f32 %v233_v52, 0.0 }
 0x102   :  { %v254_v63 = vmax.f32 %v212_v55, 0.0  ;;  %v262_v0 = vmax.f32 %v244_v56, 0.0 }
 0x103   :  { %v252_v3 = vmax.f32 %v204_v59, 0.0  ;;  %v260_v4 = vmax.f32 %v236_v60, 0.0 }
 0x104   :  { %v414_v5 = vpack.c.bf16 %v254_v63, %v253_v61  ;;  %v434_v6 = vpack.c.bf16 %v262_v0, %v261_v62 }
 0x105   :  { %v409_v7 = vpack.c.bf16 %v252_v3, %v251_v1  ;;  %v429_v8 = vpack.c.bf16 %v260_v4, %v259_v2 }
 0x106   :  { %438 = vst [vmem:[%s621_s3 + $0x18] sm:$0xff] %v414_v5   ;;  %442 = vst [vmem:[%s621_s3 + $0x38] sm:$0xff] %v434_v6  }
 0x107   :  { %437 = vst [vmem:[%s621_s3 + $0x10] sm:$0xff] %v409_v7   ;;  %441 = vst [vmem:[%s621_s3 + $0x30] sm:$0xff] %v429_v8  }

// kernel: _lambda_.46
= control target key start
LH: loop header
LB: loop body
LE: loop exit
PB: predicated region body
PF: predicated region fallthrough
CT: control target
= control target key end

     0   :  { %v521_v1 = vmov 0   ;;  %v49_v25 = vlaneseq  ;;  %s709_s1 = inlined_call_operand.vmem [shape: bf16[128,256], index: 1, kind: input, shape index: {}]   ;;  %s710_s0 = inlined_call_operand.vmem [shape: bf16[128,128], index: 0, kind: input, shape index: {}]   ;;  %s711_s2 = inlined_call_operand.vmem [shape: f32[1,256], index: 2, kind: input, shape index: {}]   ;;  %s712_s3 = inlined_call_operand.vmem [shape: bf16[128,256], index: 3, kind: output, shape index: {}]  }
   0x1   :  { %v489_v0 = vld [vmem:[%s709_s1 + $0x4] ss:$8 sps:$4 sm:$0xff]   ;;  %219 = vmatprep.mubr.bf16.mxu0 %v521_v1  ;;  %259 = vmatprep.mubr.bf16.mxu1 %v521_v1  ;;  %v491_v2 = vld [vmem:[%s709_s1] ss:$8 sps:$4 sm:$0xff]   ;;  %v492_v3 = vld [vmem:[%s709_s1 + $0x14] ss:$8 sps:$4 sm:$0xff]  }
   0x2   :  { %187 = vmatprep.subr.bf16.mxu0 %v489_v0  ;;  %472 = vmatprep.subr.bf16.mxu1 %v489_v0  ;;  %v494_v4 = vld [vmem:[%s709_s1 + $0x10] ss:$8 sps:$4 sm:$0xff]   ;;  %v495_v5 = vld [vmem:[%s709_s1 + $0x24] ss:$8 sps:$4 sm:$0xff]   ;;  %v497_v6 = vld [vmem:[%s709_s1 + $0x20] ss:$8 sps:$4 sm:$0xff]  }
   0x3   :  { %188 = vmatpush1.bf16.msra.mxu0 %v491_v2  ;;  %480 = vmatpush1.bf16.msra.mxu1 %v491_v2  ;;  %v498_v7 = vld [vmem:[%s709_s1 + $0x34] ss:$8 sps:$4 sm:$0xff]   ;;  %v500_v8 = vld [vmem:[%s709_s1 + $0x30] ss:$8 sps:$4 sm:$0xff]   ;;  %v501_v9 = vld [vmem:[%s709_s1 + $0x44] ss:$8 sps:$4 sm:$0xff]  }
   0x4   :  { %189 = vmatprep.subr.bf16.mxu0 %v492_v3  ;;  %473 = vmatprep.subr.bf16.mxu1 %v492_v3  ;;  %v503_v10 = vld [vmem:[%s709_s1 + $0x40] ss:$8 sps:$4 sm:$0xff]   ;;  %v504_v11 = vld [vmem:[%s709_s1 + $0x54] ss:$8 sps:$4 sm:$0xff]   ;;  %v506_v12 = vld [vmem:[%s709_s1 + $0x50] ss:$8 sps:$4 sm:$0xff]  }
   0x5   :  { %v507_v13 = vld [vmem:[%s709_s1 + $0x64] ss:$8 sps:$4 sm:$0xff]   ;;  %v509_v14 = vld [vmem:[%s709_s1 + $0x60] ss:$8 sps:$4 sm:$0xff]   ;;  %v510_v15 = vld [vmem:[%s709_s1 + $0x74] ss:$8 sps:$4 sm:$0xff]  }
   0x6   :  { %v512_v16 = vld [vmem:[%s709_s1 + $0x70] ss:$8 sps:$4 sm:$0xff]   ;;  %v513_v17 = vld [vmem:[%s710_s0] sm:$0xff]   ;;  %v515_v19 = vld [vmem:[%s710_s0 + $0x8] sm:$0xff]   ;;  %v50_v26 = vshrl.u32 %v49_v25, 7 }
   0x7   :  { %190 = vmatpush1.bf16.msra.mxu0 %v494_v4  ;;  %481 = vmatpush1.bf16.msra.mxu1 %v494_v4  ;;  %v514_v18 = vld [vmem:[%s710_s0 + $0x20] sm:$0xff]   ;;  %v516_v20 = vld [vmem:[%s710_s0 + $0x28] sm:$0xff]   ;;  %v517_v21 = vld [vmem:[%s710_s0 + $0x10] sm:$0xff]  }
   0x8   :  { %191 = vmatprep.subr.bf16.mxu0 %v495_v5  ;;  %474 = vmatprep.subr.bf16.mxu1 %v495_v5  ;;  %v518_v22 = vld [vmem:[%s710_s0 + $0x30] sm:$0xff]   ;;  %v519_v23 = vld [vmem:[%s710_s0 + $0x18] sm:$0xff]   ;;  %v51_v27 = vsub.s32 0, %v50_v26  ;;  %v47_v28 = vld [vmem:[%s711_s2] sm:$0x3]  ;;  %v55_v29 = vsub.s32 1, %v50_v26 }
   0x9   :  { %v520_v24 = vld [vmem:[%s710_s0 + $0x38] sm:$0xff]  }
   0xa   :  { %v625_v30 = vrot.slane %v47_v28, %v51_v27  ;;  %v627_v31 = vrot.slane %v47_v28, %v55_v29 }
   0xb   :  { %192 = vmatpush1.bf16.msra.mxu0 %v497_v6  ;;  %482 = vmatpush1.bf16.msra.mxu1 %v497_v6 }
   0xc   :  { %193 = vmatprep.subr.bf16.mxu0 %v498_v7  ;;  %475 = vmatprep.subr.bf16.mxu1 %v498_v7 }
   0xf   :  { %194 = vmatpush1.bf16.msra.mxu0 %v500_v8  ;;  %483 = vmatpush1.bf16.msra.mxu1 %v500_v8 }
  0x10   :  { %195 = vmatprep.subr.bf16.mxu0 %v501_v9  ;;  %476 = vmatprep.subr.bf16.mxu1 %v501_v9 }
  0x13   :  { %196 = vmatpush1.bf16.msra.mxu0 %v503_v10  ;;  %484 = vmatpush1.bf16.msra.mxu1 %v503_v10 }
  0x14   :  { %197 = vmatprep.subr.bf16.mxu0 %v504_v11  ;;  %477 = vmatprep.subr.bf16.mxu1 %v504_v11 }
  0x17   :  { %198 = vmatpush1.bf16.msra.mxu0 %v506_v12  ;;  %485 = vmatpush1.bf16.msra.mxu1 %v506_v12 }
  0x18   :  { %199 = vmatprep.subr.bf16.mxu0 %v507_v13  ;;  %478 = vmatprep.subr.bf16.mxu1 %v507_v13 }
  0x1b   :  { %200 = vmatpush1.bf16.msra.mxu0 %v509_v14  ;;  %486 = vmatpush1.bf16.msra.mxu1 %v509_v14 }
  0x1c   :  { %201 = vmatprep.subr.bf16.mxu0 %v510_v15  ;;  %479 = vmatprep.subr.bf16.mxu1 %v510_v15 }
  0x1f   :  { %202 = vmatpush1.bf16.msra.mxu0 %v512_v16  ;;  %487 = vmatpush1.bf16.msra.mxu1 %v512_v16 }
  0x22   :  { %220 = vmatmul.mubr.bf16.vlgmr.msra.gmra.mrb[0].mxu0 %v513_v17  ;;  %260 = vmatmul.mubr.bf16.vlgmr.msra.gmra.mrb[0].mxu1 %v514_v18 }
  0x23   :  { %229 = vmatprep.mubr.bf16.mxu0 %v521_v1  ;;  %269 = vmatprep.mubr.bf16.mxu1 %v521_v1 }
  0x2a   :  { %230 = vmatmul.mubr.bf16.gmra.mrb[4].mxu0 %v515_v19  ;;  %270 = vmatmul.mubr.bf16.gmra.mrb[4].mxu1 %v516_v20 }
  0x2b   :  { %239 = vmatprep.mubr.bf16.mxu0 %v521_v1  ;;  %279 = vmatprep.mubr.bf16.mxu1 %v521_v1 }
  0x32   :  { %240 = vmatmul.mubr.bf16.gmra.mrb[8].mxu0 %v517_v21  ;;  %280 = vmatmul.mubr.bf16.gmra.mrb[8].mxu1 %v518_v22 }
  0x33   :  { %249 = vmatprep.mubr.bf16.mxu0 %v521_v1  ;;  %289 = vmatprep.mubr.bf16.mxu1 %v521_v1 }
  0x3a   :  { %250 = vmatmul.mubr.bf16.gmra.mrb[12].mxu0 %v519_v23  ;;  %290 = vmatmul.mubr.bf16.gmra.mrb[12].mxu1 %v520_v24 }
  0xf5   :  { %v221_v32 = vpop.f32.mrb[0].mxu0  ;;  %v261_v33 = vpop.f32.mrb[0].mxu1 }
  0xf6   :  { %v222_v34 = vadd.f32 %v221_v32, %v625_v30  ;;  %v262_v35 = vadd.f32 %v261_v33, %v625_v30  ;;  %v223_v36 = vpop.f32.mrb[1].mxu0  ;;  %v263_v37 = vpop.f32.mrb[1].mxu1 }
  0xf7   :  { %v224_v38 = vadd.f32 %v223_v36, %v627_v31  ;;  %v264_v39 = vadd.f32 %v263_v37, %v627_v31  ;;  %v225_v40 = vpop.f32.mrb[2].mxu0  ;;  %v265_v41 = vpop.f32.mrb[2].mxu1 }
  0xf8   :  { %v226_v42 = vadd.f32 %v225_v40, %v625_v30  ;;  %v266_v43 = vadd.f32 %v265_v41, %v625_v30  ;;  %v227_v44 = vpop.f32.mrb[3].mxu0  ;;  %v267_v45 = vpop.f32.mrb[3].mxu1 }
  0xf9   :  { %v456_v46 = vpack.c.bf16 %v224_v38, %v222_v34  ;;  %v464_v47 = vpack.c.bf16 %v264_v39, %v262_v35  ;;  %v228_v48 = vadd.f32 %v227_v44, %v627_v31  ;;  %v268_v49 = vadd.f32 %v267_v45, %v627_v31 }
  0xfb   :  { %396 = vst [vmem:[%s712_s3] sm:$0xff] %v456_v46  ;;  %404 = vst [vmem:[%s712_s3 + $0x40] sm:$0xff] %v464_v47  ;;  %v457_v50 = vpack.c.bf16 %v228_v48, %v226_v42  ;;  %v465_v51 = vpack.c.bf16 %v268_v49, %v266_v43 }
  0xfd   :  { %397 = vst [vmem:[%s712_s3 + $0x8] sm:$0xff] %v457_v50  ;;  %405 = vst [vmem:[%s712_s3 + $0x48] sm:$0xff] %v465_v51  ;;  %v231_v52 = vpop.f32.mrb[4].mxu0  ;;  %v271_v53 = vpop.f32.mrb[4].mxu1 }
  0xfe   :  { %v232_v54 = vadd.f32 %v231_v52, %v625_v30  ;;  %v272_v55 = vadd.f32 %v271_v53, %v625_v30  ;;  %v233_v56 = vpop.f32.mrb[5].mxu0  ;;  %v273_v57 = vpop.f32.mrb[5].mxu1 }
  0xff   :  { %v234_v58 = vadd.f32 %v233_v56, %v627_v31  ;;  %v274_v59 = vadd.f32 %v273_v57, %v627_v31  ;;  %v235_v60 = vpop.f32.mrb[6].mxu0  ;;  %v275_v61 = vpop.f32.mrb[6].mxu1 }
 0x100   :  { %v236_v62 = vadd.f32 %v235_v60, %v625_v30  ;;  %v276_v63 = vadd.f32 %v275_v61, %v625_v30  ;;  %v237_v0 = vpop.f32.mrb[7].mxu0  ;;  %v277_v1 = vpop.f32.mrb[7].mxu1 }
 0x101   :  { %v458_v2 = vpack.c.bf16 %v234_v58, %v232_v54  ;;  %v466_v3 = vpack.c.bf16 %v274_v59, %v272_v55  ;;  %v238_v4 = vadd.f32 %v237_v0, %v627_v31  ;;  %v278_v5 = vadd.f32 %v277_v1, %v627_v31 }
 0x103   :  { %398 = vst [vmem:[%s712_s3 + $0x10] sm:$0xff] %v458_v2  ;;  %406 = vst [vmem:[%s712_s3 + $0x50] sm:$0xff] %v466_v3  ;;  %v459_v6 = vpack.c.bf16 %v238_v4, %v236_v62  ;;  %v467_v7 = vpack.c.bf16 %v278_v5, %v276_v63 }
 0x105   :  { %399 = vst [vmem:[%s712_s3 + $0x18] sm:$0xff] %v459_v6  ;;  %407 = vst [vmem:[%s712_s3 + $0x58] sm:$0xff] %v467_v7  ;;  %v241_v8 = vpop.f32.mrb[8].mxu0  ;;  %v281_v9 = vpop.f32.mrb[8].mxu1 }
 0x106   :  { %v242_v10 = vadd.f32 %v241_v8, %v625_v30  ;;  %v282_v11 = vadd.f32 %v281_v9, %v625_v30  ;;  %v243_v12 = vpop.f32.mrb[9].mxu0  ;;  %v283_v13 = vpop.f32.mrb[9].mxu1 }
 0x107   :  { %v244_v14 = vadd.f32 %v243_v12, %v627_v31  ;;  %v284_v15 = vadd.f32 %v283_v13, %v627_v31  ;;  %v245_v16 = vpop.f32.mrb[10].mxu0  ;;  %v285_v17 = vpop.f32.mrb[10].mxu1 }
 0x108   :  { %v246_v18 = vadd.f32 %v245_v16, %v625_v30  ;;  %v286_v19 = vadd.f32 %v285_v17, %v625_v30  ;;  %v247_v20 = vpop.f32.mrb[11].mxu0  ;;  %v287_v21 = vpop.f32.mrb[11].mxu1 }
 0x109   :  { %v460_v22 = vpack.c.bf16 %v244_v14, %v242_v10  ;;  %v468_v23 = vpack.c.bf16 %v284_v15, %v282_v11  ;;  %v248_v24 = vadd.f32 %v247_v20, %v627_v31  ;;  %v288_v25 = vadd.f32 %v287_v21, %v627_v31 }
 0x10b   :  { %400 = vst [vmem:[%s712_s3 + $0x20] sm:$0xff] %v460_v22  ;;  %408 = vst [vmem:[%s712_s3 + $0x60] sm:$0xff] %v468_v23  ;;  %v461_v26 = vpack.c.bf16 %v248_v24, %v246_v18  ;;  %v469_v27 = vpack.c.bf16 %v288_v25, %v286_v19 }
 0x10d   :  { %401 = vst [vmem:[%s712_s3 + $0x28] sm:$0xff] %v461_v26  ;;  %409 = vst [vmem:[%s712_s3 + $0x68] sm:$0xff] %v469_v27  ;;  %v251_v28 = vpop.f32.mrb[12].mxu0  ;;  %v291_v29 = vpop.f32.mrb[12].mxu1 }
 0x10e   :  { %v252_v32 = vadd.f32 %v251_v28, %v625_v30  ;;  %v292_v33 = vadd.f32 %v291_v29, %v625_v30  ;;  %v253_v34 = vpop.f32.mrb[13].mxu0  ;;  %v293_v35 = vpop.f32.mrb[13].mxu1 }
 0x10f   :  { %v254_v36 = vadd.f32 %v253_v34, %v627_v31  ;;  %v294_v37 = vadd.f32 %v293_v35, %v627_v31  ;;  %v255_v38 = vpop.f32.mrb[14].mxu0  ;;  %v295_v39 = vpop.f32.mrb[14].mxu1 }
 0x110   :  { %v256_v40 = vadd.f32 %v255_v38, %v625_v30  ;;  %v296_v41 = vadd.f32 %v295_v39, %v625_v30  ;;  %v257_v42 = vpop.f32.mrb[15].mxu0  ;;  %v297_v43 = vpop.f32.mrb[15].mxu1 }
 0x111   :  { %v462_v44 = vpack.c.bf16 %v254_v36, %v252_v32  ;;  %v470_v45 = vpack.c.bf16 %v294_v37, %v292_v33  ;;  %v258_v46 = vadd.f32 %v257_v42, %v627_v31  ;;  %v298_v47 = vadd.f32 %v297_v43, %v627_v31 }
 0x113   :  { %402 = vst [vmem:[%s712_s3 + $0x30] sm:$0xff] %v462_v44  ;;  %410 = vst [vmem:[%s712_s3 + $0x70] sm:$0xff] %v470_v45  ;;  %v463_v48 = vpack.c.bf16 %v258_v46, %v256_v40  ;;  %v471_v49 = vpack.c.bf16 %v298_v47, %v296_v41 }
 0x115   :  { %403 = vst [vmem:[%s712_s3 + $0x38] sm:$0xff] %v463_v48  ;;  %411 = vst [vmem:[%s712_s3 + $0x78] sm:$0xff] %v471_v49 }

// kernel: _lambda_.47
= control target key start
LH: loop header
LB: loop body
LE: loop exit
PB: predicated region body
PF: predicated region fallthrough
CT: control target
= control target key end

     0   :  { %v636_v1 = vmov 0   ;;  %v52_v25 = vlaneseq  ;;  %s957_s1 = inlined_call_operand.vmem [shape: bf16[128,256], index: 1, kind: input, shape index: {}]   ;;  %s958_s0 = inlined_call_operand.vmem [shape: bf16[128,128], index: 0, kind: input, shape index: {}]   ;;  %s959_s2 = inlined_call_operand.vmem [shape: f32[1,256], index: 2, kind: input, shape index: {}]   ;;  %s960_s3 = inlined_call_operand.vmem [shape: bf16[128,256], index: 3, kind: input, shape index: {}]   ;;  %s961_s4 = inlined_call_operand.vmem [shape: bf16[128,256], index: 4, kind: output, shape index: {}]  }
   0x1   :  { %v604_v0 = vld [vmem:[%s957_s1 + $0x4] ss:$8 sps:$4 sm:$0xff]   ;;  %222 = vmatprep.mubr.bf16.mxu0 %v636_v1  ;;  %262 = vmatprep.mubr.bf16.mxu1 %v636_v1  ;;  %v606_v2 = vld [vmem:[%s957_s1] ss:$8 sps:$4 sm:$0xff]   ;;  %v607_v3 = vld [vmem:[%s957_s1 + $0x14] ss:$8 sps:$4 sm:$0xff]  }
   0x2   :  { %190 = vmatprep.subr.bf16.mxu0 %v604_v0  ;;  %587 = vmatprep.subr.bf16.mxu1 %v604_v0  ;;  %v609_v4 = vld [vmem:[%s957_s1 + $0x10] ss:$8 sps:$4 sm:$0xff]   ;;  %v610_v5 = vld [vmem:[%s957_s1 + $0x24] ss:$8 sps:$4 sm:$0xff]   ;;  %v612_v6 = vld [vmem:[%s957_s1 + $0x20] ss:$8 sps:$4 sm:$0xff]  }
   0x3   :  { %191 = vmatpush1.bf16.msra.mxu0 %v606_v2  ;;  %595 = vmatpush1.bf16.msra.mxu1 %v606_v2  ;;  %v613_v7 = vld [vmem:[%s957_s1 + $0x34] ss:$8 sps:$4 sm:$0xff]   ;;  %v615_v8 = vld [vmem:[%s957_s1 + $0x30] ss:$8 sps:$4 sm:$0xff]   ;;  %v616_v9 = vld [vmem:[%s957_s1 + $0x44] ss:$8 sps:$4 sm:$0xff]  }
   0x4   :  { %192 = vmatprep.subr.bf16.mxu0 %v607_v3  ;;  %588 = vmatprep.subr.bf16.mxu1 %v607_v3  ;;  %v618_v10 = vld [vmem:[%s957_s1 + $0x40] ss:$8 sps:$4 sm:$0xff]   ;;  %v619_v11 = vld [vmem:[%s957_s1 + $0x54] ss:$8 sps:$4 sm:$0xff]   ;;  %v621_v12 = vld [vmem:[%s957_s1 + $0x50] ss:$8 sps:$4 sm:$0xff]  }
   0x5   :  { %v622_v13 = vld [vmem:[%s957_s1 + $0x64] ss:$8 sps:$4 sm:$0xff]   ;;  %v624_v14 = vld [vmem:[%s957_s1 + $0x60] ss:$8 sps:$4 sm:$0xff]   ;;  %v625_v15 = vld [vmem:[%s957_s1 + $0x74] ss:$8 sps:$4 sm:$0xff]  }
   0x6   :  { %v627_v16 = vld [vmem:[%s957_s1 + $0x70] ss:$8 sps:$4 sm:$0xff]   ;;  %v628_v17 = vld [vmem:[%s958_s0] sm:$0xff]   ;;  %v630_v19 = vld [vmem:[%s958_s0 + $0x8] sm:$0xff]   ;;  %v53_v26 = vshrl.u32 %v52_v25, 7 }
   0x7   :  { %193 = vmatpush1.bf16.msra.mxu0 %v609_v4  ;;  %596 = vmatpush1.bf16.msra.mxu1 %v609_v4  ;;  %v629_v18 = vld [vmem:[%s958_s0 + $0x20] sm:$0xff]   ;;  %v631_v20 = vld [vmem:[%s958_s0 + $0x28] sm:$0xff]   ;;  %v632_v21 = vld [vmem:[%s958_s0 + $0x10] sm:$0xff]  }
   0x8   :  { %194 = vmatprep.subr.bf16.mxu0 %v610_v5  ;;  %589 = vmatprep.subr.bf16.mxu1 %v610_v5  ;;  %v633_v22 = vld [vmem:[%s958_s0 + $0x30] sm:$0xff]   ;;  %v634_v23 = vld [vmem:[%s958_s0 + $0x18] sm:$0xff]   ;;  %v54_v27 = vsub.s32 0, %v53_v26  ;;  %v58_v28 = vsub.s32 1, %v53_v26  ;;  %v50_v29 = vld [vmem:[%s959_s2] sm:$0x3] }
   0x9   :  { %v635_v24 = vld [vmem:[%s958_s0 + $0x38] sm:$0xff]   ;;  %v303_v30 = vld [vmem:[%s960_s3] sm:$0xff]  ;;  %v304_v32 = vld [vmem:[%s960_s3 + $0x8] sm:$0xff] }
   0xa   :  { %v311_v31 = vld [vmem:[%s960_s3 + $0x40] sm:$0xff]  ;;  %v312_v33 = vld [vmem:[%s960_s3 + $0x48] sm:$0xff]  ;;  %v757_v34 = vrot.slane %v50_v29, %v54_v27  ;;  %v759_v35 = vrot.slane %v50_v29, %v58_v28  ;;  %v764_v36 = vld [vmem:[%s960_s3 + $0x10] sm:$0xff]  ;;  %v319_v38 = vunpack.c.l.bf16 %v303_v30  ;;  %v320_v40 = vunpack.c.h.bf16 %v303_v30 }
   0xb   :  { %195 = vmatpush1.bf16.msra.mxu0 %v612_v6  ;;  %597 = vmatpush1.bf16.msra.mxu1 %v612_v6  ;;  %v769_v37 = vld [vmem:[%s960_s3 + $0x50] sm:$0xff]  ;;  %v335_v39 = vunpack.c.l.bf16 %v311_v31  ;;  %v336_v41 = vunpack.c.h.bf16 %v311_v31  ;;  %v774_v42 = vld [vmem:[%s960_s3 + $0x18] sm:$0xff]  ;;  %v321_v44 = vunpack.c.l.bf16 %v304_v32  ;;  %v337_v45 = vunpack.c.l.bf16 %v312_v33  ;;  %v784_v48 = vld [vmem:[%s960_s3 + $0x20] sm:$0xff] }
   0xc   :  { %196 = vmatprep.subr.bf16.mxu0 %v613_v7  ;;  %590 = vmatprep.subr.bf16.mxu1 %v613_v7  ;;  %v779_v43 = vld [vmem:[%s960_s3 + $0x58] sm:$0xff]  ;;  %v322_v46 = vunpack.c.h.bf16 %v304_v32  ;;  %v338_v47 = vunpack.c.h.bf16 %v312_v33  ;;  %v789_v49 = vld [vmem:[%s960_s3 + $0x60] sm:$0xff]  ;;  %v323_v50 = vunpack.c.l.bf16 %v764_v36  ;;  %v339_v51 = vunpack.c.l.bf16 %v769_v37 }
   0xd   :  { %v324_v52 = vunpack.c.h.bf16 %v764_v36  ;;  %v340_v53 = vunpack.c.h.bf16 %v769_v37  ;;  %v325_v56 = vunpack.c.l.bf16 %v774_v42  ;;  %v341_v57 = vunpack.c.l.bf16 %v779_v43 }
   0xe   :  { %v326_v58 = vunpack.c.h.bf16 %v774_v42  ;;  %v342_v59 = vunpack.c.h.bf16 %v779_v43  ;;  %v327_v0 = vunpack.c.l.bf16 %v784_v48  ;;  %v328_v6 = vunpack.c.h.bf16 %v784_v48 }
   0xf   :  { %197 = vmatpush1.bf16.msra.mxu0 %v615_v8  ;;  %598 = vmatpush1.bf16.msra.mxu1 %v615_v8  ;;  %v344_v7 = vunpack.c.h.bf16 %v789_v49 }
  0x10   :  { %198 = vmatprep.subr.bf16.mxu0 %v616_v9  ;;  %591 = vmatprep.subr.bf16.mxu1 %v616_v9 }
  0x13   :  { %199 = vmatpush1.bf16.msra.mxu0 %v618_v10  ;;  %599 = vmatpush1.bf16.msra.mxu1 %v618_v10 }
  0x14   :  { %200 = vmatprep.subr.bf16.mxu0 %v619_v11  ;;  %592 = vmatprep.subr.bf16.mxu1 %v619_v11 }
  0x17   :  { %201 = vmatpush1.bf16.msra.mxu0 %v621_v12  ;;  %600 = vmatpush1.bf16.msra.mxu1 %v621_v12 }
  0x18   :  { %202 = vmatprep.subr.bf16.mxu0 %v622_v13  ;;  %593 = vmatprep.subr.bf16.mxu1 %v622_v13 }
  0x1b   :  { %203 = vmatpush1.bf16.msra.mxu0 %v624_v14  ;;  %601 = vmatpush1.bf16.msra.mxu1 %v624_v14 }
  0x1c   :  { %204 = vmatprep.subr.bf16.mxu0 %v625_v15  ;;  %594 = vmatprep.subr.bf16.mxu1 %v625_v15 }
  0x1f   :  { %205 = vmatpush1.bf16.msra.mxu0 %v627_v16  ;;  %602 = vmatpush1.bf16.msra.mxu1 %v627_v16 }
  0x22   :  { %223 = vmatmul.mubr.bf16.vlgmr.msra.gmra.mrb[0].mxu0 %v628_v17  ;;  %263 = vmatmul.mubr.bf16.vlgmr.msra.gmra.mrb[0].mxu1 %v629_v18  ;;  %v814_v18 = vld [vmem:[%s960_s3 + $0x28] sm:$0xff] }
  0x23   :  { %232 = vmatprep.mubr.bf16.mxu0 %v636_v1  ;;  %272 = vmatprep.mubr.bf16.mxu1 %v636_v1  ;;  %v329_v30 = vunpack.c.l.bf16 %v814_v18 }
  0x2a   :  { %233 = vmatmul.mubr.bf16.gmra.mrb[4].mxu0 %v630_v19  ;;  %273 = vmatmul.mubr.bf16.gmra.mrb[4].mxu1 %v631_v20  ;;  %v819_v19 = vld [vmem:[%s960_s3 + $0x68] sm:$0xff] }
  0x2b   :  { %242 = vmatprep.mubr.bf16.mxu0 %v636_v1  ;;  %282 = vmatprep.mubr.bf16.mxu1 %v636_v1  ;;  %v345_v31 = vunpack.c.l.bf16 %v819_v19 }
  0x32   :  { %243 = vmatmul.mubr.bf16.gmra.mrb[8].mxu0 %v632_v21  ;;  %283 = vmatmul.mubr.bf16.gmra.mrb[8].mxu1 %v633_v22 }
  0x33   :  { %252 = vmatprep.mubr.bf16.mxu0 %v636_v1  ;;  %292 = vmatprep.mubr.bf16.mxu1 %v636_v1  ;;  %v343_v1 = vunpack.c.l.bf16 %v789_v49 }
  0x3a   :  { %253 = vmatmul.mubr.bf16.gmra.mrb[12].mxu0 %v634_v23  ;;  %293 = vmatmul.mubr.bf16.gmra.mrb[12].mxu1 %v635_v24 }
  0xf5   :  { %v224_v54 = vpop.f32.mrb[0].mxu0  ;;  %v264_v55 = vpop.f32.mrb[0].mxu1 }
  0xf6   :  { %v225_v60 = vadd.f32 %v224_v54, %v757_v34  ;;  %v265_v61 = vadd.f32 %v264_v55, %v757_v34  ;;  %v226_v62 = vpop.f32.mrb[1].mxu0  ;;  %v266_v63 = vpop.f32.mrb[1].mxu1 }
  0xf7   :  { %v227_v2 = vadd.f32 %v226_v62, %v759_v35  ;;  %v267_v3 = vadd.f32 %v266_v63, %v759_v35  ;;  %v228_v4 = vpop.f32.mrb[2].mxu0  ;;  %v268_v5 = vpop.f32.mrb[2].mxu1 }
  0xf8   :  { %v351_v8 = vadd.f32 %v319_v38, %v225_v60  ;;  %v367_v9 = vadd.f32 %v335_v39, %v265_v61  ;;  %v229_v10 = vadd.f32 %v228_v4, %v757_v34  ;;  %v269_v11 = vadd.f32 %v268_v5, %v757_v34  ;;  %v230_v12 = vpop.f32.mrb[3].mxu0  ;;  %v270_v13 = vpop.f32.mrb[3].mxu1 }
  0xf9   :  { %v352_v14 = vadd.f32 %v320_v40, %v227_v2  ;;  %v368_v15 = vadd.f32 %v336_v41, %v267_v3  ;;  %v231_v16 = vadd.f32 %v230_v12, %v759_v35  ;;  %v271_v17 = vadd.f32 %v270_v13, %v759_v35 }
  0xfa   :  { %v383_v20 = vmax.f32 %v351_v8, 0.0  ;;  %v399_v21 = vmax.f32 %v367_v9, 0.0  ;;  %v353_v22 = vadd.f32 %v321_v44, %v229_v10  ;;  %v369_v23 = vadd.f32 %v337_v45, %v269_v11 }
  0xfb   :  { %v384_v24 = vmax.f32 %v352_v14, 0.0  ;;  %v400_v25 = vmax.f32 %v368_v15, 0.0  ;;  %v354_v26 = vadd.f32 %v322_v46, %v231_v16  ;;  %v370_v27 = vadd.f32 %v338_v47, %v271_v17  ;;  %v856_v14 = vld [vmem:[%s960_s3 + $0x30] sm:$0xff] }
  0xfc   :  { %v385_v28 = vmax.f32 %v353_v22, 0.0  ;;  %v401_v29 = vmax.f32 %v369_v23, 0.0  ;;  %v330_v46 = vunpack.c.h.bf16 %v814_v18  ;;  %v346_v47 = vunpack.c.h.bf16 %v819_v19  ;;  %v861_v15 = vld [vmem:[%s960_s3 + $0x70] sm:$0xff] }
  0xfd   :  { %v571_v32 = vpack.c.bf16 %v384_v24, %v383_v20  ;;  %v579_v33 = vpack.c.bf16 %v400_v25, %v399_v21  ;;  %v386_v38 = vmax.f32 %v354_v26, 0.0  ;;  %v402_v39 = vmax.f32 %v370_v27, 0.0  ;;  %v234_v40 = vpop.f32.mrb[4].mxu0  ;;  %v274_v41 = vpop.f32.mrb[4].mxu1 }
  0xfe   :  { %v235_v54 = vadd.f32 %v234_v40, %v757_v34  ;;  %v275_v44 = vadd.f32 %v274_v41, %v757_v34  ;;  %v236_v45 = vpop.f32.mrb[5].mxu0  ;;  %v276_v55 = vpop.f32.mrb[5].mxu1  ;;  %v331_v24 = vunpack.c.l.bf16 %v856_v14  ;;  %v347_v25 = vunpack.c.l.bf16 %v861_v15 }
  0xff   :  { %511 = vst [vmem:[%s961_s4] sm:$0xff] %v571_v32  ;;  %519 = vst [vmem:[%s961_s4 + $0x40] sm:$0xff] %v579_v33  ;;  %v572_v60 = vpack.c.bf16 %v386_v38, %v385_v28  ;;  %v580_v61 = vpack.c.bf16 %v402_v39, %v401_v29  ;;  %v237_v62 = vadd.f32 %v236_v45, %v759_v35  ;;  %v238_v2 = vpop.f32.mrb[6].mxu0  ;;  %v278_v3 = vpop.f32.mrb[6].mxu1  ;;  %v332_v43 = vunpack.c.h.bf16 %v856_v14 }
 0x100   :  { %v277_v63 = vadd.f32 %v276_v55, %v759_v35  ;;  %v355_v4 = vadd.f32 %v323_v50, %v235_v54  ;;  %v371_v5 = vadd.f32 %v339_v51, %v275_v44  ;;  %v239_v8 = vadd.f32 %v238_v2, %v757_v34  ;;  %v240_v10 = vpop.f32.mrb[7].mxu0  ;;  %v280_v11 = vpop.f32.mrb[7].mxu1 }
 0x101   :  { %v279_v9 = vadd.f32 %v278_v3, %v757_v34  ;;  %512 = vst [vmem:[%s961_s4 + $0x8] sm:$0xff] %v572_v60  ;;  %520 = vst [vmem:[%s961_s4 + $0x48] sm:$0xff] %v580_v61  ;;  %v356_v50 = vadd.f32 %v324_v52, %v237_v62  ;;  %v241_v12 = vadd.f32 %v240_v10, %v759_v35 }
 0x102   :  { %v372_v51 = vadd.f32 %v340_v53, %v277_v63  ;;  %v281_v13 = vadd.f32 %v280_v11, %v759_v35  ;;  %v387_v16 = vmax.f32 %v355_v4, 0.0  ;;  %v403_v36 = vmax.f32 %v371_v5, 0.0  ;;  %v310_v4 = vld [vmem:[%s960_s3 + $0x38] sm:$0xff] }
 0x103   :  { %v357_v37 = vadd.f32 %v325_v56, %v239_v8  ;;  %v373_v52 = vadd.f32 %v341_v57, %v279_v9  ;;  %v388_v53 = vmax.f32 %v356_v50, 0.0  ;;  %v358_v20 = vadd.f32 %v326_v58, %v241_v12  ;;  %v318_v5 = vld [vmem:[%s960_s3 + $0x78] sm:$0xff] }
 0x104   :  { %v404_v17 = vmax.f32 %v372_v51, 0.0  ;;  %v374_v21 = vadd.f32 %v342_v59, %v281_v13  ;;  %v348_v59 = vunpack.c.h.bf16 %v861_v15  ;;  %v333_v12 = vunpack.c.l.bf16 %v310_v4 }
 0x105   :  { %v389_v22 = vmax.f32 %v357_v37, 0.0  ;;  %v405_v23 = vmax.f32 %v373_v52, 0.0  ;;  %v573_v26 = vpack.c.bf16 %v388_v53, %v387_v16  ;;  %v390_v56 = vmax.f32 %v358_v20, 0.0  ;;  %v244_v29 = vpop.f32.mrb[8].mxu0  ;;  %v284_v57 = vpop.f32.mrb[8].mxu1 }
 0x106   :  { %v581_v27 = vpack.c.bf16 %v404_v17, %v403_v36  ;;  %v406_v28 = vmax.f32 %v374_v21, 0.0  ;;  %v245_v32 = vadd.f32 %v244_v29, %v757_v34  ;;  %v285_v42 = vadd.f32 %v284_v57, %v757_v34  ;;  %v246_v58 = vpop.f32.mrb[9].mxu0  ;;  %v286_v33 = vpop.f32.mrb[9].mxu1 }
 0x107   :  { %513 = vst [vmem:[%s961_s4 + $0x10] sm:$0xff] %v573_v26  ;;  %v574_v38 = vpack.c.bf16 %v390_v56, %v389_v22  ;;  %v247_v40 = vadd.f32 %v246_v58, %v759_v35  ;;  %v287_v41 = vadd.f32 %v286_v33, %v759_v35  ;;  %v248_v54 = vpop.f32.mrb[10].mxu0  ;;  %v288_v44 = vpop.f32.mrb[10].mxu1  ;;  %v349_v13 = vunpack.c.l.bf16 %v318_v5 }
 0x108   :  { %521 = vst [vmem:[%s961_s4 + $0x50] sm:$0xff] %v581_v27  ;;  %v582_v39 = vpack.c.bf16 %v406_v28, %v405_v23  ;;  %v359_v45 = vadd.f32 %v327_v0, %v245_v32  ;;  %v375_v55 = vadd.f32 %v343_v1, %v285_v42  ;;  %v249_v60 = vadd.f32 %v248_v54, %v757_v34  ;;  %v250_v62 = vpop.f32.mrb[11].mxu0  ;;  %v290_v63 = vpop.f32.mrb[11].mxu1 }
 0x109   :  { %v289_v61 = vadd.f32 %v288_v44, %v757_v34  ;;  %514 = vst [vmem:[%s961_s4 + $0x18] sm:$0xff] %v574_v38  ;;  %v360_v0 = vadd.f32 %v328_v6, %v247_v40  ;;  %v376_v1 = vadd.f32 %v344_v7, %v287_v41  ;;  %v251_v2 = vadd.f32 %v250_v62, %v759_v35 }
 0x10a   :  { %522 = vst [vmem:[%s961_s4 + $0x58] sm:$0xff] %v582_v39  ;;  %v291_v3 = vadd.f32 %v290_v63, %v759_v35  ;;  %v391_v8 = vmax.f32 %v359_v45, 0.0  ;;  %v407_v9 = vmax.f32 %v375_v55, 0.0  ;;  %v361_v48 = vadd.f32 %v329_v30, %v249_v60 }
 0x10b   :  { %v377_v49 = vadd.f32 %v345_v31, %v289_v61  ;;  %v392_v6 = vmax.f32 %v360_v0, 0.0  ;;  %v408_v7 = vmax.f32 %v376_v1, 0.0  ;;  %v362_v10 = vadd.f32 %v330_v46, %v251_v2 }
 0x10c   :  { %v378_v11 = vadd.f32 %v346_v47, %v291_v3  ;;  %v393_v50 = vmax.f32 %v361_v48, 0.0  ;;  %v334_v46 = vunpack.c.h.bf16 %v310_v4  ;;  %v350_v21 = vunpack.c.h.bf16 %v318_v5 }
 0x10d   :  { %v409_v51 = vmax.f32 %v377_v49, 0.0  ;;  %v575_v16 = vpack.c.bf16 %v392_v6, %v391_v8  ;;  %v583_v36 = vpack.c.bf16 %v408_v7, %v407_v9  ;;  %v394_v37 = vmax.f32 %v362_v10, 0.0  ;;  %v254_v30 = vpop.f32.mrb[12].mxu0  ;;  %v294_v53 = vpop.f32.mrb[12].mxu1 }
 0x10e   :  { %v410_v52 = vmax.f32 %v378_v11, 0.0  ;;  %v255_v31 = vadd.f32 %v254_v30, %v757_v34  ;;  %v295_v17 = vadd.f32 %v294_v53, %v757_v34  ;;  %v256_v20 = vpop.f32.mrb[13].mxu0  ;;  %v296_v18 = vpop.f32.mrb[13].mxu1 }
 0x10f   :  { %515 = vst [vmem:[%s961_s4 + $0x20] sm:$0xff] %v575_v16  ;;  %523 = vst [vmem:[%s961_s4 + $0x60] sm:$0xff] %v583_v36  ;;  %v576_v19 = vpack.c.bf16 %v394_v37, %v393_v50  ;;  %v257_v22 = vadd.f32 %v256_v20, %v759_v35  ;;  %v297_v23 = vadd.f32 %v296_v18, %v759_v35  ;;  %v258_v26 = vpop.f32.mrb[14].mxu0  ;;  %v298_v27 = vpop.f32.mrb[14].mxu1 }
 0x110   :  { %v584_v47 = vpack.c.bf16 %v410_v52, %v409_v51  ;;  %v363_v56 = vadd.f32 %v331_v24, %v255_v31  ;;  %v379_v28 = vadd.f32 %v347_v25, %v295_v17  ;;  %v259_v29 = vadd.f32 %v258_v26, %v757_v34  ;;  %v260_v32 = vpop.f32.mrb[15].mxu0  ;;  %v300_v42 = vpop.f32.mrb[15].mxu1 }
 0x111   :  { %v299_v57 = vadd.f32 %v298_v27, %v757_v34  ;;  %516 = vst [vmem:[%s961_s4 + $0x28] sm:$0xff] %v576_v19  ;;  %v364_v24 = vadd.f32 %v332_v43, %v257_v22  ;;  %v380_v25 = vadd.f32 %v348_v59, %v297_v23  ;;  %v261_v58 = vadd.f32 %v260_v32, %v759_v35 }
 0x112   :  { %524 = vst [vmem:[%s961_s4 + $0x68] sm:$0xff] %v584_v47  ;;  %v301_v34 = vadd.f32 %v300_v42, %v759_v35  ;;  %v395_v33 = vmax.f32 %v363_v56, 0.0  ;;  %v411_v38 = vmax.f32 %v379_v28, 0.0  ;;  %v365_v39 = vadd.f32 %v333_v12, %v259_v29 }
 0x113   :  { %v381_v40 = vadd.f32 %v349_v13, %v299_v57  ;;  %v396_v41 = vmax.f32 %v364_v24, 0.0  ;;  %v412_v54 = vmax.f32 %v380_v25, 0.0  ;;  %v366_v44 = vadd.f32 %v334_v46, %v261_v58 }
 0x114   :  { %v382_v45 = vadd.f32 %v350_v21, %v301_v34  ;;  %v397_v55 = vmax.f32 %v365_v39, 0.0 }
 0x115   :  { %v413_v60 = vmax.f32 %v381_v40, 0.0  ;;  %v577_v61 = vpack.c.bf16 %v396_v41, %v395_v33  ;;  %v585_v14 = vpack.c.bf16 %v412_v54, %v411_v38  ;;  %v398_v43 = vmax.f32 %v366_v44, 0.0 }
 0x116   :  { %v414_v62 = vmax.f32 %v382_v45, 0.0 }
 0x117   :  { %517 = vst [vmem:[%s961_s4 + $0x30] sm:$0xff] %v577_v61  ;;  %525 = vst [vmem:[%s961_s4 + $0x70] sm:$0xff] %v585_v14  ;;  %v578_v35 = vpack.c.bf16 %v398_v43, %v397_v55 }
 0x118   :  { %v586_v15 = vpack.c.bf16 %v414_v62, %v413_v60 }
 0x119   :  { %518 = vst [vmem:[%s961_s4 + $0x38] sm:$0xff] %v578_v35 }
 0x11a   :  { %526 = vst [vmem:[%s961_s4 + $0x78] sm:$0xff] %v586_v15 }

// kernel: _lambda_.48
= control target key start
LH: loop header
LB: loop body
LE: loop exit
PB: predicated region body
PF: predicated region fallthrough
CT: control target
= control target key end

     0   :  { %s836_s1 = inlined_call_operand.vmem [shape: bf16[256,128], index: 1, kind: input, shape index: {}]   ;;  %s837_s0 = inlined_call_operand.vmem [shape: bf16[128,256], index: 0, kind: input, shape index: {}]   ;;  %s838_s2 = inlined_call_operand.vmem [shape: f32[1,128], index: 2, kind: input, shape index: {}]   ;;  %s839_s3 = inlined_call_operand.vmem [shape: bf16[128,128], index: 3, kind: output, shape index: {}]  }
   0x1   :  { %v635_v0 = vld [vmem:[%s836_s1 + $0x40] sm:$0xff]   ;;  %v637_v2 = vld [vmem:[%s836_s1 + $0x48] sm:$0xff]   ;;  %v639_v4 = vld [vmem:[%s836_s1 + $0x50] sm:$0xff]  }
   0x2   :  { %v636_v1 = vld [vmem:[%s836_s1] sm:$0xff]   ;;  %555 = vmatprep.subr.bf16.mxu0 %v635_v0  ;;  %619 = vmatprep.subr.bf16.mxu1 %v635_v0  ;;  %v638_v3 = vld [vmem:[%s836_s1 + $0x8] sm:$0xff]   ;;  %v640_v5 = vld [vmem:[%s836_s1 + $0x10] sm:$0xff]  }
   0x3   :  { %556 = vmatpush3.bf16.msra.mxu0 %v636_v1  ;;  %627 = vmatpush3.bf16.msra.mxu1 %v636_v1  ;;  %v641_v6 = vld [vmem:[%s836_s1 + $0x58] sm:$0xff]   ;;  %v643_v8 = vld [vmem:[%s836_s1 + $0x60] sm:$0xff]   ;;  %v645_v10 = vld [vmem:[%s836_s1 + $0x68] sm:$0xff]  }
   0x4   :  { %557 = vmatprep.subr.bf16.mxu0 %v637_v2  ;;  %620 = vmatprep.subr.bf16.mxu1 %v637_v2  ;;  %v642_v7 = vld [vmem:[%s836_s1 + $0x18] sm:$0xff]   ;;  %v644_v9 = vld [vmem:[%s836_s1 + $0x20] sm:$0xff]   ;;  %v646_v13 = vld [vmem:[%s836_s1 + $0x28] sm:$0xff]  }
   0x5   :  { %v653_v11 = vld [vmem:[%s837_s0 + $0x4] ss:$8 sps:$4 sm:$0xff]   ;;  %v647_v14 = vld [vmem:[%s836_s1 + $0x70] sm:$0xff]   ;;  %v649_v16 = vld [vmem:[%s836_s1 + $0x78] sm:$0xff]  }
   0x6   :  { %v656_v12 = vld [vmem:[%s837_s0 + $0x44] ss:$8 sps:$4 sm:$0xff]   ;;  %278 = vmatprep.mubr.bf16.mxu0 %v653_v11  ;;  %v648_v15 = vld [vmem:[%s836_s1 + $0x30] sm:$0xff]   ;;  %v650_v17 = vld [vmem:[%s836_s1 + $0x38] sm:$0xff]  }
   0x7   :  { %558 = vmatpush3.bf16.msra.mxu0 %v638_v3  ;;  %628 = vmatpush3.bf16.msra.mxu1 %v638_v3  ;;  %v651_v18 = vld [vmem:[%s837_s0] ss:$8 sps:$4 sm:$0xff]   ;;  %v657_v20 = vld [vmem:[%s837_s0 + $0x14] ss:$8 sps:$4 sm:$0xff]   ;;  %v661_v22 = vld [vmem:[%s837_s0 + $0x10] ss:$8 sps:$4 sm:$0xff]  }
   0x8   :  { %559 = vmatprep.subr.bf16.mxu0 %v639_v4  ;;  %621 = vmatprep.subr.bf16.mxu1 %v639_v4  ;;  %v654_v19 = vld [vmem:[%s837_s0 + $0x40] ss:$8 sps:$4 sm:$0xff]   ;;  %v659_v21 = vld [vmem:[%s837_s0 + $0x54] ss:$8 sps:$4 sm:$0xff]   ;;  %v662_v23 = vld [vmem:[%s837_s0 + $0x50] ss:$8 sps:$4 sm:$0xff]  }
   0x9   :  { %310 = vmatprep.mubr.bf16.mxu1 %v656_v12  ;;  %v663_v24 = vld [vmem:[%s837_s0 + $0x24] ss:$8 sps:$4 sm:$0xff]   ;;  %v667_v26 = vld [vmem:[%s837_s0 + $0x20] ss:$8 sps:$4 sm:$0xff]   ;;  %v669_v28 = vld [vmem:[%s837_s0 + $0x34] ss:$8 sps:$4 sm:$0xff]  }
   0xa   :  { %v665_v25 = vld [vmem:[%s837_s0 + $0x64] ss:$8 sps:$4 sm:$0xff]   ;;  %v668_v27 = vld [vmem:[%s837_s0 + $0x60] ss:$8 sps:$4 sm:$0xff]   ;;  %v671_v29 = vld [vmem:[%s837_s0 + $0x74] ss:$8 sps:$4 sm:$0xff]  }
   0xb   :  { %560 = vmatpush3.bf16.msra.mxu0 %v640_v5  ;;  %629 = vmatpush3.bf16.msra.mxu1 %v640_v5  ;;  %v673_v30 = vld [vmem:[%s837_s0 + $0x30] ss:$8 sps:$4 sm:$0xff]   ;;  %v794_v34 = vld [vmem:[%s838_s2] ss:$0 sm:$0xff] }
   0xc   :  { %561 = vmatprep.subr.bf16.mxu0 %v641_v6  ;;  %622 = vmatprep.subr.bf16.mxu1 %v641_v6  ;;  %v674_v31 = vld [vmem:[%s837_s0 + $0x70] ss:$8 sps:$4 sm:$0xff]  }
   0xf   :  { %562 = vmatpush3.bf16.msra.mxu0 %v642_v7  ;;  %630 = vmatpush3.bf16.msra.mxu1 %v642_v7 }
  0x10   :  { %563 = vmatprep.subr.bf16.mxu0 %v643_v8  ;;  %623 = vmatprep.subr.bf16.mxu1 %v643_v8 }
  0x13   :  { %564 = vmatpush3.bf16.msra.mxu0 %v644_v9  ;;  %631 = vmatpush3.bf16.msra.mxu1 %v644_v9 }
  0x14   :  { %565 = vmatprep.subr.bf16.mxu0 %v645_v10  ;;  %624 = vmatprep.subr.bf16.mxu1 %v645_v10 }
  0x17   :  { %566 = vmatpush3.bf16.msra.mxu0 %v646_v13  ;;  %632 = vmatpush3.bf16.msra.mxu1 %v646_v13 }
  0x18   :  { %567 = vmatprep.subr.bf16.mxu0 %v647_v14  ;;  %625 = vmatprep.subr.bf16.mxu1 %v647_v14 }
  0x1b   :  { %568 = vmatpush3.bf16.msra.mxu0 %v648_v15  ;;  %633 = vmatpush3.bf16.msra.mxu1 %v648_v15 }
  0x1c   :  { %569 = vmatprep.subr.bf16.mxu0 %v649_v16  ;;  %626 = vmatprep.subr.bf16.mxu1 %v649_v16 }
  0x1f   :  { %570 = vmatpush3.bf16.msra.mxu0 %v650_v17  ;;  %634 = vmatpush3.bf16.msra.mxu1 %v650_v17 }
  0x22   :  { %279 = vmatmul.mubr.bf16.vlgmr.msra.gmra.mrb[0].mxu0 %v651_v18  ;;  %311 = vmatmul.mubr.bf16.vlgmr.msra.gmra.mrb[0].mxu1 %v654_v19 }
  0x23   :  { %286 = vmatprep.mubr.bf16.mxu0 %v657_v20  ;;  %318 = vmatprep.mubr.bf16.mxu1 %v659_v21 }
  0x2a   :  { %287 = vmatmul.mubr.bf16.gmra.mrb[4].mxu0 %v661_v22  ;;  %319 = vmatmul.mubr.bf16.gmra.mrb[4].mxu1 %v662_v23 }
  0x2b   :  { %294 = vmatprep.mubr.bf16.mxu0 %v663_v24  ;;  %326 = vmatprep.mubr.bf16.mxu1 %v665_v25 }
  0x32   :  { %295 = vmatmul.mubr.bf16.gmra.mrb[8].mxu0 %v667_v26  ;;  %327 = vmatmul.mubr.bf16.gmra.mrb[8].mxu1 %v668_v27 }
  0x33   :  { %302 = vmatprep.mubr.bf16.mxu0 %v669_v28  ;;  %334 = vmatprep.mubr.bf16.mxu1 %v671_v29 }
  0x3a   :  { %303 = vmatmul.mubr.bf16.gmra.mrb[12].mxu0 %v673_v30  ;;  %335 = vmatmul.mubr.bf16.gmra.mrb[12].mxu1 %v674_v31 }
  0xf5   :  { %v571_v32 = vpop.f32.mrb[0].mxu0  ;;  %v595_v33 = vpop.f32.mrb[0].mxu1 }
  0xf6   :  { %v572_v35 = vpop.f32.mrb[1].mxu0  ;;  %v596_v36 = vpop.f32.mrb[1].mxu1 }
  0xf7   :  { %v573_v37 = vadd.f32 %v572_v35, %v571_v32  ;;  %v597_v38 = vadd.f32 %v596_v36, %v595_v33  ;;  %v574_v39 = vpop.f32.mrb[2].mxu0  ;;  %v598_v40 = vpop.f32.mrb[2].mxu1 }
  0xf8   :  { %v575_v41 = vpop.f32.mrb[3].mxu0  ;;  %v599_v42 = vpop.f32.mrb[3].mxu1 }
  0xf9   :  { %v281_v43 = vadd.f32 %v573_v37, %v794_v34  ;;  %v313_v44 = vadd.f32 %v597_v38, %v794_v34  ;;  %v576_v45 = vadd.f32 %v575_v41, %v574_v39  ;;  %v600_v46 = vadd.f32 %v599_v42, %v598_v40 }
  0xfb   :  { %v284_v47 = vadd.f32 %v576_v45, %v794_v34  ;;  %v316_v48 = vadd.f32 %v600_v46, %v794_v34  ;;  %v343_v49 = vmax.f32 %v281_v43, 0.0  ;;  %v351_v50 = vmax.f32 %v313_v44, 0.0 }
  0xfd   :  { %v344_v51 = vmax.f32 %v284_v47, 0.0  ;;  %v352_v52 = vmax.f32 %v316_v48, 0.0  ;;  %v577_v53 = vpop.f32.mrb[4].mxu0  ;;  %v601_v54 = vpop.f32.mrb[4].mxu1 }
  0xfe   :  { %v578_v55 = vpop.f32.mrb[5].mxu0  ;;  %v602_v56 = vpop.f32.mrb[5].mxu1 }
  0xff   :  { %v511_v57 = vpack.c.bf16 %v344_v51, %v343_v49  ;;  %v531_v58 = vpack.c.bf16 %v352_v52, %v351_v50  ;;  %v579_v59 = vadd.f32 %v578_v55, %v577_v53  ;;  %v603_v60 = vadd.f32 %v602_v56, %v601_v54  ;;  %v580_v61 = vpop.f32.mrb[6].mxu0  ;;  %v604_v62 = vpop.f32.mrb[6].mxu1 }
 0x100   :  { %v581_v63 = vpop.f32.mrb[7].mxu0  ;;  %v605_v0 = vpop.f32.mrb[7].mxu1 }
 0x101   :  { %512 = vst [vmem:[%s839_s3] sm:$0xff] %v511_v57   ;;  %551 = vst [vmem:[%s839_s3 + $0x20] sm:$0xff] %v531_v58   ;;  %v289_v1 = vadd.f32 %v579_v59, %v794_v34  ;;  %v321_v2 = vadd.f32 %v603_v60, %v794_v34  ;;  %v582_v3 = vadd.f32 %v581_v63, %v580_v61 }
 0x102   :  { %v606_v4 = vadd.f32 %v605_v0, %v604_v62 }
 0x103   :  { %v292_v5 = vadd.f32 %v582_v3, %v794_v34  ;;  %v345_v7 = vmax.f32 %v289_v1, 0.0  ;;  %v353_v8 = vmax.f32 %v321_v2, 0.0 }
 0x104   :  { %v324_v6 = vadd.f32 %v606_v4, %v794_v34 }
 0x105   :  { %v346_v9 = vmax.f32 %v292_v5, 0.0  ;;  %v583_v11 = vpop.f32.mrb[8].mxu0  ;;  %v607_v12 = vpop.f32.mrb[8].mxu1 }
 0x106   :  { %v354_v10 = vmax.f32 %v324_v6, 0.0  ;;  %v584_v13 = vpop.f32.mrb[9].mxu0  ;;  %v608_v14 = vpop.f32.mrb[9].mxu1 }
 0x107   :  { %v516_v15 = vpack.c.bf16 %v346_v9, %v345_v7  ;;  %v585_v17 = vadd.f32 %v584_v13, %v583_v11  ;;  %v609_v18 = vadd.f32 %v608_v14, %v607_v12  ;;  %v586_v19 = vpop.f32.mrb[10].mxu0  ;;  %v610_v20 = vpop.f32.mrb[10].mxu1 }
 0x108   :  { %v536_v16 = vpack.c.bf16 %v354_v10, %v353_v8  ;;  %v587_v21 = vpop.f32.mrb[11].mxu0  ;;  %v611_v22 = vpop.f32.mrb[11].mxu1 }
 0x109   :  { %548 = vst [vmem:[%s839_s3 + $0x8] sm:$0xff] %v516_v15   ;;  %v297_v23 = vadd.f32 %v585_v17, %v794_v34  ;;  %v329_v24 = vadd.f32 %v609_v18, %v794_v34  ;;  %v588_v25 = vadd.f32 %v587_v21, %v586_v19  ;;  %v612_v26 = vadd.f32 %v611_v22, %v610_v20 }
 0x10a   :  { %552 = vst [vmem:[%s839_s3 + $0x28] sm:$0xff] %v536_v16  }
 0x10b   :  { %v300_v27 = vadd.f32 %v588_v25, %v794_v34  ;;  %v332_v28 = vadd.f32 %v612_v26, %v794_v34  ;;  %v347_v29 = vmax.f32 %v297_v23, 0.0  ;;  %v355_v30 = vmax.f32 %v329_v24, 0.0 }
 0x10d   :  { %v348_v31 = vmax.f32 %v300_v27, 0.0  ;;  %v356_v32 = vmax.f32 %v332_v28, 0.0  ;;  %v589_v33 = vpop.f32.mrb[12].mxu0  ;;  %v613_v35 = vpop.f32.mrb[12].mxu1 }
 0x10e   :  { %v590_v36 = vpop.f32.mrb[13].mxu0  ;;  %v614_v37 = vpop.f32.mrb[13].mxu1 }
 0x10f   :  { %v521_v38 = vpack.c.bf16 %v348_v31, %v347_v29  ;;  %v541_v39 = vpack.c.bf16 %v356_v32, %v355_v30  ;;  %v591_v40 = vadd.f32 %v590_v36, %v589_v33  ;;  %v615_v41 = vadd.f32 %v614_v37, %v613_v35  ;;  %v592_v42 = vpop.f32.mrb[14].mxu0  ;;  %v616_v43 = vpop.f32.mrb[14].mxu1 }
 0x110   :  { %v593_v44 = vpop.f32.mrb[15].mxu0  ;;  %v617_v45 = vpop.f32.mrb[15].mxu1 }
 0x111   :  { %549 = vst [vmem:[%s839_s3 + $0x10] sm:$0xff] %v521_v38   ;;  %553 = vst [vmem:[%s839_s3 + $0x30] sm:$0xff] %v541_v39   ;;  %v305_v46 = vadd.f32 %v591_v40, %v794_v34  ;;  %v337_v47 = vadd.f32 %v615_v41, %v794_v34  ;;  %v594_v48 = vadd.f32 %v593_v44, %v592_v42 }
 0x112   :  { %v618_v49 = vadd.f32 %v617_v45, %v616_v43 }
 0x113   :  { %v308_v50 = vadd.f32 %v594_v48, %v794_v34  ;;  %v349_v52 = vmax.f32 %v305_v46, 0.0  ;;  %v357_v53 = vmax.f32 %v337_v47, 0.0 }
 0x114   :  { %v340_v51 = vadd.f32 %v618_v49, %v794_v34 }
 0x115   :  { %v350_v54 = vmax.f32 %v308_v50, 0.0 }
 0x116   :  { %v358_v55 = vmax.f32 %v340_v51, 0.0 }
 0x117   :  { %v526_v56 = vpack.c.bf16 %v350_v54, %v349_v52 }
 0x118   :  { %v546_v57 = vpack.c.bf16 %v358_v55, %v357_v53 }
 0x119   :  { %550 = vst [vmem:[%s839_s3 + $0x18] sm:$0xff] %v526_v56  }
 0x11a   :  { %554 = vst [vmem:[%s839_s3 + $0x38] sm:$0xff] %v546_v57  }

// kernel: _lambda_.45
= control target key start
LH: loop header
LB: loop body
LE: loop exit
PB: predicated region body
PF: predicated region fallthrough
CT: control target
= control target key end

     0   :  { %s2756_s12 = smov 0   ;;  %s3208_s0 = inlined_call_operand.vmem [shape: bf16[2,11,16,128], index: 0, kind: input, shape index: {}]   ;;  %s3209_s1 = inlined_call_operand.vmem [shape: bf16[9,128,128], index: 1, kind: input, shape index: {}]   ;;  %s3210_s2 = inlined_call_operand.vmem [shape: f32[1,128], index: 2, kind: input, shape index: {}]   ;;  %s3211_s3 = inlined_call_operand.vmem [shape: bf16[2,8,8,128], index: 3, kind: output, shape index: {}]  }
   0x1 LB: > { %s1938_s13 = sadd.s32 4294967295, %s2734_s12   ;;  %p1942_p0 = scmp.ge.s32.totalorder %s2734_s12, 1  ;;  %s2734_s12 = sphi %s2756_s12, %s13_s12  }
   0x2   : > { %p137_p1 = scmp.lt.s32.totalorder %s2734_s12, 3 }
   0x4   : > { %p138_p2 = pnand %p1942_p0, %p137_p1 }
   0x5   : > { %v2643_v0 = vld [vmem:[%s3209_s1 + $0x40] sm:$0xff] (!%p138_p2)   ;;  %v2645_v2 = vld [vmem:[%s3209_s1 + $0x48] sm:$0xff] (!%p138_p2)   ;;  %p161_p3 = scmp.lt.s32.totalorder (!%p138_p2), %s1938_s13, 1  ;;  %v2647_v4 = vld [vmem:[%s3209_s1 + $0x50] sm:$0xff] (!%p138_p2)   ;;  %vm269_vm0 = vsmask.f32 (!%p138_p2), 7424 }
   0x6   : > { %141 = sbr.rel (%p138_p2) target bundleno = 397 (0x18d), region = 32  ;;  %v2644_v1 = vld [vmem:[%s3209_s1] sm:$0xff] (!%p138_p2)   ;;  %2330 = vmatprep.subr.bf16.mxu0 (!%p138_p2), %v2643_v0  ;;  %v2646_v3 = vld [vmem:[%s3209_s1 + $0x8] sm:$0xff] (!%p138_p2)   ;;  %v2648_v5 = vld [vmem:[%s3209_s1 + $0x10] sm:$0xff] (!%p138_p2)   ;;  %vm645_vm1 = vcmask (!%p138_p2), 1046528  }
   0x7   : > { %2362 = vmatprep.subr.bf16.mxu1 (!%p138_p2), %v2644_v1  ;;  %2331 = vmatpush3.bf16.msra.mxu0 (!%p138_p2), %v2643_v0  ;;  %v2649_v6 = vld [vmem:[%s3209_s1 + $0x58] sm:$0xff] (!%p138_p2)   ;;  %v2651_v8 = vld [vmem:[%s3209_s1 + $0x60] sm:$0xff] (!%p138_p2)   ;;  %v2653_v10 = vld [vmem:[%s3209_s1 + $0x68] sm:$0xff] (!%p138_p2)  }
   0x8   : > { %2363 = vmatpush3.bf16.msra.mxu1 (!%p138_p2), %v2644_v1  ;;  %2332 = vmatprep.subr.bf16.mxu0 (!%p138_p2), %v2645_v2  ;;  %v2650_v7 = vld [vmem:[%s3209_s1 + $0x18] sm:$0xff] (!%p138_p2)   ;;  %v2652_v9 = vld [vmem:[%s3209_s1 + $0x20] sm:$0xff] (!%p138_p2)   ;;  %v2654_v11 = vld [vmem:[%s3209_s1 + $0x28] sm:$0xff] (!%p138_p2)  }
   0x9   : > { %2364 = vmatprep.subr.bf16.mxu1 (!%p138_p2), %v2646_v3  ;;  %v2655_v15 = vld [vmem:[%s3209_s1 + $0x70] sm:$0xff] (!%p138_p2)   ;;  %v2657_v22 = vld [vmem:[%s3209_s1 + $0x78] sm:$0xff] (!%p138_p2)   ;;  %v2662_v34 = vld [vmem:[%s3209_s1 + $0x80] sm:$0xff] (!%p138_p2)  }
   0xa   : > { %v2656_v19 = vld [vmem:[%s3209_s1 + $0x30] sm:$0xff] (!%p138_p2)   ;;  %v2658_v27 = vld [vmem:[%s3209_s1 + $0x38] sm:$0xff] (!%p138_p2)   ;;  %v2663_v35 = vld [vmem:[%s3209_s1 + $0xc0] sm:$0xff] (!%p138_p2)  }
   0xb   : > { %2333 = vmatpush3.bf16.msra.mxu0 (!%p138_p2), %v2645_v2  ;;  %v2664_v36 = vld [vmem:[%s3209_s1 + $0x88] sm:$0xff] (!%p138_p2)   ;;  %v2668_v50 = vld [vmem:[%s3209_s1 + $0x90] sm:$0xff] (!%p138_p2)   ;;  %v2670_v58 = vld [vmem:[%s3209_s1 + $0x98] sm:$0xff] (!%p138_p2)  }
   0xc   : > { %2365 = vmatpush3.bf16.msra.mxu1 (!%p138_p2), %v2646_v3  ;;  %2334 = vmatprep.subr.bf16.mxu0 (!%p138_p2), %v2647_v4  ;;  %v2665_v43 = vld [vmem:[%s3209_s1 + $0xc8] sm:$0xff] (!%p138_p2)   ;;  %v2669_v51 = vld [vmem:[%s3209_s1 + $0xd0] sm:$0xff] (!%p138_p2)   ;;  %v2671_v60 = vld [vmem:[%s3209_s1 + $0xd8] sm:$0xff] (!%p138_p2)  }
   0xd   : > { %s3213_s13 = smov (!%p161_p3, %s1938_s13), 1  ;;  %2366 = vmatprep.subr.bf16.mxu1 %v2648_v5  ;;  %v2674_v63 = vld [vmem:[%s3209_s1 + $0xa0] sm:$0xff]  }
   0xe   : > { %s2634_s30 = smul.u32 88, %s3213_s13  ;;  %s2162_s16 = sshll.u32 %s3213_s13, 5 }
   0xf   : > { %2335 = vmatpush3.bf16.msra.mxu0 %v2647_v4  ;;  %v2675_v4 = vld [vmem:[%s3209_s1 + $0xe0] sm:$0xff]   ;;  %s170_s19 = scalar_lea.vmem %s3211_s3, %s2162_s16 }
  0x10   : > { %2367 = vmatpush3.bf16.msra.mxu1 %v2648_v5  ;;  %2336 = vmatprep.subr.bf16.mxu0 %v2649_v6  ;;  %s2803_s14 = scalar_lea.vmem %s3208_s0, %s2634_s30 }
  0x11   : > { %2368 = vmatprep.subr.bf16.mxu1 %v2650_v7  ;;  %v2809_v12 = vld [vmem:[%s2803_s14] sm:$0xff]   ;;  %v2812_v13 = vld [vmem:[%s2803_s14 + $0x8] sm:$0xff]   ;;  %v2815_v14 = vld [vmem:[%s2803_s14 + $0x10] sm:$0xff]  }
  0x12   : > { %v271_v16 = vshrl.u32 %v2809_v12, 16  ;;  %v273_v17 = vshll.u32 %v2809_v12, 16  ;;  %v278_v18 = vshll.u32 %v2812_v13, 16  ;;  %2378 = vmatprep.mubr.bf16.mxu1 %v2809_v12  ;;  %v282_v23 = vshrl.u32 %v2812_v13, 16  ;;  %v2833_v26 = vld [vmem:[%s2803_s14 + $0x18] sm:$0xff]   ;;  %v2842_v33 = vld [vmem:[%s2803_s14 + $0x20] sm:$0xff]  }
  0x13   : > { %2337 = vmatpush3.bf16.msra.mxu0 %v2649_v6  ;;  %v286_v24 = vshll.u32 %v2815_v14, 16  ;;  %v290_v29 = vshrl.u32 %v2815_v14, 16  ;;  %v294_v30 = vshll.u32 %v2833_v26, 16  ;;  %v2854_v39 = vld [vmem:[%s2803_s14 + $0x28] sm:$0xff]   ;;  %v298_v41 = vshrl.u32 %v2833_v26, 16  ;;  %v2865_v44 = vld [vmem:[%s2803_s14 + $0x30] sm:$0xff]  }
  0x14   : > { %2369 = vmatpush3.bf16.msra.mxu1 %v2650_v7  ;;  %2338 = vmatprep.subr.bf16.mxu0 %v2651_v8  ;;  %v275_v20 = vrot.slane %v273_v17, 1  ;;  %v280_v21 = vrot.slane %v278_v18, 1  ;;  %v302_v42 = vshll.u32 %v2842_v33, 16  ;;  %v306_v46 = vshrl.u32 %v2842_v33, 16  ;;  %v2885_v56 = vld [vmem:[%s2803_s14 + $0x38] sm:$0xff]  }
  0x15   : > { %2370 = vmatprep.subr.bf16.mxu1 %v2652_v9  ;;  %v288_v32 = vrot.slane %v286_v24, 1  ;;  %v296_v38 = vrot.slane %v294_v30, 1  ;;  %v310_v47 = vshll.u32 %v2854_v39, 16  ;;  %v318_v52 = vshll.u32 %v2865_v44, 16  ;;  %v188_v59 = vld [vmem:[%s2803_s14 + $0x40] sm:$0xf] }
  0x16   : > { %v276_v25 = vor.u32 %v275_v20, %v271_v16  ;;  %v284_v31 = vor.u32 %v282_v23, %v280_v21  ;;  %v304_v49 = vrot.slane %v302_v42, 1  ;;  %v314_v55 = vshrl.u32 %v2854_v39, 16  ;;  %v189_v5 = vld [vmem:[%s2803_s14 + $0x44] sm:$0xf]  ;;  %v2677_v16 = vld [vmem:[%s3209_s1 + $0xe8] sm:$0xff]   ;;  %v2682_v23 = vld [vmem:[%s3209_s1 + $0xf0] sm:$0xff]  }
  0x17   : > { %2339 = vmatpush3.bf16.msra.mxu0 %v2651_v8  ;;  %v292_v37 = vor.u32 %v290_v29, %v288_v32  ;;  %v300_v48 = vor.u32 %v298_v41, %v296_v38  ;;  %v312_v54 = vrot.slane %v310_v47, 1  ;;  %v320_v61 = vrot.slane %v318_v52, 1  ;;  %v2683_v29 = vld [vmem:[%s3209_s1 + $0xb8] sm:$0xff]   ;;  %v2689_v42 = vld [vmem:[%s3209_s1 + $0x110] sm:$0xff]  }
  0x18   : > { %2371 = vmatpush3.bf16.msra.mxu1 %v2652_v9  ;;  %2340 = vmatprep.subr.bf16.mxu0 %v2653_v10  ;;  %v281_v28 = vsel %vm269_vm0, %v276_v25, %v280_v21  ;;  %v2857_v40 = vsel %vm269_vm0, %v284_v31, %v288_v32  ;;  %v308_v53 = vor.u32 %v306_v46, %v304_v49  ;;  %v322_v0 = vshrl.u32 %v2865_v44, 16  ;;  %v2681_v21 = vld [vmem:[%s3209_s1 + $0xb0] sm:$0xff]   ;;  %v2685_v32 = vld [vmem:[%s3209_s1 + $0x100] sm:$0xff]  }
  0x19   : > { %2372 = vmatprep.subr.bf16.mxu1 %v2654_v11  ;;  %2346 = vmatprep.mubr.bf16.mxu0 %v281_v28  ;;  %v2869_v45 = vsel %vm269_vm0, %v292_v37, %v296_v38  ;;  %v2888_v57 = vsel %vm269_vm0, %v300_v48, %v304_v49  ;;  %v326_v1 = vshll.u32 %v2885_v56, 16  ;;  %v316_v2 = vor.u32 %v314_v55, %v312_v54  ;;  %v2687_v37 = vld [vmem:[%s3209_s1 + $0x108] sm:$0xff]   ;;  %v2690_v46 = vld [vmem:[%s3209_s1 + $0x150] sm:$0xff]  }
  0x1a   : > { %v2899_v62 = vsel %vm269_vm0, %v308_v53, %v312_v54  ;;  %v2907_v3 = vcombine.low %v188_v59, %v188_v59  ;;  %v324_v6 = vor.u32 %v322_v0, %v320_v61  ;;  %v330_v9 = vshrl.u32 %v2885_v56, 16  ;;  %v2688_v38 = vld [vmem:[%s3209_s1 + $0x148] sm:$0xff]   ;;  %v2691_v53 = vld [vmem:[%s3209_s1 + $0x118] sm:$0xff]  }
  0x1b   : > { %2341 = vmatpush3.bf16.msra.mxu0 %v2653_v10  ;;  %v328_v7 = vrot.slane %v326_v1, 1  ;;  %v2916_v8 = vsel %vm269_vm0, %v316_v2, %v320_v61  ;;  %v646_v24 = vrot.slane %v2809_v12, 1  ;;  %v647_v25 = vrot.slane %v2812_v13, 1  ;;  %v2684_v12 = vld [vmem:[%s3209_s1 + $0xf8] sm:$0xff]   ;;  %v190_v48 = vld [vmem:[%s2803_s14 + $0x48] sm:$0xf] }
  0x1c   : > { %2373 = vmatpush3.bf16.msra.mxu1 %v2654_v11  ;;  %2342 = vmatprep.subr.bf16.mxu0 %v2655_v15  ;;  %v334_v10 = vshll.u32 %v2907_v3, 16  ;;  %v2676_v11 = vld [vmem:[%s3209_s1 + $0xa8] sm:$0xff]   ;;  %v649_v31 = vrot.slane %v2815_v14, 1  ;;  %v653_v41 = vrot.slane %v2842_v33, 1  ;;  %v655_v47 = vrot.slane %v2854_v39, 1  ;;  %v2692_v54 = vld [vmem:[%s3209_s1 + $0x158] sm:$0xff]  }
  0x1d   : > { %2374 = vmatprep.subr.bf16.mxu1 %v2656_v19  ;;  %v2930_v17 = vsel %vm269_vm0, %v324_v6, %v328_v7  ;;  %v648_v30 = vsel %vm645_vm1, %v646_v24, %v647_v25  ;;  %v191_v49 = vld [vmem:[%s2803_s14 + $0x4c] sm:$0xf]  ;;  %v2694_v1 = vld [vmem:[%s3209_s1 + $0x160] sm:$0xff]   ;;  %v3020_v2 = vrot.slane %v2885_v56, 1  ;;  %v661_v24 = vrot.slane %v2907_v3, 1 }
  0x1e   : > { %v336_v20 = vrot.slane %v334_v10, 1  ;;  %v2997_v52 = vcombine.low %v190_v48, %v191_v49  ;;  %v2712_v49 = vld [vmem:[%s3209_s1 + $0x1e8] sm:$0xff]  }
  0x1f   : > { %2343 = vmatpush3.bf16.msra.mxu0 %v2655_v15  ;;  %v2923_v15 = vcombine.low %v188_v59, %v189_v5  ;;  %v3008_v59 = vsel %vm645_vm1, %v653_v41, %v655_v47 }
  0x20   : > { %2375 = vmatpush3.bf16.msra.mxu1 %v2656_v19  ;;  %2344 = vmatprep.subr.bf16.mxu0 %v2657_v22  ;;  %v332_v19 = vor.u32 %v330_v9, %v328_v7  ;;  %v1517_v0 = vshll.u32 %v2997_v52, 16  ;;  %v1521_v7 = vshrl.u32 %v2997_v52, 16  ;;  %v1693_v9 = vrot.slane %v2997_v52, 1 }
  0x21   : > { %2376 = vmatprep.subr.bf16.mxu1 %v2658_v27  ;;  %v1003_v18 = vshll.u32 %v2923_v15, 16  ;;  %v3027_v5 = vrot.slane %v2923_v15, 1 }
  0x22   : > { %v337_v28 = vsel %vm269_vm0, %v332_v19, %v336_v20  ;;  %v1519_v6 = vrot.slane %v1517_v0, 1  ;;  %v2696_v20 = vld [vmem:[%s3209_s1 + $0x168] sm:$0xff]  }
  0x23   : > { %2345 = vmatpush3.bf16.msra.mxu0 %v2657_v22  ;;  %v1005_v22 = vrot.slane %v1003_v18, 1  ;;  %v2725_v18 = vld [vmem:[%s2803_s14 + $0x50] ss:$0 sps:$4 sm:$0xff]   ;;  %v2720_v0 = vld [vmem:[%s3209_s1 + $0x208] sm:$0xff]  }
  0x24   : > { %2377 = vmatpush3.bf16.msra.mxu1 %v2658_v27  ;;  %2394 = vmatprep.subr.bf16.mxu0 %v2662_v34 }
  0x25   : > { %2426 = vmatprep.subr.bf16.mxu1 %v2663_v35  ;;  %v2945_v27 = vsel %vm269_vm0, %v332_v19, %v1005_v22  ;;  %v3044_v19 = vsel %vm645_vm1, %v3027_v5, %v1693_v9 }
  0x26   : > { %2347 = vmatmul.mubr.bf16.vlgmr.msra.gmra.mrb[0].mxu0 %v2857_v40 }
  0x27   : > { %2379 = vmatmul.mubr.bf16.vlgmr.msra.gmra.mrb[0].mxu1 %v2812_v13  ;;  %2395 = vmatpush3.bf16.msra.mxu0 %v2662_v34  ;;  %v2686_v34 = vld [vmem:[%s3209_s1 + $0x140] sm:$0xff]  }
  0x28   : > { %2427 = vmatpush3.bf16.msra.mxu1 %v2663_v35  ;;  %2396 = vmatprep.subr.bf16.mxu0 %v2664_v36  ;;  %v651_v35 = vrot.slane %v2833_v26, 1 }
  0x29   : > { %2428 = vmatprep.subr.bf16.mxu1 %v2665_v43  ;;  %2350 = vmatprep.mubr.bf16.mxu0 %v2869_v45 }
  0x2a   : > { %2382 = vmatprep.mubr.bf16.mxu1 %v2815_v14 }
  0x2b   : > { %2397 = vmatpush3.bf16.msra.mxu0 %v2664_v36  ;;  %v2966_v36 = vsel %vm645_vm1, %v647_v25, %v649_v31  ;;  %v1695_v25 = vrot.slane %v2725_v18, 1 }
  0x2c   : > { %2429 = vmatpush3.bf16.msra.mxu1 %v2665_v43  ;;  %2398 = vmatprep.subr.bf16.mxu0 %v2668_v50  ;;  %v1007_v43 = vshrl.u32 %v2923_v15, 16 }
  0x2d   : > { %2430 = vmatprep.subr.bf16.mxu1 %v2669_v51 }
  0x2e   : > { %2351 = vmatmul.mubr.bf16.gmra.mrb[4].mxu0 %v2888_v57  ;;  %v1009_v55 = vor.u32 %v1007_v43, %v1005_v22  ;;  %v1523_v22 = vor.u32 %v1521_v7, %v1519_v6  ;;  %v2708_v43 = vld [vmem:[%s3209_s1 + $0x1d8] sm:$0xff]  }
  0x2f   : > { %2383 = vmatmul.mubr.bf16.gmra.mrb[4].mxu1 %v2833_v26  ;;  %2399 = vmatpush3.bf16.msra.mxu0 %v2668_v50  ;;  %v2992_v50 = vcombine.low %v190_v48, %v190_v48  ;;  %v2711_v48 = vld [vmem:[%s3209_s1 + $0x1a8] sm:$0xff]  }
  0x30   : > { %2431 = vmatpush3.bf16.msra.mxu1 %v2669_v51  ;;  %2400 = vmatprep.subr.bf16.mxu0 %v2670_v58  ;;  %v2995_v51 = vsel %vm645_vm1, %v651_v35, %v653_v41  ;;  %v2704_v41 = vld [vmem:[%s3209_s1 + $0x1c8] sm:$0xff]  }
  0x31   : > { %2432 = vmatprep.subr.bf16.mxu1 %v2671_v60  ;;  %2354 = vmatprep.mubr.bf16.mxu0 %v2899_v62 }
  0x32   : > { %2386 = vmatprep.mubr.bf16.mxu1 %v2842_v33 }
  0x33   : > { %2401 = vmatpush3.bf16.msra.mxu0 %v2670_v58  ;;  %v1011_v58 = vshll.u32 %v2992_v50, 16 }
  0x34   : > { %2433 = vmatpush3.bf16.msra.mxu1 %v2671_v60  ;;  %2402 = vmatprep.subr.bf16.mxu0 %v2674_v63  ;;  %v657_v60 = vrot.slane %v2865_v44, 1 }
  0x35   : > { %2434 = vmatprep.subr.bf16.mxu1 %v2675_v4  ;;  %v1013_v61 = vrot.slane %v1011_v58, 1  ;;  %v2716_v58 = vld [vmem:[%s3209_s1 + $0x1f0] sm:$0xff]  }
  0x36   : > { %2355 = vmatmul.mubr.bf16.gmra.mrb[8].mxu0 %v2916_v8  ;;  %v3033_v10 = vsel %vm645_vm1, %v655_v47, %v657_v60  ;;  %v2710_v47 = vld [vmem:[%s3209_s1 + $0x1e0] sm:$0xff]  }
  0x37   : > { %2387 = vmatmul.mubr.bf16.gmra.mrb[8].mxu1 %v2854_v39  ;;  %2403 = vmatpush3.bf16.msra.mxu0 %v2674_v63  ;;  %v2693_v63 = vld [vmem:[%s3209_s1 + $0x120] sm:$0xff]  }
  0x38   : > { %2435 = vmatpush3.bf16.msra.mxu1 %v2675_v4  ;;  %2404 = vmatprep.subr.bf16.mxu0 %v2676_v11  ;;  %v3023_v4 = vsel %vm269_vm0, %v1009_v55, %v1013_v61  ;;  %v2718_v61 = vld [vmem:[%s3209_s1 + $0x1f8] sm:$0xff]  }
  0x39   : > { %2436 = vmatprep.subr.bf16.mxu1 %v2677_v16  ;;  %2358 = vmatprep.mubr.bf16.mxu0 %v2930_v17 }
  0x3a   : > { %2390 = vmatprep.mubr.bf16.mxu1 %v2865_v44 }
  0x3b   : > { %2405 = vmatpush3.bf16.msra.mxu0 %v2676_v11  ;;  %v3036_v11 = vsel %vm269_vm0, %v1009_v55, %v1519_v6  ;;  %v2715_v55 = vld [vmem:[%s3209_s1 + $0x1b0] sm:$0xff]  }
  0x3c   : > { %2437 = vmatpush3.bf16.msra.mxu1 %v2677_v16  ;;  %2406 = vmatprep.subr.bf16.mxu0 %v2681_v21  ;;  %v2695_v16 = vld [vmem:[%s3209_s1 + $0x128] sm:$0xff]  }
  0x3d   : > { %2438 = vmatprep.subr.bf16.mxu1 %v2682_v23 }
  0x3e   : > { %2359 = vmatmul.mubr.bf16.gmra.mrb[12].mxu0 %v337_v28  ;;  %v2697_v28 = vld [vmem:[%s3209_s1 + $0x130] sm:$0xff]  }
  0x3f   : > { %2391 = vmatmul.mubr.bf16.gmra.mrb[12].mxu1 %v2885_v56  ;;  %2407 = vmatpush3.bf16.msra.mxu0 %v2681_v21  ;;  %v3052_v21 = vsel %vm645_vm1, %v657_v60, %v3020_v2 }
  0x40   : > { %2439 = vmatpush3.bf16.msra.mxu1 %v2682_v23  ;;  %2408 = vmatprep.subr.bf16.mxu0 %v2683_v29  ;;  %v1525_v23 = vshll.u32 %v2725_v18, 16 }
  0x41   : > { %2440 = vmatprep.subr.bf16.mxu1 %v2684_v12  ;;  %2410 = vmatprep.mubr.bf16.mxu0 %v648_v30  ;;  %v3064_v30 = vsel %vm645_vm1, %v1693_v9, %v1695_v25 }
  0x42   : > { %2442 = vmatprep.mubr.bf16.mxu1 %v2812_v13  ;;  %v2976_v13 = vsel %vm645_vm1, %v649_v31, %v651_v35  ;;  %v662_v31 = vsel %vm645_vm1, %v3020_v2, %v661_v24  ;;  %v2701_v35 = vld [vmem:[%s3209_s1 + $0x180] sm:$0xff]  }
  0x43   : > { %2409 = vmatpush3.bf16.msra.mxu0 %v2683_v29  ;;  %v1527_v29 = vrot.slane %v1525_v23, 1 }
  0x44   : > { %2441 = vmatpush3.bf16.msra.mxu1 %v2684_v12  ;;  %2458 = vmatprep.subr.bf16.mxu0 %v2685_v32  ;;  %v2698_v12 = vld [vmem:[%s3209_s1 + $0x170] sm:$0xff]  }
  0x45   : > { %2490 = vmatprep.subr.bf16.mxu1 %v2686_v34  ;;  %v3068_v3 = vsel %vm269_vm0, %v1523_v22, %v1527_v29 }
  0x46   : > { %2411 = vmatmul.mubr.bf16.vlgmr.msra.gmra.mrb[16].mxu0 %v2966_v36 }
  0x47   : > { %2443 = vmatmul.mubr.bf16.vlgmr.msra.gmra.mrb[16].mxu1 %v2815_v14  ;;  %2459 = vmatpush3.bf16.msra.mxu0 %v2685_v32  ;;  %v2699_v32 = vld [vmem:[%s3209_s1 + $0x138] sm:$0xff]  }
  0x48   : > { %2491 = vmatpush3.bf16.msra.mxu1 %v2686_v34  ;;  %2460 = vmatprep.subr.bf16.mxu0 %v2687_v37  ;;  %v2700_v34 = vld [vmem:[%s3209_s1 + $0x178] sm:$0xff]  }
  0x49   : > { %2492 = vmatprep.subr.bf16.mxu1 %v2688_v38  ;;  %2414 = vmatprep.mubr.bf16.mxu0 %v2976_v13 }
  0x4a   : > { %2446 = vmatprep.mubr.bf16.mxu1 %v2833_v26 }
  0x4b   : > { %2461 = vmatpush3.bf16.msra.mxu0 %v2687_v37  ;;  %v2702_v37 = vld [vmem:[%s3209_s1 + $0x1c0] sm:$0xff]  }
  0x4c   : > { %2493 = vmatpush3.bf16.msra.mxu1 %v2688_v38  ;;  %2462 = vmatprep.subr.bf16.mxu0 %v2689_v42  ;;  %v2703_v38 = vld [vmem:[%s3209_s1 + $0x188] sm:$0xff]  }
  0x4d   : > { %2494 = vmatprep.subr.bf16.mxu1 %v2690_v46 }
  0x4e   : > { %2415 = vmatmul.mubr.bf16.gmra.mrb[20].mxu0 %v2995_v51 }
  0x4f   : > { %2447 = vmatmul.mubr.bf16.gmra.mrb[20].mxu1 %v2842_v33  ;;  %2463 = vmatpush3.bf16.msra.mxu0 %v2689_v42  ;;  %v2707_v42 = vld [vmem:[%s3209_s1 + $0x198] sm:$0xff]  }
  0x50   : > { %2495 = vmatpush3.bf16.msra.mxu1 %v2690_v46  ;;  %2464 = vmatprep.subr.bf16.mxu0 %v2691_v53  ;;  %v2709_v46 = vld [vmem:[%s3209_s1 + $0x1a0] sm:$0xff]  }
  0x51   : > { %2496 = vmatprep.subr.bf16.mxu1 %v2692_v54  ;;  %2418 = vmatprep.mubr.bf16.mxu0 %v3008_v59 }
  0x52   : > { %2450 = vmatprep.mubr.bf16.mxu1 %v2854_v39 }
  0x53   : > { %2465 = vmatpush3.bf16.msra.mxu0 %v2691_v53  ;;  %v3130_v53 = vsel %vm645_vm1, %v3020_v2, %v3027_v5 }
  0x54   : > { %2497 = vmatpush3.bf16.msra.mxu1 %v2692_v54  ;;  %2466 = vmatprep.subr.bf16.mxu0 %v2693_v63  ;;  %v1181_v54 = vrot.slane %v2992_v50, 1  ;;  %v2717_v50 = vld [vmem:[%s3209_s1 + $0x1b8] sm:$0xff]  }
  0x55   : > { %2498 = vmatprep.subr.bf16.mxu1 %v2694_v1 }
  0x56   : > { %2419 = vmatmul.mubr.bf16.gmra.mrb[24].mxu0 %v3033_v10  ;;  %v1182_v60 = vsel %vm645_vm1, %v3027_v5, %v1181_v54 }
  0x57   : > { %2451 = vmatmul.mubr.bf16.gmra.mrb[24].mxu1 %v2865_v44  ;;  %2467 = vmatpush3.bf16.msra.mxu0 %v2693_v63  ;;  %v2719_v63 = vld [vmem:[%s3209_s1 + $0x200] sm:$0xff]  }
  0x58   : > { %2499 = vmatpush3.bf16.msra.mxu1 %v2694_v1  ;;  %2468 = vmatprep.subr.bf16.mxu0 %v2695_v16 }
  0x59   : > { %2500 = vmatprep.subr.bf16.mxu1 %v2696_v20  ;;  %2422 = vmatprep.mubr.bf16.mxu0 %v3052_v21 }
  0x5a   : > { %2454 = vmatprep.mubr.bf16.mxu1 %v2885_v56 }
  0x5b   : > { %2469 = vmatpush3.bf16.msra.mxu0 %v2695_v16 }
  0x5c   : > { %2501 = vmatpush3.bf16.msra.mxu1 %v2696_v20  ;;  %2470 = vmatprep.subr.bf16.mxu0 %v2697_v28 }
  0x5d   : > { %2502 = vmatprep.subr.bf16.mxu1 %v2698_v12 }
  0x5e   : > { %2423 = vmatmul.mubr.bf16.gmra.mrb[28].mxu0 %v662_v31 }
  0x5f   : > { %2455 = vmatmul.mubr.bf16.gmra.mrb[28].mxu1 %v2923_v15  ;;  %2471 = vmatpush3.bf16.msra.mxu0 %v2697_v28 }
  0x60   : > { %2503 = vmatpush3.bf16.msra.mxu1 %v2698_v12  ;;  %2472 = vmatprep.subr.bf16.mxu0 %v2699_v32 }
  0x61   : > { %2504 = vmatprep.subr.bf16.mxu1 %v2700_v34  ;;  %2474 = vmatprep.mubr.bf16.mxu0 %v2857_v40  ;;  %v2705_v40 = vld [vmem:[%s3209_s1 + $0x190] sm:$0xff]  }
  0x62   : > { %2506 = vmatprep.mubr.bf16.mxu1 %v2966_v36  ;;  %v2706_v36 = vld [vmem:[%s3209_s1 + $0x1d0] sm:$0xff]  }
  0x63   : > { %2473 = vmatpush3.bf16.msra.mxu0 %v2699_v32 }
  0x64   : > { %2505 = vmatpush3.bf16.msra.mxu1 %v2700_v34  ;;  %2522 = vmatprep.subr.bf16.mxu0 %v2701_v35 }
  0x65   : > { %2554 = vmatprep.subr.bf16.mxu1 %v2702_v37 }
  0x66   : > { %2475 = vmatmul.mubr.bf16.vlgmr.msra.gmra.mrb[32].mxu0 %v2869_v45 }
  0x67   : > { %2507 = vmatmul.mubr.bf16.vlgmr.msra.gmra.mrb[32].mxu1 %v2976_v13  ;;  %2523 = vmatpush3.bf16.msra.mxu0 %v2701_v35 }
  0x68   : > { %2555 = vmatpush3.bf16.msra.mxu1 %v2702_v37  ;;  %2524 = vmatprep.subr.bf16.mxu0 %v2703_v38 }
  0x69   : > { %2556 = vmatprep.subr.bf16.mxu1 %v2704_v41  ;;  %2478 = vmatprep.mubr.bf16.mxu0 %v2888_v57 }
  0x6a   : > { %2510 = vmatprep.mubr.bf16.mxu1 %v2995_v51 }
  0x6b   : > { %2525 = vmatpush3.bf16.msra.mxu0 %v2703_v38 }
  0x6c   : > { %2557 = vmatpush3.bf16.msra.mxu1 %v2704_v41  ;;  %2526 = vmatprep.subr.bf16.mxu0 %v2705_v40 }
  0x6d   : > { %2558 = vmatprep.subr.bf16.mxu1 %v2706_v36 }
  0x6e   : > { %2479 = vmatmul.mubr.bf16.gmra.mrb[36].mxu0 %v2899_v62 }
  0x6f   : > { %2511 = vmatmul.mubr.bf16.gmra.mrb[36].mxu1 %v3008_v59  ;;  %2527 = vmatpush3.bf16.msra.mxu0 %v2705_v40 }
  0x70   : > { %2559 = vmatpush3.bf16.msra.mxu1 %v2706_v36  ;;  %2528 = vmatprep.subr.bf16.mxu0 %v2707_v42 }
  0x71   : > { %2560 = vmatprep.subr.bf16.mxu1 %v2708_v43  ;;  %2482 = vmatprep.mubr.bf16.mxu0 %v2916_v8 }
  0x72   : > { %2514 = vmatprep.mubr.bf16.mxu1 %v3033_v10 }
  0x73   : > { %2529 = vmatpush3.bf16.msra.mxu0 %v2707_v42 }
  0x74   : > { %2561 = vmatpush3.bf16.msra.mxu1 %v2708_v43  ;;  %2530 = vmatprep.subr.bf16.mxu0 %v2709_v46 }
  0x75   : > { %2562 = vmatprep.subr.bf16.mxu1 %v2710_v47 }
  0x76   : > { %2483 = vmatmul.mubr.bf16.gmra.mrb[40].mxu0 %v2930_v17 }
  0x77   : > { %2515 = vmatmul.mubr.bf16.gmra.mrb[40].mxu1 %v3052_v21  ;;  %2531 = vmatpush3.bf16.msra.mxu0 %v2709_v46 }
  0x78   : > { %2563 = vmatpush3.bf16.msra.mxu1 %v2710_v47  ;;  %2532 = vmatprep.subr.bf16.mxu0 %v2711_v48 }
  0x79   : > { %2564 = vmatprep.subr.bf16.mxu1 %v2712_v49  ;;  %2486 = vmatprep.mubr.bf16.mxu0 %v2945_v27 }
  0x7a   : > { %2518 = vmatprep.mubr.bf16.mxu1 %v3130_v53 }
  0x7b   : > { %2533 = vmatpush3.bf16.msra.mxu0 %v2711_v48 }
  0x7c   : > { %2565 = vmatpush3.bf16.msra.mxu1 %v2712_v49  ;;  %2534 = vmatprep.subr.bf16.mxu0 %v2715_v55 }
  0x7d   : > { %2566 = vmatprep.subr.bf16.mxu1 %v2716_v58 }
  0x7e   : > { %2487 = vmatmul.mubr.bf16.gmra.mrb[44].mxu0 %v3023_v4 }
  0x7f   : > { %2519 = vmatmul.mubr.bf16.gmra.mrb[44].mxu1 %v1182_v60  ;;  %2535 = vmatpush3.bf16.msra.mxu0 %v2715_v55 }
  0x80   : > { %2567 = vmatpush3.bf16.msra.mxu1 %v2716_v58  ;;  %2536 = vmatprep.subr.bf16.mxu0 %v2717_v50 }
  0x81   : > { %2568 = vmatprep.subr.bf16.mxu1 %v2718_v61  ;;  %2538 = vmatprep.mubr.bf16.mxu0 %v2815_v14  ;;  %v2721_v14 = vld [vmem:[%s3209_s1 + $0x210] sm:$0xff]  }
  0x82   : > { %2570 = vmatprep.mubr.bf16.mxu1 %v2869_v45  ;;  %v2727_v45 = vld [vmem:[%s3209_s1 + $0x238] sm:$0xff]  }
  0x83   : > { %2537 = vmatpush3.bf16.msra.mxu0 %v2717_v50 }
  0x84   : > { %2569 = vmatpush3.bf16.msra.mxu1 %v2718_v61  ;;  %2586 = vmatprep.subr.bf16.mxu0 %v2719_v63 }
  0x85   : > { %2618 = vmatprep.subr.bf16.mxu1 %v2719_v63 }
  0x86   : > { %2539 = vmatmul.mubr.bf16.vlgmr.msra.gmra.mrb[48].mxu0 %v2833_v26  ;;  %v2722_v26 = vld [vmem:[%s3209_s1 + $0x218] sm:$0xff]  }
  0x87   : > { %2571 = vmatmul.mubr.bf16.vlgmr.msra.gmra.mrb[48].mxu1 %v2888_v57  ;;  %2587 = vmatpush3.bf16.msra.mxu0 %v2719_v63 }
  0x88   : > { %2626 = vmatpush3.bf16.msra.mxu1 %v2719_v63  ;;  %2588 = vmatprep.subr.bf16.mxu0 %v2720_v0 }
  0x89   : > { %2619 = vmatprep.subr.bf16.mxu1 %v2720_v0  ;;  %2542 = vmatprep.mubr.bf16.mxu0 %v2842_v33  ;;  %v2723_v33 = vld [vmem:[%s3209_s1 + $0x220] sm:$0xff]  }
  0x8a   : > { %2574 = vmatprep.mubr.bf16.mxu1 %v2899_v62 }
  0x8b   : > { %2589 = vmatpush3.bf16.msra.mxu0 %v2720_v0 }
  0x8c   : > { %2627 = vmatpush3.bf16.msra.mxu1 %v2720_v0  ;;  %2590 = vmatprep.subr.bf16.mxu0 %v2721_v14 }
  0x8d   : > { %2620 = vmatprep.subr.bf16.mxu1 %v2721_v14 }
  0x8e   : > { %2543 = vmatmul.mubr.bf16.gmra.mrb[52].mxu0 %v2854_v39  ;;  %v2724_v39 = vld [vmem:[%s3209_s1 + $0x228] sm:$0xff]  }
  0x8f   : > { %2575 = vmatmul.mubr.bf16.gmra.mrb[52].mxu1 %v2916_v8  ;;  %2591 = vmatpush3.bf16.msra.mxu0 %v2721_v14 }
  0x90   : > { %2628 = vmatpush3.bf16.msra.mxu1 %v2721_v14  ;;  %2592 = vmatprep.subr.bf16.mxu0 %v2722_v26 }
  0x91   : > { %2621 = vmatprep.subr.bf16.mxu1 %v2722_v26  ;;  %2546 = vmatprep.mubr.bf16.mxu0 %v2865_v44  ;;  %v2726_v44 = vld [vmem:[%s3209_s1 + $0x230] sm:$0xff]  }
  0x92   : > { %2578 = vmatprep.mubr.bf16.mxu1 %v2930_v17 }
  0x93   : > { %2593 = vmatpush3.bf16.msra.mxu0 %v2722_v26 }
  0x94   : > { %2629 = vmatpush3.bf16.msra.mxu1 %v2722_v26  ;;  %2594 = vmatprep.subr.bf16.mxu0 %v2723_v33 }
  0x95   : > { %2622 = vmatprep.subr.bf16.mxu1 %v2723_v33 }
  0x96   : > { %2547 = vmatmul.mubr.bf16.gmra.mrb[56].mxu0 %v2885_v56 }
  0x97   : > { %2579 = vmatmul.mubr.bf16.gmra.mrb[56].mxu1 %v2945_v27  ;;  %2595 = vmatpush3.bf16.msra.mxu0 %v2723_v33 }
  0x98   : > { %2630 = vmatpush3.bf16.msra.mxu1 %v2723_v33  ;;  %2596 = vmatprep.subr.bf16.mxu0 %v2724_v39 }
  0x99   : > { %2623 = vmatprep.subr.bf16.mxu1 %v2724_v39  ;;  %2550 = vmatprep.mubr.bf16.mxu0 %v2923_v15 }
  0x9a   : > { %2582 = vmatprep.mubr.bf16.mxu1 %v3036_v11 }
  0x9b   : > { %2597 = vmatpush3.bf16.msra.mxu0 %v2724_v39 }
  0x9c   : > { %2631 = vmatpush3.bf16.msra.mxu1 %v2724_v39  ;;  %2598 = vmatprep.subr.bf16.mxu0 %v2726_v44 }
  0x9d   : > { %2624 = vmatprep.subr.bf16.mxu1 %v2726_v44 }
  0x9e   : > { %2551 = vmatmul.mubr.bf16.gmra.mrb[60].mxu0 %v2997_v52 }
  0x9f   : > { %2583 = vmatmul.mubr.bf16.gmra.mrb[60].mxu1 %v3068_v3  ;;  %2599 = vmatpush3.bf16.msra.mxu0 %v2726_v44 }
  0xa0   : > { %2632 = vmatpush3.bf16.msra.mxu1 %v2726_v44  ;;  %2600 = vmatprep.subr.bf16.mxu0 %v2727_v45 }
  0xa1   : > { %2625 = vmatprep.subr.bf16.mxu1 %v2727_v45  ;;  %2602 = vmatprep.mubr.bf16.mxu0 %v2976_v13 }
  0xa2   : > { %2610 = vmatprep.mubr.bf16.mxu1 %v3052_v21 }
  0xa3   : > { %2601 = vmatpush3.bf16.msra.mxu0 %v2727_v45 }
  0xa4   : > { %2633 = vmatpush3.bf16.msra.mxu1 %v2727_v45 }
  0xa6   : > { %2603 = vmatmul.mubr.bf16.vlgmr.msra.gmra.mrb[64].mxu0 %v2995_v51 }
  0xa7   : > { %2611 = vmatmul.mubr.bf16.vlgmr.msra.gmra.mrb[64].mxu1 %v3130_v53  ;;  %2606 = vmatprep.mubr.bf16.mxu0 %v3008_v59 }
  0xa8   : > { %2614 = vmatprep.mubr.bf16.mxu1 %v3044_v19 }
  0xae   : > { %2607 = vmatmul.mubr.bf16.gmra.mrb[68].mxu0 %v3033_v10 }
  0xaf   : > { %2615 = vmatmul.mubr.bf16.gmra.mrb[68].mxu1 %v3064_v30 }
  0xf9   : > { %v2348_v56 = vpop.f32.mrb[0].mxu0 }
  0xfa   : > { %v2380_v57 = vpop.f32.mrb[0].mxu1  ;;  %v428_v62 = vpop.f32.mrb[1].mxu0 }
  0xfb   : > { %v581_v8 = vadd.f32 %v2380_v57, %v2348_v56  ;;  %v573_v15 = vpop.f32.mrb[1].mxu1  ;;  %v2349_v17 = vpop.f32.mrb[2].mxu0 }
  0xfc   : > { %v574_v27 = vadd.f32 %v573_v15, %v428_v62  ;;  %v2381_v13 = vpop.f32.mrb[2].mxu1  ;;  %v431_v52 = vpop.f32.mrb[3].mxu0 }
  0xfd   : > { %v576_v51 = vpop.f32.mrb[3].mxu1 }
 0x101   : > { %v2352_v1 = vpop.f32.mrb[4].mxu0 }
 0x102   : > { %v2384_v2 = vpop.f32.mrb[4].mxu1  ;;  %v442_v4 = vpop.f32.mrb[5].mxu0 }
 0x103   : > { %v595_v59 = vadd.f32 %v2384_v2, %v2352_v1  ;;  %v587_v5 = vpop.f32.mrb[5].mxu1  ;;  %v2353_v6 = vpop.f32.mrb[6].mxu0 }
 0x104   : > { %v588_v7 = vadd.f32 %v587_v5, %v442_v4  ;;  %v2385_v9 = vpop.f32.mrb[6].mxu1  ;;  %v445_v10 = vpop.f32.mrb[7].mxu0 }
 0x105   : > { %v590_v11 = vpop.f32.mrb[7].mxu1 }
 0x109   : > { %v2356_v16 = vpop.f32.mrb[8].mxu0 }
 0x10a   : > { %v2388_v18 = vpop.f32.mrb[8].mxu1  ;;  %v456_v19 = vpop.f32.mrb[9].mxu0 }
 0x10b   : > { %v609_v20 = vadd.f32 %v2388_v18, %v2356_v16  ;;  %v601_v21 = vpop.f32.mrb[9].mxu1  ;;  %v2357_v22 = vpop.f32.mrb[10].mxu0 }
 0x10c   : > { %v602_v23 = vadd.f32 %v601_v21, %v456_v19  ;;  %v2389_v24 = vpop.f32.mrb[10].mxu1  ;;  %v459_v25 = vpop.f32.mrb[11].mxu0 }
 0x10d   : > { %v604_v28 = vpop.f32.mrb[11].mxu1 }
 0x111   : > { %v2360_v29 = vpop.f32.mrb[12].mxu0 }
 0x112   : > { %v2392_v12 = vpop.f32.mrb[12].mxu1  ;;  %v470_v30 = vpop.f32.mrb[13].mxu0 }
 0x113   : > { %v623_v3 = vadd.f32 %v2392_v12, %v2360_v29  ;;  %v615_v31 = vpop.f32.mrb[13].mxu1  ;;  %v2361_v32 = vpop.f32.mrb[14].mxu0 }
 0x114   : > { %v616_v34 = vadd.f32 %v615_v31, %v470_v30  ;;  %v2393_v35 = vpop.f32.mrb[14].mxu1  ;;  %v473_v37 = vpop.f32.mrb[15].mxu0 }
 0x115   : > { %v618_v38 = vpop.f32.mrb[15].mxu1 }
 0x119   : > { %v2412_v41 = vpop.f32.mrb[16].mxu0 }
 0x11a   : > { %v809_v40 = vadd.f32 %v2412_v41, %v581_v8  ;;  %v2444_v36 = vpop.f32.mrb[16].mxu1  ;;  %v753_v42 = vpop.f32.mrb[17].mxu0 }
 0x11b   : > { %v808_v43 = vadd.f32 %v753_v42, %v574_v27  ;;  %v919_v46 = vpop.f32.mrb[17].mxu1  ;;  %v2413_v47 = vpop.f32.mrb[18].mxu0 }
 0x11c   : > { %v975_v48 = vadd.f32 %v2444_v36, %v809_v40  ;;  %v2445_v49 = vpop.f32.mrb[18].mxu1  ;;  %v756_v53 = vpop.f32.mrb[19].mxu0 }
 0x11d   : > { %v974_v54 = vadd.f32 %v919_v46, %v808_v43  ;;  %v922_v55 = vpop.f32.mrb[19].mxu1 }
 0x121   : > { %v2416_v58 = vpop.f32.mrb[20].mxu0 }
 0x122   : > { %v811_v60 = vadd.f32 %v2416_v58, %v595_v59  ;;  %v2448_v50 = vpop.f32.mrb[20].mxu1  ;;  %v767_v61 = vpop.f32.mrb[21].mxu0 }
 0x123   : > { %v810_v63 = vadd.f32 %v767_v61, %v588_v7  ;;  %v933_v0 = vpop.f32.mrb[21].mxu1  ;;  %v2417_v14 = vpop.f32.mrb[22].mxu0 }
 0x124   : > { %v977_v26 = vadd.f32 %v2448_v50, %v811_v60  ;;  %v2449_v33 = vpop.f32.mrb[22].mxu1  ;;  %v770_v39 = vpop.f32.mrb[23].mxu0 }
 0x125   : > { %v976_v44 = vadd.f32 %v933_v0, %v810_v63  ;;  %v936_v45 = vpop.f32.mrb[23].mxu1 }
 0x129   : > { %v2420_v56 = vpop.f32.mrb[24].mxu0 }
 0x12a   : > { %v813_v57 = vadd.f32 %v2420_v56, %v609_v20  ;;  %v2452_v62 = vpop.f32.mrb[24].mxu1  ;;  %v781_v8 = vpop.f32.mrb[25].mxu0 }
 0x12b   : > { %v812_v15 = vadd.f32 %v781_v8, %v602_v23  ;;  %v947_v17 = vpop.f32.mrb[25].mxu1  ;;  %v2421_v27 = vpop.f32.mrb[26].mxu0 }
 0x12c   : > { %v979_v13 = vadd.f32 %v2452_v62, %v813_v57  ;;  %v2453_v52 = vpop.f32.mrb[26].mxu1  ;;  %v784_v51 = vpop.f32.mrb[27].mxu0 }
 0x12d   : > { %v978_v1 = vadd.f32 %v947_v17, %v812_v15  ;;  %v950_v2 = vpop.f32.mrb[27].mxu1 }
 0x131   : > { %v2424_v4 = vpop.f32.mrb[28].mxu0 }
 0x132   : > { %v815_v59 = vadd.f32 %v2424_v4, %v623_v3  ;;  %v2456_v5 = vpop.f32.mrb[28].mxu1  ;;  %v795_v6 = vpop.f32.mrb[29].mxu0 }
 0x133   : > { %v814_v7 = vadd.f32 %v795_v6, %v616_v34  ;;  %v961_v9 = vpop.f32.mrb[29].mxu1  ;;  %v2425_v10 = vpop.f32.mrb[30].mxu0 }
 0x134   : > { %v981_v11 = vadd.f32 %v2456_v5, %v815_v59  ;;  %v2457_v16 = vpop.f32.mrb[30].mxu1  ;;  %v798_v18 = vpop.f32.mrb[31].mxu0 }
 0x135   : > { %v980_v19 = vadd.f32 %v961_v9, %v814_v7  ;;  %v964_v20 = vpop.f32.mrb[31].mxu1 }
 0x139   : > { %v2476_v21 = vpop.f32.mrb[32].mxu0 }
 0x13a   : > { %v1155_v22 = vadd.f32 %v2476_v21, %v975_v48  ;;  %v2508_v23 = vpop.f32.mrb[32].mxu1  ;;  %v1099_v24 = vpop.f32.mrb[33].mxu0 }
 0x13b   : > { %v1154_v25 = vadd.f32 %v1099_v24, %v974_v54  ;;  %v1267_v28 = vpop.f32.mrb[33].mxu1  ;;  %v2477_v29 = vpop.f32.mrb[34].mxu0 }
 0x13c   : > { %v1323_v12 = vadd.f32 %v2508_v23, %v1155_v22  ;;  %v2509_v30 = vpop.f32.mrb[34].mxu1  ;;  %v1102_v3 = vpop.f32.mrb[35].mxu0 }
 0x13d   : > { %v1322_v31 = vadd.f32 %v1267_v28, %v1154_v25  ;;  %v1270_v32 = vpop.f32.mrb[35].mxu1 }
 0x141   : > { %v2480_v34 = vpop.f32.mrb[36].mxu0 }
 0x142   : > { %v1157_v35 = vadd.f32 %v2480_v34, %v977_v26  ;;  %v2512_v37 = vpop.f32.mrb[36].mxu1  ;;  %v1113_v38 = vpop.f32.mrb[37].mxu0 }
 0x143   : > { %v1156_v41 = vadd.f32 %v1113_v38, %v976_v44  ;;  %v1281_v40 = vpop.f32.mrb[37].mxu1  ;;  %v2481_v36 = vpop.f32.mrb[38].mxu0 }
 0x144   : > { %v1325_v42 = vadd.f32 %v2512_v37, %v1157_v35  ;;  %v2513_v43 = vpop.f32.mrb[38].mxu1  ;;  %v1116_v46 = vpop.f32.mrb[39].mxu0 }
 0x145   : > { %v1324_v47 = vadd.f32 %v1281_v40, %v1156_v41  ;;  %v1284_v48 = vpop.f32.mrb[39].mxu1 }
 0x149   : > { %v2484_v49 = vpop.f32.mrb[40].mxu0 }
 0x14a   : > { %v1159_v53 = vadd.f32 %v2484_v49, %v979_v13  ;;  %v2516_v54 = vpop.f32.mrb[40].mxu1  ;;  %v1127_v55 = vpop.f32.mrb[41].mxu0 }
 0x14b   : > { %v1158_v58 = vadd.f32 %v1127_v55, %v978_v1  ;;  %v1295_v60 = vpop.f32.mrb[41].mxu1  ;;  %v2485_v50 = vpop.f32.mrb[42].mxu0 }
 0x14c   : > { %v1327_v61 = vadd.f32 %v2516_v54, %v1159_v53  ;;  %v2517_v63 = vpop.f32.mrb[42].mxu1  ;;  %v1130_v0 = vpop.f32.mrb[43].mxu0 }
 0x14d   : > { %v1326_v14 = vadd.f32 %v1295_v60, %v1158_v58  ;;  %v1298_v26 = vpop.f32.mrb[43].mxu1  ;;  %v2159_v0 = vld [vmem:[%s3210_s2] ss:$0 sm:$0xff] }
 0x151   : > { %v2488_v33 = vpop.f32.mrb[44].mxu0 }
 0x152   : > { %v1161_v39 = vadd.f32 %v2488_v33, %v981_v11  ;;  %v2520_v44 = vpop.f32.mrb[44].mxu1  ;;  %v1141_v45 = vpop.f32.mrb[45].mxu0 }
 0x153   : > { %v1160_v56 = vadd.f32 %v1141_v45, %v980_v19  ;;  %v1309_v57 = vpop.f32.mrb[45].mxu1  ;;  %v2489_v62 = vpop.f32.mrb[46].mxu0 }
 0x154   : > { %v1329_v8 = vadd.f32 %v2520_v44, %v1161_v39  ;;  %v2521_v15 = vpop.f32.mrb[46].mxu1  ;;  %v1144_v17 = vpop.f32.mrb[47].mxu0 }
 0x155   : > { %v1328_v27 = vadd.f32 %v1309_v57, %v1160_v56  ;;  %v1312_v13 = vpop.f32.mrb[47].mxu1 }
 0x159   : > { %v2540_v52 = vpop.f32.mrb[48].mxu0 }
 0x15a   : > { %v1489_v51 = vadd.f32 %v2540_v52, %v1323_v12  ;;  %v2572_v1 = vpop.f32.mrb[48].mxu1  ;;  %v1433_v2 = vpop.f32.mrb[49].mxu0 }
 0x15b   : > { %v1488_v4 = vadd.f32 %v1433_v2, %v1322_v31  ;;  %v1613_v59 = vpop.f32.mrb[49].mxu1  ;;  %v2541_v5 = vpop.f32.mrb[50].mxu0 }
 0x15c   : > { %v1669_v6 = vadd.f32 %v2572_v1, %v1489_v51  ;;  %v2573_v7 = vpop.f32.mrb[50].mxu1  ;;  %v1436_v9 = vpop.f32.mrb[51].mxu0 }
 0x15d   : > { %v1668_v10 = vadd.f32 %v1613_v59, %v1488_v4  ;;  %v1616_v11 = vpop.f32.mrb[51].mxu1 }
 0x161   : > { %v2544_v16 = vpop.f32.mrb[52].mxu0 }
 0x162   : > { %v1491_v18 = vadd.f32 %v2544_v16, %v1325_v42  ;;  %v2576_v19 = vpop.f32.mrb[52].mxu1  ;;  %v1447_v20 = vpop.f32.mrb[53].mxu0 }
 0x163   : > { %v1490_v21 = vadd.f32 %v1447_v20, %v1324_v47  ;;  %v1627_v22 = vpop.f32.mrb[53].mxu1  ;;  %v2545_v23 = vpop.f32.mrb[54].mxu0 }
 0x164   : > { %v1671_v24 = vadd.f32 %v2576_v19, %v1491_v18  ;;  %v2577_v25 = vpop.f32.mrb[54].mxu1  ;;  %v1450_v28 = vpop.f32.mrb[55].mxu0 }
 0x165   : > { %v1670_v29 = vadd.f32 %v1627_v22, %v1490_v21  ;;  %v1630_v12 = vpop.f32.mrb[55].mxu1 }
 0x169   : > { %v2548_v30 = vpop.f32.mrb[56].mxu0 }
 0x16a   : > { %v1493_v3 = vadd.f32 %v2548_v30, %v1327_v61  ;;  %v2580_v31 = vpop.f32.mrb[56].mxu1  ;;  %v1461_v32 = vpop.f32.mrb[57].mxu0 }
 0x16b   : > { %v1492_v34 = vadd.f32 %v1461_v32, %v1326_v14  ;;  %v1641_v35 = vpop.f32.mrb[57].mxu1  ;;  %v2549_v37 = vpop.f32.mrb[58].mxu0 }
 0x16c   : > { %v1673_v38 = vadd.f32 %v2580_v31, %v1493_v3  ;;  %v2581_v41 = vpop.f32.mrb[58].mxu1  ;;  %v1464_v40 = vpop.f32.mrb[59].mxu0 }
 0x16d   : > { %v1672_v36 = vadd.f32 %v1641_v35, %v1492_v34  ;;  %v1644_v42 = vpop.f32.mrb[59].mxu1 }
 0x171   : > { %v2552_v43 = vpop.f32.mrb[60].mxu0 }
 0x172   : > { %v1495_v46 = vadd.f32 %v2552_v43, %v1329_v8  ;;  %v2584_v47 = vpop.f32.mrb[60].mxu1  ;;  %v1475_v48 = vpop.f32.mrb[61].mxu0 }
 0x173   : > { %v1494_v49 = vadd.f32 %v1475_v48, %v1328_v27  ;;  %v1655_v53 = vpop.f32.mrb[61].mxu1  ;;  %v2553_v54 = vpop.f32.mrb[62].mxu0 }
 0x174   : > { %v1675_v55 = vadd.f32 %v2584_v47, %v1495_v46  ;;  %v2585_v58 = vpop.f32.mrb[62].mxu1  ;;  %v1478_v60 = vpop.f32.mrb[63].mxu0 }
 0x175   : > { %v1674_v50 = vadd.f32 %v1655_v53, %v1494_v49  ;;  %v1658_v61 = vpop.f32.mrb[63].mxu1 }
 0x179   : > { %v2604_v63 = vpop.f32.mrb[64].mxu0 }
 0x17a   : > { %v1837_v14 = vadd.f32 %v2604_v63, %v1669_v6  ;;  %v2612_v26 = vpop.f32.mrb[64].mxu1  ;;  %v1781_v33 = vpop.f32.mrb[65].mxu0 }
 0x17b   : > { %v1841_v39 = vadd.f32 %v2612_v26, %v1673_v38  ;;  %v1836_v44 = vadd.f32 %v1781_v33, %v1668_v10  ;;  %v1809_v45 = vpop.f32.mrb[65].mxu1  ;;  %v2605_v56 = vpop.f32.mrb[66].mxu0 }
 0x17c   : > { %v1852_v57 = vadd.f32 %v2159_v0, %v1837_v14  ;;  %v1840_v62 = vadd.f32 %v1809_v45, %v1672_v36  ;;  %v2613_v8 = vpop.f32.mrb[66].mxu1  ;;  %v1784_v15 = vpop.f32.mrb[67].mxu0 }
 0x17d   : > { %v1856_v17 = vadd.f32 %v2159_v0, %v1841_v39  ;;  %v1851_v27 = vadd.f32 %v2159_v0, %v1836_v44  ;;  %v1812_v13 = vpop.f32.mrb[67].mxu1 }
 0x17e   : > { %v1860_v52 = vmax.f32 %v1852_v57, 0.0  ;;  %v1855_v51 = vadd.f32 %v2159_v0, %v1840_v62 }
 0x17f   : > { %v1864_v1 = vmax.f32 %v1856_v17, 0.0  ;;  %v1859_v2 = vmax.f32 %v1851_v27, 0.0 }
 0x180   : > { %v1863_v4 = vmax.f32 %v1855_v51, 0.0 }
 0x181   : > { %v2166_v59 = vpack.c.bf16 %v1860_v52, %v1859_v2  ;;  %v2608_v5 = vpop.f32.mrb[68].mxu0 }
 0x182   : > { %v2176_v6 = vpack.c.bf16 %v1864_v1, %v1863_v4  ;;  %v1839_v7 = vadd.f32 %v2608_v5, %v1671_v24  ;;  %v2616_v9 = vpop.f32.mrb[68].mxu1  ;;  %v1795_v10 = vpop.f32.mrb[69].mxu0 }
 0x183   : > { %2167 = vst [vmem:[%s170_s19] sm:$0xff] %v2166_v59   ;;  %v1843_v11 = vadd.f32 %v2616_v9, %v1675_v55  ;;  %v1838_v16 = vadd.f32 %v1795_v10, %v1670_v29  ;;  %v1823_v18 = vpop.f32.mrb[69].mxu1  ;;  %v2609_v19 = vpop.f32.mrb[70].mxu0 }
 0x184   : > { %2184 = vst [vmem:[%s170_s19 + $0x10] sm:$0xff] %v2176_v6   ;;  %v1854_v20 = vadd.f32 %v2159_v0, %v1839_v7  ;;  %v1842_v21 = vadd.f32 %v1823_v18, %v1674_v50  ;;  %v2617_v22 = vpop.f32.mrb[70].mxu1  ;;  %v1798_v23 = vpop.f32.mrb[71].mxu0 }
 0x185   : > { %v1858_v25 = vadd.f32 %v2159_v0, %v1843_v11  ;;  %v1853_v28 = vadd.f32 %v2159_v0, %v1838_v16  ;;  %v1826_v12 = vpop.f32.mrb[71].mxu1 }
 0x186   : > { %v1862_v30 = vmax.f32 %v1854_v20, 0.0  ;;  %v1857_v3 = vadd.f32 %v2159_v0, %v1842_v21 }
 0x187   : > { %v1866_v31 = vmax.f32 %v1858_v25, 0.0  ;;  %v1861_v32 = vmax.f32 %v1853_v28, 0.0 }
 0x188   : > { %v1865_v24 = vmax.f32 %v1857_v3, 0.0 }
 0x189   : > { %v2171_v34 = vpack.c.bf16 %v1862_v30, %v1861_v32 }
 0x18a   : > { %v2181_v35 = vpack.c.bf16 %v1866_v31, %v1865_v24 }
 0x18b   : > { %2183 = vst [vmem:[%s170_s19 + $0x8] sm:$0xff] %v2171_v34  }
 0x18c   : > { %2185 = vst [vmem:[%s170_s19 + $0x18] sm:$0xff] %v2181_v35  }
 0x18d PF: > { %s13_s12 = sadd.s32 1, %s2734_s12  }
 0x18e   : > { %p10_p4 = scmp.ge.s32.totalorder %s13_s12, 4  }
 0x190   :  { %12 = sbr.rel (!%p10_p4) target bundleno = 1 (0x1), region = 70 }

// kernel: _lambda_.56
= control target key start
LH: loop header
LB: loop body
LE: loop exit
PB: predicated region body
PF: predicated region fallthrough
CT: control target
= control target key end

     0   :  { %s1047_s1 = inlined_call_operand.vmem [shape: bf16[256,512], index: 1, kind: input, shape index: {}]   ;;  %s1048_s0 = inlined_call_operand.vmem [shape: bf16[32,256], index: 0, kind: input, shape index: {}]   ;;  %s1049_s2 = inlined_call_operand.vmem [shape: f32[1,512], index: 2, kind: input, shape index: {}]   ;;  %s1050_s3 = inlined_call_operand.vmem [shape: bf16[32,512], index: 3, kind: output, shape index: {}]  }
   0x1   :  { %v694_v0 = vld [vmem:[%s1047_s1 + $0x4] ss:$16 sps:$4 sm:$0xff]   ;;  %v696_v1 = vld [vmem:[%s1047_s1 + $0xc] ss:$16 sps:$4 sm:$0xff]   ;;  %v698_v2 = vld [vmem:[%s1047_s1] ss:$16 sps:$4 sm:$0xff]  }
   0x2   :  { %444 = vmatprep.subr.bf16.mxu0 %v694_v0  ;;  %v699_v3 = vld [vmem:[%s1047_s1 + $0x8] ss:$16 sps:$4 sm:$0xff]   ;;  %497 = vmatprep.subr.bf16.mxu1 %v696_v1  ;;  %v700_v4 = vld [vmem:[%s1047_s1 + $0x24] ss:$16 sps:$4 sm:$0xff]   ;;  %v702_v5 = vld [vmem:[%s1047_s1 + $0x2c] ss:$16 sps:$4 sm:$0xff]  }
   0x3   :  { %445 = vmatpush1.bf16.msra.mxu0 %v698_v2  ;;  %498 = vmatpush1.bf16.msra.mxu1 %v699_v3  ;;  %v704_v6 = vld [vmem:[%s1047_s1 + $0x20] ss:$16 sps:$4 sm:$0xff]   ;;  %v705_v7 = vld [vmem:[%s1047_s1 + $0x28] ss:$16 sps:$4 sm:$0xff]   ;;  %v706_v8 = vld [vmem:[%s1047_s1 + $0x44] ss:$16 sps:$4 sm:$0xff]  }
   0x4   :  { %446 = vmatprep.subr.bf16.mxu0 %v700_v4  ;;  %499 = vmatprep.subr.bf16.mxu1 %v702_v5  ;;  %v708_v9 = vld [vmem:[%s1047_s1 + $0x4c] ss:$16 sps:$4 sm:$0xff]   ;;  %v710_v10 = vld [vmem:[%s1047_s1 + $0x40] ss:$16 sps:$4 sm:$0xff]   ;;  %v711_v11 = vld [vmem:[%s1047_s1 + $0x48] ss:$16 sps:$4 sm:$0xff]   ;;  %v84_v4 = vlaneseq }
   0x5   :  { %v712_v12 = vld [vmem:[%s1047_s1 + $0x64] ss:$16 sps:$4 sm:$0xff]   ;;  %v714_v13 = vld [vmem:[%s1047_s1 + $0x6c] ss:$16 sps:$4 sm:$0xff]   ;;  %v716_v14 = vld [vmem:[%s1047_s1 + $0x60] ss:$16 sps:$4 sm:$0xff]  }
   0x6   :  { %v717_v15 = vld [vmem:[%s1047_s1 + $0x68] ss:$16 sps:$4 sm:$0xff]   ;;  %v718_v16 = vld [vmem:[%s1047_s1 + $0x84] ss:$16 sps:$4 sm:$0xff]   ;;  %v720_v17 = vld [vmem:[%s1047_s1 + $0x8c] ss:$16 sps:$4 sm:$0xff]  }
   0x7   :  { %447 = vmatpush1.bf16.msra.mxu0 %v704_v6  ;;  %500 = vmatpush1.bf16.msra.mxu1 %v705_v7  ;;  %v722_v18 = vld [vmem:[%s1047_s1 + $0x80] ss:$16 sps:$4 sm:$0xff]   ;;  %v723_v19 = vld [vmem:[%s1047_s1 + $0x88] ss:$16 sps:$4 sm:$0xff]   ;;  %v724_v20 = vld [vmem:[%s1047_s1 + $0xa4] ss:$16 sps:$4 sm:$0xff]  }
   0x8   :  { %448 = vmatprep.subr.bf16.mxu0 %v706_v8  ;;  %501 = vmatprep.subr.bf16.mxu1 %v708_v9  ;;  %v726_v21 = vld [vmem:[%s1047_s1 + $0xac] ss:$16 sps:$4 sm:$0xff]   ;;  %v728_v22 = vld [vmem:[%s1047_s1 + $0xa0] ss:$16 sps:$4 sm:$0xff]   ;;  %v729_v23 = vld [vmem:[%s1047_s1 + $0xa8] ss:$16 sps:$4 sm:$0xff]  }
   0x9   :  { %v730_v24 = vld [vmem:[%s1047_s1 + $0xc4] ss:$16 sps:$4 sm:$0xff]   ;;  %v732_v25 = vld [vmem:[%s1047_s1 + $0xcc] ss:$16 sps:$4 sm:$0xff]   ;;  %v734_v26 = vld [vmem:[%s1047_s1 + $0xc0] ss:$16 sps:$4 sm:$0xff]  }
   0xa   :  { %v735_v27 = vld [vmem:[%s1047_s1 + $0xc8] ss:$16 sps:$4 sm:$0xff]   ;;  %v736_v28 = vld [vmem:[%s1047_s1 + $0xe4] ss:$16 sps:$4 sm:$0xff]   ;;  %v738_v29 = vld [vmem:[%s1047_s1 + $0xec] ss:$16 sps:$4 sm:$0xff]  }
   0xb   :  { %449 = vmatpush1.bf16.msra.mxu0 %v710_v10  ;;  %502 = vmatpush1.bf16.msra.mxu1 %v711_v11  ;;  %v740_v30 = vld [vmem:[%s1047_s1 + $0xe0] ss:$16 sps:$4 sm:$0xff]   ;;  %v741_v31 = vld [vmem:[%s1047_s1 + $0xe8] ss:$16 sps:$4 sm:$0xff]   ;;  %v742_v32 = vld [vmem:[%s1047_s1 + $0x104] ss:$16 sps:$4 sm:$0xff]  }
   0xc   :  { %450 = vmatprep.subr.bf16.mxu0 %v712_v12  ;;  %503 = vmatprep.subr.bf16.mxu1 %v714_v13  ;;  %v744_v33 = vld [vmem:[%s1047_s1 + $0x10c] ss:$16 sps:$4 sm:$0xff]   ;;  %v746_v34 = vld [vmem:[%s1047_s1 + $0x100] ss:$16 sps:$4 sm:$0xff]   ;;  %v747_v35 = vld [vmem:[%s1047_s1 + $0x108] ss:$16 sps:$4 sm:$0xff]  }
   0xd   :  { %v748_v36 = vld [vmem:[%s1047_s1 + $0x124] ss:$16 sps:$4 sm:$0xff]   ;;  %v750_v37 = vld [vmem:[%s1047_s1 + $0x12c] ss:$16 sps:$4 sm:$0xff]   ;;  %v752_v38 = vld [vmem:[%s1047_s1 + $0x120] ss:$16 sps:$4 sm:$0xff]  }
   0xe   :  { %v753_v39 = vld [vmem:[%s1047_s1 + $0x128] ss:$16 sps:$4 sm:$0xff]   ;;  %v754_v40 = vld [vmem:[%s1047_s1 + $0x144] ss:$16 sps:$4 sm:$0xff]   ;;  %v756_v41 = vld [vmem:[%s1047_s1 + $0x14c] ss:$16 sps:$4 sm:$0xff]  }
   0xf   :  { %451 = vmatpush1.bf16.msra.mxu0 %v716_v14  ;;  %504 = vmatpush1.bf16.msra.mxu1 %v717_v15  ;;  %v758_v42 = vld [vmem:[%s1047_s1 + $0x140] ss:$16 sps:$4 sm:$0xff]   ;;  %v759_v43 = vld [vmem:[%s1047_s1 + $0x148] ss:$16 sps:$4 sm:$0xff]   ;;  %v760_v44 = vld [vmem:[%s1047_s1 + $0x164] ss:$16 sps:$4 sm:$0xff]  }
  0x10   :  { %452 = vmatprep.subr.bf16.mxu0 %v718_v16  ;;  %505 = vmatprep.subr.bf16.mxu1 %v720_v17  ;;  %v762_v45 = vld [vmem:[%s1047_s1 + $0x16c] ss:$16 sps:$4 sm:$0xff]   ;;  %v764_v46 = vld [vmem:[%s1047_s1 + $0x160] ss:$16 sps:$4 sm:$0xff]   ;;  %v765_v48 = vld [vmem:[%s1047_s1 + $0x168] ss:$16 sps:$4 sm:$0xff]  }
  0x11   :  { %v792_v47 = vld [vmem:[%s1048_s0 + $0x4] ss:$8 sps:$4 sm:$0xff]   ;;  %v770_v51 = vld [vmem:[%s1047_s1 + $0x180] ss:$16 sps:$4 sm:$0xff]   ;;  %v771_v52 = vld [vmem:[%s1047_s1 + $0x188] ss:$16 sps:$4 sm:$0xff]  }
  0x12   :  { %v766_v49 = vld [vmem:[%s1047_s1 + $0x184] ss:$16 sps:$4 sm:$0xff]   ;;  %v768_v50 = vld [vmem:[%s1047_s1 + $0x18c] ss:$16 sps:$4 sm:$0xff]   ;;  %476 = vmatprep.mubr.bf16.mxu0 %v792_v47  ;;  %529 = vmatprep.mubr.bf16.mxu1 %v792_v47  ;;  %v776_v55 = vld [vmem:[%s1047_s1 + $0x1a0] ss:$16 sps:$4 sm:$0xff]  }
  0x13   :  { %453 = vmatpush1.bf16.msra.mxu0 %v722_v18  ;;  %506 = vmatpush1.bf16.msra.mxu1 %v723_v19  ;;  %v772_v53 = vld [vmem:[%s1047_s1 + $0x1a4] ss:$16 sps:$4 sm:$0xff]   ;;  %v774_v54 = vld [vmem:[%s1047_s1 + $0x1ac] ss:$16 sps:$4 sm:$0xff]   ;;  %v777_v56 = vld [vmem:[%s1047_s1 + $0x1a8] ss:$16 sps:$4 sm:$0xff]  }
  0x14   :  { %454 = vmatprep.subr.bf16.mxu0 %v724_v20  ;;  %507 = vmatprep.subr.bf16.mxu1 %v726_v21  ;;  %v778_v57 = vld [vmem:[%s1047_s1 + $0x1c4] ss:$16 sps:$4 sm:$0xff]   ;;  %v780_v58 = vld [vmem:[%s1047_s1 + $0x1cc] ss:$16 sps:$4 sm:$0xff]   ;;  %v782_v59 = vld [vmem:[%s1047_s1 + $0x1c0] ss:$16 sps:$4 sm:$0xff]  }
  0x15   :  { %v783_v60 = vld [vmem:[%s1047_s1 + $0x1c8] ss:$16 sps:$4 sm:$0xff]   ;;  %v784_v61 = vld [vmem:[%s1047_s1 + $0x1e4] ss:$16 sps:$4 sm:$0xff]   ;;  %v786_v62 = vld [vmem:[%s1047_s1 + $0x1ec] ss:$16 sps:$4 sm:$0xff]  }
  0x16   :  { %v788_v63 = vld [vmem:[%s1047_s1 + $0x1e0] ss:$16 sps:$4 sm:$0xff]   ;;  %v789_v0 = vld [vmem:[%s1047_s1 + $0x1e8] ss:$16 sps:$4 sm:$0xff]   ;;  %v793_v2 = vld [vmem:[%s1048_s0 + $0x14] ss:$8 sps:$4 sm:$0xff]  }
  0x17   :  { %455 = vmatpush1.bf16.msra.mxu0 %v728_v22  ;;  %508 = vmatpush1.bf16.msra.mxu1 %v729_v23  ;;  %v790_v1 = vld [vmem:[%s1048_s0] ss:$8 sps:$4 sm:$0xff]   ;;  %v795_v3 = vld [vmem:[%s1048_s0 + $0x10] ss:$8 sps:$4 sm:$0xff]   ;;  %v85_v5 = vshrl.u32 %v84_v4, 7 }
  0x18   :  { %456 = vmatprep.subr.bf16.mxu0 %v730_v24  ;;  %509 = vmatprep.subr.bf16.mxu1 %v732_v25  ;;  %v82_v8 = vld [vmem:[%s1049_s2] sm:$0xf] }
  0x19   :  { %v86_v6 = vsub.s32 0, %v85_v5  ;;  %v94_v7 = vsub.s32 2, %v85_v5  ;;  %v90_v9 = vsub.s32 1, %v85_v5  ;;  %v98_v10 = vsub.s32 3, %v85_v5 }
  0x1b   :  { %457 = vmatpush1.bf16.msra.mxu0 %v734_v26  ;;  %510 = vmatpush1.bf16.msra.mxu1 %v735_v27  ;;  %v87_v11 = vrot.slane %v82_v8, %v86_v6  ;;  %v95_v12 = vrot.slane %v82_v8, %v94_v7  ;;  %v91_v13 = vrot.slane %v82_v8, %v90_v9 }
  0x1c   :  { %458 = vmatprep.subr.bf16.mxu0 %v736_v28  ;;  %511 = vmatprep.subr.bf16.mxu1 %v738_v29  ;;  %v99_v14 = vrot.slane %v82_v8, %v98_v10 }
  0x1f   :  { %459 = vmatpush1.bf16.msra.mxu0 %v740_v30  ;;  %512 = vmatpush1.bf16.msra.mxu1 %v741_v31 }
  0x20   :  { %460 = vmatprep.subr.bf16.mxu0 %v742_v32  ;;  %513 = vmatprep.subr.bf16.mxu1 %v744_v33 }
  0x23   :  { %461 = vmatpush1.bf16.msra.mxu0 %v746_v34  ;;  %514 = vmatpush1.bf16.msra.mxu1 %v747_v35 }
  0x24   :  { %462 = vmatprep.subr.bf16.mxu0 %v748_v36  ;;  %515 = vmatprep.subr.bf16.mxu1 %v750_v37 }
  0x27   :  { %463 = vmatpush1.bf16.msra.mxu0 %v752_v38  ;;  %516 = vmatpush1.bf16.msra.mxu1 %v753_v39 }
  0x28   :  { %464 = vmatprep.subr.bf16.mxu0 %v754_v40  ;;  %517 = vmatprep.subr.bf16.mxu1 %v756_v41 }
  0x2b   :  { %465 = vmatpush1.bf16.msra.mxu0 %v758_v42  ;;  %518 = vmatpush1.bf16.msra.mxu1 %v759_v43 }
  0x2c   :  { %466 = vmatprep.subr.bf16.mxu0 %v760_v44  ;;  %519 = vmatprep.subr.bf16.mxu1 %v762_v45 }
  0x2f   :  { %467 = vmatpush1.bf16.msra.mxu0 %v764_v46  ;;  %520 = vmatpush1.bf16.msra.mxu1 %v765_v48 }
  0x30   :  { %468 = vmatprep.subr.bf16.mxu0 %v766_v49  ;;  %521 = vmatprep.subr.bf16.mxu1 %v768_v50 }
  0x33   :  { %469 = vmatpush1.bf16.msra.mxu0 %v770_v51  ;;  %522 = vmatpush1.bf16.msra.mxu1 %v771_v52 }
  0x34   :  { %470 = vmatprep.subr.bf16.mxu0 %v772_v53  ;;  %523 = vmatprep.subr.bf16.mxu1 %v774_v54 }
  0x37   :  { %471 = vmatpush1.bf16.msra.mxu0 %v776_v55  ;;  %524 = vmatpush1.bf16.msra.mxu1 %v777_v56 }
  0x38   :  { %472 = vmatprep.subr.bf16.mxu0 %v778_v57  ;;  %525 = vmatprep.subr.bf16.mxu1 %v780_v58 }
  0x3b   :  { %473 = vmatpush1.bf16.msra.mxu0 %v782_v59  ;;  %526 = vmatpush1.bf16.msra.mxu1 %v783_v60 }
  0x3c   :  { %474 = vmatprep.subr.bf16.mxu0 %v784_v61  ;;  %527 = vmatprep.subr.bf16.mxu1 %v786_v62 }
  0x3f   :  { %475 = vmatpush1.bf16.msra.mxu0 %v788_v63  ;;  %528 = vmatpush1.bf16.msra.mxu1 %v789_v0 }
  0x42   :  { %477 = vmatmul.mubr.bf16.vlgmr.msra.gmra.mrb[0].mxu0 %v790_v1  ;;  %530 = vmatmul.mubr.bf16.vlgmr.msra.gmra.mrb[0].mxu1 %v790_v1 }
  0x43   :  { %486 = vmatprep.mubr.bf16.mxu0 %v793_v2  ;;  %539 = vmatprep.mubr.bf16.mxu1 %v793_v2 }
  0x4a   :  { %487 = vmatmul.mubr.bf16.gmra.mrb[4].mxu0 %v795_v3  ;;  %540 = vmatmul.mubr.bf16.gmra.mrb[4].mxu1 %v795_v3 }
 0x115   :  { %v478_v15 = vpop.f32.mrb[0].mxu0  ;;  %v531_v16 = vpop.f32.mrb[0].mxu1 }
 0x116   :  { %v479_v17 = vadd.f32 %v478_v15, %v87_v11  ;;  %v532_v18 = vadd.f32 %v531_v16, %v95_v12  ;;  %v480_v19 = vpop.f32.mrb[1].mxu0  ;;  %v533_v20 = vpop.f32.mrb[1].mxu1 }
 0x117   :  { %v481_v21 = vadd.f32 %v480_v19, %v91_v13  ;;  %v534_v22 = vadd.f32 %v533_v20, %v99_v14  ;;  %v482_v23 = vpop.f32.mrb[2].mxu0  ;;  %v535_v24 = vpop.f32.mrb[2].mxu1 }
 0x118   :  { %v483_v25 = vadd.f32 %v482_v23, %v87_v11  ;;  %v536_v26 = vadd.f32 %v535_v24, %v95_v12  ;;  %v484_v27 = vpop.f32.mrb[3].mxu0  ;;  %v537_v28 = vpop.f32.mrb[3].mxu1 }
 0x119   :  { %v686_v29 = vpack.c.bf16 %v481_v21, %v479_v17  ;;  %v687_v30 = vpack.c.bf16 %v534_v22, %v532_v18  ;;  %v485_v31 = vadd.f32 %v484_v27, %v91_v13  ;;  %v538_v32 = vadd.f32 %v537_v28, %v99_v14 }
 0x11b   :  { %598 = vst [vmem:[%s1050_s3] sm:$0xff] %v686_v29  ;;  %599 = vst [vmem:[%s1050_s3 + $0x8] sm:$0xff] %v687_v30  ;;  %v688_v33 = vpack.c.bf16 %v485_v31, %v483_v25  ;;  %v689_v34 = vpack.c.bf16 %v538_v32, %v536_v26 }
 0x11d   :  { %600 = vst [vmem:[%s1050_s3 + $0x10] sm:$0xff] %v688_v33  ;;  %601 = vst [vmem:[%s1050_s3 + $0x18] sm:$0xff] %v689_v34  ;;  %v488_v35 = vpop.f32.mrb[4].mxu0  ;;  %v541_v36 = vpop.f32.mrb[4].mxu1 }
 0x11e   :  { %v489_v37 = vadd.f32 %v488_v35, %v87_v11  ;;  %v542_v38 = vadd.f32 %v541_v36, %v95_v12  ;;  %v490_v39 = vpop.f32.mrb[5].mxu0  ;;  %v543_v40 = vpop.f32.mrb[5].mxu1 }
 0x11f   :  { %v491_v41 = vadd.f32 %v490_v39, %v91_v13  ;;  %v544_v42 = vadd.f32 %v543_v40, %v99_v14  ;;  %v492_v43 = vpop.f32.mrb[6].mxu0  ;;  %v545_v44 = vpop.f32.mrb[6].mxu1 }
 0x120   :  { %v493_v45 = vadd.f32 %v492_v43, %v87_v11  ;;  %v546_v46 = vadd.f32 %v545_v44, %v95_v12  ;;  %v494_v47 = vpop.f32.mrb[7].mxu0  ;;  %v547_v48 = vpop.f32.mrb[7].mxu1 }
 0x121   :  { %v690_v49 = vpack.c.bf16 %v491_v41, %v489_v37  ;;  %v691_v50 = vpack.c.bf16 %v544_v42, %v542_v38  ;;  %v495_v51 = vadd.f32 %v494_v47, %v91_v13  ;;  %v548_v52 = vadd.f32 %v547_v48, %v99_v14 }
 0x123   :  { %602 = vst [vmem:[%s1050_s3 + $0x20] sm:$0xff] %v690_v49  ;;  %603 = vst [vmem:[%s1050_s3 + $0x28] sm:$0xff] %v691_v50  ;;  %v692_v53 = vpack.c.bf16 %v495_v51, %v493_v45  ;;  %v693_v54 = vpack.c.bf16 %v548_v52, %v546_v46 }
 0x125   :  { %604 = vst [vmem:[%s1050_s3 + $0x30] sm:$0xff] %v692_v53  ;;  %605 = vst [vmem:[%s1050_s3 + $0x38] sm:$0xff] %v693_v54 }

// kernel: _lambda_.57
= control target key start
LH: loop header
LB: loop body
LE: loop exit
PB: predicated region body
PF: predicated region fallthrough
CT: control target
= control target key end

     0   :  { %v571_v1 = vmov 0   ;;  %v56_v35 = vlaneseq  ;;  %s786_s1 = inlined_call_operand.vmem [shape: bf16[128,512], index: 1, kind: input, shape index: {}]   ;;  %s787_s0 = inlined_call_operand.vmem [shape: bf16[32,128], index: 0, kind: input, shape index: {}]   ;;  %s788_s2 = inlined_call_operand.vmem [shape: f32[1,512], index: 2, kind: input, shape index: {}]   ;;  %s789_s3 = inlined_call_operand.vmem [shape: bf16[32,512], index: 3, kind: input, shape index: {}]   ;;  %s790_s4 = inlined_call_operand.vmem [shape: bf16[32,512], index: 4, kind: output, shape index: {}]  }
   0x1   :  { %v521_v0 = vld [vmem:[%s786_s1 + $0x4] ss:$16 sps:$4 sm:$0xff]   ;;  %280 = vmatprep.mubr.bf16.mxu0 %v571_v1  ;;  %333 = vmatprep.mubr.bf16.mxu1 %v571_v1  ;;  %v523_v2 = vld [vmem:[%s786_s1 + $0xc] ss:$16 sps:$4 sm:$0xff]   ;;  %v525_v3 = vld [vmem:[%s786_s1] ss:$16 sps:$4 sm:$0xff]  }
   0x2   :  { %248 = vmatprep.subr.bf16.mxu0 %v521_v0  ;;  %v526_v4 = vld [vmem:[%s786_s1 + $0x8] ss:$16 sps:$4 sm:$0xff]   ;;  %301 = vmatprep.subr.bf16.mxu1 %v523_v2  ;;  %v527_v5 = vld [vmem:[%s786_s1 + $0x24] ss:$16 sps:$4 sm:$0xff]   ;;  %v529_v6 = vld [vmem:[%s786_s1 + $0x2c] ss:$16 sps:$4 sm:$0xff]  }
   0x3   :  { %249 = vmatpush1.bf16.msra.mxu0 %v525_v3  ;;  %302 = vmatpush1.bf16.msra.mxu1 %v526_v4  ;;  %v531_v7 = vld [vmem:[%s786_s1 + $0x20] ss:$16 sps:$4 sm:$0xff]   ;;  %v532_v8 = vld [vmem:[%s786_s1 + $0x28] ss:$16 sps:$4 sm:$0xff]   ;;  %v533_v9 = vld [vmem:[%s786_s1 + $0x44] ss:$16 sps:$4 sm:$0xff]  }
   0x4   :  { %250 = vmatprep.subr.bf16.mxu0 %v527_v5  ;;  %303 = vmatprep.subr.bf16.mxu1 %v529_v6  ;;  %v535_v10 = vld [vmem:[%s786_s1 + $0x4c] ss:$16 sps:$4 sm:$0xff]   ;;  %v537_v11 = vld [vmem:[%s786_s1 + $0x40] ss:$16 sps:$4 sm:$0xff]   ;;  %v538_v12 = vld [vmem:[%s786_s1 + $0x48] ss:$16 sps:$4 sm:$0xff]  }
   0x5   :  { %v539_v13 = vld [vmem:[%s786_s1 + $0x64] ss:$16 sps:$4 sm:$0xff]   ;;  %v541_v14 = vld [vmem:[%s786_s1 + $0x6c] ss:$16 sps:$4 sm:$0xff]   ;;  %v543_v15 = vld [vmem:[%s786_s1 + $0x60] ss:$16 sps:$4 sm:$0xff]  }
   0x6   :  { %v544_v16 = vld [vmem:[%s786_s1 + $0x68] ss:$16 sps:$4 sm:$0xff]   ;;  %v545_v17 = vld [vmem:[%s786_s1 + $0x84] ss:$16 sps:$4 sm:$0xff]   ;;  %v547_v18 = vld [vmem:[%s786_s1 + $0x8c] ss:$16 sps:$4 sm:$0xff]  }
   0x7   :  { %251 = vmatpush1.bf16.msra.mxu0 %v531_v7  ;;  %304 = vmatpush1.bf16.msra.mxu1 %v532_v8  ;;  %v549_v19 = vld [vmem:[%s786_s1 + $0x80] ss:$16 sps:$4 sm:$0xff]   ;;  %v550_v20 = vld [vmem:[%s786_s1 + $0x88] ss:$16 sps:$4 sm:$0xff]   ;;  %v551_v21 = vld [vmem:[%s786_s1 + $0xa4] ss:$16 sps:$4 sm:$0xff]  }
   0x8   :  { %252 = vmatprep.subr.bf16.mxu0 %v533_v9  ;;  %305 = vmatprep.subr.bf16.mxu1 %v535_v10  ;;  %v553_v22 = vld [vmem:[%s786_s1 + $0xac] ss:$16 sps:$4 sm:$0xff]   ;;  %v555_v23 = vld [vmem:[%s786_s1 + $0xa0] ss:$16 sps:$4 sm:$0xff]   ;;  %v556_v24 = vld [vmem:[%s786_s1 + $0xa8] ss:$16 sps:$4 sm:$0xff]  }
   0x9   :  { %v557_v25 = vld [vmem:[%s786_s1 + $0xc4] ss:$16 sps:$4 sm:$0xff]   ;;  %v559_v26 = vld [vmem:[%s786_s1 + $0xcc] ss:$16 sps:$4 sm:$0xff]   ;;  %v561_v27 = vld [vmem:[%s786_s1 + $0xc0] ss:$16 sps:$4 sm:$0xff]  }
   0xa   :  { %v562_v28 = vld [vmem:[%s786_s1 + $0xc8] ss:$16 sps:$4 sm:$0xff]   ;;  %v563_v29 = vld [vmem:[%s786_s1 + $0xe4] ss:$16 sps:$4 sm:$0xff]   ;;  %v565_v30 = vld [vmem:[%s786_s1 + $0xec] ss:$16 sps:$4 sm:$0xff]  }
   0xb   :  { %253 = vmatpush1.bf16.msra.mxu0 %v537_v11  ;;  %306 = vmatpush1.bf16.msra.mxu1 %v538_v12  ;;  %v567_v31 = vld [vmem:[%s786_s1 + $0xe0] ss:$16 sps:$4 sm:$0xff]   ;;  %v568_v32 = vld [vmem:[%s786_s1 + $0xe8] ss:$16 sps:$4 sm:$0xff]   ;;  %v57_v36 = vshrl.u32 %v56_v35, 7 }
   0xc   :  { %254 = vmatprep.subr.bf16.mxu0 %v539_v13  ;;  %307 = vmatprep.subr.bf16.mxu1 %v541_v14  ;;  %v569_v33 = vld [vmem:[%s787_s0] sm:$0xff]   ;;  %v570_v34 = vld [vmem:[%s787_s0 + $0x8] sm:$0xff]   ;;  %v356_v46 = vld [vmem:[%s789_s3 + $0x10] sm:$0xff] }
   0xd   :  { %v58_v37 = vsub.s32 0, %v57_v36  ;;  %v66_v38 = vsub.s32 2, %v57_v36  ;;  %v54_v39 = vld [vmem:[%s788_s2] sm:$0xf]  ;;  %v62_v40 = vsub.s32 1, %v57_v36  ;;  %v70_v41 = vsub.s32 3, %v57_v36 }
   0xe   :  { %v354_v42 = vld [vmem:[%s789_s3] sm:$0xff]  ;;  %v355_v43 = vld [vmem:[%s789_s3 + $0x8] sm:$0xff]  ;;  %v357_v47 = vld [vmem:[%s789_s3 + $0x18] sm:$0xff]  ;;  %v366_v58 = vunpack.c.l.bf16 %v356_v46  ;;  %v367_v60 = vunpack.c.h.bf16 %v356_v46 }
   0xf   :  { %255 = vmatpush1.bf16.msra.mxu0 %v543_v15  ;;  %308 = vmatpush1.bf16.msra.mxu1 %v544_v16  ;;  %v712_v44 = vrot.slane %v54_v39, %v58_v37  ;;  %v714_v45 = vrot.slane %v54_v39, %v66_v38  ;;  %v722_v48 = vrot.slane %v54_v39, %v62_v40  ;;  %v729_v50 = vld [vmem:[%s789_s3 + $0x20] sm:$0xff]  ;;  %v734_v51 = vld [vmem:[%s789_s3 + $0x28] sm:$0xff]  ;;  %v362_v52 = vunpack.c.l.bf16 %v354_v42 }
  0x10   :  { %256 = vmatprep.subr.bf16.mxu0 %v545_v17  ;;  %309 = vmatprep.subr.bf16.mxu1 %v547_v18  ;;  %v724_v49 = vrot.slane %v54_v39, %v70_v41  ;;  %v364_v53 = vunpack.c.l.bf16 %v355_v43  ;;  %v363_v54 = vunpack.c.h.bf16 %v354_v42  ;;  %v365_v55 = vunpack.c.h.bf16 %v355_v43 }
  0x11   :  { %v368_v59 = vunpack.c.l.bf16 %v357_v47  ;;  %v369_v61 = vunpack.c.h.bf16 %v357_v47  ;;  %v370_v2 = vunpack.c.l.bf16 %v729_v50  ;;  %v372_v3 = vunpack.c.l.bf16 %v734_v51 }
  0x12   :  { %v371_v8 = vunpack.c.h.bf16 %v729_v50  ;;  %v373_v9 = vunpack.c.h.bf16 %v734_v51 }
  0x13   :  { %257 = vmatpush1.bf16.msra.mxu0 %v549_v19  ;;  %310 = vmatpush1.bf16.msra.mxu1 %v550_v20  ;;  %v360_v20 = vld [vmem:[%s789_s3 + $0x30] sm:$0xff] }
  0x14   :  { %258 = vmatprep.subr.bf16.mxu0 %v551_v21  ;;  %311 = vmatprep.subr.bf16.mxu1 %v553_v22  ;;  %v361_v21 = vld [vmem:[%s789_s3 + $0x38] sm:$0xff]  ;;  %v375_v46 = vunpack.c.h.bf16 %v360_v20 }
  0x15   :  { %v377_v47 = vunpack.c.h.bf16 %v361_v21 }
  0x17   :  { %259 = vmatpush1.bf16.msra.mxu0 %v555_v23  ;;  %312 = vmatpush1.bf16.msra.mxu1 %v556_v24 }
  0x18   :  { %260 = vmatprep.subr.bf16.mxu0 %v557_v25  ;;  %313 = vmatprep.subr.bf16.mxu1 %v559_v26 }
  0x1b   :  { %261 = vmatpush1.bf16.msra.mxu0 %v561_v27  ;;  %314 = vmatpush1.bf16.msra.mxu1 %v562_v28 }
  0x1c   :  { %262 = vmatprep.subr.bf16.mxu0 %v563_v29  ;;  %315 = vmatprep.subr.bf16.mxu1 %v565_v30 }
  0x1f   :  { %263 = vmatpush1.bf16.msra.mxu0 %v567_v31  ;;  %316 = vmatpush1.bf16.msra.mxu1 %v568_v32  ;;  %v374_v32 = vunpack.c.l.bf16 %v360_v20 }
  0x22   :  { %281 = vmatmul.mubr.bf16.vlgmr.msra.gmra.mrb[0].mxu0 %v569_v33  ;;  %334 = vmatmul.mubr.bf16.vlgmr.msra.gmra.mrb[0].mxu1 %v569_v33  ;;  %v376_v33 = vunpack.c.l.bf16 %v361_v21 }
  0x23   :  { %290 = vmatprep.mubr.bf16.mxu0 %v571_v1  ;;  %343 = vmatprep.mubr.bf16.mxu1 %v571_v1 }
  0x2a   :  { %291 = vmatmul.mubr.bf16.gmra.mrb[4].mxu0 %v570_v34  ;;  %344 = vmatmul.mubr.bf16.gmra.mrb[4].mxu1 %v570_v34 }
  0xf5   :  { %v282_v56 = vpop.f32.mrb[0].mxu0  ;;  %v335_v57 = vpop.f32.mrb[0].mxu1 }
  0xf6   :  { %v283_v62 = vadd.f32 %v282_v56, %v712_v44  ;;  %v336_v63 = vadd.f32 %v335_v57, %v714_v45  ;;  %v284_v0 = vpop.f32.mrb[1].mxu0  ;;  %v337_v1 = vpop.f32.mrb[1].mxu1 }
  0xf7   :  { %v285_v4 = vadd.f32 %v284_v0, %v722_v48  ;;  %v338_v5 = vadd.f32 %v337_v1, %v724_v49  ;;  %v286_v6 = vpop.f32.mrb[2].mxu0  ;;  %v339_v7 = vpop.f32.mrb[2].mxu1 }
  0xf8   :  { %v378_v10 = vadd.f32 %v362_v52, %v283_v62  ;;  %v380_v11 = vadd.f32 %v364_v53, %v336_v63  ;;  %v287_v12 = vadd.f32 %v286_v6, %v712_v44  ;;  %v340_v13 = vadd.f32 %v339_v7, %v714_v45  ;;  %v288_v14 = vpop.f32.mrb[3].mxu0  ;;  %v341_v15 = vpop.f32.mrb[3].mxu1 }
  0xf9   :  { %v379_v16 = vadd.f32 %v363_v54, %v285_v4  ;;  %v381_v17 = vadd.f32 %v365_v55, %v338_v5  ;;  %v289_v18 = vadd.f32 %v288_v14, %v722_v48  ;;  %v342_v19 = vadd.f32 %v341_v15, %v724_v49 }
  0xfa   :  { %v394_v22 = vmax.f32 %v378_v10, 0.0  ;;  %v396_v23 = vmax.f32 %v380_v11, 0.0  ;;  %v382_v24 = vadd.f32 %v366_v58, %v287_v12  ;;  %v384_v25 = vadd.f32 %v368_v59, %v340_v13 }
  0xfb   :  { %v395_v26 = vmax.f32 %v379_v16, 0.0  ;;  %v397_v27 = vmax.f32 %v381_v17, 0.0  ;;  %v383_v28 = vadd.f32 %v367_v60, %v289_v18  ;;  %v385_v29 = vadd.f32 %v369_v61, %v342_v19 }
  0xfc   :  { %v398_v30 = vmax.f32 %v382_v24, 0.0  ;;  %v400_v31 = vmax.f32 %v384_v25, 0.0 }
  0xfd   :  { %v512_v34 = vpack.c.bf16 %v395_v26, %v394_v22  ;;  %v513_v35 = vpack.c.bf16 %v397_v27, %v396_v23  ;;  %v399_v36 = vmax.f32 %v383_v28, 0.0  ;;  %v401_v37 = vmax.f32 %v385_v29, 0.0  ;;  %v292_v38 = vpop.f32.mrb[4].mxu0  ;;  %v345_v39 = vpop.f32.mrb[4].mxu1 }
  0xfe   :  { %v293_v40 = vadd.f32 %v292_v38, %v712_v44  ;;  %v346_v41 = vadd.f32 %v345_v39, %v714_v45  ;;  %v294_v42 = vpop.f32.mrb[5].mxu0  ;;  %v347_v43 = vpop.f32.mrb[5].mxu1 }
  0xff   :  { %458 = vst [vmem:[%s790_s4] sm:$0xff] %v512_v34  ;;  %459 = vst [vmem:[%s790_s4 + $0x8] sm:$0xff] %v513_v35  ;;  %v514_v50 = vpack.c.bf16 %v399_v36, %v398_v30  ;;  %v515_v51 = vpack.c.bf16 %v401_v37, %v400_v31  ;;  %v295_v52 = vadd.f32 %v294_v42, %v722_v48  ;;  %v296_v54 = vpop.f32.mrb[6].mxu0  ;;  %v349_v55 = vpop.f32.mrb[6].mxu1 }
 0x100   :  { %v348_v53 = vadd.f32 %v347_v43, %v724_v49  ;;  %v386_v56 = vadd.f32 %v370_v2, %v293_v40  ;;  %v388_v57 = vadd.f32 %v372_v3, %v346_v41  ;;  %v297_v58 = vadd.f32 %v296_v54, %v712_v44  ;;  %v298_v60 = vpop.f32.mrb[7].mxu0  ;;  %v351_v61 = vpop.f32.mrb[7].mxu1 }
 0x101   :  { %v350_v59 = vadd.f32 %v349_v55, %v714_v45  ;;  %460 = vst [vmem:[%s790_s4 + $0x10] sm:$0xff] %v514_v50  ;;  %461 = vst [vmem:[%s790_s4 + $0x18] sm:$0xff] %v515_v51  ;;  %v387_v62 = vadd.f32 %v371_v8, %v295_v52  ;;  %v299_v0 = vadd.f32 %v298_v60, %v722_v48 }
 0x102   :  { %v389_v63 = vadd.f32 %v373_v9, %v348_v53  ;;  %v352_v1 = vadd.f32 %v351_v61, %v724_v49  ;;  %v402_v2 = vmax.f32 %v386_v56, 0.0  ;;  %v404_v44 = vmax.f32 %v388_v57, 0.0 }
 0x103   :  { %v390_v3 = vadd.f32 %v374_v32, %v297_v58  ;;  %v392_v45 = vadd.f32 %v376_v33, %v350_v59  ;;  %v403_v4 = vmax.f32 %v387_v62, 0.0  ;;  %v391_v6 = vadd.f32 %v375_v46, %v299_v0 }
 0x104   :  { %v405_v5 = vmax.f32 %v389_v63, 0.0  ;;  %v393_v7 = vadd.f32 %v377_v47, %v352_v1 }
 0x105   :  { %v406_v10 = vmax.f32 %v390_v3, 0.0  ;;  %v408_v11 = vmax.f32 %v392_v45, 0.0  ;;  %v516_v12 = vpack.c.bf16 %v403_v4, %v402_v2  ;;  %v407_v14 = vmax.f32 %v391_v6, 0.0 }
 0x106   :  { %v517_v13 = vpack.c.bf16 %v405_v5, %v404_v44  ;;  %v409_v15 = vmax.f32 %v393_v7, 0.0 }
 0x107   :  { %462 = vst [vmem:[%s790_s4 + $0x20] sm:$0xff] %v516_v12  ;;  %v518_v48 = vpack.c.bf16 %v407_v14, %v406_v10 }
 0x108   :  { %463 = vst [vmem:[%s790_s4 + $0x28] sm:$0xff] %v517_v13  ;;  %v519_v49 = vpack.c.bf16 %v409_v15, %v408_v11 }
 0x109   :  { %464 = vst [vmem:[%s790_s4 + $0x30] sm:$0xff] %v518_v48 }
 0x10a   :  { %465 = vst [vmem:[%s790_s4 + $0x38] sm:$0xff] %v519_v49 }

// kernel: _lambda_.55
= control target key start
LH: loop header
LB: loop body
LE: loop exit
PB: predicated region body
PF: predicated region fallthrough
CT: control target
= control target key end

     0   :  { %s1632_s1 = inlined_call_operand.vmem [shape: bf16[1152,128], index: 1, kind: input, shape index: {}]   ;;  %s1633_s0 = inlined_call_operand.vmem [shape: bf16[32,1152], index: 0, kind: input, shape index: {}]   ;;  %s1634_s2 = inlined_call_operand.vmem [shape: f32[1,128], index: 2, kind: input, shape index: {}]   ;;  %s1635_s3 = inlined_call_operand.vmem [shape: bf16[32,128], index: 3, kind: output, shape index: {}]  }
   0x1   :  { %v1235_v0 = vld [vmem:[%s1632_s1 + $0x40] sm:$0xff]   ;;  %v1239_v4 = vld [vmem:[%s1632_s1 + $0x48] sm:$0xff]   ;;  %v1243_v8 = vld [vmem:[%s1632_s1 + $0x50] sm:$0xff]  }
   0x2   :  { %v1236_v1 = vld [vmem:[%s1632_s1] sm:$0xff]   ;;  %1093 = vmatprep.subr.bf16.mxu0 %v1235_v0  ;;  %v1240_v5 = vld [vmem:[%s1632_s1 + $0x8] sm:$0xff]   ;;  %v1244_v9 = vld [vmem:[%s1632_s1 + $0x10] sm:$0xff]  }
   0x3   :  { %v1237_v2 = vld [vmem:[%s1632_s1 + $0xc0] sm:$0xff]   ;;  %1094 = vmatpush3.bf16.msra.mxu0 %v1236_v1  ;;  %v1241_v6 = vld [vmem:[%s1632_s1 + $0xc8] sm:$0xff]   ;;  %v1245_v10 = vld [vmem:[%s1632_s1 + $0xd0] sm:$0xff]  }
   0x4   :  { %v1238_v3 = vld [vmem:[%s1632_s1 + $0x80] sm:$0xff]   ;;  %1121 = vmatprep.subr.bf16.mxu1 %v1237_v2  ;;  %1095 = vmatprep.subr.bf16.mxu0 %v1239_v4  ;;  %v1242_v7 = vld [vmem:[%s1632_s1 + $0x88] sm:$0xff]   ;;  %v1246_v11 = vld [vmem:[%s1632_s1 + $0x90] sm:$0xff]  }
   0x5   :  { %1122 = vmatpush3.bf16.msra.mxu1 %v1238_v3  ;;  %v1247_v12 = vld [vmem:[%s1632_s1 + $0x58] sm:$0xff]   ;;  %v1251_v16 = vld [vmem:[%s1632_s1 + $0x60] sm:$0xff]   ;;  %v1255_v20 = vld [vmem:[%s1632_s1 + $0x68] sm:$0xff]  }
   0x6   :  { %1123 = vmatprep.subr.bf16.mxu1 %v1241_v6  ;;  %v1248_v13 = vld [vmem:[%s1632_s1 + $0x18] sm:$0xff]   ;;  %v1252_v17 = vld [vmem:[%s1632_s1 + $0x20] sm:$0xff]   ;;  %v1256_v21 = vld [vmem:[%s1632_s1 + $0x28] sm:$0xff]  }
   0x7   :  { %1096 = vmatpush3.bf16.msra.mxu0 %v1240_v5  ;;  %v1249_v14 = vld [vmem:[%s1632_s1 + $0xd8] sm:$0xff]   ;;  %v1253_v18 = vld [vmem:[%s1632_s1 + $0xe0] sm:$0xff]   ;;  %v1257_v22 = vld [vmem:[%s1632_s1 + $0xe8] sm:$0xff]  }
   0x8   :  { %1097 = vmatprep.subr.bf16.mxu0 %v1243_v8  ;;  %v1250_v15 = vld [vmem:[%s1632_s1 + $0x98] sm:$0xff]   ;;  %v1254_v19 = vld [vmem:[%s1632_s1 + $0xa0] sm:$0xff]   ;;  %v1258_v23 = vld [vmem:[%s1632_s1 + $0xa8] sm:$0xff]  }
   0x9   :  { %1124 = vmatpush3.bf16.msra.mxu1 %v1242_v7  ;;  %v1259_v24 = vld [vmem:[%s1632_s1 + $0x70] sm:$0xff]   ;;  %v1263_v28 = vld [vmem:[%s1632_s1 + $0x78] sm:$0xff]   ;;  %v1266_v31 = vld [vmem:[%s1633_s0] ss:$36 sps:$4 sm:$0xff]  }
   0xa   :  { %1125 = vmatprep.subr.bf16.mxu1 %v1245_v10  ;;  %v1260_v25 = vld [vmem:[%s1632_s1 + $0x30] sm:$0xff]   ;;  %v1264_v29 = vld [vmem:[%s1632_s1 + $0x38] sm:$0xff]   ;;  %v1268_v32 = vld [vmem:[%s1633_s0 + $0x4] ss:$36 sps:$4 sm:$0xff]  }
   0xb   :  { %1098 = vmatpush3.bf16.msra.mxu0 %v1244_v9  ;;  %v1261_v26 = vld [vmem:[%s1632_s1 + $0xf0] sm:$0xff]   ;;  %v1265_v30 = vld [vmem:[%s1632_s1 + $0xf8] sm:$0xff]   ;;  %742 = vmatprep.mubr.bf16.mxu0 %v1268_v32  ;;  %v1270_v34 = vld [vmem:[%s1632_s1 + $0x140] sm:$0xff]  }
   0xc   :  { %1099 = vmatprep.subr.bf16.mxu0 %v1247_v12  ;;  %v1262_v27 = vld [vmem:[%s1632_s1 + $0xb0] sm:$0xff]   ;;  %v1269_v33 = vld [vmem:[%s1632_s1 + $0xb8] sm:$0xff]   ;;  %v1271_v35 = vld [vmem:[%s1633_s0 + $0x8] ss:$36 sps:$4 sm:$0xff]  }
   0xd   :  { %1126 = vmatpush3.bf16.msra.mxu1 %v1246_v11  ;;  %v1273_v36 = vld [vmem:[%s1633_s0 + $0xc] ss:$36 sps:$4 sm:$0xff]   ;;  %v1274_v37 = vld [vmem:[%s1632_s1 + $0x100] sm:$0xff]   ;;  %v1285_v48 = vld [vmem:[%s1632_s1 + $0x158] sm:$0xff]  }
   0xe   :  { %1127 = vmatprep.subr.bf16.mxu1 %v1249_v14  ;;  %791 = vmatprep.mubr.bf16.mxu1 %v1273_v36  ;;  %v1275_v38 = vld [vmem:[%s1632_s1 + $0x1c0] sm:$0xff]   ;;  %v1277_v40 = vld [vmem:[%s1632_s1 + $0x148] sm:$0xff]   ;;  %v1281_v44 = vld [vmem:[%s1632_s1 + $0x150] sm:$0xff]  }
   0xf   :  { %1100 = vmatpush3.bf16.msra.mxu0 %v1248_v13  ;;  %v1276_v39 = vld [vmem:[%s1632_s1 + $0x180] sm:$0xff]   ;;  %v1278_v41 = vld [vmem:[%s1632_s1 + $0x108] sm:$0xff]   ;;  %v1282_v45 = vld [vmem:[%s1632_s1 + $0x110] sm:$0xff]  }
  0x10   :  { %1101 = vmatprep.subr.bf16.mxu0 %v1251_v16  ;;  %v1279_v42 = vld [vmem:[%s1632_s1 + $0x1c8] sm:$0xff]   ;;  %v1283_v46 = vld [vmem:[%s1632_s1 + $0x1d0] sm:$0xff]   ;;  %v1286_v49 = vld [vmem:[%s1632_s1 + $0x118] sm:$0xff]  }
  0x11   :  { %1128 = vmatpush3.bf16.msra.mxu1 %v1250_v15  ;;  %v1280_v43 = vld [vmem:[%s1632_s1 + $0x188] sm:$0xff]   ;;  %v1284_v47 = vld [vmem:[%s1632_s1 + $0x190] sm:$0xff]   ;;  %v1287_v50 = vld [vmem:[%s1632_s1 + $0x1d8] sm:$0xff]  }
  0x12   :  { %1129 = vmatprep.subr.bf16.mxu1 %v1253_v18  ;;  %v1288_v51 = vld [vmem:[%s1632_s1 + $0x198] sm:$0xff]   ;;  %v1289_v52 = vld [vmem:[%s1632_s1 + $0x160] sm:$0xff]   ;;  %v1293_v56 = vld [vmem:[%s1632_s1 + $0x168] sm:$0xff]  }
  0x13   :  { %1102 = vmatpush3.bf16.msra.mxu0 %v1252_v17  ;;  %v1290_v53 = vld [vmem:[%s1632_s1 + $0x120] sm:$0xff]   ;;  %v1294_v57 = vld [vmem:[%s1633_s0 + $0x4c] ss:$36 sps:$4 sm:$0xff]   ;;  %v1299_v61 = vld [vmem:[%s1633_s0 + $0x54] ss:$36 sps:$4 sm:$0xff]  }
  0x14   :  { %1103 = vmatprep.subr.bf16.mxu0 %v1255_v20  ;;  %v1291_v54 = vld [vmem:[%s1632_s1 + $0x1e0] sm:$0xff]   ;;  %v1296_v58 = vld [vmem:[%s1632_s1 + $0x128] sm:$0xff]   ;;  %v1302_v63 = vld [vmem:[%s1633_s0 + $0x50] ss:$36 sps:$4 sm:$0xff]  }
  0x15   :  { %1130 = vmatpush3.bf16.msra.mxu1 %v1254_v19  ;;  %v1292_v55 = vld [vmem:[%s1632_s1 + $0x1a0] sm:$0xff]   ;;  %v1297_v59 = vld [vmem:[%s1633_s0 + $0x48] ss:$36 sps:$4 sm:$0xff]   ;;  %v1303_v0 = vld [vmem:[%s1632_s1 + $0x170] sm:$0xff]  }
  0x16   :  { %1131 = vmatprep.subr.bf16.mxu1 %v1257_v22  ;;  %v1298_v60 = vld [vmem:[%s1632_s1 + $0x1e8] sm:$0xff]   ;;  %v1304_v1 = vld [vmem:[%s1632_s1 + $0x130] sm:$0xff]   ;;  %v1307_v4 = vld [vmem:[%s1632_s1 + $0x178] sm:$0xff]  }
  0x17   :  { %1104 = vmatpush3.bf16.msra.mxu0 %v1256_v21  ;;  %v1301_v62 = vld [vmem:[%s1632_s1 + $0x1a8] sm:$0xff]   ;;  %v1305_v2 = vld [vmem:[%s1632_s1 + $0x1f0] sm:$0xff]   ;;  %v1308_v5 = vld [vmem:[%s1632_s1 + $0x138] sm:$0xff]  }
  0x18   :  { %1105 = vmatprep.subr.bf16.mxu0 %v1259_v24  ;;  %v1306_v3 = vld [vmem:[%s1632_s1 + $0x1b0] sm:$0xff]   ;;  %v1309_v6 = vld [vmem:[%s1632_s1 + $0x1f8] sm:$0xff]   ;;  %v1314_v10 = vld [vmem:[%s1632_s1 + $0x200] sm:$0xff]  }
  0x19   :  { %1132 = vmatpush3.bf16.msra.mxu1 %v1258_v23  ;;  %v1310_v7 = vld [vmem:[%s1633_s0 + $0x10] ss:$36 sps:$4 sm:$0xff]   ;;  %v1313_v9 = vld [vmem:[%s1632_s1 + $0x1b8] sm:$0xff]   ;;  %v1318_v13 = vld [vmem:[%s1632_s1 + $0x208] sm:$0xff]  }
  0x1a   :  { %1133 = vmatprep.subr.bf16.mxu1 %v1261_v26  ;;  %v1312_v8 = vld [vmem:[%s1633_s0 + $0x14] ss:$36 sps:$4 sm:$0xff]   ;;  %v1317_v12 = vld [vmem:[%s1633_s0 + $0x1c] ss:$36 sps:$4 sm:$0xff]   ;;  %v1323_v17 = vld [vmem:[%s1633_s0 + $0x64] ss:$36 sps:$4 sm:$0xff]  }
  0x1b   :  { %1106 = vmatpush3.bf16.msra.mxu0 %v1260_v25  ;;  %v1315_v11 = vld [vmem:[%s1633_s0 + $0x18] ss:$36 sps:$4 sm:$0xff]   ;;  %v1322_v16 = vld [vmem:[%s1632_s1 + $0x210] sm:$0xff]   ;;  %v1325_v18 = vld [vmem:[%s1633_s0 + $0x60] ss:$36 sps:$4 sm:$0xff]  }
  0x1c   :  { %1107 = vmatprep.subr.bf16.mxu0 %v1263_v28  ;;  %v1319_v14 = vld [vmem:[%s1633_s0 + $0x5c] ss:$36 sps:$4 sm:$0xff]   ;;  %v1328_v22 = vld [vmem:[%s1632_s1 + $0x228] sm:$0xff]   ;;  %v1329_v23 = vld [vmem:[%s1632_s1 + $0x230] sm:$0xff]  }
  0x1d   :  { %1134 = vmatpush3.bf16.msra.mxu1 %v1262_v27  ;;  %v1321_v15 = vld [vmem:[%s1633_s0 + $0x58] ss:$36 sps:$4 sm:$0xff]   ;;  %v1327_v20 = vld [vmem:[%s1632_s1 + $0x220] sm:$0xff]   ;;  %v1332_v25 = vld [vmem:[%s1633_s0 + $0x68] ss:$36 sps:$4 sm:$0xff]  }
  0x1e   :  { %1135 = vmatprep.subr.bf16.mxu1 %v1265_v30  ;;  %v1326_v19 = vld [vmem:[%s1632_s1 + $0x218] sm:$0xff]   ;;  %v1331_v21 = vld [vmem:[%s1633_s0 + $0x20] ss:$36 sps:$4 sm:$0xff]  }
  0x1f   :  { %1108 = vmatpush3.bf16.msra.mxu0 %v1264_v29  ;;  %v1330_v24 = vld [vmem:[%s1632_s1 + $0x238] sm:$0xff]   ;;  %v983_v27 = vld [vmem:[%s1634_s2] ss:$0 sm:$0xff] }
  0x20   :  { %1149 = vmatprep.subr.bf16.mxu0 %v1270_v34 }
  0x21   :  { %1136 = vmatpush3.bf16.msra.mxu1 %v1269_v33 }
  0x22   :  { %743 = vmatmul.mubr.bf16.vlgmr.msra.gmra.mrb[0].mxu0 %v1266_v31  ;;  %1177 = vmatprep.subr.bf16.mxu1 %v1275_v38 }
  0x23   :  { %1150 = vmatpush3.bf16.msra.mxu0 %v1274_v37  ;;  %750 = vmatprep.mubr.bf16.mxu0 %v1294_v57 }
  0x24   :  { %792 = vmatmul.mubr.bf16.vlgmr.msra.gmra.mrb[0].mxu1 %v1271_v35  ;;  %1151 = vmatprep.subr.bf16.mxu0 %v1277_v40 }
  0x25   :  { %1178 = vmatpush3.bf16.msra.mxu1 %v1276_v39  ;;  %799 = vmatprep.mubr.bf16.mxu1 %v1299_v61 }
  0x26   :  { %1179 = vmatprep.subr.bf16.mxu1 %v1279_v42 }
  0x27   :  { %1152 = vmatpush3.bf16.msra.mxu0 %v1278_v41 }
  0x28   :  { %1153 = vmatprep.subr.bf16.mxu0 %v1281_v44 }
  0x29   :  { %1180 = vmatpush3.bf16.msra.mxu1 %v1280_v43 }
  0x2a   :  { %1181 = vmatprep.subr.bf16.mxu1 %v1283_v46  ;;  %751 = vmatmul.mubr.bf16.gmra.mrb[4].mxu0 %v1297_v59 }
  0x2b   :  { %1154 = vmatpush3.bf16.msra.mxu0 %v1282_v45  ;;  %840 = vmatprep.mubr.bf16.mxu0 %v1312_v8 }
  0x2c   :  { %1155 = vmatprep.subr.bf16.mxu0 %v1285_v48  ;;  %800 = vmatmul.mubr.bf16.gmra.mrb[4].mxu1 %v1302_v63 }
  0x2d   :  { %1182 = vmatpush3.bf16.msra.mxu1 %v1284_v47  ;;  %889 = vmatprep.mubr.bf16.mxu1 %v1317_v12 }
  0x2e   :  { %1183 = vmatprep.subr.bf16.mxu1 %v1287_v50 }
  0x2f   :  { %1156 = vmatpush3.bf16.msra.mxu0 %v1286_v49 }
  0x30   :  { %1157 = vmatprep.subr.bf16.mxu0 %v1289_v52 }
  0x31   :  { %1184 = vmatpush3.bf16.msra.mxu1 %v1288_v51 }
  0x32   :  { %1185 = vmatprep.subr.bf16.mxu1 %v1291_v54 }
  0x33   :  { %1158 = vmatpush3.bf16.msra.mxu0 %v1290_v53 }
  0x34   :  { %1159 = vmatprep.subr.bf16.mxu0 %v1293_v56 }
  0x35   :  { %1186 = vmatpush3.bf16.msra.mxu1 %v1292_v55 }
  0x36   :  { %1187 = vmatprep.subr.bf16.mxu1 %v1298_v60 }
  0x37   :  { %1160 = vmatpush3.bf16.msra.mxu0 %v1296_v58 }
  0x38   :  { %1161 = vmatprep.subr.bf16.mxu0 %v1303_v0 }
  0x39   :  { %1188 = vmatpush3.bf16.msra.mxu1 %v1301_v62 }
  0x3a   :  { %1189 = vmatprep.subr.bf16.mxu1 %v1305_v2 }
  0x3b   :  { %1162 = vmatpush3.bf16.msra.mxu0 %v1304_v1 }
  0x3c   :  { %1163 = vmatprep.subr.bf16.mxu0 %v1307_v4 }
  0x3d   :  { %1190 = vmatpush3.bf16.msra.mxu1 %v1306_v3 }
  0x3e   :  { %1191 = vmatprep.subr.bf16.mxu1 %v1309_v6 }
  0x3f   :  { %1164 = vmatpush3.bf16.msra.mxu0 %v1308_v5 }
  0x40   :  { %1215 = vmatprep.subr.bf16.mxu0 %v1314_v10 }
  0x41   :  { %1192 = vmatpush3.bf16.msra.mxu1 %v1313_v9 }
  0x42   :  { %841 = vmatmul.mubr.bf16.vlgmr.msra.gmra.mrb[8].mxu0 %v1310_v7 }
  0x43   :  { %1216 = vmatpush3.bf16.msra.mxu0 %v1314_v10  ;;  %848 = vmatprep.mubr.bf16.mxu0 %v1319_v14 }
  0x44   :  { %890 = vmatmul.mubr.bf16.vlgmr.msra.gmra.mrb[8].mxu1 %v1315_v11  ;;  %1217 = vmatprep.subr.bf16.mxu0 %v1318_v13 }
  0x45   :  { %897 = vmatprep.mubr.bf16.mxu1 %v1323_v17 }
  0x47   :  { %1218 = vmatpush3.bf16.msra.mxu0 %v1318_v13 }
  0x48   :  { %1219 = vmatprep.subr.bf16.mxu0 %v1322_v16 }
  0x4a   :  { %849 = vmatmul.mubr.bf16.gmra.mrb[12].mxu0 %v1321_v15 }
  0x4b   :  { %1220 = vmatpush3.bf16.msra.mxu0 %v1322_v16  ;;  %1231 = vmatprep.mubr.bf16.mxu0 %v1331_v21 }
  0x4c   :  { %898 = vmatmul.mubr.bf16.gmra.mrb[12].mxu1 %v1325_v18  ;;  %1221 = vmatprep.subr.bf16.mxu0 %v1326_v19 }
  0x4f   :  { %1222 = vmatpush3.bf16.msra.mxu0 %v1326_v19 }
  0x50   :  { %1223 = vmatprep.subr.bf16.mxu0 %v1327_v20 }
  0x53   :  { %1224 = vmatpush3.bf16.msra.mxu0 %v1327_v20 }
  0x54   :  { %1225 = vmatprep.subr.bf16.mxu0 %v1328_v22 }
  0x57   :  { %1226 = vmatpush3.bf16.msra.mxu0 %v1328_v22 }
  0x58   :  { %1227 = vmatprep.subr.bf16.mxu0 %v1329_v23 }
  0x5b   :  { %1228 = vmatpush3.bf16.msra.mxu0 %v1329_v23 }
  0x5c   :  { %1229 = vmatprep.subr.bf16.mxu0 %v1330_v24 }
  0x5f   :  { %1230 = vmatpush3.bf16.msra.mxu0 %v1330_v24 }
  0x62   :  { %1232 = vmatmul.mubr.bf16.vlgmr.msra.gmra.mrb[16].mxu0 %v1332_v25 }
  0xf5   :  { %v1109_v26 = vpop.f32.mrb[0].mxu0 }
  0xf6   :  { %v1110_v28 = vpop.f32.mrb[1].mxu0 }
  0xf7   :  { %v1111_v29 = vadd.f32 %v1110_v28, %v1109_v26  ;;  %v1112_v30 = vpop.f32.mrb[2].mxu0  ;;  %v1137_v31 = vpop.f32.mrb[0].mxu1 }
  0xf8   :  { %v1113_v32 = vpop.f32.mrb[3].mxu0  ;;  %v1138_v35 = vpop.f32.mrb[1].mxu1 }
  0xf9   :  { %v745_v33 = vadd.f32 %v1111_v29, %v983_v27  ;;  %v1114_v34 = vadd.f32 %v1113_v32, %v1112_v30  ;;  %v1139_v36 = vadd.f32 %v1138_v35, %v1137_v31  ;;  %v1140_v37 = vpop.f32.mrb[2].mxu1 }
  0xfa   :  { %v1141_v39 = vpop.f32.mrb[3].mxu1 }
  0xfb   :  { %v748_v38 = vadd.f32 %v1114_v34, %v983_v27  ;;  %v794_v40 = vadd.f32 %v1139_v36, %v745_v33  ;;  %v1142_v41 = vadd.f32 %v1141_v39, %v1140_v37 }
  0xfd   :  { %v797_v42 = vadd.f32 %v1142_v41, %v748_v38  ;;  %v1115_v43 = vpop.f32.mrb[4].mxu0 }
  0xfe   :  { %v1116_v44 = vpop.f32.mrb[5].mxu0 }
  0xff   :  { %v1117_v45 = vadd.f32 %v1116_v44, %v1115_v43  ;;  %v1118_v46 = vpop.f32.mrb[6].mxu0  ;;  %v1143_v47 = vpop.f32.mrb[4].mxu1 }
 0x100   :  { %v1119_v48 = vpop.f32.mrb[7].mxu0  ;;  %v1144_v51 = vpop.f32.mrb[5].mxu1 }
 0x101   :  { %v753_v49 = vadd.f32 %v1117_v45, %v983_v27  ;;  %v1120_v50 = vadd.f32 %v1119_v48, %v1118_v46  ;;  %v1145_v52 = vadd.f32 %v1144_v51, %v1143_v47  ;;  %v1146_v53 = vpop.f32.mrb[6].mxu1 }
 0x102   :  { %v1147_v55 = vpop.f32.mrb[7].mxu1 }
 0x103   :  { %v756_v54 = vadd.f32 %v1120_v50, %v983_v27  ;;  %v802_v56 = vadd.f32 %v1145_v52, %v753_v49  ;;  %v1148_v57 = vadd.f32 %v1147_v55, %v1146_v53 }
 0x105   :  { %v805_v58 = vadd.f32 %v1148_v57, %v756_v54 }
 0x115   :  { %v1165_v59 = vpop.f32.mrb[8].mxu0 }
 0x116   :  { %v1166_v60 = vpop.f32.mrb[9].mxu0 }
 0x117   :  { %v1167_v61 = vadd.f32 %v1166_v60, %v1165_v59  ;;  %v1168_v62 = vpop.f32.mrb[10].mxu0  ;;  %v1193_v63 = vpop.f32.mrb[8].mxu1 }
 0x118   :  { %v1169_v0 = vpop.f32.mrb[11].mxu0  ;;  %v1194_v3 = vpop.f32.mrb[9].mxu1 }
 0x119   :  { %v843_v1 = vadd.f32 %v1167_v61, %v794_v40  ;;  %v1170_v2 = vadd.f32 %v1169_v0, %v1168_v62  ;;  %v1195_v4 = vadd.f32 %v1194_v3, %v1193_v63  ;;  %v1196_v5 = vpop.f32.mrb[10].mxu1 }
 0x11a   :  { %v1197_v7 = vpop.f32.mrb[11].mxu1 }
 0x11b   :  { %v846_v6 = vadd.f32 %v1170_v2, %v797_v42  ;;  %v1198_v8 = vadd.f32 %v1197_v7, %v1196_v5  ;;  %v892_v9 = vadd.f32 %v1195_v4, %v843_v1 }
 0x11d   :  { %v1171_v10 = vpop.f32.mrb[12].mxu0  ;;  %v895_v12 = vadd.f32 %v1198_v8, %v846_v6 }
 0x11e   :  { %v1172_v11 = vpop.f32.mrb[13].mxu0 }
 0x11f   :  { %v1173_v13 = vadd.f32 %v1172_v11, %v1171_v10  ;;  %v1174_v14 = vpop.f32.mrb[14].mxu0  ;;  %v1199_v15 = vpop.f32.mrb[12].mxu1 }
 0x120   :  { %v1175_v16 = vpop.f32.mrb[15].mxu0  ;;  %v1200_v19 = vpop.f32.mrb[13].mxu1 }
 0x121   :  { %v851_v17 = vadd.f32 %v1173_v13, %v802_v56  ;;  %v1176_v18 = vadd.f32 %v1175_v16, %v1174_v14  ;;  %v1201_v20 = vadd.f32 %v1200_v19, %v1199_v15  ;;  %v1202_v21 = vpop.f32.mrb[14].mxu1 }
 0x122   :  { %v1203_v23 = vpop.f32.mrb[15].mxu1 }
 0x123   :  { %v854_v22 = vadd.f32 %v1176_v18, %v805_v58  ;;  %v1204_v24 = vadd.f32 %v1203_v23, %v1202_v21  ;;  %v900_v25 = vadd.f32 %v1201_v20, %v851_v17 }
 0x125   :  { %v903_v26 = vadd.f32 %v1204_v24, %v854_v22 }
 0x135   :  { %v1233_v27 = vpop.f32.mrb[16].mxu0 }
 0x136   :  { %v949_v28 = vadd.f32 %v1233_v27, %v900_v25  ;;  %v940_v29 = vpop.f32.mrb[17].mxu0 }
 0x137   :  { %v941_v30 = vadd.f32 %v940_v29, %v892_v9  ;;  %v1234_v31 = vpop.f32.mrb[18].mxu0 }
 0x138   :  { %v952_v32 = vadd.f32 %v1234_v31, %v903_v26  ;;  %v943_v33 = vpop.f32.mrb[19].mxu0  ;;  %v957_v35 = vmax.f32 %v949_v28, 0.0 }
 0x139   :  { %v944_v34 = vadd.f32 %v943_v33, %v895_v12  ;;  %v955_v37 = vmax.f32 %v941_v30, 0.0 }
 0x13a   :  { %v958_v36 = vmax.f32 %v952_v32, 0.0 }
 0x13b   :  { %v956_v38 = vmax.f32 %v944_v34, 0.0 }
 0x13c   :  { %v1090_v39 = vpack.c.bf16 %v958_v36, %v957_v35 }
 0x13d   :  { %v1085_v40 = vpack.c.bf16 %v956_v38, %v955_v37 }
 0x13e   :  { %1092 = vst [vmem:[%s1635_s3 + $0x8] sm:$0xff] %v1090_v39  }
 0x13f   :  { %1086 = vst [vmem:[%s1635_s3] sm:$0xff] %v1085_v40  }

// kernel: _lambda_.58
= control target key start
LH: loop header
LB: loop body
LE: loop exit
PB: predicated region body
PF: predicated region fallthrough
CT: control target
= control target key end

     0   :  { %s761_s1 = inlined_call_operand.vmem [shape: bf16[512,128], index: 1, kind: input, shape index: {}]   ;;  %s762_s0 = inlined_call_operand.vmem [shape: bf16[32,512], index: 0, kind: input, shape index: {}]   ;;  %s763_s2 = inlined_call_operand.vmem [shape: f32[1,128], index: 2, kind: input, shape index: {}]   ;;  %s764_s3 = inlined_call_operand.vmem [shape: bf16[32,128], index: 3, kind: output, shape index: {}]  }
   0x1   :  { %v568_v0 = vld [vmem:[%s761_s1 + $0x40] sm:$0xff]   ;;  %v572_v4 = vld [vmem:[%s761_s1 + $0x48] sm:$0xff]   ;;  %v576_v8 = vld [vmem:[%s761_s1 + $0x50] sm:$0xff]  }
   0x2   :  { %v569_v1 = vld [vmem:[%s761_s1 + $0xc0] sm:$0xff]   ;;  %512 = vmatprep.subr.bf16.mxu0 %v568_v0  ;;  %v573_v5 = vld [vmem:[%s761_s1 + $0xc8] sm:$0xff]   ;;  %v577_v9 = vld [vmem:[%s761_s1 + $0xd0] sm:$0xff]  }
   0x3   :  { %v570_v2 = vld [vmem:[%s761_s1] sm:$0xff]   ;;  %540 = vmatprep.subr.bf16.mxu1 %v569_v1  ;;  %v574_v6 = vld [vmem:[%s761_s1 + $0x8] sm:$0xff]   ;;  %v578_v10 = vld [vmem:[%s761_s1 + $0x10] sm:$0xff]  }
   0x4   :  { %v571_v3 = vld [vmem:[%s761_s1 + $0x80] sm:$0xff]   ;;  %513 = vmatpush3.bf16.msra.mxu0 %v570_v2  ;;  %v575_v7 = vld [vmem:[%s761_s1 + $0x88] sm:$0xff]   ;;  %v579_v11 = vld [vmem:[%s761_s1 + $0x90] sm:$0xff]  }
   0x5   :  { %541 = vmatpush3.bf16.msra.mxu1 %v571_v3  ;;  %514 = vmatprep.subr.bf16.mxu0 %v572_v4  ;;  %v580_v12 = vld [vmem:[%s761_s1 + $0x58] sm:$0xff]   ;;  %v584_v16 = vld [vmem:[%s761_s1 + $0x60] sm:$0xff]   ;;  %v588_v20 = vld [vmem:[%s761_s1 + $0x68] sm:$0xff]  }
   0x6   :  { %542 = vmatprep.subr.bf16.mxu1 %v573_v5  ;;  %v581_v13 = vld [vmem:[%s761_s1 + $0xd8] sm:$0xff]   ;;  %v585_v17 = vld [vmem:[%s761_s1 + $0xe0] sm:$0xff]   ;;  %v589_v21 = vld [vmem:[%s761_s1 + $0xe8] sm:$0xff]  }
   0x7   :  { %v582_v14 = vld [vmem:[%s761_s1 + $0x18] sm:$0xff]   ;;  %v586_v18 = vld [vmem:[%s761_s1 + $0x20] sm:$0xff]   ;;  %v590_v22 = vld [vmem:[%s761_s1 + $0x28] sm:$0xff]  }
   0x8   :  { %515 = vmatpush3.bf16.msra.mxu0 %v574_v6  ;;  %v583_v15 = vld [vmem:[%s761_s1 + $0x98] sm:$0xff]   ;;  %v587_v19 = vld [vmem:[%s761_s1 + $0xa0] sm:$0xff]   ;;  %v591_v23 = vld [vmem:[%s761_s1 + $0xa8] sm:$0xff]  }
   0x9   :  { %543 = vmatpush3.bf16.msra.mxu1 %v575_v7  ;;  %516 = vmatprep.subr.bf16.mxu0 %v576_v8  ;;  %v592_v24 = vld [vmem:[%s761_s1 + $0x70] sm:$0xff]   ;;  %v596_v28 = vld [vmem:[%s761_s1 + $0x78] sm:$0xff]   ;;  %v452_v42 = vld [vmem:[%s763_s2] ss:$0 sm:$0xff] }
   0xa   :  { %544 = vmatprep.subr.bf16.mxu1 %v577_v9  ;;  %v593_v25 = vld [vmem:[%s761_s1 + $0xf0] sm:$0xff]   ;;  %v597_v29 = vld [vmem:[%s761_s1 + $0xf8] sm:$0xff]  }
   0xb   :  { %v594_v26 = vld [vmem:[%s761_s1 + $0x30] sm:$0xff]   ;;  %v598_v30 = vld [vmem:[%s761_s1 + $0x38] sm:$0xff]  }
   0xc   :  { %517 = vmatpush3.bf16.msra.mxu0 %v578_v10  ;;  %v595_v27 = vld [vmem:[%s761_s1 + $0xb0] sm:$0xff]   ;;  %v599_v31 = vld [vmem:[%s761_s1 + $0xb8] sm:$0xff]  }
   0xd   :  { %545 = vmatpush3.bf16.msra.mxu1 %v579_v11  ;;  %518 = vmatprep.subr.bf16.mxu0 %v580_v12  ;;  %v600_v32 = vld [vmem:[%s762_s0] ss:$16 sps:$4 sm:$0xff]   ;;  %v602_v33 = vld [vmem:[%s762_s0 + $0x4] ss:$16 sps:$4 sm:$0xff]   ;;  %v603_v34 = vld [vmem:[%s762_s0 + $0x8] ss:$16 sps:$4 sm:$0xff]  }
   0xe   :  { %546 = vmatprep.subr.bf16.mxu1 %v581_v13  ;;  %v605_v35 = vld [vmem:[%s762_s0 + $0xc] ss:$16 sps:$4 sm:$0xff]   ;;  %358 = vmatprep.mubr.bf16.mxu0 %v602_v33  ;;  %v606_v36 = vld [vmem:[%s762_s0 + $0x24] ss:$16 sps:$4 sm:$0xff]   ;;  %v610_v38 = vld [vmem:[%s762_s0 + $0x20] ss:$16 sps:$4 sm:$0xff]  }
   0xf   :  { %407 = vmatprep.mubr.bf16.mxu1 %v605_v35  ;;  %v608_v37 = vld [vmem:[%s762_s0 + $0x2c] ss:$16 sps:$4 sm:$0xff]   ;;  %v611_v39 = vld [vmem:[%s762_s0 + $0x28] ss:$16 sps:$4 sm:$0xff]  }
  0x10   :  { %519 = vmatpush3.bf16.msra.mxu0 %v582_v14 }
  0x11   :  { %547 = vmatpush3.bf16.msra.mxu1 %v583_v15  ;;  %520 = vmatprep.subr.bf16.mxu0 %v584_v16 }
  0x12   :  { %548 = vmatprep.subr.bf16.mxu1 %v585_v17 }
  0x14   :  { %521 = vmatpush3.bf16.msra.mxu0 %v586_v18 }
  0x15   :  { %549 = vmatpush3.bf16.msra.mxu1 %v587_v19  ;;  %522 = vmatprep.subr.bf16.mxu0 %v588_v20 }
  0x16   :  { %550 = vmatprep.subr.bf16.mxu1 %v589_v21 }
  0x18   :  { %523 = vmatpush3.bf16.msra.mxu0 %v590_v22 }
  0x19   :  { %551 = vmatpush3.bf16.msra.mxu1 %v591_v23  ;;  %524 = vmatprep.subr.bf16.mxu0 %v592_v24 }
  0x1a   :  { %552 = vmatprep.subr.bf16.mxu1 %v593_v25 }
  0x1c   :  { %525 = vmatpush3.bf16.msra.mxu0 %v594_v26 }
  0x1d   :  { %553 = vmatpush3.bf16.msra.mxu1 %v595_v27  ;;  %526 = vmatprep.subr.bf16.mxu0 %v596_v28 }
  0x1e   :  { %554 = vmatprep.subr.bf16.mxu1 %v597_v29 }
  0x20   :  { %527 = vmatpush3.bf16.msra.mxu0 %v598_v30 }
  0x21   :  { %555 = vmatpush3.bf16.msra.mxu1 %v599_v31 }
  0x23   :  { %359 = vmatmul.mubr.bf16.vlgmr.msra.gmra.mrb[0].mxu0 %v600_v32 }
  0x24   :  { %408 = vmatmul.mubr.bf16.vlgmr.msra.gmra.mrb[0].mxu1 %v603_v34  ;;  %366 = vmatprep.mubr.bf16.mxu0 %v606_v36 }
  0x25   :  { %415 = vmatprep.mubr.bf16.mxu1 %v608_v37 }
  0x2b   :  { %367 = vmatmul.mubr.bf16.gmra.mrb[4].mxu0 %v610_v38 }
  0x2c   :  { %416 = vmatmul.mubr.bf16.gmra.mrb[4].mxu1 %v611_v39 }
  0xf6   :  { %v528_v40 = vpop.f32.mrb[0].mxu0 }
  0xf7   :  { %v556_v41 = vpop.f32.mrb[0].mxu1  ;;  %v529_v43 = vpop.f32.mrb[1].mxu0 }
  0xf8   :  { %v530_v44 = vadd.f32 %v529_v43, %v528_v40  ;;  %v557_v45 = vpop.f32.mrb[1].mxu1  ;;  %v531_v46 = vpop.f32.mrb[2].mxu0 }
  0xf9   :  { %v558_v47 = vadd.f32 %v557_v45, %v556_v41  ;;  %v559_v48 = vpop.f32.mrb[2].mxu1  ;;  %v532_v49 = vpop.f32.mrb[3].mxu0 }
  0xfa   :  { %v361_v50 = vadd.f32 %v530_v44, %v452_v42  ;;  %v533_v51 = vadd.f32 %v532_v49, %v531_v46  ;;  %v560_v52 = vpop.f32.mrb[3].mxu1 }
  0xfb   :  { %v561_v53 = vadd.f32 %v560_v52, %v559_v48 }
  0xfc   :  { %v410_v54 = vadd.f32 %v558_v47, %v361_v50  ;;  %v364_v55 = vadd.f32 %v533_v51, %v452_v42 }
  0xfe   :  { %v413_v56 = vadd.f32 %v561_v53, %v364_v55  ;;  %v534_v57 = vpop.f32.mrb[4].mxu0  ;;  %v424_v60 = vmax.f32 %v410_v54, 0.0 }
  0xff   :  { %v562_v58 = vpop.f32.mrb[4].mxu1  ;;  %v535_v59 = vpop.f32.mrb[5].mxu0 }
 0x100   :  { %v425_v61 = vmax.f32 %v413_v56, 0.0  ;;  %v536_v62 = vadd.f32 %v535_v59, %v534_v57  ;;  %v563_v63 = vpop.f32.mrb[5].mxu1  ;;  %v537_v0 = vpop.f32.mrb[6].mxu0 }
 0x101   :  { %v564_v1 = vadd.f32 %v563_v63, %v562_v58  ;;  %v565_v2 = vpop.f32.mrb[6].mxu1  ;;  %v538_v3 = vpop.f32.mrb[7].mxu0 }
 0x102   :  { %v504_v4 = vpack.c.bf16 %v425_v61, %v424_v60  ;;  %v369_v5 = vadd.f32 %v536_v62, %v452_v42  ;;  %v539_v6 = vadd.f32 %v538_v3, %v537_v0  ;;  %v566_v7 = vpop.f32.mrb[7].mxu1 }
 0x103   :  { %v567_v8 = vadd.f32 %v566_v7, %v565_v2 }
 0x104   :  { %505 = vst [vmem:[%s764_s3] sm:$0xff] %v504_v4   ;;  %v418_v9 = vadd.f32 %v564_v1, %v369_v5  ;;  %v372_v10 = vadd.f32 %v539_v6, %v452_v42 }
 0x106   :  { %v421_v11 = vadd.f32 %v567_v8, %v372_v10  ;;  %v426_v12 = vmax.f32 %v418_v9, 0.0 }
 0x108   :  { %v427_v13 = vmax.f32 %v421_v11, 0.0 }
 0x10a   :  { %v509_v14 = vpack.c.bf16 %v427_v13, %v426_v12 }
 0x10c   :  { %511 = vst [vmem:[%s764_s3 + $0x8] sm:$0xff] %v509_v14  }

// kernel: _lambda_.67
= control target key start
LH: loop header
LB: loop body
LE: loop exit
PB: predicated region body
PF: predicated region fallthrough
CT: control target
= control target key end

     0   :  { %s1059_s1 = inlined_call_operand.vmem [shape: bf16[512,256], index: 1, kind: input, shape index: {}]   ;;  %s1060_s0 = inlined_call_operand.vmem [shape: bf16[32,512], index: 0, kind: input, shape index: {}]   ;;  %s1061_s2 = inlined_call_operand.vmem [shape: f32[1,256], index: 2, kind: input, shape index: {}]   ;;  %s1062_s3 = inlined_call_operand.vmem [shape: bf16[32,256], index: 3, kind: output, shape index: {}]  }
   0x1   :  { %v700_v0 = vld [vmem:[%s1059_s1 + $0x4] ss:$8 sps:$4 sm:$0xff]   ;;  %v704_v2 = vld [vmem:[%s1059_s1] ss:$8 sps:$4 sm:$0xff]   ;;  %v706_v4 = vld [vmem:[%s1059_s1 + $0x14] ss:$8 sps:$4 sm:$0xff]  }
   0x2   :  { %v702_v1 = vld [vmem:[%s1059_s1 + $0x104] ss:$8 sps:$4 sm:$0xff]   ;;  %458 = vmatprep.subr.bf16.mxu1 %v700_v0  ;;  %v705_v3 = vld [vmem:[%s1059_s1 + $0x100] ss:$8 sps:$4 sm:$0xff]   ;;  %v708_v5 = vld [vmem:[%s1059_s1 + $0x114] ss:$8 sps:$4 sm:$0xff]  }
   0x3   :  { %511 = vmatprep.subr.bf16.mxu0 %v702_v1  ;;  %459 = vmatpush1.bf16.msra.mxu1 %v704_v2  ;;  %v710_v6 = vld [vmem:[%s1059_s1 + $0x10] ss:$8 sps:$4 sm:$0xff]   ;;  %v712_v8 = vld [vmem:[%s1059_s1 + $0x24] ss:$8 sps:$4 sm:$0xff]   ;;  %v716_v10 = vld [vmem:[%s1059_s1 + $0x20] ss:$8 sps:$4 sm:$0xff]  }
   0x4   :  { %512 = vmatpush1.bf16.msra.mxu0 %v705_v3  ;;  %460 = vmatprep.subr.bf16.mxu1 %v706_v4  ;;  %v711_v7 = vld [vmem:[%s1059_s1 + $0x110] ss:$8 sps:$4 sm:$0xff]   ;;  %v714_v9 = vld [vmem:[%s1059_s1 + $0x124] ss:$8 sps:$4 sm:$0xff]   ;;  %v717_v11 = vld [vmem:[%s1059_s1 + $0x120] ss:$8 sps:$4 sm:$0xff]  }
   0x5   :  { %513 = vmatprep.subr.bf16.mxu0 %v708_v5  ;;  %v718_v12 = vld [vmem:[%s1059_s1 + $0x34] ss:$8 sps:$4 sm:$0xff]   ;;  %v722_v14 = vld [vmem:[%s1059_s1 + $0x30] ss:$8 sps:$4 sm:$0xff]   ;;  %v724_v16 = vld [vmem:[%s1059_s1 + $0x44] ss:$8 sps:$4 sm:$0xff]  }
   0x6   :  { %v720_v13 = vld [vmem:[%s1059_s1 + $0x134] ss:$8 sps:$4 sm:$0xff]   ;;  %v723_v15 = vld [vmem:[%s1059_s1 + $0x130] ss:$8 sps:$4 sm:$0xff]   ;;  %v726_v17 = vld [vmem:[%s1059_s1 + $0x144] ss:$8 sps:$4 sm:$0xff]  }
   0x7   :  { %461 = vmatpush1.bf16.msra.mxu1 %v710_v6  ;;  %v728_v18 = vld [vmem:[%s1059_s1 + $0x40] ss:$8 sps:$4 sm:$0xff]   ;;  %v730_v20 = vld [vmem:[%s1059_s1 + $0x54] ss:$8 sps:$4 sm:$0xff]   ;;  %v734_v22 = vld [vmem:[%s1059_s1 + $0x50] ss:$8 sps:$4 sm:$0xff]  }
   0x8   :  { %514 = vmatpush1.bf16.msra.mxu0 %v711_v7  ;;  %462 = vmatprep.subr.bf16.mxu1 %v712_v8  ;;  %v729_v19 = vld [vmem:[%s1059_s1 + $0x140] ss:$8 sps:$4 sm:$0xff]   ;;  %v732_v21 = vld [vmem:[%s1059_s1 + $0x154] ss:$8 sps:$4 sm:$0xff]   ;;  %v735_v23 = vld [vmem:[%s1059_s1 + $0x150] ss:$8 sps:$4 sm:$0xff]   ;;  %v88_v8 = vlaneseq }
   0x9   :  { %515 = vmatprep.subr.bf16.mxu0 %v714_v9  ;;  %v736_v24 = vld [vmem:[%s1059_s1 + $0x64] ss:$8 sps:$4 sm:$0xff]   ;;  %v740_v26 = vld [vmem:[%s1059_s1 + $0x60] ss:$8 sps:$4 sm:$0xff]   ;;  %v742_v28 = vld [vmem:[%s1059_s1 + $0x74] ss:$8 sps:$4 sm:$0xff]  }
   0xa   :  { %v738_v25 = vld [vmem:[%s1059_s1 + $0x164] ss:$8 sps:$4 sm:$0xff]   ;;  %v741_v27 = vld [vmem:[%s1059_s1 + $0x160] ss:$8 sps:$4 sm:$0xff]   ;;  %v744_v29 = vld [vmem:[%s1059_s1 + $0x174] ss:$8 sps:$4 sm:$0xff]  }
   0xb   :  { %463 = vmatpush1.bf16.msra.mxu1 %v716_v10  ;;  %v746_v30 = vld [vmem:[%s1059_s1 + $0x70] ss:$8 sps:$4 sm:$0xff]   ;;  %v748_v32 = vld [vmem:[%s1059_s1 + $0x84] ss:$8 sps:$4 sm:$0xff]   ;;  %v752_v34 = vld [vmem:[%s1059_s1 + $0x80] ss:$8 sps:$4 sm:$0xff]  }
   0xc   :  { %516 = vmatpush1.bf16.msra.mxu0 %v717_v11  ;;  %464 = vmatprep.subr.bf16.mxu1 %v718_v12  ;;  %v747_v31 = vld [vmem:[%s1059_s1 + $0x170] ss:$8 sps:$4 sm:$0xff]   ;;  %v750_v33 = vld [vmem:[%s1059_s1 + $0x184] ss:$8 sps:$4 sm:$0xff]   ;;  %v753_v35 = vld [vmem:[%s1059_s1 + $0x180] ss:$8 sps:$4 sm:$0xff]  }
   0xd   :  { %517 = vmatprep.subr.bf16.mxu0 %v720_v13  ;;  %v754_v36 = vld [vmem:[%s1059_s1 + $0x94] ss:$8 sps:$4 sm:$0xff]   ;;  %v758_v38 = vld [vmem:[%s1059_s1 + $0x90] ss:$8 sps:$4 sm:$0xff]   ;;  %v760_v40 = vld [vmem:[%s1059_s1 + $0xa4] ss:$8 sps:$4 sm:$0xff]  }
   0xe   :  { %v756_v37 = vld [vmem:[%s1059_s1 + $0x194] ss:$8 sps:$4 sm:$0xff]   ;;  %v759_v39 = vld [vmem:[%s1059_s1 + $0x190] ss:$8 sps:$4 sm:$0xff]   ;;  %v762_v41 = vld [vmem:[%s1059_s1 + $0x1a4] ss:$8 sps:$4 sm:$0xff]  }
   0xf   :  { %465 = vmatpush1.bf16.msra.mxu1 %v722_v14  ;;  %v764_v42 = vld [vmem:[%s1059_s1 + $0xa0] ss:$8 sps:$4 sm:$0xff]   ;;  %v766_v44 = vld [vmem:[%s1059_s1 + $0xb4] ss:$8 sps:$4 sm:$0xff]   ;;  %v770_v46 = vld [vmem:[%s1059_s1 + $0xb0] ss:$8 sps:$4 sm:$0xff]  }
  0x10   :  { %518 = vmatpush1.bf16.msra.mxu0 %v723_v15  ;;  %466 = vmatprep.subr.bf16.mxu1 %v724_v16  ;;  %v765_v43 = vld [vmem:[%s1059_s1 + $0x1a0] ss:$8 sps:$4 sm:$0xff]   ;;  %v768_v45 = vld [vmem:[%s1059_s1 + $0x1b4] ss:$8 sps:$4 sm:$0xff]   ;;  %v771_v47 = vld [vmem:[%s1059_s1 + $0x1b0] ss:$8 sps:$4 sm:$0xff]  }
  0x11   :  { %519 = vmatprep.subr.bf16.mxu0 %v726_v17  ;;  %v772_v48 = vld [vmem:[%s1059_s1 + $0xc4] ss:$8 sps:$4 sm:$0xff]   ;;  %v776_v52 = vld [vmem:[%s1059_s1 + $0xc0] ss:$8 sps:$4 sm:$0xff]   ;;  %v778_v54 = vld [vmem:[%s1059_s1 + $0xd4] ss:$8 sps:$4 sm:$0xff]  }
  0x12   :  { %v798_v49 = vld [vmem:[%s1060_s0 + $0x4] ss:$16 sps:$4 sm:$0xff]   ;;  %v801_v51 = vld [vmem:[%s1060_s0 + $0xc] ss:$16 sps:$4 sm:$0xff]   ;;  %v777_v53 = vld [vmem:[%s1059_s1 + $0x1c0] ss:$8 sps:$4 sm:$0xff]  }
  0x13   :  { %467 = vmatpush1.bf16.msra.mxu1 %v728_v18  ;;  %v774_v50 = vld [vmem:[%s1059_s1 + $0x1c4] ss:$8 sps:$4 sm:$0xff]   ;;  %490 = vmatprep.mubr.bf16.mxu1 %v798_v49  ;;  %v780_v55 = vld [vmem:[%s1059_s1 + $0x1d4] ss:$8 sps:$4 sm:$0xff]   ;;  %v782_v56 = vld [vmem:[%s1059_s1 + $0xd0] ss:$8 sps:$4 sm:$0xff]  }
  0x14   :  { %520 = vmatpush1.bf16.msra.mxu0 %v729_v19  ;;  %468 = vmatprep.subr.bf16.mxu1 %v730_v20  ;;  %v783_v57 = vld [vmem:[%s1059_s1 + $0x1d0] ss:$8 sps:$4 sm:$0xff]   ;;  %v784_v58 = vld [vmem:[%s1059_s1 + $0xe4] ss:$8 sps:$4 sm:$0xff]   ;;  %v788_v60 = vld [vmem:[%s1059_s1 + $0xe0] ss:$8 sps:$4 sm:$0xff]  }
  0x15   :  { %521 = vmatprep.subr.bf16.mxu0 %v732_v21  ;;  %543 = vmatprep.mubr.bf16.mxu0 %v801_v51  ;;  %v786_v59 = vld [vmem:[%s1059_s1 + $0x1e4] ss:$8 sps:$4 sm:$0xff]   ;;  %v789_v61 = vld [vmem:[%s1059_s1 + $0x1e0] ss:$8 sps:$4 sm:$0xff]   ;;  %v790_v62 = vld [vmem:[%s1059_s1 + $0xf4] ss:$8 sps:$4 sm:$0xff]  }
  0x16   :  { %v792_v63 = vld [vmem:[%s1059_s1 + $0x1f4] ss:$8 sps:$4 sm:$0xff]   ;;  %v794_v0 = vld [vmem:[%s1059_s1 + $0xf0] ss:$8 sps:$4 sm:$0xff]   ;;  %v89_v9 = vshrl.u32 %v88_v8, 7 }
  0x17   :  { %469 = vmatpush1.bf16.msra.mxu1 %v734_v22  ;;  %v795_v1 = vld [vmem:[%s1059_s1 + $0x1f0] ss:$8 sps:$4 sm:$0xff]   ;;  %v802_v4 = vld [vmem:[%s1060_s0 + $0x24] ss:$16 sps:$4 sm:$0xff]   ;;  %v804_v5 = vld [vmem:[%s1060_s0 + $0x2c] ss:$16 sps:$4 sm:$0xff]  }
  0x18   :  { %522 = vmatpush1.bf16.msra.mxu0 %v735_v23  ;;  %470 = vmatprep.subr.bf16.mxu1 %v736_v24  ;;  %v796_v2 = vld [vmem:[%s1060_s0] ss:$16 sps:$4 sm:$0xff]   ;;  %v799_v3 = vld [vmem:[%s1060_s0 + $0x8] ss:$16 sps:$4 sm:$0xff]   ;;  %v90_v10 = vsub.s32 0, %v89_v9  ;;  %v94_v12 = vsub.s32 1, %v89_v9 }
  0x19   :  { %523 = vmatprep.subr.bf16.mxu0 %v738_v25  ;;  %v806_v6 = vld [vmem:[%s1060_s0 + $0x20] ss:$16 sps:$4 sm:$0xff]   ;;  %v807_v7 = vld [vmem:[%s1060_s0 + $0x28] ss:$16 sps:$4 sm:$0xff]  }
  0x1a   :  { %v86_v11 = vld [vmem:[%s1061_s2] sm:$0x3] }
  0x1b   :  { %471 = vmatpush1.bf16.msra.mxu1 %v740_v26  ;;  %v91_v13 = vrot.slane %v86_v11, %v90_v10  ;;  %v95_v14 = vrot.slane %v86_v11, %v94_v12 }
  0x1c   :  { %524 = vmatpush1.bf16.msra.mxu0 %v741_v27  ;;  %472 = vmatprep.subr.bf16.mxu1 %v742_v28 }
  0x1d   :  { %525 = vmatprep.subr.bf16.mxu0 %v744_v29 }
  0x1f   :  { %473 = vmatpush1.bf16.msra.mxu1 %v746_v30 }
  0x20   :  { %526 = vmatpush1.bf16.msra.mxu0 %v747_v31  ;;  %474 = vmatprep.subr.bf16.mxu1 %v748_v32 }
  0x21   :  { %527 = vmatprep.subr.bf16.mxu0 %v750_v33 }
  0x23   :  { %475 = vmatpush1.bf16.msra.mxu1 %v752_v34 }
  0x24   :  { %528 = vmatpush1.bf16.msra.mxu0 %v753_v35  ;;  %476 = vmatprep.subr.bf16.mxu1 %v754_v36 }
  0x25   :  { %529 = vmatprep.subr.bf16.mxu0 %v756_v37 }
  0x27   :  { %477 = vmatpush1.bf16.msra.mxu1 %v758_v38 }
  0x28   :  { %530 = vmatpush1.bf16.msra.mxu0 %v759_v39  ;;  %478 = vmatprep.subr.bf16.mxu1 %v760_v40 }
  0x29   :  { %531 = vmatprep.subr.bf16.mxu0 %v762_v41 }
  0x2b   :  { %479 = vmatpush1.bf16.msra.mxu1 %v764_v42 }
  0x2c   :  { %532 = vmatpush1.bf16.msra.mxu0 %v765_v43  ;;  %480 = vmatprep.subr.bf16.mxu1 %v766_v44 }
  0x2d   :  { %533 = vmatprep.subr.bf16.mxu0 %v768_v45 }
  0x2f   :  { %481 = vmatpush1.bf16.msra.mxu1 %v770_v46 }
  0x30   :  { %534 = vmatpush1.bf16.msra.mxu0 %v771_v47  ;;  %482 = vmatprep.subr.bf16.mxu1 %v772_v48 }
  0x31   :  { %535 = vmatprep.subr.bf16.mxu0 %v774_v50 }
  0x33   :  { %483 = vmatpush1.bf16.msra.mxu1 %v776_v52 }
  0x34   :  { %536 = vmatpush1.bf16.msra.mxu0 %v777_v53  ;;  %484 = vmatprep.subr.bf16.mxu1 %v778_v54 }
  0x35   :  { %537 = vmatprep.subr.bf16.mxu0 %v780_v55 }
  0x37   :  { %485 = vmatpush1.bf16.msra.mxu1 %v782_v56 }
  0x38   :  { %538 = vmatpush1.bf16.msra.mxu0 %v783_v57  ;;  %486 = vmatprep.subr.bf16.mxu1 %v784_v58 }
  0x39   :  { %539 = vmatprep.subr.bf16.mxu0 %v786_v59 }
  0x3b   :  { %487 = vmatpush1.bf16.msra.mxu1 %v788_v60 }
  0x3c   :  { %540 = vmatpush1.bf16.msra.mxu0 %v789_v61  ;;  %488 = vmatprep.subr.bf16.mxu1 %v790_v62 }
  0x3d   :  { %541 = vmatprep.subr.bf16.mxu0 %v792_v63 }
  0x3f   :  { %489 = vmatpush1.bf16.msra.mxu1 %v794_v0 }
  0x40   :  { %542 = vmatpush1.bf16.msra.mxu0 %v795_v1 }
  0x42   :  { %491 = vmatmul.mubr.bf16.vlgmr.msra.gmra.mrb[0].mxu1 %v796_v2 }
  0x43   :  { %544 = vmatmul.mubr.bf16.vlgmr.msra.gmra.mrb[0].mxu0 %v799_v3  ;;  %500 = vmatprep.mubr.bf16.mxu1 %v802_v4 }
  0x44   :  { %553 = vmatprep.mubr.bf16.mxu0 %v804_v5 }
  0x4a   :  { %501 = vmatmul.mubr.bf16.gmra.mrb[4].mxu1 %v806_v6 }
  0x4b   :  { %554 = vmatmul.mubr.bf16.gmra.mrb[4].mxu0 %v807_v7 }
 0x115   :  { %v492_v15 = vpop.f32.mrb[0].mxu1 }
 0x116   :  { %v545_v16 = vpop.f32.mrb[0].mxu0  ;;  %v493_v17 = vadd.f32 %v492_v15, %v91_v13  ;;  %v494_v18 = vpop.f32.mrb[1].mxu1 }
 0x117   :  { %v547_v19 = vpop.f32.mrb[1].mxu0  ;;  %v495_v20 = vadd.f32 %v494_v18, %v95_v14  ;;  %v496_v21 = vpop.f32.mrb[2].mxu1 }
 0x118   :  { %v549_v22 = vpop.f32.mrb[2].mxu0  ;;  %v546_v23 = vadd.f32 %v545_v16, %v493_v17  ;;  %v497_v24 = vadd.f32 %v496_v21, %v91_v13  ;;  %v498_v25 = vpop.f32.mrb[3].mxu1 }
 0x119   :  { %v551_v26 = vpop.f32.mrb[3].mxu0  ;;  %v548_v27 = vadd.f32 %v547_v19, %v495_v20  ;;  %v499_v28 = vadd.f32 %v498_v25, %v95_v14 }
 0x11a   :  { %v564_v29 = vmax.f32 %v546_v23, 0.0  ;;  %v550_v30 = vadd.f32 %v549_v22, %v497_v24 }
 0x11b   :  { %v565_v31 = vmax.f32 %v548_v27, 0.0  ;;  %v552_v32 = vadd.f32 %v551_v26, %v499_v28 }
 0x11c   :  { %v566_v33 = vmax.f32 %v550_v30, 0.0 }
 0x11d   :  { %v680_v34 = vpack.c.bf16 %v565_v31, %v564_v29  ;;  %v567_v35 = vmax.f32 %v552_v32, 0.0  ;;  %v502_v36 = vpop.f32.mrb[4].mxu1 }
 0x11e   :  { %v555_v37 = vpop.f32.mrb[4].mxu0  ;;  %v503_v38 = vadd.f32 %v502_v36, %v91_v13  ;;  %v504_v39 = vpop.f32.mrb[5].mxu1 }
 0x11f   :  { %v557_v40 = vpop.f32.mrb[5].mxu0  ;;  %596 = vst [vmem:[%s1062_s3] sm:$0xff] %v680_v34  ;;  %v681_v41 = vpack.c.bf16 %v567_v35, %v566_v33  ;;  %v505_v42 = vadd.f32 %v504_v39, %v95_v14  ;;  %v506_v43 = vpop.f32.mrb[6].mxu1 }
 0x120   :  { %v559_v44 = vpop.f32.mrb[6].mxu0  ;;  %v556_v45 = vadd.f32 %v555_v37, %v503_v38  ;;  %v507_v46 = vadd.f32 %v506_v43, %v91_v13  ;;  %v508_v47 = vpop.f32.mrb[7].mxu1 }
 0x121   :  { %v561_v48 = vpop.f32.mrb[7].mxu0  ;;  %597 = vst [vmem:[%s1062_s3 + $0x8] sm:$0xff] %v681_v41  ;;  %v558_v49 = vadd.f32 %v557_v40, %v505_v42  ;;  %v509_v50 = vadd.f32 %v508_v47, %v95_v14 }
 0x122   :  { %v568_v51 = vmax.f32 %v556_v45, 0.0  ;;  %v560_v52 = vadd.f32 %v559_v44, %v507_v46 }
 0x123   :  { %v569_v53 = vmax.f32 %v558_v49, 0.0  ;;  %v562_v54 = vadd.f32 %v561_v48, %v509_v50 }
 0x124   :  { %v570_v55 = vmax.f32 %v560_v52, 0.0 }
 0x125   :  { %v682_v56 = vpack.c.bf16 %v569_v53, %v568_v51  ;;  %v571_v57 = vmax.f32 %v562_v54, 0.0 }
 0x127   :  { %598 = vst [vmem:[%s1062_s3 + $0x10] sm:$0xff] %v682_v56  ;;  %v683_v58 = vpack.c.bf16 %v571_v57, %v570_v55 }
 0x129   :  { %599 = vst [vmem:[%s1062_s3 + $0x18] sm:$0xff] %v683_v58 }

// kernel: _lambda_.59
= control target key start
LH: loop header
LB: loop body
LE: loop exit
PB: predicated region body
PF: predicated region fallthrough
CT: control target
= control target key end

     0   :  { %s2057_s12 = smov 0   ;;  %s2386_s0 = inlined_call_operand.vmem [shape: bf16[2,7,8,128], index: 0, kind: input, shape index: {}]   ;;  %s2387_s1 = inlined_call_operand.vmem [shape: bf16[9,128,128], index: 1, kind: input, shape index: {}]   ;;  %s2388_s2 = inlined_call_operand.vmem [shape: f32[1,128], index: 2, kind: input, shape index: {}]   ;;  %s2389_s3 = inlined_call_operand.vmem [shape: bf16[2,4,4,128], index: 3, kind: output, shape index: {}]  }
   0x1 LB: > { %s1418_s13 = sadd.s32 4294967295, %s2035_s12   ;;  %p1422_p0 = scmp.ge.s32.totalorder %s2035_s12, 1  ;;  %s2035_s12 = sphi %s2057_s12, %s13_s12  }
   0x2   : > { %p137_p1 = scmp.lt.s32.totalorder %s2035_s12, 3 }
   0x4   : > { %p138_p2 = pnand %p1422_p0, %p137_p1 }
   0x5   : > { %v1949_v0 = vld [vmem:[%s2387_s1 + $0x40] sm:$0xff] (!%p138_p2)   ;;  %p161_p3 = scmp.lt.s32.totalorder (!%p138_p2), %s1418_s13, 1  ;;  %v1951_v2 = vld [vmem:[%s2387_s1 + $0x48] sm:$0xff] (!%p138_p2)   ;;  %v1953_v4 = vld [vmem:[%s2387_s1 + $0x50] sm:$0xff] (!%p138_p2)   ;;  %vm225_vm0 = vsmask.f32 (!%p138_p2), 7424 }
   0x6   : > { %141 = sbr.rel (%p138_p2) target bundleno = 391 (0x187), region = 32  ;;  %v1950_v1 = vld [vmem:[%s2387_s1 + $0x100] sm:$0xff] (!%p138_p2)   ;;  %1728 = vmatprep.subr.bf16.mxu1 (!%p138_p2), %v1949_v0  ;;  %v1952_v3 = vld [vmem:[%s2387_s1 + $0x108] sm:$0xff] (!%p138_p2)   ;;  %v1954_v5 = vld [vmem:[%s2387_s1 + $0x110] sm:$0xff] (!%p138_p2)   ;;  %vm461_vm1 = vcmask (!%p138_p2), 1046528  }
   0x7   : > { %1808 = vmatprep.subr.bf16.mxu0 (!%p138_p2), %v1950_v1  ;;  %1729 = vmatpush3.bf16.msra.mxu1 (!%p138_p2), %v1949_v0  ;;  %v1955_v6 = vld [vmem:[%s2387_s1 + $0x58] sm:$0xff] (!%p138_p2)   ;;  %v1957_v8 = vld [vmem:[%s2387_s1 + $0x60] sm:$0xff] (!%p138_p2)   ;;  %v1959_v10 = vld [vmem:[%s2387_s1 + $0x68] sm:$0xff] (!%p138_p2)  }
   0x8   : > { %1809 = vmatpush3.bf16.msra.mxu0 (!%p138_p2), %v1950_v1  ;;  %1730 = vmatprep.subr.bf16.mxu1 (!%p138_p2), %v1951_v2  ;;  %v1956_v7 = vld [vmem:[%s2387_s1 + $0x118] sm:$0xff] (!%p138_p2)   ;;  %v1958_v9 = vld [vmem:[%s2387_s1 + $0x120] sm:$0xff] (!%p138_p2)   ;;  %v1960_v14 = vld [vmem:[%s2387_s1 + $0x128] sm:$0xff] (!%p138_p2)  }
   0x9   : > { %1810 = vmatprep.subr.bf16.mxu0 (!%p138_p2), %v1952_v3  ;;  %v1961_v20 = vld [vmem:[%s2387_s1 + $0x70] sm:$0xff] (!%p138_p2)   ;;  %v1963_v32 = vld [vmem:[%s2387_s1 + $0x78] sm:$0xff] (!%p138_p2)   ;;  %v1967_v49 = vld [vmem:[%s2387_s1] sm:$0xff] (!%p138_p2)  }
   0xa   : > { %v1962_v24 = vld [vmem:[%s2387_s1 + $0x130] sm:$0xff] (!%p138_p2)   ;;  %v1964_v37 = vld [vmem:[%s2387_s1 + $0x138] sm:$0xff] (!%p138_p2)   ;;  %v1970_v52 = vld [vmem:[%s2387_s1 + $0x140] sm:$0xff] (!%p138_p2)  }
   0xb   : > { %1731 = vmatpush3.bf16.msra.mxu1 (!%p138_p2), %v1951_v2  ;;  %v1973_v57 = vld [vmem:[%s2387_s1 + $0x8] sm:$0xff] (!%p138_p2)   ;;  %v1975_v60 = vld [vmem:[%s2387_s1 + $0x10] sm:$0xff] (!%p138_p2)  }
   0xc   : > { %1811 = vmatpush3.bf16.msra.mxu0 (!%p138_p2), %v1952_v3  ;;  %1732 = vmatprep.subr.bf16.mxu1 (!%p138_p2), %v1953_v4  ;;  %v1974_v58 = vld [vmem:[%s2387_s1 + $0x148] sm:$0xff] (!%p138_p2)   ;;  %v1976_v1 = vld [vmem:[%s2387_s1 + $0x150] sm:$0xff] (!%p138_p2)  }
   0xd   : > { %s2391_s13 = smov (!%p161_p3, %s1418_s13), 1  ;;  %1812 = vmatprep.subr.bf16.mxu0 %v1954_v5 }
   0xe   : > { %s1940_s30 = smul.u32 28, %s2391_s13  ;;  %s1637_s16 = sshll.u32 %s2391_s13, 3 }
   0xf   : > { %1733 = vmatpush3.bf16.msra.mxu1 %v1953_v4  ;;  %v1977_v4 = vld [vmem:[%s2387_s1 + $0x18] sm:$0xff]   ;;  %s170_s19 = scalar_lea.vmem %s2389_s3, %s1637_s16 }
  0x10   : > { %1813 = vmatpush3.bf16.msra.mxu0 %v1954_v5  ;;  %1734 = vmatprep.subr.bf16.mxu1 %v1955_v6  ;;  %s2101_s10 = scalar_lea.vmem %s2386_s0, %s1940_s30  ;;  %v1978_v5 = vld [vmem:[%s2387_s1 + $0x158] sm:$0xff]  }
  0x11   : > { %1814 = vmatprep.subr.bf16.mxu0 %v1956_v7  ;;  %v172_v11 = vld [vmem:[%s2101_s10] sm:$0xf]  ;;  %v173_v12 = vld [vmem:[%s2101_s10 + $0x4] sm:$0xf]  ;;  %v174_v13 = vld [vmem:[%s2101_s10 + $0x8] sm:$0xf] }
  0x12   : > { %v175_v15 = vld [vmem:[%s2101_s10 + $0xc] sm:$0xf]  ;;  %v2113_v16 = vcombine.low %v172_v11, %v173_v12  ;;  %v2115_v17 = vcombine.low %v173_v12, %v174_v13  ;;  %v176_v19 = vld [vmem:[%s2101_s10 + $0x10] sm:$0xf]  ;;  %v177_v31 = vld [vmem:[%s2101_s10 + $0x14] sm:$0xf] }
  0x13   : > { %1735 = vmatpush3.bf16.msra.mxu1 %v1955_v6  ;;  %v2117_v18 = vcombine.low %v174_v13, %v175_v15  ;;  %v2125_v23 = vcombine.low %v175_v15, %v176_v19  ;;  %v2133_v28 = vcombine.low %v176_v19, %v176_v19  ;;  %v2141_v36 = vcombine.low %v177_v31, %v177_v31  ;;  %v1979_v6 = vld [vmem:[%s2387_s1 + $0x20] sm:$0xff]   ;;  %v1984_v11 = vld [vmem:[%s2387_s1 + $0x170] sm:$0xff]   ;;  %v1985_v12 = vld [vmem:[%s2387_s1 + $0x38] sm:$0xff]  }
  0x14   : > { %1815 = vmatpush3.bf16.msra.mxu0 %v1956_v7  ;;  %1736 = vmatprep.subr.bf16.mxu1 %v1957_v8  ;;  %v227_v21 = vshrl.u32 %v2113_v16, 16  ;;  %v229_v22 = vshll.u32 %v2113_v16, 16  ;;  %v713_v26 = vshrl.u32 %v2115_v17, 16  ;;  %v715_v27 = vshll.u32 %v2115_v17, 16  ;;  %v1980_v7 = vld [vmem:[%s2387_s1 + $0x160] sm:$0xff]   ;;  %v1986_v13 = vld [vmem:[%s2387_s1 + $0x178] sm:$0xff]  }
  0x15   : > { %1816 = vmatprep.subr.bf16.mxu0 %v1958_v9  ;;  %v234_v25 = vshll.u32 %v2117_v18, 16  ;;  %v720_v30 = vshll.u32 %v2125_v23, 16  ;;  %v238_v35 = vshrl.u32 %v2117_v18, 16  ;;  %v242_v40 = vshll.u32 %v2133_v28, 16 }
  0x16   : > { %v231_v29 = vrot.slane %v229_v22, 1  ;;  %v717_v34 = vrot.slane %v715_v27, 1  ;;  %v2147_v41 = vcombine.low %v176_v19, %v177_v31  ;;  %v724_v43 = vshrl.u32 %v2125_v23, 16  ;;  %v1988_v19 = vld [vmem:[%s2387_s1 + $0x180] sm:$0xff]   ;;  %v1989_v22 = vld [vmem:[%s2387_s1 + $0x88] sm:$0xff]   ;;  %v1992_v27 = vld [vmem:[%s2387_s1 + $0x190] sm:$0xff]  }
  0x17   : > { %1737 = vmatpush3.bf16.msra.mxu1 %v1957_v8  ;;  %v236_v33 = vrot.slane %v234_v25, 1  ;;  %v722_v39 = vrot.slane %v720_v30, 1  ;;  %v728_v44 = vshll.u32 %v2141_v36, 16  ;;  %v244_v48 = vrot.slane %v242_v40, 1  ;;  %v1981_v8 = vld [vmem:[%s2387_s1 + $0x28] sm:$0xff]   ;;  %v1991_v25 = vld [vmem:[%s2387_s1 + $0x90] sm:$0xff]  }
  0x18   : > { %1817 = vmatpush3.bf16.msra.mxu0 %v1958_v9  ;;  %1738 = vmatprep.subr.bf16.mxu1 %v1959_v10  ;;  %v232_v38 = vor.u32 %v231_v29, %v227_v21  ;;  %v718_v42 = vor.u32 %v717_v34, %v713_v26  ;;  %v852_v54 = vrot.slane %v2115_v17, 1  ;;  %v853_v55 = vrot.slane %v2125_v23, 1  ;;  %v1982_v9 = vld [vmem:[%s2387_s1 + $0x168] sm:$0xff]   ;;  %v2021_v29 = vld [vmem:[%s2101_s10 + $0x18] ss:$0 sps:$4 sm:$0xff]  }
  0x19   : > { %1818 = vmatprep.subr.bf16.mxu0 %v1960_v14  ;;  %v240_v47 = vor.u32 %v238_v35, %v236_v33  ;;  %v726_v50 = vor.u32 %v724_v43, %v722_v39  ;;  %v730_v51 = vrot.slane %v728_v44, 1  ;;  %v1101_v59 = vshll.u32 %v2147_v41, 16  ;;  %v1994_v34 = vld [vmem:[%s2387_s1 + $0x198] sm:$0xff]   ;;  %v1998_v40 = vld [vmem:[%s2387_s1 + $0x1a8] sm:$0xff]   ;;  %v2000_v43 = vld [vmem:[%s2387_s1 + $0x1b0] sm:$0xff]  }
  0x1a   : > { %v237_v45 = vsel %vm225_vm0, %v232_v38, %v236_v33  ;;  %v723_v46 = vsel %vm225_vm0, %v718_v42, %v722_v39  ;;  %v854_v61 = vsel %vm461_vm1, %v852_v54, %v853_v55  ;;  %v2179_v63 = vrot.slane %v2117_v18, 1  ;;  %v1996_v38 = vld [vmem:[%s2387_s1 + $0x1a0] sm:$0xff]   ;;  %v1997_v39 = vld [vmem:[%s2387_s1 + $0xa8] sm:$0xff]   ;;  %v1999_v42 = vld [vmem:[%s2387_s1 + $0xb0] sm:$0xff]  }
  0x1b   : > { %1739 = vmatpush3.bf16.msra.mxu1 %v1959_v10  ;;  %1744 = vmatprep.mubr.bf16.mxu1 %v237_v45  ;;  %v245_v53 = vsel %vm225_vm0, %v240_v47, %v244_v48  ;;  %v731_v56 = vsel %vm225_vm0, %v726_v50, %v730_v51  ;;  %v2176_v62 = vrot.slane %v1101_v59, 1  ;;  %v1233_v0 = vrot.slane %v2147_v41, 1  ;;  %v1983_v10 = vld [vmem:[%s2387_s1 + $0x30] sm:$0xff]   ;;  %v2001_v44 = vld [vmem:[%s2387_s1 + $0xb8] sm:$0xff]   ;;  %v2004_v48 = vld [vmem:[%s2387_s1 + $0x1c0] sm:$0xff]  }
  0x1c   : > { %1819 = vmatpush3.bf16.msra.mxu0 %v1960_v14  ;;  %1740 = vmatprep.subr.bf16.mxu1 %v1961_v20  ;;  %v1987_v14 = vld [vmem:[%s2387_s1 + $0x80] sm:$0xff]   ;;  %v855_v15 = vrot.slane %v2141_v36, 1  ;;  %v1105_v26 = vshrl.u32 %v2147_v41, 16  ;;  %v1109_v31 = vshll.u32 %v2021_v29, 16  ;;  %v1235_v33 = vrot.slane %v2021_v29, 1  ;;  %v2002_v45 = vld [vmem:[%s2387_s1 + $0x1b8] sm:$0xff]  }
  0x1d   : > { %1820 = vmatprep.subr.bf16.mxu0 %v1962_v24  ;;  %1824 = vmatprep.mubr.bf16.mxu0 %v723_v46  ;;  %v2188_v2 = vsel %vm225_vm0, %v240_v47, %v2176_v62  ;;  %v2194_v3 = vsel %vm461_vm1, %v2179_v63, %v1233_v0  ;;  %v465_v46 = vrot.slane %v2133_v28, 1  ;;  %v2003_v47 = vld [vmem:[%s2387_s1 + $0xc0] sm:$0xff]   ;;  %v2006_v28 = vld [vmem:[%s2387_s1 + $0xc8] sm:$0xff]   ;;  %v2008_v51 = vld [vmem:[%s2387_s1 + $0xd0] sm:$0xff]  }
  0x1e   : > { %v856_v21 = vsel %vm461_vm1, %v853_v55, %v855_v15  ;;  %v1107_v30 = vor.u32 %v1105_v26, %v2176_v62  ;;  %v1111_v35 = vrot.slane %v1109_v31, 1  ;;  %v2007_v50 = vld [vmem:[%s2387_s1 + $0x1c8] sm:$0xff]   ;;  %v2013_v54 = vld [vmem:[%s2387_s1 + $0x1e0] sm:$0xff]   ;;  %v2018_v59 = vld [vmem:[%s2387_s1 + $0xf8] sm:$0xff]  }
  0x1f   : > { %1741 = vmatpush3.bf16.msra.mxu1 %v1961_v20  ;;  %v462_v20 = vrot.slane %v2113_v16, 1  ;;  %v2014_v55 = vld [vmem:[%s2387_s1 + $0xe8] sm:$0xff]  }
  0x20   : > { %1821 = vmatpush3.bf16.msra.mxu0 %v1962_v24  ;;  %1742 = vmatprep.subr.bf16.mxu1 %v1963_v32  ;;  %v1990_v24 = vld [vmem:[%s2387_s1 + $0x188] sm:$0xff]   ;;  %v2268_v36 = vsel %vm225_vm0, %v1107_v30, %v1111_v35 }
  0x21   : > { %1822 = vmatprep.subr.bf16.mxu0 %v1964_v37  ;;  %v2022_v62 = vld [vmem:[%s2387_s1 + $0x208] sm:$0xff]  }
  0x23   : > { %1743 = vmatpush3.bf16.msra.mxu1 %v1963_v32  ;;  %v1993_v32 = vld [vmem:[%s2387_s1 + $0x98] sm:$0xff]  }
  0x24   : > { %1823 = vmatpush3.bf16.msra.mxu0 %v1964_v37  ;;  %1748 = vmatprep.subr.bf16.mxu1 %v1967_v49  ;;  %v1995_v37 = vld [vmem:[%s2387_s1 + $0xa0] sm:$0xff]  }
  0x25   : > { %1828 = vmatprep.subr.bf16.mxu0 %v1970_v52 }
  0x26   : > { %1745 = vmatmul.mubr.bf16.vlgmr.msra.gmra.mrb[0].mxu1 %v245_v53  ;;  %v2011_v53 = vld [vmem:[%s2387_s1 + $0x1d8] sm:$0xff]  }
  0x27   : > { %1749 = vmatpush3.bf16.msra.mxu1 %v1967_v49  ;;  %1825 = vmatmul.mubr.bf16.vlgmr.msra.gmra.mrb[0].mxu0 %v731_v56  ;;  %v466_v49 = vsel %vm461_vm1, %v2179_v63, %v465_v46  ;;  %v2015_v56 = vld [vmem:[%s2387_s1 + $0x1e8] sm:$0xff]  }
  0x28   : > { %1829 = vmatpush3.bf16.msra.mxu0 %v1970_v52  ;;  %1750 = vmatprep.subr.bf16.mxu1 %v1973_v57  ;;  %v2009_v52 = vld [vmem:[%s2387_s1 + $0x1d0] sm:$0xff]  }
  0x29   : > { %1830 = vmatprep.subr.bf16.mxu0 %v1974_v58  ;;  %1764 = vmatprep.mubr.bf16.mxu1 %v2113_v16  ;;  %v464_v16 = vsel %vm461_vm1, %v462_v20, %v2179_v63  ;;  %v2023_v63 = vld [vmem:[%s2387_s1 + $0x210] sm:$0xff]  }
  0x2a   : > { %1844 = vmatprep.mubr.bf16.mxu0 %v854_v61  ;;  %v2020_v61 = vld [vmem:[%s2387_s1 + $0x200] sm:$0xff]  }
  0x2b   : > { %1751 = vmatpush3.bf16.msra.mxu1 %v1973_v57  ;;  %v2016_v57 = vld [vmem:[%s2387_s1 + $0xf0] sm:$0xff]  }
  0x2c   : > { %1831 = vmatpush3.bf16.msra.mxu0 %v1974_v58  ;;  %1752 = vmatprep.subr.bf16.mxu1 %v1975_v60  ;;  %v2017_v58 = vld [vmem:[%s2387_s1 + $0x1f0] sm:$0xff]  }
  0x2d   : > { %1832 = vmatprep.subr.bf16.mxu0 %v1976_v1 }
  0x2f   : > { %1753 = vmatpush3.bf16.msra.mxu1 %v1975_v60  ;;  %v2019_v60 = vld [vmem:[%s2387_s1 + $0x1f8] sm:$0xff]  }
  0x30   : > { %1833 = vmatpush3.bf16.msra.mxu0 %v1976_v1  ;;  %1754 = vmatprep.subr.bf16.mxu1 %v1977_v4  ;;  %v2026_v1 = vld [vmem:[%s2387_s1 + $0x228] sm:$0xff]  }
  0x31   : > { %1834 = vmatprep.subr.bf16.mxu0 %v1978_v5 }
  0x33   : > { %1755 = vmatpush3.bf16.msra.mxu1 %v1977_v4 }
  0x34   : > { %1835 = vmatpush3.bf16.msra.mxu0 %v1978_v5  ;;  %1756 = vmatprep.subr.bf16.mxu1 %v1979_v6 }
  0x35   : > { %1836 = vmatprep.subr.bf16.mxu0 %v1980_v7 }
  0x37   : > { %1757 = vmatpush3.bf16.msra.mxu1 %v1979_v6 }
  0x38   : > { %1837 = vmatpush3.bf16.msra.mxu0 %v1980_v7  ;;  %1758 = vmatprep.subr.bf16.mxu1 %v1981_v8 }
  0x39   : > { %1838 = vmatprep.subr.bf16.mxu0 %v1982_v9 }
  0x3b   : > { %1759 = vmatpush3.bf16.msra.mxu1 %v1981_v8 }
  0x3c   : > { %1839 = vmatpush3.bf16.msra.mxu0 %v1982_v9  ;;  %1760 = vmatprep.subr.bf16.mxu1 %v1983_v10  ;;  %v1634_v9 = vld [vmem:[%s2388_s2] ss:$0 sm:$0xff] }
  0x3d   : > { %1840 = vmatprep.subr.bf16.mxu0 %v1984_v11 }
  0x3f   : > { %1761 = vmatpush3.bf16.msra.mxu1 %v1983_v10 }
  0x40   : > { %1841 = vmatpush3.bf16.msra.mxu0 %v1984_v11  ;;  %1762 = vmatprep.subr.bf16.mxu1 %v1985_v12 }
  0x41   : > { %1842 = vmatprep.subr.bf16.mxu0 %v1986_v13 }
  0x43   : > { %1763 = vmatpush3.bf16.msra.mxu1 %v1985_v12 }
  0x44   : > { %1843 = vmatpush3.bf16.msra.mxu0 %v1986_v13  ;;  %1768 = vmatprep.subr.bf16.mxu1 %v1987_v14 }
  0x45   : > { %1848 = vmatprep.subr.bf16.mxu0 %v1988_v19 }
  0x46   : > { %1765 = vmatmul.mubr.bf16.vlgmr.msra.gmra.mrb[0].mxu1 %v2117_v18 }
  0x47   : > { %1769 = vmatpush3.bf16.msra.mxu1 %v1987_v14  ;;  %1845 = vmatmul.mubr.bf16.vlgmr.msra.gmra.mrb[0].mxu0 %v856_v21 }
  0x48   : > { %1849 = vmatpush3.bf16.msra.mxu0 %v1988_v19  ;;  %1770 = vmatprep.subr.bf16.mxu1 %v1989_v22 }
  0x49   : > { %1850 = vmatprep.subr.bf16.mxu0 %v1990_v24  ;;  %1784 = vmatprep.mubr.bf16.mxu1 %v464_v16 }
  0x4a   : > { %1864 = vmatprep.mubr.bf16.mxu0 %v2117_v18  ;;  %v2265_v18 = vsel %vm461_vm1, %v1233_v0, %v1235_v33  ;;  %v2024_v0 = vld [vmem:[%s2387_s1 + $0x218] sm:$0xff]  }
  0x4b   : > { %1771 = vmatpush3.bf16.msra.mxu1 %v1989_v22 }
  0x4c   : > { %1851 = vmatpush3.bf16.msra.mxu0 %v1990_v24  ;;  %1772 = vmatprep.subr.bf16.mxu1 %v1991_v25 }
  0x4d   : > { %1852 = vmatprep.subr.bf16.mxu0 %v1992_v27 }
  0x4f   : > { %1773 = vmatpush3.bf16.msra.mxu1 %v1991_v25 }
  0x50   : > { %1853 = vmatpush3.bf16.msra.mxu0 %v1992_v27  ;;  %1774 = vmatprep.subr.bf16.mxu1 %v1993_v32 }
  0x51   : > { %1854 = vmatprep.subr.bf16.mxu0 %v1994_v34 }
  0x53   : > { %1775 = vmatpush3.bf16.msra.mxu1 %v1993_v32 }
  0x54   : > { %1855 = vmatpush3.bf16.msra.mxu0 %v1994_v34  ;;  %1776 = vmatprep.subr.bf16.mxu1 %v1995_v37 }
  0x55   : > { %1856 = vmatprep.subr.bf16.mxu0 %v1996_v38 }
  0x57   : > { %1777 = vmatpush3.bf16.msra.mxu1 %v1995_v37 }
  0x58   : > { %1857 = vmatpush3.bf16.msra.mxu0 %v1996_v38  ;;  %1778 = vmatprep.subr.bf16.mxu1 %v1997_v39 }
  0x59   : > { %1858 = vmatprep.subr.bf16.mxu0 %v1998_v40 }
  0x5b   : > { %1779 = vmatpush3.bf16.msra.mxu1 %v1997_v39 }
  0x5c   : > { %1859 = vmatpush3.bf16.msra.mxu0 %v1998_v40  ;;  %1780 = vmatprep.subr.bf16.mxu1 %v1999_v42 }
  0x5d   : > { %1860 = vmatprep.subr.bf16.mxu0 %v2000_v43 }
  0x5f   : > { %1781 = vmatpush3.bf16.msra.mxu1 %v1999_v42 }
  0x60   : > { %1861 = vmatpush3.bf16.msra.mxu0 %v2000_v43  ;;  %1782 = vmatprep.subr.bf16.mxu1 %v2001_v44 }
  0x61   : > { %1862 = vmatprep.subr.bf16.mxu0 %v2002_v45 }
  0x63   : > { %1783 = vmatpush3.bf16.msra.mxu1 %v2001_v44 }
  0x64   : > { %1863 = vmatpush3.bf16.msra.mxu0 %v2002_v45  ;;  %1788 = vmatprep.subr.bf16.mxu1 %v2003_v47 }
  0x65   : > { %1868 = vmatprep.subr.bf16.mxu0 %v2004_v48 }
  0x66   : > { %1785 = vmatmul.mubr.bf16.vlgmr.msra.gmra.mrb[0].mxu1 %v466_v49 }
  0x67   : > { %1789 = vmatpush3.bf16.msra.mxu1 %v2003_v47  ;;  %1865 = vmatmul.mubr.bf16.vlgmr.msra.gmra.mrb[0].mxu0 %v2147_v41  ;;  %v2010_v41 = vld [vmem:[%s2387_s1 + $0xd8] sm:$0xff]  }
  0x68   : > { %1869 = vmatpush3.bf16.msra.mxu0 %v2004_v48  ;;  %1790 = vmatprep.subr.bf16.mxu1 %v2006_v28 }
  0x69   : > { %1870 = vmatprep.subr.bf16.mxu0 %v2007_v50  ;;  %1804 = vmatprep.mubr.bf16.mxu1 %v2115_v17  ;;  %v2012_v17 = vld [vmem:[%s2387_s1 + $0xe0] sm:$0xff]  }
  0x6a   : > { %1884 = vmatprep.mubr.bf16.mxu0 %v2188_v2  ;;  %v2027_v2 = vld [vmem:[%s2387_s1 + $0x230] sm:$0xff]  }
  0x6b   : > { %1791 = vmatpush3.bf16.msra.mxu1 %v2006_v28 }
  0x6c   : > { %1871 = vmatpush3.bf16.msra.mxu0 %v2007_v50  ;;  %1792 = vmatprep.subr.bf16.mxu1 %v2008_v51 }
  0x6d   : > { %1872 = vmatprep.subr.bf16.mxu0 %v2009_v52 }
  0x6f   : > { %1793 = vmatpush3.bf16.msra.mxu1 %v2008_v51 }
  0x70   : > { %1873 = vmatpush3.bf16.msra.mxu0 %v2009_v52  ;;  %1794 = vmatprep.subr.bf16.mxu1 %v2010_v41 }
  0x71   : > { %1874 = vmatprep.subr.bf16.mxu0 %v2011_v53 }
  0x73   : > { %1795 = vmatpush3.bf16.msra.mxu1 %v2010_v41 }
  0x74   : > { %1875 = vmatpush3.bf16.msra.mxu0 %v2011_v53  ;;  %1796 = vmatprep.subr.bf16.mxu1 %v2012_v17 }
  0x75   : > { %1876 = vmatprep.subr.bf16.mxu0 %v2013_v54 }
  0x77   : > { %1797 = vmatpush3.bf16.msra.mxu1 %v2012_v17 }
  0x78   : > { %1877 = vmatpush3.bf16.msra.mxu0 %v2013_v54  ;;  %1798 = vmatprep.subr.bf16.mxu1 %v2014_v55 }
  0x79   : > { %1878 = vmatprep.subr.bf16.mxu0 %v2015_v56 }
  0x7b   : > { %1799 = vmatpush3.bf16.msra.mxu1 %v2014_v55 }
  0x7c   : > { %1879 = vmatpush3.bf16.msra.mxu0 %v2015_v56  ;;  %1800 = vmatprep.subr.bf16.mxu1 %v2016_v57 }
  0x7d   : > { %1880 = vmatprep.subr.bf16.mxu0 %v2017_v58 }
  0x7f   : > { %1801 = vmatpush3.bf16.msra.mxu1 %v2016_v57 }
  0x80   : > { %1881 = vmatpush3.bf16.msra.mxu0 %v2017_v58  ;;  %1802 = vmatprep.subr.bf16.mxu1 %v2018_v59 }
  0x81   : > { %1882 = vmatprep.subr.bf16.mxu0 %v2019_v60 }
  0x83   : > { %1803 = vmatpush3.bf16.msra.mxu1 %v2018_v59 }
  0x84   : > { %1883 = vmatpush3.bf16.msra.mxu0 %v2019_v60 }
  0x85   : > { %1888 = vmatprep.subr.bf16.mxu0 %v2020_v61 }
  0x86   : > { %1805 = vmatmul.mubr.bf16.vlgmr.msra.gmra.mrb[0].mxu1 %v2125_v23  ;;  %v2025_v23 = vld [vmem:[%s2387_s1 + $0x220] sm:$0xff]  }
  0x87   : > { %1885 = vmatmul.mubr.bf16.vlgmr.msra.gmra.mrb[0].mxu0 %v2268_v36 }
  0x88   : > { %1889 = vmatpush3.bf16.msra.mxu0 %v2020_v61  ;;  %1904 = vmatprep.mubr.bf16.mxu0 %v2194_v3  ;;  %v2028_v3 = vld [vmem:[%s2387_s1 + $0x238] sm:$0xff]  }
  0x89   : > { %1890 = vmatprep.subr.bf16.mxu0 %v2022_v62 }
  0x8c   : > { %1891 = vmatpush3.bf16.msra.mxu0 %v2022_v62 }
  0x8d   : > { %1892 = vmatprep.subr.bf16.mxu0 %v2023_v63 }
  0x90   : > { %1893 = vmatpush3.bf16.msra.mxu0 %v2023_v63 }
  0x91   : > { %1894 = vmatprep.subr.bf16.mxu0 %v2024_v0 }
  0x94   : > { %1895 = vmatpush3.bf16.msra.mxu0 %v2024_v0 }
  0x95   : > { %1896 = vmatprep.subr.bf16.mxu0 %v2025_v23 }
  0x98   : > { %1897 = vmatpush3.bf16.msra.mxu0 %v2025_v23 }
  0x99   : > { %1898 = vmatprep.subr.bf16.mxu0 %v2026_v1 }
  0x9c   : > { %1899 = vmatpush3.bf16.msra.mxu0 %v2026_v1 }
  0x9d   : > { %1900 = vmatprep.subr.bf16.mxu0 %v2027_v2 }
  0xa0   : > { %1901 = vmatpush3.bf16.msra.mxu0 %v2027_v2 }
  0xa1   : > { %1902 = vmatprep.subr.bf16.mxu0 %v2028_v3 }
  0xa4   : > { %1903 = vmatpush3.bf16.msra.mxu0 %v2028_v3 }
  0xa7   : > { %1905 = vmatmul.mubr.bf16.vlgmr.msra.gmra.mrb[0].mxu0 %v2265_v18 }
 0x159   : > { %v1806_v4 = vpop.f32.mrb[0].mxu1 }
 0x15a   : > { %v673_v5 = vpop.f32.mrb[1].mxu1 }
 0x15b   : > { %v1807_v6 = vpop.f32.mrb[2].mxu1 }
 0x15c   : > { %v676_v7 = vpop.f32.mrb[3].mxu1 }
 0x17a   : > { %v1906_v8 = vpop.f32.mrb[0].mxu0 }
 0x17b   : > { %v1908_v10 = vadd.f32 %v1906_v8, %v1806_v4  ;;  %v1321_v11 = vpop.f32.mrb[1].mxu0 }
 0x17c   : > { %v1909_v12 = vadd.f32 %v1321_v11, %v673_v5  ;;  %v1907_v13 = vpop.f32.mrb[2].mxu0 }
 0x17d   : > { %v1349_v14 = vadd.f32 %v1908_v10, %v1634_v9  ;;  %v1910_v15 = vadd.f32 %v1907_v13, %v1807_v6  ;;  %v1324_v19 = vpop.f32.mrb[3].mxu0 }
 0x17e   : > { %v1347_v20 = vadd.f32 %v1909_v12, %v1634_v9  ;;  %v1911_v21 = vadd.f32 %v1324_v19, %v676_v7 }
 0x17f   : > { %v1353_v22 = vmax.f32 %v1349_v14, 0.0  ;;  %v1350_v24 = vadd.f32 %v1910_v15, %v1634_v9 }
 0x180   : > { %v1351_v16 = vmax.f32 %v1347_v20, 0.0  ;;  %v1348_v25 = vadd.f32 %v1911_v21, %v1634_v9 }
 0x181   : > { %v1357_v26 = vpack.c.bf16 %v1353_v22, %v1353_v22  ;;  %v1354_v27 = vmax.f32 %v1350_v24, 0.0 }
 0x182   : > { %v1355_v29 = vpack.c.bf16 %v1351_v16, %v1351_v16  ;;  %v1352_v30 = vmax.f32 %v1348_v25, 0.0 }
 0x183   : > { %1361 = vst [vmem:[%s170_s19 + $0x4] sm:$0x3] %v1357_v26  ;;  %v1358_v31 = vpack.c.bf16 %v1354_v27, %v1354_v27 }
 0x184   : > { %1359 = vst [vmem:[%s170_s19] sm:$0x3] %v1355_v29  ;;  %v1356_v32 = vpack.c.bf16 %v1352_v30, %v1352_v30 }
 0x185   : > { %1362 = vst [vmem:[%s170_s19 + $0x6] sm:$0x3] %v1358_v31 }
 0x186   : > { %1360 = vst [vmem:[%s170_s19 + $0x2] sm:$0x3] %v1356_v32 }
 0x187 PF: > { %s13_s12 = sadd.s32 1, %s2035_s12  }
 0x188   : > { %p10_p4 = scmp.ge.s32.totalorder %s13_s12, 4  }
 0x18a   :  { %12 = sbr.rel (!%p10_p4) target bundleno = 1 (0x1), region = 70 }

// kernel: _lambda_.68
= control target key start
LH: loop header
LB: loop body
LE: loop exit
PB: predicated region body
PF: predicated region fallthrough
CT: control target
= control target key end

     0   :  { %s3954_s12 = smov 0   ;;  %s5012_s0 = inlined_call_operand.vmem [shape: bf16[2,7,8,256], index: 0, kind: input, shape index: {}]   ;;  %s5013_s1 = inlined_call_operand.vmem [shape: bf16[9,256,256], index: 1, kind: input, shape index: {}]   ;;  %s5014_s2 = inlined_call_operand.vmem [shape: f32[1,256], index: 2, kind: input, shape index: {}]   ;;  %s5015_s3 = inlined_call_operand.vmem [shape: bf16[2,4,4,256], index: 3, kind: output, shape index: {}]  }
   0x1 LB: > { %s2793_s13 = sadd.s32 4294967295, %s3932_s12   ;;  %p2797_p0 = scmp.ge.s32.totalorder %s3932_s12, 1  ;;  %s3932_s12 = sphi %s3954_s12, %s13_s12  }
   0x2   : > { %p137_p1 = scmp.lt.s32.totalorder %s3932_s12, 3 }
   0x4   : > { %p138_p2 = pnand %p2797_p0, %p137_p1 }
   0x5   : > { %v3477_v0 = vld [vmem:[%s5013_s1 + $0x104] ss:$8 sps:$4 sm:$0xff] (!%p138_p2)   ;;  %v3481_v2 = vld [vmem:[%s5013_s1 + $0x100] ss:$8 sps:$4 sm:$0xff] (!%p138_p2)   ;;  %v3483_v4 = vld [vmem:[%s5013_s1 + $0x114] ss:$8 sps:$4 sm:$0xff] (!%p138_p2)  }
   0x6   : > { %141 = sbr.rel (%p138_p2) target bundleno = 551 (0x227), region = 32  ;;  %v3479_v1 = vld [vmem:[%s5013_s1 + $0x404] ss:$8 sps:$4 sm:$0xff] (!%p138_p2)   ;;  %469 = vmatprep.subr.bf16.mxu1 (!%p138_p2), %v3477_v0  ;;  %v3482_v3 = vld [vmem:[%s5013_s1 + $0x400] ss:$8 sps:$4 sm:$0xff] (!%p138_p2)   ;;  %p161_p3 = scmp.lt.s32.totalorder (!%p138_p2), %s2793_s13, 1 }
   0x7   : > { %1512 = vmatprep.subr.bf16.mxu0 (!%p138_p2), %v3479_v1  ;;  %470 = vmatpush1.bf16.msra.mxu1 (!%p138_p2), %v3481_v2  ;;  %v3485_v5 = vld [vmem:[%s5013_s1 + $0x414] ss:$8 sps:$4 sm:$0xff] (!%p138_p2)   ;;  %v3487_v6 = vld [vmem:[%s5013_s1 + $0x110] ss:$8 sps:$4 sm:$0xff] (!%p138_p2)   ;;  %v3489_v8 = vld [vmem:[%s5013_s1 + $0x124] ss:$8 sps:$4 sm:$0xff] (!%p138_p2)  }
   0x8   : > { %1513 = vmatpush1.bf16.msra.mxu0 (!%p138_p2), %v3482_v3  ;;  %471 = vmatprep.subr.bf16.mxu1 (!%p138_p2), %v3483_v4  ;;  %v3488_v7 = vld [vmem:[%s5013_s1 + $0x410] ss:$8 sps:$4 sm:$0xff] (!%p138_p2)   ;;  %v3491_v9 = vld [vmem:[%s5013_s1 + $0x424] ss:$8 sps:$4 sm:$0xff] (!%p138_p2)   ;;  %v3493_v10 = vld [vmem:[%s5013_s1 + $0x120] ss:$8 sps:$4 sm:$0xff] (!%p138_p2)  }
   0x9   : > { %1514 = vmatprep.subr.bf16.mxu0 (!%p138_p2), %v3485_v5  ;;  %v3494_v11 = vld [vmem:[%s5013_s1 + $0x420] ss:$8 sps:$4 sm:$0xff] (!%p138_p2)   ;;  %v3495_v12 = vld [vmem:[%s5013_s1 + $0x134] ss:$8 sps:$4 sm:$0xff] (!%p138_p2)   ;;  %v3499_v14 = vld [vmem:[%s5013_s1 + $0x130] ss:$8 sps:$4 sm:$0xff] (!%p138_p2)  }
   0xa   : > { %v3497_v13 = vld [vmem:[%s5013_s1 + $0x434] ss:$8 sps:$4 sm:$0xff] (!%p138_p2)   ;;  %v3500_v15 = vld [vmem:[%s5013_s1 + $0x430] ss:$8 sps:$4 sm:$0xff] (!%p138_p2)   ;;  %v3501_v16 = vld [vmem:[%s5013_s1 + $0x144] ss:$8 sps:$4 sm:$0xff] (!%p138_p2)  }
   0xb   : > { %472 = vmatpush1.bf16.msra.mxu1 (!%p138_p2), %v3487_v6  ;;  %v3503_v17 = vld [vmem:[%s5013_s1 + $0x444] ss:$8 sps:$4 sm:$0xff] (!%p138_p2)   ;;  %v3505_v18 = vld [vmem:[%s5013_s1 + $0x140] ss:$8 sps:$4 sm:$0xff] (!%p138_p2)   ;;  %v3507_v20 = vld [vmem:[%s5013_s1 + $0x154] ss:$8 sps:$4 sm:$0xff] (!%p138_p2)  }
   0xc   : > { %1515 = vmatpush1.bf16.msra.mxu0 (!%p138_p2), %v3488_v7  ;;  %473 = vmatprep.subr.bf16.mxu1 (!%p138_p2), %v3489_v8  ;;  %v3506_v19 = vld [vmem:[%s5013_s1 + $0x440] ss:$8 sps:$4 sm:$0xff] (!%p138_p2)   ;;  %v3509_v21 = vld [vmem:[%s5013_s1 + $0x454] ss:$8 sps:$4 sm:$0xff] (!%p138_p2)   ;;  %v3511_v22 = vld [vmem:[%s5013_s1 + $0x150] ss:$8 sps:$4 sm:$0xff] (!%p138_p2)  }
   0xd   : > { %1516 = vmatprep.subr.bf16.mxu0 %v3491_v9  ;;  %v3512_v23 = vld [vmem:[%s5013_s1 + $0x450] ss:$8 sps:$4 sm:$0xff]   ;;  %v3513_v24 = vld [vmem:[%s5013_s1 + $0x164] ss:$8 sps:$4 sm:$0xff]   ;;  %v3517_v26 = vld [vmem:[%s5013_s1 + $0x160] ss:$8 sps:$4 sm:$0xff]  }
   0xe   : > { %v3515_v25 = vld [vmem:[%s5013_s1 + $0x464] ss:$8 sps:$4 sm:$0xff]   ;;  %v3518_v27 = vld [vmem:[%s5013_s1 + $0x460] ss:$8 sps:$4 sm:$0xff]   ;;  %v3519_v28 = vld [vmem:[%s5013_s1 + $0x174] ss:$8 sps:$4 sm:$0xff]  }
   0xf   : > { %474 = vmatpush1.bf16.msra.mxu1 %v3493_v10  ;;  %v3521_v29 = vld [vmem:[%s5013_s1 + $0x474] ss:$8 sps:$4 sm:$0xff]   ;;  %v3523_v30 = vld [vmem:[%s5013_s1 + $0x170] ss:$8 sps:$4 sm:$0xff]   ;;  %v3525_v32 = vld [vmem:[%s5013_s1 + $0x184] ss:$8 sps:$4 sm:$0xff]  }
  0x10   : > { %1517 = vmatpush1.bf16.msra.mxu0 %v3494_v11  ;;  %475 = vmatprep.subr.bf16.mxu1 %v3495_v12  ;;  %v3524_v31 = vld [vmem:[%s5013_s1 + $0x470] ss:$8 sps:$4 sm:$0xff]   ;;  %v3527_v33 = vld [vmem:[%s5013_s1 + $0x484] ss:$8 sps:$4 sm:$0xff]   ;;  %v3529_v34 = vld [vmem:[%s5013_s1 + $0x180] ss:$8 sps:$4 sm:$0xff]  }
  0x11   : > { %1518 = vmatprep.subr.bf16.mxu0 %v3497_v13  ;;  %v3530_v35 = vld [vmem:[%s5013_s1 + $0x480] ss:$8 sps:$4 sm:$0xff]   ;;  %s5017_s13 = smov (!%p161_p3, %s2793_s13), 1  ;;  %v3531_v36 = vld [vmem:[%s5013_s1 + $0x194] ss:$8 sps:$4 sm:$0xff]   ;;  %vm772_vm1 = vcmask 1046528  }
  0x12   : > { %v3533_v37 = vld [vmem:[%s5013_s1 + $0x494] ss:$8 sps:$4 sm:$0xff]   ;;  %v3535_v38 = vld [vmem:[%s5013_s1 + $0x190] ss:$8 sps:$4 sm:$0xff]   ;;  %s3468_s17 = smul.u32 56, %s5017_s13  ;;  %s3371_s11 = sshll.u32 %s5017_s13, 4 }
  0x13   : > { %476 = vmatpush1.bf16.msra.mxu1 %v3499_v14  ;;  %v3536_v39 = vld [vmem:[%s5013_s1 + $0x490] ss:$8 sps:$4 sm:$0xff]   ;;  %v3537_v40 = vld [vmem:[%s5013_s1 + $0x1a4] ss:$8 sps:$4 sm:$0xff]   ;;  %v3541_v42 = vld [vmem:[%s5013_s1 + $0x1a0] ss:$8 sps:$4 sm:$0xff]   ;;  %s170_s15 = scalar_lea.vmem %s5015_s3, %s3371_s11 }
  0x14   : > { %1519 = vmatpush1.bf16.msra.mxu0 %v3500_v15  ;;  %477 = vmatprep.subr.bf16.mxu1 %v3501_v16  ;;  %v3539_v41 = vld [vmem:[%s5013_s1 + $0x4a4] ss:$8 sps:$4 sm:$0xff]   ;;  %v3542_v43 = vld [vmem:[%s5013_s1 + $0x4a0] ss:$8 sps:$4 sm:$0xff]   ;;  %s4104_s30 = scalar_lea.vmem %s5012_s0, %s3468_s17  ;;  %v3543_v44 = vld [vmem:[%s5013_s1 + $0x1b4] ss:$8 sps:$4 sm:$0xff]  }
  0x15   : > { %1520 = vmatprep.subr.bf16.mxu0 %v3503_v17  ;;  %v3545_v45 = vld [vmem:[%s5013_s1 + $0x4b4] ss:$8 sps:$4 sm:$0xff]   ;;  %v3547_v46 = vld [vmem:[%s5013_s1 + $0x1b0] ss:$8 sps:$4 sm:$0xff]   ;;  %v171_v48 = vld [vmem:[%s4104_s30] sm:$0xff] }
  0x16   : > { %v3548_v47 = vld [vmem:[%s5013_s1 + $0x4b0] ss:$8 sps:$4 sm:$0xff]   ;;  %v172_v49 = vld [vmem:[%s4104_s30 + $0x8] sm:$0xff]  ;;  %vm264_vm0 = vsmask.f32 7424  ;;  %v4135_v57 = vld [vmem:[%s4104_s30 + $0x20] sm:$0xff] }
  0x17   : > { %478 = vmatpush1.bf16.msra.mxu1 %v3505_v18  ;;  %v173_v50 = vld [vmem:[%s4104_s30 + $0x10] sm:$0xff]  ;;  %v174_v51 = vld [vmem:[%s4104_s30 + $0x18] sm:$0xff]  ;;  %v3549_v52 = vld [vmem:[%s5013_s1 + $0x1c4] ss:$8 sps:$4 sm:$0xff]   ;;  %v4125_v53 = vcombine.high %v171_v48, %v172_v49  ;;  %v4151_v2 = vcombine.low %v171_v48, %v172_v49 }
  0x18   : > { %1521 = vmatpush1.bf16.msra.mxu0 %v3506_v19  ;;  %479 = vmatprep.subr.bf16.mxu1 %v3507_v20  ;;  %v4127_v54 = vcombine.high %v173_v50, %v174_v51  ;;  %v4129_v55 = vcombine.high %v172_v49, %v173_v50  ;;  %v3551_v56 = vld [vmem:[%s5013_s1 + $0x4c4] ss:$8 sps:$4 sm:$0xff]   ;;  %v4141_v61 = vcombine.high %v174_v51, %v4135_v57  ;;  %v3553_v62 = vld [vmem:[%s5013_s1 + $0x1c0] ss:$8 sps:$4 sm:$0xff]   ;;  %v3555_v7 = vld [vmem:[%s5013_s1 + $0x1d4] ss:$8 sps:$4 sm:$0xff]  }
  0x19   : > { %1522 = vmatprep.subr.bf16.mxu0 %v3509_v21  ;;  %v278_v58 = vshrl.u32 %v4125_v53, 16  ;;  %v280_v59 = vshll.u32 %v4125_v53, 16  ;;  %v3554_v63 = vld [vmem:[%s5013_s1 + $0x4c0] ss:$8 sps:$4 sm:$0xff]   ;;  %v4154_v6 = vcombine.low %v172_v49, %v173_v50  ;;  %v3557_v8 = vld [vmem:[%s5013_s1 + $0x4d4] ss:$8 sps:$4 sm:$0xff]   ;;  %v4170_v15 = vcombine.low %v173_v50, %v174_v51 }
  0x1a   : > { %v285_v60 = vshll.u32 %v4127_v54, 16  ;;  %v1321_v0 = vshrl.u32 %v4129_v55, 16  ;;  %v1323_v1 = vshll.u32 %v4129_v55, 16  ;;  %v1328_v5 = vshll.u32 %v4141_v61, 16  ;;  %v3559_v12 = vld [vmem:[%s5013_s1 + $0x1d0] ss:$8 sps:$4 sm:$0xff]  }
  0x1b   : > { %480 = vmatpush1.bf16.msra.mxu1 %v3511_v22  ;;  %v282_v3 = vrot.slane %v280_v59, 1  ;;  %v3560_v13 = vld [vmem:[%s5013_s1 + $0x4d0] ss:$8 sps:$4 sm:$0xff]   ;;  %v3561_v16 = vld [vmem:[%s5013_s1 + $0x1e4] ss:$8 sps:$4 sm:$0xff]   ;;  %v268_v18 = vshll.u32 %v4151_v2, 16  ;;  %v4178_v19 = vcombine.low %v174_v51, %v4135_v57 }
  0x1c   : > { %1523 = vmatpush1.bf16.msra.mxu0 %v3512_v23  ;;  %481 = vmatprep.subr.bf16.mxu1 %v3513_v24  ;;  %v287_v4 = vrot.slane %v285_v60, 1  ;;  %v1325_v9 = vrot.slane %v1323_v1, 1  ;;  %v4162_v11 = vrot.slane %v1328_v5, 1  ;;  %v1311_v20 = vshll.u32 %v4154_v6, 16  ;;  %v3563_v21 = vld [vmem:[%s5013_s1 + $0x4e4] ss:$8 sps:$4 sm:$0xff]  }
  0x1d   : > { %1524 = vmatprep.subr.bf16.mxu0 %v3515_v25  ;;  %v283_v10 = vor.u32 %v282_v3, %v278_v58  ;;  %v3565_v23 = vld [vmem:[%s5013_s1 + $0x1e0] ss:$8 sps:$4 sm:$0xff]   ;;  %v3567_v25 = vld [vmem:[%s5013_s1 + $0x1f4] ss:$8 sps:$4 sm:$0xff]   ;;  %v3587_v58 = vld [vmem:[%s5013_s1 + $0x10] ss:$8 sps:$4 sm:$0xff]  }
  0x1e   : > { %v1326_v14 = vor.u32 %v1325_v9, %v1321_v0  ;;  %v3566_v24 = vld [vmem:[%s5013_s1 + $0x4e0] ss:$8 sps:$4 sm:$0xff]   ;;  %v3589_v51 = vld [vmem:[%s5013_s1 + $0x14] ss:$8 sps:$4 sm:$0xff]   ;;  %v3590_v60 = vld [vmem:[%s5013_s1 + $0x510] ss:$8 sps:$4 sm:$0xff]  }
  0x1f   : > { %482 = vmatpush1.bf16.msra.mxu1 %v3517_v26  ;;  %v288_v17 = vsel %vm264_vm0, %v283_v10, %v287_v4  ;;  %v266_v26 = vshrl.u32 %v4151_v2, 16  ;;  %v3598_v1 = vld [vmem:[%s5013_s1 + $0x524] ss:$8 sps:$4 sm:$0xff]   ;;  %v3593_v3 = vld [vmem:[%s5013_s1 + $0x20] ss:$8 sps:$4 sm:$0xff]  }
  0x20   : > { %1525 = vmatpush1.bf16.msra.mxu0 %v3518_v27  ;;  %483 = vmatprep.subr.bf16.mxu1 %v3519_v28  ;;  %v1331_v22 = vsel %vm264_vm0, %v1326_v14, %v4162_v11  ;;  %v273_v27 = vshll.u32 %v4170_v15, 16  ;;  %v4199_v28 = vcombine.high %v4135_v57, %v4135_v57  ;;  %v3601_v5 = vld [vmem:[%s5013_s1 + $0x34] ss:$8 sps:$4 sm:$0xff]   ;;  %v3599_v9 = vld [vmem:[%s5013_s1 + $0x30] ss:$8 sps:$4 sm:$0xff]  }
  0x21   : > { %1526 = vmatprep.subr.bf16.mxu0 %v3521_v29  ;;  %501 = vmatprep.mubr.bf16.mxu1 %v288_v17  ;;  %v270_v29 = vrot.slane %v268_v18, 1  ;;  %v3602_v10 = vld [vmem:[%s5013_s1 + $0x530] ss:$8 sps:$4 sm:$0xff]   ;;  %v3605_v14 = vld [vmem:[%s5013_s1 + $0x40] ss:$8 sps:$4 sm:$0xff]  }
  0x22   : > { %1544 = vmatprep.mubr.bf16.mxu0 %v1331_v22  ;;  %v3613_v17 = vld [vmem:[%s5013_s1 + $0x54] ss:$8 sps:$4 sm:$0xff]   ;;  %v1340_v22 = vshrl.u32 %v4141_v61, 16 }
  0x23   : > { %484 = vmatpush1.bf16.msra.mxu1 %v3523_v30  ;;  %v1309_v30 = vshrl.u32 %v4154_v6, 16  ;;  %v3616_v18 = vld [vmem:[%s5013_s1 + $0x554] ss:$8 sps:$4 sm:$0xff]  }
  0x24   : > { %1527 = vmatpush1.bf16.msra.mxu0 %v3524_v31  ;;  %485 = vmatprep.subr.bf16.mxu1 %v3525_v32  ;;  %v1313_v31 = vrot.slane %v1311_v20, 1  ;;  %v1316_v32 = vshll.u32 %v4178_v19, 16  ;;  %v3611_v20 = vld [vmem:[%s5013_s1 + $0x50] ss:$8 sps:$4 sm:$0xff]  }
  0x25   : > { %1528 = vmatprep.subr.bf16.mxu0 %v3527_v33  ;;  %v3569_v33 = vld [vmem:[%s5013_s1 + $0x4f4] ss:$8 sps:$4 sm:$0xff]  }
  0x27   : > { %486 = vmatpush1.bf16.msra.mxu1 %v3529_v34  ;;  %v3571_v34 = vld [vmem:[%s5013_s1 + $0x1f0] ss:$8 sps:$4 sm:$0xff]  }
  0x28   : > { %1529 = vmatpush1.bf16.msra.mxu0 %v3530_v35  ;;  %487 = vmatprep.subr.bf16.mxu1 %v3531_v36  ;;  %v275_v35 = vrot.slane %v273_v27, 1  ;;  %v297_v36 = vshrl.u32 %v4127_v54, 16 }
  0x29   : > { %1530 = vmatprep.subr.bf16.mxu0 %v3533_v37  ;;  %v301_v37 = vshll.u32 %v4199_v28, 16 }
  0x2b   : > { %488 = vmatpush1.bf16.msra.mxu1 %v3535_v38  ;;  %v3572_v38 = vld [vmem:[%s5013_s1 + $0x4f0] ss:$8 sps:$4 sm:$0xff]   ;;  %v303_v48 = vrot.slane %v301_v37, 1  ;;  %v3628_v37 = vld [vmem:[%s5013_s1 + $0x574] ss:$8 sps:$4 sm:$0xff]  }
  0x2c   : > { %1531 = vmatpush1.bf16.msra.mxu0 %v3536_v39  ;;  %489 = vmatprep.subr.bf16.mxu1 %v3537_v40  ;;  %v3577_v39 = vld [vmem:[%s5013_s1 + $0x4] ss:$8 sps:$4 sm:$0xff]   ;;  %v271_v40 = vor.u32 %v270_v29, %v266_v26 }
  0x2d   : > { %1532 = vmatprep.subr.bf16.mxu0 %v3539_v41  ;;  %v1314_v41 = vor.u32 %v1313_v31, %v1309_v30  ;;  %v4315_v26 = vld [vmem:[%s4104_s30 + $0x28] sm:$0xff] }
  0x2e   : > { %v276_v49 = vsel %vm264_vm0, %v271_v40, %v275_v35  ;;  %v4319_v27 = vcombine.high %v4315_v26, %v4315_v26  ;;  %v4323_v29 = vcombine.low %v4315_v26, %v4315_v26  ;;  %v3617_v30 = vld [vmem:[%s5013_s1 + $0x60] ss:$8 sps:$4 sm:$0xff]   ;;  %v3623_v40 = vld [vmem:[%s5013_s1 + $0x70] ss:$8 sps:$4 sm:$0xff]  }
  0x2f   : > { %490 = vmatpush1.bf16.msra.mxu1 %v3541_v42  ;;  %v4217_v42 = vrot.slane %v1316_v32, 1  ;;  %v3620_v31 = vld [vmem:[%s5013_s1 + $0x560] ss:$8 sps:$4 sm:$0xff]   ;;  %v3625_v32 = vld [vmem:[%s5013_s1 + $0x74] ss:$8 sps:$4 sm:$0xff]  }
  0x30   : > { %1533 = vmatpush1.bf16.msra.mxu0 %v3542_v43  ;;  %491 = vmatprep.subr.bf16.mxu1 %v3543_v44  ;;  %v4221_v43 = vcombine.low %v4135_v57, %v4135_v57  ;;  %v3582_v44 = vld [vmem:[%s5013_s1 + $0x504] ss:$8 sps:$4 sm:$0xff]   ;;  %v3592_v57 = vld [vmem:[%s5013_s1 + $0x514] ss:$8 sps:$4 sm:$0xff]  }
  0x31   : > { %1534 = vmatprep.subr.bf16.mxu0 %v3545_v45  ;;  %v3575_v45 = vld [vmem:[%s5013_s1] ss:$8 sps:$4 sm:$0xff]   ;;  %v1319_v50 = vsel %vm264_vm0, %v1314_v41, %v4217_v42  ;;  %v1610_v41 = vrot.slane %v4141_v61, 1 }
  0x33   : > { %492 = vmatpush1.bf16.msra.mxu1 %v3547_v46  ;;  %v3580_v46 = vld [vmem:[%s5013_s1 + $0x500] ss:$8 sps:$4 sm:$0xff]  }
  0x34   : > { %1535 = vmatpush1.bf16.msra.mxu0 %v3548_v47  ;;  %493 = vmatprep.subr.bf16.mxu1 %v3549_v52  ;;  %v4232_v47 = vor.u32 %v297_v36, %v287_v4  ;;  %v289_v52 = vshrl.u32 %v4170_v15, 16  ;;  %v3596_v4 = vld [vmem:[%s5013_s1 + $0x520] ss:$8 sps:$4 sm:$0xff]   ;;  %v1336_v36 = vshll.u32 %v4323_v29, 16 }
  0x35   : > { %1536 = vmatprep.subr.bf16.mxu0 %v3551_v56  ;;  %v293_v56 = vshll.u32 %v4221_v43, 16 }
  0x36   : > { %v304_v59 = vsel %vm264_vm0, %v4232_v47, %v303_v48  ;;  %v3634_v48 = vld [vmem:[%s5013_s1 + $0x584] ss:$8 sps:$4 sm:$0xff]  }
  0x37   : > { %494 = vmatpush1.bf16.msra.mxu1 %v3553_v62  ;;  %v3595_v62 = vld [vmem:[%s5013_s1 + $0x24] ss:$8 sps:$4 sm:$0xff]   ;;  %v295_v0 = vrot.slane %v293_v56, 1  ;;  %v3640_v56 = vld [vmem:[%s5013_s1 + $0x594] ss:$8 sps:$4 sm:$0xff]  }
  0x38   : > { %1537 = vmatpush1.bf16.msra.mxu0 %v3554_v63  ;;  %495 = vmatprep.subr.bf16.mxu1 %v3555_v7  ;;  %v4256_v63 = vor.u32 %v289_v52, %v275_v35  ;;  %v3637_v52 = vld [vmem:[%s5013_s1 + $0x94] ss:$8 sps:$4 sm:$0xff]  }
  0x39   : > { %1538 = vmatprep.subr.bf16.mxu0 %v3557_v8  ;;  %v3604_v8 = vld [vmem:[%s5013_s1 + $0x534] ss:$8 sps:$4 sm:$0xff]  }
  0x3a   : > { %v296_v7 = vsel %vm264_vm0, %v4256_v63, %v295_v0  ;;  %v3644_v0 = vld [vmem:[%s5013_s1 + $0x5a0] ss:$8 sps:$4 sm:$0xff]  }
  0x3b   : > { %496 = vmatpush1.bf16.msra.mxu1 %v3559_v12  ;;  %v3607_v12 = vld [vmem:[%s5013_s1 + $0x44] ss:$8 sps:$4 sm:$0xff]  }
  0x3c   : > { %1539 = vmatpush1.bf16.msra.mxu0 %v3560_v13  ;;  %497 = vmatprep.subr.bf16.mxu1 %v3561_v16  ;;  %v3610_v13 = vld [vmem:[%s5013_s1 + $0x544] ss:$8 sps:$4 sm:$0xff]   ;;  %v3608_v16 = vld [vmem:[%s5013_s1 + $0x540] ss:$8 sps:$4 sm:$0xff]  }
  0x3d   : > { %1540 = vmatprep.subr.bf16.mxu0 %v3563_v21  ;;  %v3614_v21 = vld [vmem:[%s5013_s1 + $0x550] ss:$8 sps:$4 sm:$0xff]  }
  0x3f   : > { %498 = vmatpush1.bf16.msra.mxu1 %v3565_v23  ;;  %v3619_v23 = vld [vmem:[%s5013_s1 + $0x64] ss:$8 sps:$4 sm:$0xff]  }
  0x40   : > { %1541 = vmatpush1.bf16.msra.mxu0 %v3566_v24  ;;  %499 = vmatprep.subr.bf16.mxu1 %v3567_v25  ;;  %v3622_v24 = vld [vmem:[%s5013_s1 + $0x564] ss:$8 sps:$4 sm:$0xff]   ;;  %v1332_v25 = vshrl.u32 %v4178_v19, 16 }
  0x41   : > { %1542 = vmatprep.subr.bf16.mxu0 %v3569_v33  ;;  %v1342_v33 = vor.u32 %v1340_v22, %v4162_v11  ;;  %v1609_v11 = vrot.slane %v4129_v55, 1  ;;  %v3677_v22 = vld [vmem:[%s5013_s1 + $0xf4] ss:$8 sps:$4 sm:$0xff]  }
  0x42   : > { %v1334_v35 = vor.u32 %v1332_v25, %v4217_v42  ;;  %v3626_v42 = vld [vmem:[%s5013_s1 + $0x570] ss:$8 sps:$4 sm:$0xff]  }
  0x43   : > { %500 = vmatpush1.bf16.msra.mxu1 %v3571_v34  ;;  %v1344_v34 = vshll.u32 %v4319_v27, 16  ;;  %v3678_v25 = vld [vmem:[%s5013_s1 + $0x5f0] ss:$8 sps:$4 sm:$0xff]  }
  0x44   : > { %1543 = vmatpush1.bf16.msra.mxu0 %v3572_v38  ;;  %686 = vmatprep.subr.bf16.mxu1 %v3577_v39  ;;  %v1338_v39 = vrot.slane %v1336_v36, 1  ;;  %v3684_v36 = vld [vmem:[%s5013_s1 + $0x600] ss:$8 sps:$4 sm:$0xff]  }
  0x45   : > { %1780 = vmatprep.subr.bf16.mxu0 %v3582_v44  ;;  %v1346_v38 = vrot.slane %v1344_v34, 1  ;;  %v3681_v34 = vld [vmem:[%s5013_s1 + $0x200] ss:$8 sps:$4 sm:$0xff]  }
  0x46   : > { %502 = vmatmul.mubr.bf16.vlgmr.msra.gmra.mrb[0].mxu1 %v276_v49  ;;  %v3629_v49 = vld [vmem:[%s5013_s1 + $0x80] ss:$8 sps:$4 sm:$0xff]  }
  0x47   : > { %1545 = vmatmul.mubr.bf16.vlgmr.msra.gmra.mrb[0].mxu0 %v1319_v50  ;;  %687 = vmatpush1.bf16.msra.mxu1 %v3575_v45  ;;  %v1347_v44 = vsel %vm264_vm0, %v1342_v33, %v1346_v38  ;;  %v1339_v45 = vsel %vm264_vm0, %v1334_v35, %v1338_v39  ;;  %v1611_v50 = vsel %vm772_vm1, %v1609_v11, %v1610_v41  ;;  %v3686_v33 = vld [vmem:[%s5013_s1 + $0x604] ss:$8 sps:$4 sm:$0xff]   ;;  %v1614_v35 = vrot.slane %v4319_v27, 1  ;;  %v3689_v38 = vld [vmem:[%s5013_s1 + $0x214] ss:$8 sps:$4 sm:$0xff]  }
  0x48   : > { %1781 = vmatpush1.bf16.msra.mxu0 %v3580_v46  ;;  %688 = vmatprep.subr.bf16.mxu1 %v3589_v51  ;;  %v3631_v46 = vld [vmem:[%s5013_s1 + $0x84] ss:$8 sps:$4 sm:$0xff]   ;;  %v3632_v51 = vld [vmem:[%s5013_s1 + $0x580] ss:$8 sps:$4 sm:$0xff]   ;;  %v3692_v39 = vld [vmem:[%s5013_s1 + $0x614] ss:$8 sps:$4 sm:$0xff]  }
  0x49   : > { %1782 = vmatprep.subr.bf16.mxu0 %v3592_v57  ;;  %511 = vmatprep.mubr.bf16.mxu1 %v304_v59  ;;  %v3635_v57 = vld [vmem:[%s5013_s1 + $0x90] ss:$8 sps:$4 sm:$0xff]   ;;  %v3643_v59 = vld [vmem:[%s5013_s1 + $0xa4] ss:$8 sps:$4 sm:$0xff]  }
  0x4a   : > { %1554 = vmatprep.mubr.bf16.mxu0 %v1347_v44  ;;  %v3687_v27 = vld [vmem:[%s5013_s1 + $0x210] ss:$8 sps:$4 sm:$0xff]   ;;  %v3695_v44 = vld [vmem:[%s5013_s1 + $0x224] ss:$8 sps:$4 sm:$0xff]  }
  0x4b   : > { %689 = vmatpush1.bf16.msra.mxu1 %v3587_v58  ;;  %v3638_v58 = vld [vmem:[%s5013_s1 + $0x590] ss:$8 sps:$4 sm:$0xff]  }
  0x4c   : > { %1783 = vmatpush1.bf16.msra.mxu0 %v3590_v60  ;;  %690 = vmatprep.subr.bf16.mxu1 %v3595_v62  ;;  %v3646_v60 = vld [vmem:[%s5013_s1 + $0x5a4] ss:$8 sps:$4 sm:$0xff]   ;;  %v3641_v62 = vld [vmem:[%s5013_s1 + $0xa0] ss:$8 sps:$4 sm:$0xff]   ;;  %v3690_v11 = vld [vmem:[%s5013_s1 + $0x610] ss:$8 sps:$4 sm:$0xff]  }
  0x4d   : > { %1784 = vmatprep.subr.bf16.mxu0 %v3598_v1  ;;  %v3649_v1 = vld [vmem:[%s5013_s1 + $0xb4] ss:$8 sps:$4 sm:$0xff]  }
  0x4e   : > { %512 = vmatmul.mubr.bf16.gmra.mrb[4].mxu1 %v296_v7  ;;  %v3655_v7 = vld [vmem:[%s5013_s1 + $0xc4] ss:$8 sps:$4 sm:$0xff]  }
  0x4f   : > { %691 = vmatpush1.bf16.msra.mxu1 %v3593_v3  ;;  %718 = vmatprep.mubr.bf16.mxu1 %v4125_v53  ;;  %v3652_v3 = vld [vmem:[%s5013_s1 + $0x5b4] ss:$8 sps:$4 sm:$0xff]  }
  0x50   : > { %1785 = vmatpush1.bf16.msra.mxu0 %v3596_v4  ;;  %692 = vmatprep.subr.bf16.mxu1 %v3601_v5  ;;  %v3647_v4 = vld [vmem:[%s5013_s1 + $0xb0] ss:$8 sps:$4 sm:$0xff]  }
  0x51   : > { %1786 = vmatprep.subr.bf16.mxu0 %v3604_v8  ;;  %1555 = vmatmul.mubr.bf16.gmra.mrb[4].mxu0 %v1339_v45  ;;  %v3650_v5 = vld [vmem:[%s5013_s1 + $0x5b0] ss:$8 sps:$4 sm:$0xff]   ;;  %v3658_v8 = vld [vmem:[%s5013_s1 + $0x5c4] ss:$8 sps:$4 sm:$0xff]  }
  0x52   : > { %1812 = vmatprep.mubr.bf16.mxu0 %v1611_v50  ;;  %v3698_v45 = vld [vmem:[%s5013_s1 + $0x624] ss:$8 sps:$4 sm:$0xff]   ;;  %v3701_v50 = vld [vmem:[%s5013_s1 + $0x234] ss:$8 sps:$4 sm:$0xff]  }
  0x53   : > { %693 = vmatpush1.bf16.msra.mxu1 %v3599_v9  ;;  %v3653_v9 = vld [vmem:[%s5013_s1 + $0xc0] ss:$8 sps:$4 sm:$0xff]  }
  0x54   : > { %1787 = vmatpush1.bf16.msra.mxu0 %v3602_v10  ;;  %694 = vmatprep.subr.bf16.mxu1 %v3607_v12  ;;  %v3656_v10 = vld [vmem:[%s5013_s1 + $0x5c0] ss:$8 sps:$4 sm:$0xff]   ;;  %v3661_v12 = vld [vmem:[%s5013_s1 + $0xd4] ss:$8 sps:$4 sm:$0xff]  }
  0x55   : > { %1788 = vmatprep.subr.bf16.mxu0 %v3610_v13  ;;  %v3664_v13 = vld [vmem:[%s5013_s1 + $0x5d4] ss:$8 sps:$4 sm:$0xff]  }
  0x57   : > { %695 = vmatpush1.bf16.msra.mxu1 %v3605_v14  ;;  %v3659_v14 = vld [vmem:[%s5013_s1 + $0xd0] ss:$8 sps:$4 sm:$0xff]  }
  0x58   : > { %1789 = vmatpush1.bf16.msra.mxu0 %v3608_v16  ;;  %696 = vmatprep.subr.bf16.mxu1 %v3613_v17  ;;  %v3662_v16 = vld [vmem:[%s5013_s1 + $0x5d0] ss:$8 sps:$4 sm:$0xff]   ;;  %v3668_v17 = vld [vmem:[%s5013_s1 + $0xe4] ss:$8 sps:$4 sm:$0xff]  }
  0x59   : > { %1790 = vmatprep.subr.bf16.mxu0 %v3616_v18  ;;  %v3672_v18 = vld [vmem:[%s5013_s1 + $0x5e4] ss:$8 sps:$4 sm:$0xff]  }
  0x5b   : > { %697 = vmatpush1.bf16.msra.mxu1 %v3611_v20  ;;  %v3666_v20 = vld [vmem:[%s5013_s1 + $0xe0] ss:$8 sps:$4 sm:$0xff]  }
  0x5c   : > { %1791 = vmatpush1.bf16.msra.mxu0 %v3614_v21  ;;  %698 = vmatprep.subr.bf16.mxu1 %v3619_v23  ;;  %v3670_v21 = vld [vmem:[%s5013_s1 + $0x5e0] ss:$8 sps:$4 sm:$0xff]   ;;  %v3680_v23 = vld [vmem:[%s5013_s1 + $0x5f4] ss:$8 sps:$4 sm:$0xff]  }
  0x5d   : > { %1792 = vmatprep.subr.bf16.mxu0 %v3622_v24  ;;  %v3675_v24 = vld [vmem:[%s5013_s1 + $0xf0] ss:$8 sps:$4 sm:$0xff]  }
  0x5f   : > { %699 = vmatpush1.bf16.msra.mxu1 %v3617_v30  ;;  %v1606_v30 = vrot.slane %v4154_v6, 1 }
  0x60   : > { %1793 = vmatpush1.bf16.msra.mxu0 %v3620_v31  ;;  %700 = vmatprep.subr.bf16.mxu1 %v3625_v32  ;;  %v1607_v31 = vrot.slane %v4178_v19, 1  ;;  %v3683_v32 = vld [vmem:[%s5013_s1 + $0x204] ss:$8 sps:$4 sm:$0xff]  }
  0x61   : > { %1794 = vmatprep.subr.bf16.mxu0 %v3628_v37 }
  0x62   : > { %v1608_v37 = vsel %vm772_vm1, %v1606_v30, %v1607_v31  ;;  %v3744_v30 = vld [vmem:[%s5013_s1 + $0x6a0] ss:$8 sps:$4 sm:$0xff]  }
  0x63   : > { %701 = vmatpush1.bf16.msra.mxu1 %v3623_v40  ;;  %v1615_v40 = vsel %vm772_vm1, %v1610_v41, %v1614_v35  ;;  %v3693_v41 = vld [vmem:[%s5013_s1 + $0x220] ss:$8 sps:$4 sm:$0xff]   ;;  %v3755_v35 = vld [vmem:[%s5013_s1 + $0x2c4] ss:$8 sps:$4 sm:$0xff]  }
  0x64   : > { %1795 = vmatpush1.bf16.msra.mxu0 %v3626_v42  ;;  %702 = vmatprep.subr.bf16.mxu1 %v3631_v46  ;;  %v1612_v42 = vrot.slane %v4323_v29, 1  ;;  %v776_v46 = vrot.slane %v4125_v53, 1  ;;  %v4495_v29 = vrot.slane %v4127_v54, 1  ;;  %v3704_v53 = vld [vmem:[%s5013_s1 + $0x634] ss:$8 sps:$4 sm:$0xff]  }
  0x65   : > { %1796 = vmatprep.subr.bf16.mxu0 %v3634_v48  ;;  %v3696_v48 = vld [vmem:[%s5013_s1 + $0x620] ss:$8 sps:$4 sm:$0xff]  }
  0x67   : > { %703 = vmatpush1.bf16.msra.mxu1 %v3629_v49  ;;  %v1613_v49 = vsel %vm772_vm1, %v1607_v31, %v1612_v42  ;;  %v3749_v31 = vld [vmem:[%s5013_s1 + $0x2b4] ss:$8 sps:$4 sm:$0xff]   ;;  %v3767_v42 = vld [vmem:[%s5013_s1 + $0x2e4] ss:$8 sps:$4 sm:$0xff]  }
  0x68   : > { %1797 = vmatpush1.bf16.msra.mxu0 %v3632_v51  ;;  %704 = vmatprep.subr.bf16.mxu1 %v3637_v52  ;;  %v3699_v51 = vld [vmem:[%s5013_s1 + $0x230] ss:$8 sps:$4 sm:$0xff]   ;;  %v778_v52 = vsel %vm772_vm1, %v776_v46, %v4495_v29  ;;  %v3773_v46 = vld [vmem:[%s5013_s1 + $0x2f4] ss:$8 sps:$4 sm:$0xff]  }
  0x69   : > { %1798 = vmatprep.subr.bf16.mxu0 %v3640_v56  ;;  %v3702_v56 = vld [vmem:[%s5013_s1 + $0x630] ss:$8 sps:$4 sm:$0xff]  }
  0x6b   : > { %705 = vmatpush1.bf16.msra.mxu1 %v3635_v57  ;;  %v3707_v57 = vld [vmem:[%s5013_s1 + $0x244] ss:$8 sps:$4 sm:$0xff]  }
  0x6c   : > { %1799 = vmatpush1.bf16.msra.mxu0 %v3638_v58  ;;  %706 = vmatprep.subr.bf16.mxu1 %v3643_v59  ;;  %v3710_v58 = vld [vmem:[%s5013_s1 + $0x644] ss:$8 sps:$4 sm:$0xff]   ;;  %v3705_v59 = vld [vmem:[%s5013_s1 + $0x240] ss:$8 sps:$4 sm:$0xff]  }
  0x6d   : > { %1800 = vmatprep.subr.bf16.mxu0 %v3646_v60  ;;  %v3708_v60 = vld [vmem:[%s5013_s1 + $0x640] ss:$8 sps:$4 sm:$0xff]  }
  0x6f   : > { %707 = vmatpush1.bf16.msra.mxu1 %v3641_v62  ;;  %v3713_v62 = vld [vmem:[%s5013_s1 + $0x254] ss:$8 sps:$4 sm:$0xff]  }
  0x70   : > { %1801 = vmatpush1.bf16.msra.mxu0 %v3644_v0  ;;  %708 = vmatprep.subr.bf16.mxu1 %v3649_v1  ;;  %v3711_v0 = vld [vmem:[%s5013_s1 + $0x250] ss:$8 sps:$4 sm:$0xff]  }
  0x71   : > { %1802 = vmatprep.subr.bf16.mxu0 %v3652_v3  ;;  %v3714_v1 = vld [vmem:[%s5013_s1 + $0x650] ss:$8 sps:$4 sm:$0xff]   ;;  %v3719_v3 = vld [vmem:[%s5013_s1 + $0x264] ss:$8 sps:$4 sm:$0xff]  }
  0x73   : > { %709 = vmatpush1.bf16.msra.mxu1 %v3647_v4  ;;  %v3722_v4 = vld [vmem:[%s5013_s1 + $0x664] ss:$8 sps:$4 sm:$0xff]  }
  0x74   : > { %1803 = vmatpush1.bf16.msra.mxu0 %v3650_v5  ;;  %710 = vmatprep.subr.bf16.mxu1 %v3655_v7  ;;  %v3717_v5 = vld [vmem:[%s5013_s1 + $0x260] ss:$8 sps:$4 sm:$0xff]  }
  0x75   : > { %1804 = vmatprep.subr.bf16.mxu0 %v3658_v8  ;;  %v3720_v7 = vld [vmem:[%s5013_s1 + $0x660] ss:$8 sps:$4 sm:$0xff]   ;;  %v3725_v8 = vld [vmem:[%s5013_s1 + $0x274] ss:$8 sps:$4 sm:$0xff]  }
  0x77   : > { %711 = vmatpush1.bf16.msra.mxu1 %v3653_v9  ;;  %v3728_v9 = vld [vmem:[%s5013_s1 + $0x674] ss:$8 sps:$4 sm:$0xff]  }
  0x78   : > { %1805 = vmatpush1.bf16.msra.mxu0 %v3656_v10  ;;  %712 = vmatprep.subr.bf16.mxu1 %v3661_v12  ;;  %v3723_v10 = vld [vmem:[%s5013_s1 + $0x270] ss:$8 sps:$4 sm:$0xff]  }
  0x79   : > { %1806 = vmatprep.subr.bf16.mxu0 %v3664_v13  ;;  %v3726_v12 = vld [vmem:[%s5013_s1 + $0x670] ss:$8 sps:$4 sm:$0xff]   ;;  %v3731_v13 = vld [vmem:[%s5013_s1 + $0x284] ss:$8 sps:$4 sm:$0xff]  }
  0x7b   : > { %713 = vmatpush1.bf16.msra.mxu1 %v3659_v14  ;;  %v3734_v14 = vld [vmem:[%s5013_s1 + $0x684] ss:$8 sps:$4 sm:$0xff]  }
  0x7c   : > { %1807 = vmatpush1.bf16.msra.mxu0 %v3662_v16  ;;  %714 = vmatprep.subr.bf16.mxu1 %v3668_v17  ;;  %v3729_v16 = vld [vmem:[%s5013_s1 + $0x280] ss:$8 sps:$4 sm:$0xff]  }
  0x7d   : > { %1808 = vmatprep.subr.bf16.mxu0 %v3672_v18  ;;  %v3732_v17 = vld [vmem:[%s5013_s1 + $0x680] ss:$8 sps:$4 sm:$0xff]   ;;  %v3737_v18 = vld [vmem:[%s5013_s1 + $0x294] ss:$8 sps:$4 sm:$0xff]  }
  0x7f   : > { %715 = vmatpush1.bf16.msra.mxu1 %v3666_v20  ;;  %v3740_v20 = vld [vmem:[%s5013_s1 + $0x694] ss:$8 sps:$4 sm:$0xff]  }
  0x80   : > { %1809 = vmatpush1.bf16.msra.mxu0 %v3670_v21  ;;  %716 = vmatprep.subr.bf16.mxu1 %v3677_v22  ;;  %v3735_v21 = vld [vmem:[%s5013_s1 + $0x290] ss:$8 sps:$4 sm:$0xff]  }
  0x81   : > { %1810 = vmatprep.subr.bf16.mxu0 %v3680_v23  ;;  %v3738_v22 = vld [vmem:[%s5013_s1 + $0x690] ss:$8 sps:$4 sm:$0xff]   ;;  %v3743_v23 = vld [vmem:[%s5013_s1 + $0x2a4] ss:$8 sps:$4 sm:$0xff]  }
  0x83   : > { %717 = vmatpush1.bf16.msra.mxu1 %v3675_v24  ;;  %v3746_v24 = vld [vmem:[%s5013_s1 + $0x6a4] ss:$8 sps:$4 sm:$0xff]  }
  0x84   : > { %1811 = vmatpush1.bf16.msra.mxu0 %v3678_v25  ;;  %947 = vmatprep.subr.bf16.mxu1 %v3683_v32  ;;  %v3741_v25 = vld [vmem:[%s5013_s1 + $0x2a0] ss:$8 sps:$4 sm:$0xff]   ;;  %v3752_v32 = vld [vmem:[%s5013_s1 + $0x6b4] ss:$8 sps:$4 sm:$0xff]  }
  0x85   : > { %2038 = vmatprep.subr.bf16.mxu0 %v3686_v33  ;;  %v3747_v33 = vld [vmem:[%s5013_s1 + $0x2b0] ss:$8 sps:$4 sm:$0xff]  }
  0x86   : > { %719 = vmatmul.mubr.bf16.vlgmr.msra.gmra.mrb[0].mxu1 %v4151_v2 }
  0x87   : > { %1813 = vmatmul.mubr.bf16.vlgmr.msra.gmra.mrb[0].mxu0 %v1608_v37  ;;  %948 = vmatpush1.bf16.msra.mxu1 %v3681_v34  ;;  %v3750_v34 = vld [vmem:[%s5013_s1 + $0x6b0] ss:$8 sps:$4 sm:$0xff]   ;;  %v3753_v37 = vld [vmem:[%s5013_s1 + $0x2c0] ss:$8 sps:$4 sm:$0xff]  }
  0x88   : > { %2039 = vmatpush1.bf16.msra.mxu0 %v3684_v36  ;;  %949 = vmatprep.subr.bf16.mxu1 %v3689_v38  ;;  %v3758_v36 = vld [vmem:[%s5013_s1 + $0x6c4] ss:$8 sps:$4 sm:$0xff]   ;;  %v3756_v38 = vld [vmem:[%s5013_s1 + $0x6c0] ss:$8 sps:$4 sm:$0xff]  }
  0x89   : > { %2040 = vmatprep.subr.bf16.mxu0 %v3692_v39  ;;  %728 = vmatprep.mubr.bf16.mxu1 %v4127_v54  ;;  %v3761_v39 = vld [vmem:[%s5013_s1 + $0x2d4] ss:$8 sps:$4 sm:$0xff]  }
  0x8a   : > { %1822 = vmatprep.mubr.bf16.mxu0 %v1615_v40  ;;  %v3759_v40 = vld [vmem:[%s5013_s1 + $0x2d0] ss:$8 sps:$4 sm:$0xff]  }
  0x8b   : > { %950 = vmatpush1.bf16.msra.mxu1 %v3687_v27  ;;  %v3764_v27 = vld [vmem:[%s5013_s1 + $0x6d4] ss:$8 sps:$4 sm:$0xff]  }
  0x8c   : > { %2041 = vmatpush1.bf16.msra.mxu0 %v3690_v11  ;;  %951 = vmatprep.subr.bf16.mxu1 %v3695_v44  ;;  %v3762_v11 = vld [vmem:[%s5013_s1 + $0x6d0] ss:$8 sps:$4 sm:$0xff]   ;;  %v3770_v44 = vld [vmem:[%s5013_s1 + $0x6e4] ss:$8 sps:$4 sm:$0xff]  }
  0x8d   : > { %2042 = vmatprep.subr.bf16.mxu0 %v3698_v45  ;;  %v3765_v45 = vld [vmem:[%s5013_s1 + $0x2e0] ss:$8 sps:$4 sm:$0xff]  }
  0x8e   : > { %729 = vmatmul.mubr.bf16.gmra.mrb[4].mxu1 %v4170_v15 }
  0x8f   : > { %1823 = vmatmul.mubr.bf16.gmra.mrb[4].mxu0 %v1613_v49  ;;  %952 = vmatpush1.bf16.msra.mxu1 %v3693_v41  ;;  %v3768_v41 = vld [vmem:[%s5013_s1 + $0x6e0] ss:$8 sps:$4 sm:$0xff]   ;;  %v3771_v49 = vld [vmem:[%s5013_s1 + $0x2f0] ss:$8 sps:$4 sm:$0xff]  }
  0x90   : > { %2043 = vmatpush1.bf16.msra.mxu0 %v3696_v48  ;;  %953 = vmatprep.subr.bf16.mxu1 %v3701_v50  ;;  %v3776_v48 = vld [vmem:[%s5013_s1 + $0x6f4] ss:$8 sps:$4 sm:$0xff]   ;;  %v773_v50 = vrot.slane %v4151_v2, 1  ;;  %v3782_v2 = vld [vmem:[%s5013_s1 + $0x704] ss:$8 sps:$4 sm:$0xff]  }
  0x91   : > { %2044 = vmatprep.subr.bf16.mxu0 %v3704_v53  ;;  %979 = vmatprep.mubr.bf16.mxu1 %v778_v52  ;;  %v3774_v53 = vld [vmem:[%s5013_s1 + $0x6f0] ss:$8 sps:$4 sm:$0xff]   ;;  %v4666_v52 = vrot.slane %v4170_v15, 1 }
  0x92   : > { %2070 = vmatprep.mubr.bf16.mxu0 %v4127_v54  ;;  %v3716_v54 = vld [vmem:[%s5013_s1 + $0x654] ss:$8 sps:$4 sm:$0xff]  }
  0x93   : > { %954 = vmatpush1.bf16.msra.mxu1 %v3699_v51  ;;  %v3779_v51 = vld [vmem:[%s5013_s1 + $0x304] ss:$8 sps:$4 sm:$0xff]  }
  0x94   : > { %2045 = vmatpush1.bf16.msra.mxu0 %v3702_v56  ;;  %955 = vmatprep.subr.bf16.mxu1 %v3707_v57  ;;  %v3777_v56 = vld [vmem:[%s5013_s1 + $0x300] ss:$8 sps:$4 sm:$0xff]   ;;  %v781_v57 = vrot.slane %v4199_v28, 1 }
  0x95   : > { %2046 = vmatprep.subr.bf16.mxu0 %v3710_v58  ;;  %v3780_v58 = vld [vmem:[%s5013_s1 + $0x700] ss:$8 sps:$4 sm:$0xff]  }
  0x96   : > { %v3925_v28 = vld [vmem:[%s4104_s30 + $0x20] sm:$0xff] }
  0x97   : > { %956 = vmatpush1.bf16.msra.mxu1 %v3705_v59  ;;  %v775_v59 = vsel %vm772_vm1, %v773_v50, %v4666_v52  ;;  %v3848_v50 = vld [vmem:[%s5013_s1 + $0x7b4] ss:$8 sps:$4 sm:$0xff]  }
  0x98   : > { %2047 = vmatpush1.bf16.msra.mxu0 %v3708_v60  ;;  %957 = vmatprep.subr.bf16.mxu1 %v3713_v62  ;;  %v3785_v60 = vld [vmem:[%s5013_s1 + $0x314] ss:$8 sps:$4 sm:$0xff]  }
  0x99   : > { %2048 = vmatprep.subr.bf16.mxu0 %v3716_v54  ;;  %v3788_v62 = vld [vmem:[%s5013_s1 + $0x714] ss:$8 sps:$4 sm:$0xff]   ;;  %v4688_v54 = vcombine.high %v3925_v28, %v4315_v26 }
  0x9b   : > { %958 = vmatpush1.bf16.msra.mxu1 %v3711_v0  ;;  %v782_v0 = vsel %vm772_vm1, %v4495_v29, %v781_v57  ;;  %v3849_v57 = vld [vmem:[%s5013_s1 + $0x3c0] ss:$8 sps:$4 sm:$0xff]  }
  0x9c   : > { %2049 = vmatpush1.bf16.msra.mxu0 %v3714_v1  ;;  %959 = vmatprep.subr.bf16.mxu1 %v3719_v3  ;;  %v2143_v1 = vshll.u32 %v4688_v54, 16  ;;  %v3783_v3 = vld [vmem:[%s5013_s1 + $0x310] ss:$8 sps:$4 sm:$0xff]  }
  0x9d   : > { %2050 = vmatprep.subr.bf16.mxu0 %v3722_v4  ;;  %v3786_v4 = vld [vmem:[%s5013_s1 + $0x710] ss:$8 sps:$4 sm:$0xff]  }
  0x9f   : > { %960 = vmatpush1.bf16.msra.mxu1 %v3717_v5  ;;  %v779_v5 = vrot.slane %v4221_v43, 1  ;;  %v3789_v43 = vld [vmem:[%s5013_s1 + $0x320] ss:$8 sps:$4 sm:$0xff]  }
  0xa0   : > { %2051 = vmatpush1.bf16.msra.mxu0 %v3720_v7  ;;  %961 = vmatprep.subr.bf16.mxu1 %v3725_v8  ;;  %v3794_v7 = vld [vmem:[%s5013_s1 + $0x724] ss:$8 sps:$4 sm:$0xff]   ;;  %v4709_v8 = vcombine.low %v3925_v28, %v4315_v26  ;;  %v3797_v26 = vld [vmem:[%s5013_s1 + $0x334] ss:$8 sps:$4 sm:$0xff]   ;;  %v3858_v28 = vld [vmem:[%s5013_s1 + $0x7d0] ss:$8 sps:$4 sm:$0xff]  }
  0xa1   : > { %2052 = vmatprep.subr.bf16.mxu0 %v3728_v9  ;;  %v4711_v9 = vrot.slane %v2143_v1, 1  ;;  %v3864_v1 = vld [vmem:[%s5013_s1 + $0x3e4] ss:$8 sps:$4 sm:$0xff]  }
  0xa3   : > { %962 = vmatpush1.bf16.msra.mxu1 %v3723_v10  ;;  %v3792_v10 = vld [vmem:[%s5013_s1 + $0x720] ss:$8 sps:$4 sm:$0xff]  }
  0xa4   : > { %2053 = vmatpush1.bf16.msra.mxu0 %v3726_v12  ;;  %963 = vmatprep.subr.bf16.mxu1 %v3731_v13  ;;  %v780_v12 = vsel %vm772_vm1, %v4666_v52, %v779_v5  ;;  %v3800_v13 = vld [vmem:[%s5013_s1 + $0x734] ss:$8 sps:$4 sm:$0xff]   ;;  %v3862_v5 = vld [vmem:[%s5013_s1 + $0x3e0] ss:$8 sps:$4 sm:$0xff]  }
  0xa5   : > { %2054 = vmatprep.subr.bf16.mxu0 %v3734_v14  ;;  %v2146_v14 = vsel %vm264_vm0, %v4232_v47, %v4711_v9  ;;  %v3806_v47 = vld [vmem:[%s5013_s1 + $0x744] ss:$8 sps:$4 sm:$0xff]  }
  0xa7   : > { %964 = vmatpush1.bf16.msra.mxu1 %v3729_v16  ;;  %v3795_v16 = vld [vmem:[%s5013_s1 + $0x330] ss:$8 sps:$4 sm:$0xff]  }
  0xa8   : > { %2055 = vmatpush1.bf16.msra.mxu0 %v3732_v17  ;;  %965 = vmatprep.subr.bf16.mxu1 %v3737_v18  ;;  %v3798_v17 = vld [vmem:[%s5013_s1 + $0x730] ss:$8 sps:$4 sm:$0xff]   ;;  %v3803_v18 = vld [vmem:[%s5013_s1 + $0x344] ss:$8 sps:$4 sm:$0xff]  }
  0xa9   : > { %2056 = vmatprep.subr.bf16.mxu0 %v3740_v20  ;;  %v3801_v20 = vld [vmem:[%s5013_s1 + $0x340] ss:$8 sps:$4 sm:$0xff]  }
  0xab   : > { %966 = vmatpush1.bf16.msra.mxu1 %v3735_v21  ;;  %v3804_v21 = vld [vmem:[%s5013_s1 + $0x740] ss:$8 sps:$4 sm:$0xff]  }
  0xac   : > { %2057 = vmatpush1.bf16.msra.mxu0 %v3738_v22  ;;  %967 = vmatprep.subr.bf16.mxu1 %v3743_v23  ;;  %v3809_v22 = vld [vmem:[%s5013_s1 + $0x354] ss:$8 sps:$4 sm:$0xff]   ;;  %v3807_v23 = vld [vmem:[%s5013_s1 + $0x350] ss:$8 sps:$4 sm:$0xff]  }
  0xad   : > { %2058 = vmatprep.subr.bf16.mxu0 %v3746_v24  ;;  %v3810_v24 = vld [vmem:[%s5013_s1 + $0x750] ss:$8 sps:$4 sm:$0xff]  }
  0xaf   : > { %968 = vmatpush1.bf16.msra.mxu1 %v3741_v25  ;;  %v3815_v25 = vld [vmem:[%s5013_s1 + $0x364] ss:$8 sps:$4 sm:$0xff]  }
  0xb0   : > { %2059 = vmatpush1.bf16.msra.mxu0 %v3744_v30  ;;  %969 = vmatprep.subr.bf16.mxu1 %v3749_v31  ;;  %v3818_v30 = vld [vmem:[%s5013_s1 + $0x764] ss:$8 sps:$4 sm:$0xff]   ;;  %v3813_v31 = vld [vmem:[%s5013_s1 + $0x360] ss:$8 sps:$4 sm:$0xff]  }
  0xb1   : > { %2060 = vmatprep.subr.bf16.mxu0 %v3752_v32  ;;  %v3816_v32 = vld [vmem:[%s5013_s1 + $0x760] ss:$8 sps:$4 sm:$0xff]  }
  0xb3   : > { %970 = vmatpush1.bf16.msra.mxu1 %v3747_v33  ;;  %v3821_v33 = vld [vmem:[%s5013_s1 + $0x374] ss:$8 sps:$4 sm:$0xff]  }
  0xb4   : > { %2061 = vmatpush1.bf16.msra.mxu0 %v3750_v34  ;;  %971 = vmatprep.subr.bf16.mxu1 %v3755_v35  ;;  %v3824_v34 = vld [vmem:[%s5013_s1 + $0x774] ss:$8 sps:$4 sm:$0xff]   ;;  %v3819_v35 = vld [vmem:[%s5013_s1 + $0x370] ss:$8 sps:$4 sm:$0xff]  }
  0xb5   : > { %2062 = vmatprep.subr.bf16.mxu0 %v3758_v36  ;;  %v3822_v36 = vld [vmem:[%s5013_s1 + $0x770] ss:$8 sps:$4 sm:$0xff]  }
  0xb7   : > { %972 = vmatpush1.bf16.msra.mxu1 %v3753_v37  ;;  %v3827_v37 = vld [vmem:[%s5013_s1 + $0x384] ss:$8 sps:$4 sm:$0xff]  }
  0xb8   : > { %2063 = vmatpush1.bf16.msra.mxu0 %v3756_v38  ;;  %973 = vmatprep.subr.bf16.mxu1 %v3761_v39  ;;  %v3830_v38 = vld [vmem:[%s5013_s1 + $0x784] ss:$8 sps:$4 sm:$0xff]   ;;  %v3825_v39 = vld [vmem:[%s5013_s1 + $0x380] ss:$8 sps:$4 sm:$0xff]  }
  0xb9   : > { %2064 = vmatprep.subr.bf16.mxu0 %v3764_v27  ;;  %v3828_v27 = vld [vmem:[%s5013_s1 + $0x780] ss:$8 sps:$4 sm:$0xff]  }
  0xbb   : > { %974 = vmatpush1.bf16.msra.mxu1 %v3759_v40  ;;  %v3833_v40 = vld [vmem:[%s5013_s1 + $0x394] ss:$8 sps:$4 sm:$0xff]  }
  0xbc   : > { %2065 = vmatpush1.bf16.msra.mxu0 %v3762_v11  ;;  %975 = vmatprep.subr.bf16.mxu1 %v3767_v42  ;;  %v3836_v11 = vld [vmem:[%s5013_s1 + $0x794] ss:$8 sps:$4 sm:$0xff]   ;;  %v3831_v42 = vld [vmem:[%s5013_s1 + $0x390] ss:$8 sps:$4 sm:$0xff]  }
  0xbd   : > { %2066 = vmatprep.subr.bf16.mxu0 %v3770_v44  ;;  %v3834_v44 = vld [vmem:[%s5013_s1 + $0x790] ss:$8 sps:$4 sm:$0xff]  }
  0xbf   : > { %976 = vmatpush1.bf16.msra.mxu1 %v3765_v45  ;;  %v3839_v45 = vld [vmem:[%s5013_s1 + $0x3a4] ss:$8 sps:$4 sm:$0xff]  }
  0xc0   : > { %2067 = vmatpush1.bf16.msra.mxu0 %v3768_v41  ;;  %977 = vmatprep.subr.bf16.mxu1 %v3773_v46  ;;  %v3842_v41 = vld [vmem:[%s5013_s1 + $0x7a4] ss:$8 sps:$4 sm:$0xff]   ;;  %v3837_v46 = vld [vmem:[%s5013_s1 + $0x3a0] ss:$8 sps:$4 sm:$0xff]  }
  0xc1   : > { %2068 = vmatprep.subr.bf16.mxu0 %v3776_v48  ;;  %v3840_v48 = vld [vmem:[%s5013_s1 + $0x7a0] ss:$8 sps:$4 sm:$0xff]  }
  0xc3   : > { %978 = vmatpush1.bf16.msra.mxu1 %v3771_v49  ;;  %v3845_v49 = vld [vmem:[%s5013_s1 + $0x3b4] ss:$8 sps:$4 sm:$0xff]  }
  0xc4   : > { %2069 = vmatpush1.bf16.msra.mxu0 %v3774_v53  ;;  %1209 = vmatprep.subr.bf16.mxu1 %v3779_v51  ;;  %v3843_v53 = vld [vmem:[%s5013_s1 + $0x3b0] ss:$8 sps:$4 sm:$0xff]  }
  0xc5   : > { %2327 = vmatprep.subr.bf16.mxu0 %v3782_v2  ;;  %v3846_v51 = vld [vmem:[%s5013_s1 + $0x7b0] ss:$8 sps:$4 sm:$0xff]   ;;  %v3851_v2 = vld [vmem:[%s5013_s1 + $0x3c4] ss:$8 sps:$4 sm:$0xff]  }
  0xc6   : > { %980 = vmatmul.mubr.bf16.vlgmr.msra.gmra.mrb[0].mxu1 %v775_v59  ;;  %v3857_v59 = vld [vmem:[%s5013_s1 + $0x3d4] ss:$8 sps:$4 sm:$0xff]  }
  0xc7   : > { %2071 = vmatmul.mubr.bf16.vlgmr.msra.gmra.mrb[0].mxu0 %v4170_v15  ;;  %1210 = vmatpush1.bf16.msra.mxu1 %v3777_v56  ;;  %v3791_v15 = vld [vmem:[%s5013_s1 + $0x324] ss:$8 sps:$4 sm:$0xff]  }
  0xc8   : > { %2328 = vmatpush1.bf16.msra.mxu0 %v3780_v58  ;;  %1211 = vmatprep.subr.bf16.mxu1 %v3785_v60  ;;  %v3854_v56 = vld [vmem:[%s5013_s1 + $0x7c4] ss:$8 sps:$4 sm:$0xff]   ;;  %v3852_v58 = vld [vmem:[%s5013_s1 + $0x7c0] ss:$8 sps:$4 sm:$0xff]   ;;  %v3860_v60 = vld [vmem:[%s5013_s1 + $0x7d4] ss:$8 sps:$4 sm:$0xff]  }
  0xc9   : > { %2329 = vmatprep.subr.bf16.mxu0 %v3788_v62  ;;  %989 = vmatprep.mubr.bf16.mxu1 %v782_v0  ;;  %v3855_v62 = vld [vmem:[%s5013_s1 + $0x3d0] ss:$8 sps:$4 sm:$0xff]  }
  0xca   : > { %2080 = vmatprep.mubr.bf16.mxu0 %v4688_v54  ;;  %v177_v0 = vld [vmem:[%s4104_s30 + $0x30] sm:$0xff] }
  0xcb   : > { %1212 = vmatpush1.bf16.msra.mxu1 %v3783_v3  ;;  %v3868_v3 = vld [vmem:[%s5013_s1 + $0x7e4] ss:$8 sps:$4 sm:$0xff]  }
  0xcc   : > { %2330 = vmatpush1.bf16.msra.mxu0 %v3786_v4  ;;  %1213 = vmatprep.subr.bf16.mxu1 %v3791_v15  ;;  %v3264_v4 = vcombine.high %v177_v0, %v177_v0  ;;  %v3866_v15 = vld [vmem:[%s5013_s1 + $0x7e0] ss:$8 sps:$4 sm:$0xff]  }
  0xcd   : > { %2331 = vmatprep.subr.bf16.mxu0 %v3794_v7  ;;  %v2138_v7 = vshll.u32 %v4709_v8, 16 }
  0xce   : > { %990 = vmatmul.mubr.bf16.gmra.mrb[4].mxu1 %v780_v12  ;;  %v2155_v12 = vshrl.u32 %v4688_v54, 16 }
  0xcf   : > { %2081 = vmatmul.mubr.bf16.gmra.mrb[4].mxu0 %v4709_v8  ;;  %1214 = vmatpush1.bf16.msra.mxu1 %v3789_v43  ;;  %v3871_v43 = vld [vmem:[%s5013_s1 + $0x3f4] ss:$8 sps:$4 sm:$0xff]  }
  0xd0   : > { %2332 = vmatpush1.bf16.msra.mxu0 %v3792_v10  ;;  %1215 = vmatprep.subr.bf16.mxu1 %v3797_v26  ;;  %v3874_v10 = vld [vmem:[%s5013_s1 + $0x7f4] ss:$8 sps:$4 sm:$0xff]   ;;  %v2159_v26 = vshll.u32 %v3264_v4, 16 }
  0xd1   : > { %2333 = vmatprep.subr.bf16.mxu0 %v3800_v13  ;;  %1241 = vmatprep.mubr.bf16.mxu1 %v4129_v55  ;;  %v3812_v55 = vld [vmem:[%s5013_s1 + $0x754] ss:$8 sps:$4 sm:$0xff]   ;;  %v3869_v13 = vld [vmem:[%s5013_s1 + $0x3f0] ss:$8 sps:$4 sm:$0xff]  }
  0xd2   : > { %2359 = vmatprep.mubr.bf16.mxu0 %v2146_v14  ;;  %v3872_v14 = vld [vmem:[%s5013_s1 + $0x7f0] ss:$8 sps:$4 sm:$0xff]  }
  0xd3   : > { %1216 = vmatpush1.bf16.msra.mxu1 %v3795_v16  ;;  %v2140_v16 = vrot.slane %v2138_v7, 1 }
  0xd4   : > { %2334 = vmatpush1.bf16.msra.mxu0 %v3798_v17  ;;  %1217 = vmatprep.subr.bf16.mxu1 %v3803_v18  ;;  %v4885_v17 = vcombine.low %v177_v0, %v177_v0  ;;  %v3877_v18 = vld [vmem:[%s5013_s1 + $0x804] ss:$8 sps:$4 sm:$0xff]  }
  0xd5   : > { %2335 = vmatprep.subr.bf16.mxu0 %v3806_v47  ;;  %v2157_v47 = vor.u32 %v2155_v12, %v4711_v9  ;;  %v3880_v9 = vld [vmem:[%s5013_s1 + $0x814] ss:$8 sps:$4 sm:$0xff]  }
  0xd7   : > { %1218 = vmatpush1.bf16.msra.mxu1 %v3801_v20  ;;  %v2161_v20 = vrot.slane %v2159_v26, 1 }
  0xd8   : > { %2336 = vmatpush1.bf16.msra.mxu0 %v3804_v21  ;;  %1219 = vmatprep.subr.bf16.mxu1 %v3809_v22  ;;  %v2141_v21 = vsel %vm264_vm0, %v4256_v63, %v2140_v16  ;;  %v3875_v22 = vld [vmem:[%s5013_s1 + $0x800] ss:$8 sps:$4 sm:$0xff]   ;;  %v3878_v63 = vld [vmem:[%s5013_s1 + $0x810] ss:$8 sps:$4 sm:$0xff]  }
  0xd9   : > { %2337 = vmatprep.subr.bf16.mxu0 %v3812_v55  ;;  %v2147_v55 = vshrl.u32 %v4709_v8, 16 }
  0xdb   : > { %1220 = vmatpush1.bf16.msra.mxu1 %v3807_v23  ;;  %v2151_v23 = vshll.u32 %v4885_v17, 16 }
  0xdc   : > { %2338 = vmatpush1.bf16.msra.mxu0 %v3810_v24  ;;  %1221 = vmatprep.subr.bf16.mxu1 %v3815_v25  ;;  %v2162_v24 = vsel %vm264_vm0, %v2157_v47, %v2161_v20  ;;  %v2149_v25 = vor.u32 %v2147_v55, %v2140_v16  ;;  %v2656_v47 = vlaneseq }
  0xdd   : > { %2339 = vmatprep.subr.bf16.mxu0 %v3818_v30  ;;  %v2153_v30 = vrot.slane %v2151_v23, 1 }
  0xde   : > { %v2657_v20 = vshrl.u32 %v2656_v47, 7 }
  0xdf   : > { %1222 = vmatpush1.bf16.msra.mxu1 %v3813_v31  ;;  %v3885_v31 = vld [vmem:[%s5013_s1 + $0x824] ss:$8 sps:$4 sm:$0xff]  }
  0xe0   : > { %2340 = vmatpush1.bf16.msra.mxu0 %v3816_v32  ;;  %1223 = vmatprep.subr.bf16.mxu1 %v3821_v33  ;;  %v2427_v32 = vrot.slane %v3264_v4, 1  ;;  %v2154_v33 = vsel %vm264_vm0, %v2149_v25, %v2153_v30  ;;  %v2662_v55 = vsub.s32 1, %v2657_v20 }
  0xe1   : > { %2341 = vmatprep.subr.bf16.mxu0 %v3824_v34  ;;  %v3883_v34 = vld [vmem:[%s5013_s1 + $0x820] ss:$8 sps:$4 sm:$0xff]  }
  0xe3   : > { %1224 = vmatpush1.bf16.msra.mxu1 %v3819_v35  ;;  %v3888_v35 = vld [vmem:[%s5013_s1 + $0x834] ss:$8 sps:$4 sm:$0xff]  }
  0xe4   : > { %2342 = vmatpush1.bf16.msra.mxu0 %v3822_v36  ;;  %1225 = vmatprep.subr.bf16.mxu1 %v3827_v37  ;;  %v3886_v36 = vld [vmem:[%s5013_s1 + $0x830] ss:$8 sps:$4 sm:$0xff]   ;;  %v3891_v37 = vld [vmem:[%s5013_s1 + $0x844] ss:$8 sps:$4 sm:$0xff]  }
  0xe5   : > { %2343 = vmatprep.subr.bf16.mxu0 %v3830_v38  ;;  %v3892_v38 = vld [vmem:[%s5013_s1 + $0x850] ss:$8 sps:$4 sm:$0xff]  }
  0xe7   : > { %1226 = vmatpush1.bf16.msra.mxu1 %v3825_v39  ;;  %v3897_v39 = vld [vmem:[%s5013_s1 + $0x864] ss:$8 sps:$4 sm:$0xff]  }
  0xe8   : > { %2344 = vmatpush1.bf16.msra.mxu0 %v3828_v27  ;;  %1227 = vmatprep.subr.bf16.mxu1 %v3833_v40  ;;  %v3895_v27 = vld [vmem:[%s5013_s1 + $0x860] ss:$8 sps:$4 sm:$0xff]   ;;  %v3900_v40 = vld [vmem:[%s5013_s1 + $0x874] ss:$8 sps:$4 sm:$0xff]  }
  0xe9   : > { %2345 = vmatprep.subr.bf16.mxu0 %v3836_v11  ;;  %v3898_v11 = vld [vmem:[%s5013_s1 + $0x870] ss:$8 sps:$4 sm:$0xff]  }
  0xeb   : > { %1228 = vmatpush1.bf16.msra.mxu1 %v3831_v42  ;;  %v3903_v42 = vld [vmem:[%s5013_s1 + $0x884] ss:$8 sps:$4 sm:$0xff]  }
  0xec   : > { %2346 = vmatpush1.bf16.msra.mxu0 %v3834_v44  ;;  %1229 = vmatprep.subr.bf16.mxu1 %v3839_v45  ;;  %v3901_v44 = vld [vmem:[%s5013_s1 + $0x880] ss:$8 sps:$4 sm:$0xff]   ;;  %v3906_v45 = vld [vmem:[%s5013_s1 + $0x894] ss:$8 sps:$4 sm:$0xff]  }
  0xed   : > { %2347 = vmatprep.subr.bf16.mxu0 %v3842_v41  ;;  %v3904_v41 = vld [vmem:[%s5013_s1 + $0x890] ss:$8 sps:$4 sm:$0xff]  }
  0xef   : > { %1230 = vmatpush1.bf16.msra.mxu1 %v3837_v46  ;;  %v3909_v46 = vld [vmem:[%s5013_s1 + $0x8a4] ss:$8 sps:$4 sm:$0xff]  }
  0xf0   : > { %2348 = vmatpush1.bf16.msra.mxu0 %v3840_v48  ;;  %1231 = vmatprep.subr.bf16.mxu1 %v3845_v49  ;;  %v3907_v48 = vld [vmem:[%s5013_s1 + $0x8a0] ss:$8 sps:$4 sm:$0xff]   ;;  %v3912_v49 = vld [vmem:[%s5013_s1 + $0x8b4] ss:$8 sps:$4 sm:$0xff]  }
  0xf1   : > { %2349 = vmatprep.subr.bf16.mxu0 %v3848_v50  ;;  %v3910_v50 = vld [vmem:[%s5013_s1 + $0x8b0] ss:$8 sps:$4 sm:$0xff]  }
  0xf3   : > { %1232 = vmatpush1.bf16.msra.mxu1 %v3843_v53  ;;  %v3915_v53 = vld [vmem:[%s5013_s1 + $0x8c4] ss:$8 sps:$4 sm:$0xff]  }
  0xf4   : > { %2350 = vmatpush1.bf16.msra.mxu0 %v3846_v51  ;;  %1233 = vmatprep.subr.bf16.mxu1 %v3851_v2  ;;  %v3913_v51 = vld [vmem:[%s5013_s1 + $0x8c0] ss:$8 sps:$4 sm:$0xff]   ;;  %v3918_v2 = vld [vmem:[%s5013_s1 + $0x8d4] ss:$8 sps:$4 sm:$0xff]  }
  0xf5   : > { %2351 = vmatprep.subr.bf16.mxu0 %v3854_v56  ;;  %v3916_v56 = vld [vmem:[%s5013_s1 + $0x8d0] ss:$8 sps:$4 sm:$0xff]  }
  0xf7   : > { %1234 = vmatpush1.bf16.msra.mxu1 %v3849_v57  ;;  %v3921_v57 = vld [vmem:[%s5013_s1 + $0x8e4] ss:$8 sps:$4 sm:$0xff]  }
  0xf8   : > { %2352 = vmatpush1.bf16.msra.mxu0 %v3852_v58  ;;  %1235 = vmatprep.subr.bf16.mxu1 %v3857_v59  ;;  %v3919_v58 = vld [vmem:[%s5013_s1 + $0x8e0] ss:$8 sps:$4 sm:$0xff]   ;;  %v3924_v59 = vld [vmem:[%s5013_s1 + $0x8f4] ss:$8 sps:$4 sm:$0xff]  }
  0xf9   : > { %2353 = vmatprep.subr.bf16.mxu0 %v3860_v60  ;;  %v3922_v60 = vld [vmem:[%s5013_s1 + $0x8f0] ss:$8 sps:$4 sm:$0xff]  }
  0xfb   : > { %1236 = vmatpush1.bf16.msra.mxu1 %v3855_v62  ;;  %v2421_v62 = vrot.slane %v4709_v8, 1 }
  0xfc   : > { %2354 = vmatpush1.bf16.msra.mxu0 %v3858_v28  ;;  %1237 = vmatprep.subr.bf16.mxu1 %v3864_v1  ;;  %v2425_v28 = vrot.slane %v4885_v17, 1 }
  0xfd   : > { %2355 = vmatprep.subr.bf16.mxu0 %v3868_v3  ;;  %v2422_v0 = vsel %vm772_vm1, %v4666_v52, %v2421_v62 }
  0xfe   : > { %v2426_v1 = vsel %vm772_vm1, %v2421_v62, %v2425_v28 }
  0xff   : > { %1238 = vmatpush1.bf16.msra.mxu1 %v3862_v5 }
 0x100   : > { %2356 = vmatpush1.bf16.msra.mxu0 %v3866_v15  ;;  %1239 = vmatprep.subr.bf16.mxu1 %v3871_v43 }
 0x101   : > { %2357 = vmatprep.subr.bf16.mxu0 %v3874_v10 }
 0x103   : > { %1240 = vmatpush1.bf16.msra.mxu1 %v3869_v13 }
 0x104   : > { %2358 = vmatpush1.bf16.msra.mxu0 %v3872_v14  ;;  %3372 = vmatprep.subr.bf16.mxu1 %v3877_v18 }
 0x105   : > { %2593 = vmatprep.subr.bf16.mxu0 %v3877_v18 }
 0x106   : > { %1242 = vmatmul.mubr.bf16.vlgmr.msra.gmra.mrb[0].mxu1 %v4154_v6  ;;  %v2423_v6 = vrot.slane %v4688_v54, 1 }
 0x107   : > { %2360 = vmatmul.mubr.bf16.vlgmr.msra.gmra.mrb[0].mxu0 %v2141_v21  ;;  %3388 = vmatpush1.bf16.msra.mxu1 %v3875_v22  ;;  %v2658_v21 = vsub.s32 0, %v2657_v20 }
 0x108   : > { %2594 = vmatpush1.bf16.msra.mxu0 %v3875_v22  ;;  %3373 = vmatprep.subr.bf16.mxu1 %v3880_v9  ;;  %v2428_v54 = vsel %vm772_vm1, %v2423_v6, %v2427_v32  ;;  %v2654_v22 = vld [vmem:[%s5014_s2] sm:$0x3] }
 0x109   : > { %2595 = vmatprep.subr.bf16.mxu0 %v3880_v9  ;;  %1251 = vmatprep.mubr.bf16.mxu1 %v4141_v61  ;;  %v2424_v61 = vsel %vm772_vm1, %v4495_v29, %v2423_v6  ;;  %v3894_v29 = vld [vmem:[%s5013_s1 + $0x854] ss:$8 sps:$4 sm:$0xff]   ;;  %v2659_v23 = vrot.slane %v2654_v22, %v2658_v21 }
 0x10a   : > { %2369 = vmatprep.mubr.bf16.mxu0 %v2162_v24 }
 0x10b   : > { %3389 = vmatpush1.bf16.msra.mxu1 %v3878_v63 }
 0x10c   : > { %2596 = vmatpush1.bf16.msra.mxu0 %v3878_v63  ;;  %3374 = vmatprep.subr.bf16.mxu1 %v3885_v31  ;;  %v2663_v63 = vrot.slane %v2654_v22, %v2662_v55 }
 0x10d   : > { %2597 = vmatprep.subr.bf16.mxu0 %v3885_v31 }
 0x10e   : > { %1252 = vmatmul.mubr.bf16.gmra.mrb[4].mxu1 %v4178_v19  ;;  %v3889_v19 = vld [vmem:[%s5013_s1 + $0x840] ss:$8 sps:$4 sm:$0xff]  }
 0x10f   : > { %2370 = vmatmul.mubr.bf16.gmra.mrb[4].mxu0 %v2154_v33  ;;  %3390 = vmatpush1.bf16.msra.mxu1 %v3883_v34 }
 0x110   : > { %2598 = vmatpush1.bf16.msra.mxu0 %v3883_v34  ;;  %3375 = vmatprep.subr.bf16.mxu1 %v3888_v35 }
 0x111   : > { %2599 = vmatprep.subr.bf16.mxu0 %v3888_v35  ;;  %2625 = vmatprep.mubr.bf16.mxu0 %v2424_v61 }
 0x112   : > { %2635 = vmatprep.mubr.bf16.mxu1 %v2428_v54 }
 0x113   : > { %3391 = vmatpush1.bf16.msra.mxu1 %v3886_v36 }
 0x114   : > { %2600 = vmatpush1.bf16.msra.mxu0 %v3886_v36  ;;  %3376 = vmatprep.subr.bf16.mxu1 %v3891_v37 }
 0x115   : > { %2601 = vmatprep.subr.bf16.mxu0 %v3891_v37 }
 0x117   : > { %3392 = vmatpush1.bf16.msra.mxu1 %v3889_v19 }
 0x118   : > { %2602 = vmatpush1.bf16.msra.mxu0 %v3889_v19  ;;  %3377 = vmatprep.subr.bf16.mxu1 %v3894_v29 }
 0x119   : > { %2603 = vmatprep.subr.bf16.mxu0 %v3894_v29 }
 0x11b   : > { %3393 = vmatpush1.bf16.msra.mxu1 %v3892_v38 }
 0x11c   : > { %2604 = vmatpush1.bf16.msra.mxu0 %v3892_v38  ;;  %3378 = vmatprep.subr.bf16.mxu1 %v3897_v39 }
 0x11d   : > { %2605 = vmatprep.subr.bf16.mxu0 %v3897_v39 }
 0x11f   : > { %3394 = vmatpush1.bf16.msra.mxu1 %v3895_v27 }
 0x120   : > { %2606 = vmatpush1.bf16.msra.mxu0 %v3895_v27  ;;  %3379 = vmatprep.subr.bf16.mxu1 %v3900_v40 }
 0x121   : > { %2607 = vmatprep.subr.bf16.mxu0 %v3900_v40 }
 0x123   : > { %3395 = vmatpush1.bf16.msra.mxu1 %v3898_v11 }
 0x124   : > { %2608 = vmatpush1.bf16.msra.mxu0 %v3898_v11  ;;  %3380 = vmatprep.subr.bf16.mxu1 %v3903_v42 }
 0x125   : > { %2609 = vmatprep.subr.bf16.mxu0 %v3903_v42 }
 0x127   : > { %3396 = vmatpush1.bf16.msra.mxu1 %v3901_v44 }
 0x128   : > { %2610 = vmatpush1.bf16.msra.mxu0 %v3901_v44  ;;  %3381 = vmatprep.subr.bf16.mxu1 %v3906_v45 }
 0x129   : > { %2611 = vmatprep.subr.bf16.mxu0 %v3906_v45 }
 0x12b   : > { %3397 = vmatpush1.bf16.msra.mxu1 %v3904_v41 }
 0x12c   : > { %2612 = vmatpush1.bf16.msra.mxu0 %v3904_v41  ;;  %3382 = vmatprep.subr.bf16.mxu1 %v3909_v46 }
 0x12d   : > { %2613 = vmatprep.subr.bf16.mxu0 %v3909_v46 }
 0x12f   : > { %3398 = vmatpush1.bf16.msra.mxu1 %v3907_v48 }
 0x130   : > { %2614 = vmatpush1.bf16.msra.mxu0 %v3907_v48  ;;  %3383 = vmatprep.subr.bf16.mxu1 %v3912_v49 }
 0x131   : > { %2615 = vmatprep.subr.bf16.mxu0 %v3912_v49 }
 0x133   : > { %3399 = vmatpush1.bf16.msra.mxu1 %v3910_v50 }
 0x134   : > { %2616 = vmatpush1.bf16.msra.mxu0 %v3910_v50  ;;  %3384 = vmatprep.subr.bf16.mxu1 %v3915_v53 }
 0x135   : > { %2617 = vmatprep.subr.bf16.mxu0 %v3915_v53 }
 0x137   : > { %3400 = vmatpush1.bf16.msra.mxu1 %v3913_v51 }
 0x138   : > { %2618 = vmatpush1.bf16.msra.mxu0 %v3913_v51  ;;  %3385 = vmatprep.subr.bf16.mxu1 %v3918_v2 }
 0x139   : > { %2619 = vmatprep.subr.bf16.mxu0 %v3918_v2 }
 0x13b   : > { %3401 = vmatpush1.bf16.msra.mxu1 %v3916_v56 }
 0x13c   : > { %2620 = vmatpush1.bf16.msra.mxu0 %v3916_v56  ;;  %3386 = vmatprep.subr.bf16.mxu1 %v3921_v57 }
 0x13d   : > { %2621 = vmatprep.subr.bf16.mxu0 %v3921_v57 }
 0x13f   : > { %3402 = vmatpush1.bf16.msra.mxu1 %v3919_v58 }
 0x140   : > { %2622 = vmatpush1.bf16.msra.mxu0 %v3919_v58  ;;  %3387 = vmatprep.subr.bf16.mxu1 %v3924_v59 }
 0x141   : > { %2623 = vmatprep.subr.bf16.mxu0 %v3924_v59 }
 0x143   : > { %3403 = vmatpush1.bf16.msra.mxu1 %v3922_v60 }
 0x144   : > { %2624 = vmatpush1.bf16.msra.mxu0 %v3922_v60 }
 0x146   : > { %2636 = vmatmul.mubr.bf16.vlgmr.msra.gmra.mrb[8].mxu1 %v2426_v1 }
 0x147   : > { %2626 = vmatmul.mubr.bf16.vlgmr.msra.gmra.mrb[0].mxu0 %v2422_v0 }
 0x1d9   : > { %v1243_v3 = vpop.f32.mrb[0].mxu1 }
 0x1da   : > { %v1245_v4 = vpop.f32.mrb[1].mxu1 }
 0x1db   : > { %v1247_v5 = vpop.f32.mrb[2].mxu1 }
 0x1dc   : > { %v1249_v15 = vpop.f32.mrb[3].mxu1 }
 0x1e1   : > { %v1253_v7 = vpop.f32.mrb[4].mxu1 }
 0x1e2   : > { %v2371_v43 = vpop.f32.mrb[4].mxu0  ;;  %v1255_v10 = vpop.f32.mrb[5].mxu1 }
 0x1e3   : > { %v3408_v8 = vadd.f32 %v2371_v43, %v1253_v7  ;;  %v2373_v12 = vpop.f32.mrb[5].mxu0  ;;  %v1257_v13 = vpop.f32.mrb[6].mxu1 }
 0x1e4   : > { %v3410_v26 = vadd.f32 %v2373_v12, %v1255_v10  ;;  %v2375_v14 = vpop.f32.mrb[6].mxu0  ;;  %v1259_v17 = vpop.f32.mrb[7].mxu1 }
 0x1e5   : > { %v3412_v16 = vadd.f32 %v2375_v14, %v1257_v13  ;;  %v2377_v18 = vpop.f32.mrb[7].mxu0 }
 0x1e6   : > { %v3414_v52 = vadd.f32 %v2377_v18, %v1259_v17 }
 0x219   : > { %v2637_v24 = vpop.f32.mrb[8].mxu1 }
 0x21a   : > { %v2627_v9 = vpop.f32.mrb[0].mxu0  ;;  %v3409_v30 = vadd.f32 %v3408_v8, %v2637_v24  ;;  %v2639_v6 = vpop.f32.mrb[9].mxu1 }
 0x21b   : > { %v3404_v25 = vadd.f32 %v2627_v9, %v1243_v3  ;;  %v2629_v31 = vpop.f32.mrb[1].mxu0  ;;  %v3411_v33 = vadd.f32 %v3410_v26, %v2639_v6  ;;  %v2641_v35 = vpop.f32.mrb[10].mxu1 }
 0x21c   : > { %v3405_v32 = vadd.f32 %v2629_v31, %v1245_v4  ;;  %v2631_v34 = vpop.f32.mrb[2].mxu0  ;;  %v2670_v54 = vadd.f32 %v3409_v30, %v2659_v23  ;;  %v3413_v37 = vadd.f32 %v3412_v16, %v2641_v35  ;;  %v2643_v29 = vpop.f32.mrb[11].mxu1 }
 0x21d   : > { %v2666_v61 = vadd.f32 %v3404_v25, %v2659_v23  ;;  %v3406_v36 = vadd.f32 %v2631_v34, %v1247_v5  ;;  %v2633_v19 = vpop.f32.mrb[3].mxu0  ;;  %v2671_v39 = vadd.f32 %v3411_v33, %v2663_v63  ;;  %v3415_v40 = vadd.f32 %v3414_v52, %v2643_v29 }
 0x21e   : > { %v2667_v38 = vadd.f32 %v3405_v32, %v2663_v63  ;;  %v3407_v27 = vadd.f32 %v2633_v19, %v1249_v15  ;;  %v2678_v42 = vmax.f32 %v2670_v54, 0.0  ;;  %v2672_v45 = vadd.f32 %v3413_v37, %v2659_v23 }
 0x21f   : > { %v2674_v11 = vmax.f32 %v2666_v61, 0.0  ;;  %v2668_v44 = vadd.f32 %v3406_v36, %v2659_v23  ;;  %v2679_v46 = vmax.f32 %v2671_v39, 0.0  ;;  %v2673_v49 = vadd.f32 %v3415_v40, %v2663_v63 }
 0x220   : > { %v2675_v41 = vmax.f32 %v2667_v38, 0.0  ;;  %v2669_v48 = vadd.f32 %v3407_v27, %v2663_v63  ;;  %v2680_v53 = vmax.f32 %v2672_v45, 0.0 }
 0x221   : > { %v2676_v50 = vmax.f32 %v2668_v44, 0.0  ;;  %v3363_v2 = vpack.c.bf16 %v2679_v46, %v2678_v42  ;;  %v2681_v57 = vmax.f32 %v2673_v49, 0.0 }
 0x222   : > { %v3361_v51 = vpack.c.bf16 %v2675_v41, %v2674_v11  ;;  %v2677_v56 = vmax.f32 %v2669_v48, 0.0 }
 0x223   : > { %3367 = vst.sshfl [vmem:[%s170_s15 + $0x8] sm:$0x33 pattern:$0x76325410] %v3363_v2  ;;  %v3364_v59 = vpack.c.bf16 %v2681_v57, %v2680_v53 }
 0x224   : > { %3365 = vst.sshfl [vmem:[%s170_s15] sm:$0x33 pattern:$0x76325410] %v3361_v51  ;;  %v3362_v58 = vpack.c.bf16 %v2677_v56, %v2676_v50 }
 0x225   : > { %3368 = vst.sshfl [vmem:[%s170_s15 + $0xc] sm:$0x33 pattern:$0x76325410] %v3364_v59 }
 0x226   : > { %3366 = vst.sshfl [vmem:[%s170_s15 + $0x4] sm:$0x33 pattern:$0x76325410] %v3362_v58 }
 0x227 PF: > { %s13_s12 = sadd.s32 1, %s3932_s12  }
 0x228   : > { %p10_p4 = scmp.ge.s32.totalorder %s13_s12, 4  }
 0x22a   :  { %12 = sbr.rel (!%p10_p4) target bundleno = 1 (0x1), region = 70 }

// kernel: _lambda_.69
= control target key start
LH: loop header
LB: loop body
LE: loop exit
PB: predicated region body
PF: predicated region fallthrough
CT: control target
= control target key end

     0   :  { %s3483_s1 = inlined_call_operand.vmem [shape: bf16[512,1024], index: 1, kind: input, shape index: {}]   ;;  %s3484_s0 = inlined_call_operand.vmem [shape: bf16[32,512], index: 0, kind: input, shape index: {}]   ;;  %s3485_s2 = inlined_call_operand.vmem [shape: f32[1,1024], index: 2, kind: input, shape index: {}]   ;;  %s3486_s3 = inlined_call_operand.vmem [shape: bf16[32,1024], index: 3, kind: output, shape index: {}]  }
   0x1   :  { %v22_v0 = vld [vmem:[%s3483_s1] sm:$0xff]  ;;  %v23_v2 = vld [vmem:[%s3483_s1 + $0x8] sm:$0xff] }
   0x2   :  { %v26_v1 = vld [vmem:[%s3483_s1 + $0x20] sm:$0xff]  ;;  %v27_v4 = vld [vmem:[%s3483_s1 + $0x28] sm:$0xff] }
   0x3   :  { %v2189_v3 = vcombine.high %v22_v0, %v26_v1  ;;  %v2188_v5 = vcombine.low %v22_v0, %v26_v1  ;;  %v30_v6 = vld [vmem:[%s3483_s1 + $0x40] sm:$0xff]  ;;  %v2191_v8 = vcombine.high %v23_v2, %v27_v4  ;;  %v2190_v9 = vcombine.low %v23_v2, %v27_v4  ;;  %v31_v11 = vld [vmem:[%s3483_s1 + $0x48] sm:$0xff] }
   0x4   :  { %v34_v7 = vld [vmem:[%s3483_s1 + $0x60] sm:$0xff]  ;;  %v35_v12 = vld [vmem:[%s3483_s1 + $0x68] sm:$0xff] }
   0x5   :  { %v2197_v10 = vcombine.high %v30_v6, %v34_v7  ;;  %v38_v13 = vld [vmem:[%s3483_s1 + $0x80] sm:$0xff]  ;;  %1640 = vmatprep.subr.bf16.mxu0 %v2189_v3  ;;  %v2199_v14 = vcombine.high %v31_v11, %v35_v12  ;;  %v39_v16 = vld [vmem:[%s3483_s1 + $0x88] sm:$0xff]  ;;  %1746 = vmatprep.subr.bf16.mxu1 %v2191_v8  ;;  %v2196_v18 = vcombine.low %v30_v6, %v34_v7 }
   0x6   :  { %v42_v15 = vld [vmem:[%s3483_s1 + $0xa0] sm:$0xff]  ;;  %v43_v17 = vld [vmem:[%s3483_s1 + $0xa8] sm:$0xff]  ;;  %1641 = vmatpush1.bf16.msra.mxu0 %v2188_v5  ;;  %1747 = vmatpush1.bf16.msra.mxu1 %v2190_v9  ;;  %v2198_v19 = vcombine.low %v31_v11, %v35_v12 }
   0x7   :  { %1642 = vmatprep.subr.bf16.mxu0 %v2197_v10  ;;  %v2205_v20 = vcombine.high %v38_v13, %v42_v15  ;;  %1748 = vmatprep.subr.bf16.mxu1 %v2199_v14  ;;  %v2207_v21 = vcombine.high %v39_v16, %v43_v17  ;;  %v46_v22 = vld [vmem:[%s3483_s1 + $0xc0] sm:$0xff]  ;;  %v47_v24 = vld [vmem:[%s3483_s1 + $0xc8] sm:$0xff]  ;;  %v2204_v26 = vcombine.low %v38_v13, %v42_v15 }
   0x8   :  { %v50_v23 = vld [vmem:[%s3483_s1 + $0xe0] sm:$0xff]  ;;  %v51_v25 = vld [vmem:[%s3483_s1 + $0xe8] sm:$0xff]  ;;  %v2206_v27 = vcombine.low %v39_v16, %v43_v17 }
   0x9   :  { %v2213_v28 = vcombine.high %v46_v22, %v50_v23  ;;  %v2215_v29 = vcombine.high %v47_v24, %v51_v25  ;;  %v54_v30 = vld [vmem:[%s3483_s1 + $0x100] sm:$0xff]  ;;  %v55_v32 = vld [vmem:[%s3483_s1 + $0x108] sm:$0xff]  ;;  %v2212_v34 = vcombine.low %v46_v22, %v50_v23  ;;  %v2214_v35 = vcombine.low %v47_v24, %v51_v25 }
   0xa   :  { %1643 = vmatpush1.bf16.msra.mxu0 %v2196_v18  ;;  %1749 = vmatpush1.bf16.msra.mxu1 %v2198_v19  ;;  %v58_v31 = vld [vmem:[%s3483_s1 + $0x120] sm:$0xff]  ;;  %v59_v33 = vld [vmem:[%s3483_s1 + $0x128] sm:$0xff] }
   0xb   :  { %1644 = vmatprep.subr.bf16.mxu0 %v2205_v20  ;;  %1750 = vmatprep.subr.bf16.mxu1 %v2207_v21  ;;  %v2221_v36 = vcombine.high %v54_v30, %v58_v31  ;;  %v2223_v37 = vcombine.high %v55_v32, %v59_v33  ;;  %v62_v38 = vld [vmem:[%s3483_s1 + $0x140] sm:$0xff]  ;;  %v63_v40 = vld [vmem:[%s3483_s1 + $0x148] sm:$0xff]  ;;  %v2220_v42 = vcombine.low %v54_v30, %v58_v31 }
   0xc   :  { %v66_v39 = vld [vmem:[%s3483_s1 + $0x160] sm:$0xff]  ;;  %v67_v41 = vld [vmem:[%s3483_s1 + $0x168] sm:$0xff]  ;;  %v2222_v43 = vcombine.low %v55_v32, %v59_v33 }
   0xd   :  { %v2229_v44 = vcombine.high %v62_v38, %v66_v39  ;;  %v2231_v45 = vcombine.high %v63_v40, %v67_v41  ;;  %v70_v46 = vld [vmem:[%s3483_s1 + $0x180] sm:$0xff]  ;;  %v71_v48 = vld [vmem:[%s3483_s1 + $0x188] sm:$0xff]  ;;  %v2228_v50 = vcombine.low %v62_v38, %v66_v39  ;;  %v2230_v51 = vcombine.low %v63_v40, %v67_v41 }
   0xe   :  { %1645 = vmatpush1.bf16.msra.mxu0 %v2204_v26  ;;  %1751 = vmatpush1.bf16.msra.mxu1 %v2206_v27  ;;  %v74_v47 = vld [vmem:[%s3483_s1 + $0x1a0] sm:$0xff]  ;;  %v75_v49 = vld [vmem:[%s3483_s1 + $0x1a8] sm:$0xff] }
   0xf   :  { %1646 = vmatprep.subr.bf16.mxu0 %v2213_v28  ;;  %1752 = vmatprep.subr.bf16.mxu1 %v2215_v29  ;;  %v2237_v52 = vcombine.high %v70_v46, %v74_v47  ;;  %v2239_v53 = vcombine.high %v71_v48, %v75_v49  ;;  %v78_v54 = vld [vmem:[%s3483_s1 + $0x1c0] sm:$0xff]  ;;  %v79_v57 = vld [vmem:[%s3483_s1 + $0x1c8] sm:$0xff]  ;;  %v2236_v59 = vcombine.low %v70_v46, %v74_v47 }
  0x10   :  { %v82_v55 = vld [vmem:[%s3483_s1 + $0x1e0] sm:$0xff]  ;;  %v83_v58 = vld [vmem:[%s3483_s1 + $0x1e8] sm:$0xff]  ;;  %v2238_v60 = vcombine.low %v71_v48, %v75_v49 }
  0x11   :  { %v2665_v56 = vld [vmem:[%s3484_s0 + $0x4] ss:$16 sps:$4 sm:$0xff]   ;;  %v2245_v61 = vcombine.high %v78_v54, %v82_v55  ;;  %v2247_v62 = vcombine.high %v79_v57, %v83_v58  ;;  %v87_v1 = vld [vmem:[%s3483_s1 + $0x208] sm:$0xff]  ;;  %v2244_v3 = vcombine.low %v78_v54, %v82_v55  ;;  %v2246_v4 = vcombine.low %v79_v57, %v83_v58 }
  0x12   :  { %1647 = vmatpush1.bf16.msra.mxu0 %v2212_v34  ;;  %1753 = vmatpush1.bf16.msra.mxu1 %v2214_v35  ;;  %v86_v63 = vld [vmem:[%s3483_s1 + $0x200] sm:$0xff]  ;;  %v91_v2 = vld [vmem:[%s3483_s1 + $0x228] sm:$0xff] }
  0x13   :  { %1648 = vmatprep.subr.bf16.mxu0 %v2221_v36  ;;  %1754 = vmatprep.subr.bf16.mxu1 %v2223_v37  ;;  %v90_v0 = vld [vmem:[%s3483_s1 + $0x220] sm:$0xff]  ;;  %v2255_v6 = vcombine.high %v87_v1, %v91_v2  ;;  %v95_v9 = vld [vmem:[%s3483_s1 + $0x248] sm:$0xff]  ;;  %v2254_v12 = vcombine.low %v87_v1, %v91_v2 }
  0x14   :  { %1672 = vmatprep.mubr.bf16.mxu0 %v2665_v56  ;;  %1778 = vmatprep.mubr.bf16.mxu1 %v2665_v56  ;;  %v2253_v5 = vcombine.high %v86_v63, %v90_v0  ;;  %v94_v7 = vld [vmem:[%s3483_s1 + $0x240] sm:$0xff]  ;;  %v99_v10 = vld [vmem:[%s3483_s1 + $0x268] sm:$0xff]  ;;  %v2252_v11 = vcombine.low %v86_v63, %v90_v0 }
  0x15   :  { %v98_v8 = vld [vmem:[%s3483_s1 + $0x260] sm:$0xff]  ;;  %v2263_v14 = vcombine.high %v95_v9, %v99_v10  ;;  %v103_v17 = vld [vmem:[%s3483_s1 + $0x288] sm:$0xff]  ;;  %v2262_v20 = vcombine.low %v95_v9, %v99_v10 }
  0x16   :  { %1649 = vmatpush1.bf16.msra.mxu0 %v2220_v42  ;;  %1755 = vmatpush1.bf16.msra.mxu1 %v2222_v43  ;;  %v2261_v13 = vcombine.high %v94_v7, %v98_v8  ;;  %v102_v15 = vld [vmem:[%s3483_s1 + $0x280] sm:$0xff]  ;;  %v107_v18 = vld [vmem:[%s3483_s1 + $0x2a8] sm:$0xff]  ;;  %v2260_v19 = vcombine.low %v94_v7, %v98_v8 }
  0x17   :  { %1650 = vmatprep.subr.bf16.mxu0 %v2229_v44  ;;  %1756 = vmatprep.subr.bf16.mxu1 %v2231_v45  ;;  %v106_v16 = vld [vmem:[%s3483_s1 + $0x2a0] sm:$0xff]  ;;  %v2271_v22 = vcombine.high %v103_v17, %v107_v18  ;;  %v111_v25 = vld [vmem:[%s3483_s1 + $0x2c8] sm:$0xff]  ;;  %v2270_v28 = vcombine.low %v103_v17, %v107_v18 }
  0x18   :  { %v2269_v21 = vcombine.high %v102_v15, %v106_v16  ;;  %v110_v23 = vld [vmem:[%s3483_s1 + $0x2c0] sm:$0xff]  ;;  %v115_v26 = vld [vmem:[%s3483_s1 + $0x2e8] sm:$0xff]  ;;  %v2268_v27 = vcombine.low %v102_v15, %v106_v16 }
  0x19   :  { %v114_v24 = vld [vmem:[%s3483_s1 + $0x2e0] sm:$0xff]  ;;  %v2279_v30 = vcombine.high %v111_v25, %v115_v26  ;;  %v119_v33 = vld [vmem:[%s3483_s1 + $0x308] sm:$0xff]  ;;  %v2278_v36 = vcombine.low %v111_v25, %v115_v26 }
  0x1a   :  { %1651 = vmatpush1.bf16.msra.mxu0 %v2228_v50  ;;  %1757 = vmatpush1.bf16.msra.mxu1 %v2230_v51  ;;  %v2277_v29 = vcombine.high %v110_v23, %v114_v24  ;;  %v118_v31 = vld [vmem:[%s3483_s1 + $0x300] sm:$0xff]  ;;  %v123_v34 = vld [vmem:[%s3483_s1 + $0x328] sm:$0xff]  ;;  %v2276_v35 = vcombine.low %v110_v23, %v114_v24 }
  0x1b   :  { %1652 = vmatprep.subr.bf16.mxu0 %v2237_v52  ;;  %1758 = vmatprep.subr.bf16.mxu1 %v2239_v53  ;;  %v122_v32 = vld [vmem:[%s3483_s1 + $0x320] sm:$0xff]  ;;  %v2287_v38 = vcombine.high %v119_v33, %v123_v34  ;;  %v127_v41 = vld [vmem:[%s3483_s1 + $0x348] sm:$0xff]  ;;  %v2286_v44 = vcombine.low %v119_v33, %v123_v34 }
  0x1c   :  { %v2285_v37 = vcombine.high %v118_v31, %v122_v32  ;;  %v126_v39 = vld [vmem:[%s3483_s1 + $0x340] sm:$0xff]  ;;  %v131_v42 = vld [vmem:[%s3483_s1 + $0x368] sm:$0xff]  ;;  %v2284_v43 = vcombine.low %v118_v31, %v122_v32 }
  0x1d   :  { %v130_v40 = vld [vmem:[%s3483_s1 + $0x360] sm:$0xff]  ;;  %v2295_v46 = vcombine.high %v127_v41, %v131_v42  ;;  %v135_v49 = vld [vmem:[%s3483_s1 + $0x388] sm:$0xff]  ;;  %v2294_v52 = vcombine.low %v127_v41, %v131_v42 }
  0x1e   :  { %1653 = vmatpush1.bf16.msra.mxu0 %v2236_v59  ;;  %1759 = vmatpush1.bf16.msra.mxu1 %v2238_v60  ;;  %v2293_v45 = vcombine.high %v126_v39, %v130_v40  ;;  %v134_v47 = vld [vmem:[%s3483_s1 + $0x380] sm:$0xff]  ;;  %v139_v50 = vld [vmem:[%s3483_s1 + $0x3a8] sm:$0xff]  ;;  %v2292_v51 = vcombine.low %v126_v39, %v130_v40 }
  0x1f   :  { %1654 = vmatprep.subr.bf16.mxu0 %v2245_v61  ;;  %1760 = vmatprep.subr.bf16.mxu1 %v2247_v62  ;;  %v138_v48 = vld [vmem:[%s3483_s1 + $0x3a0] sm:$0xff]  ;;  %v2303_v54 = vcombine.high %v135_v49, %v139_v50  ;;  %v143_v58 = vld [vmem:[%s3483_s1 + $0x3c8] sm:$0xff]  ;;  %v2302_v61 = vcombine.low %v135_v49, %v139_v50 }
  0x20   :  { %v2301_v53 = vcombine.high %v134_v47, %v138_v48  ;;  %v142_v55 = vld [vmem:[%s3483_s1 + $0x3c0] sm:$0xff]  ;;  %v147_v59 = vld [vmem:[%s3483_s1 + $0x3e8] sm:$0xff]  ;;  %v2300_v60 = vcombine.low %v134_v47, %v138_v48 }
  0x21   :  { %v146_v57 = vld [vmem:[%s3483_s1 + $0x3e0] sm:$0xff]  ;;  %v2311_v63 = vcombine.high %v143_v58, %v147_v59  ;;  %v151_v2 = vld [vmem:[%s3483_s1 + $0x408] sm:$0xff] }
  0x22   :  { %1655 = vmatpush1.bf16.msra.mxu0 %v2244_v3  ;;  %1761 = vmatpush1.bf16.msra.mxu1 %v2246_v4  ;;  %v2309_v62 = vcombine.high %v142_v55, %v146_v57  ;;  %v150_v0 = vld [vmem:[%s3483_s1 + $0x400] sm:$0xff]  ;;  %v155_v3 = vld [vmem:[%s3483_s1 + $0x428] sm:$0xff]  ;;  %v2308_v4 = vcombine.low %v142_v55, %v146_v57 }
  0x23   :  { %1656 = vmatprep.subr.bf16.mxu0 %v2253_v5  ;;  %1762 = vmatprep.subr.bf16.mxu1 %v2255_v6  ;;  %v154_v1 = vld [vmem:[%s3483_s1 + $0x420] sm:$0xff]  ;;  %v2310_v5 = vcombine.low %v143_v58, %v147_v59  ;;  %v2319_v7 = vcombine.high %v151_v2, %v155_v3  ;;  %v187_v39 = vld [vmem:[%s3483_s1 + $0x528] sm:$0xff] }
  0x24   :  { %v2317_v6 = vcombine.high %v150_v0, %v154_v1  ;;  %v158_v8 = vld [vmem:[%s3483_s1 + $0x440] sm:$0xff]  ;;  %v195_v47 = vld [vmem:[%s3483_s1 + $0x568] sm:$0xff] }
  0x25   :  { %v162_v9 = vld [vmem:[%s3483_s1 + $0x460] sm:$0xff]  ;;  %v203_v55 = vld [vmem:[%s3483_s1 + $0x5a8] sm:$0xff] }
  0x26   :  { %1657 = vmatpush1.bf16.msra.mxu0 %v2252_v11  ;;  %1763 = vmatpush1.bf16.msra.mxu1 %v2254_v12  ;;  %v2792_v10 = vld [vmem:[%s3484_s0] ss:$16 sps:$4 sm:$0xff]   ;;  %v159_v11 = vld [vmem:[%s3483_s1 + $0x448] sm:$0xff]  ;;  %v2325_v15 = vcombine.high %v158_v8, %v162_v9 }
  0x27   :  { %1658 = vmatprep.subr.bf16.mxu0 %v2261_v13  ;;  %1764 = vmatprep.subr.bf16.mxu1 %v2263_v14  ;;  %v163_v12 = vld [vmem:[%s3483_s1 + $0x468] sm:$0xff]  ;;  %v2316_v13 = vcombine.low %v150_v0, %v154_v1  ;;  %v2318_v14 = vcombine.low %v151_v2, %v155_v3  ;;  %v166_v17 = vld [vmem:[%s3483_s1 + $0x480] sm:$0xff] }
  0x28   :  { %v2327_v16 = vcombine.high %v159_v11, %v163_v12  ;;  %v170_v18 = vld [vmem:[%s3483_s1 + $0x4a0] sm:$0xff]  ;;  %v2326_v23 = vcombine.low %v159_v11, %v163_v12  ;;  %v211_v0 = vld [vmem:[%s3483_s1 + $0x5e8] sm:$0xff] }
  0x29   :  { %v2333_v24 = vcombine.high %v166_v17, %v170_v18  ;;  %v174_v26 = vld [vmem:[%s3483_s1 + $0x4c0] sm:$0xff]  ;;  %v2332_v31 = vcombine.low %v166_v17, %v170_v18  ;;  %v227_v17 = vld [vmem:[%s3483_s1 + $0x668] sm:$0xff] }
  0x2a   :  { %1659 = vmatpush1.bf16.msra.mxu0 %v2260_v19  ;;  %1765 = vmatpush1.bf16.msra.mxu1 %v2262_v20  ;;  %v2809_v19 = vld [vmem:[%s3484_s0 + $0x24] ss:$16 sps:$4 sm:$0xff]   ;;  %v167_v20 = vld [vmem:[%s3483_s1 + $0x488] sm:$0xff] }
  0x2b   :  { %1660 = vmatprep.subr.bf16.mxu0 %v2269_v21  ;;  %1766 = vmatprep.subr.bf16.mxu1 %v2271_v22  ;;  %v171_v21 = vld [vmem:[%s3483_s1 + $0x4a8] sm:$0xff]  ;;  %v2324_v22 = vcombine.low %v158_v8, %v162_v9 }
  0x2c   :  { %v2335_v25 = vcombine.high %v167_v20, %v171_v21  ;;  %v2334_v32 = vcombine.low %v167_v20, %v171_v21  ;;  %v219_v8 = vld [vmem:[%s3483_s1 + $0x628] sm:$0xff] }
  0x2e   :  { %1661 = vmatpush1.bf16.msra.mxu0 %v2268_v27  ;;  %1767 = vmatpush1.bf16.msra.mxu1 %v2270_v28  ;;  %v178_v27 = vld [vmem:[%s3483_s1 + $0x4e0] sm:$0xff]  ;;  %v175_v28 = vld [vmem:[%s3483_s1 + $0x4c8] sm:$0xff] }
  0x2f   :  { %1662 = vmatprep.subr.bf16.mxu0 %v2277_v29  ;;  %1768 = vmatprep.subr.bf16.mxu1 %v2279_v30  ;;  %v179_v29 = vld [vmem:[%s3483_s1 + $0x4e8] sm:$0xff]  ;;  %v2836_v30 = vld [vmem:[%s3484_s0 + $0x20] ss:$16 sps:$4 sm:$0xff]   ;;  %v2341_v33 = vcombine.high %v174_v26, %v178_v27  ;;  %v2340_v40 = vcombine.low %v174_v26, %v178_v27 }
  0x30   :  { %v2343_v34 = vcombine.high %v175_v28, %v179_v29  ;;  %v2342_v41 = vcombine.low %v175_v28, %v179_v29  ;;  %v235_v26 = vld [vmem:[%s3483_s1 + $0x6a8] sm:$0xff] }
  0x32   :  { %1663 = vmatpush1.bf16.msra.mxu0 %v2276_v35  ;;  %1769 = vmatpush1.bf16.msra.mxu1 %v2278_v36  ;;  %v182_v35 = vld [vmem:[%s3483_s1 + $0x500] sm:$0xff] }
  0x33   :  { %1664 = vmatprep.subr.bf16.mxu0 %v2285_v37  ;;  %1770 = vmatprep.subr.bf16.mxu1 %v2287_v38  ;;  %v186_v36 = vld [vmem:[%s3483_s1 + $0x520] sm:$0xff]  ;;  %v2847_v37 = vld [vmem:[%s3484_s0 + $0xc] ss:$16 sps:$4 sm:$0xff]  }
  0x34   :  { %v183_v38 = vld [vmem:[%s3483_s1 + $0x508] sm:$0xff]  ;;  %v2349_v42 = vcombine.high %v182_v35, %v186_v36  ;;  %v2348_v48 = vcombine.low %v182_v35, %v186_v36 }
  0x35   :  { %v2350_v49 = vcombine.low %v183_v38, %v187_v39  ;;  %v243_v35 = vld [vmem:[%s3483_s1 + $0x6e8] sm:$0xff] }
  0x36   :  { %1665 = vmatpush1.bf16.msra.mxu0 %v2284_v43  ;;  %1771 = vmatpush1.bf16.msra.mxu1 %v2286_v44  ;;  %v2351_v43 = vcombine.high %v183_v38, %v187_v39  ;;  %v190_v44 = vld [vmem:[%s3483_s1 + $0x540] sm:$0xff] }
  0x37   :  { %1666 = vmatprep.subr.bf16.mxu0 %v2293_v45  ;;  %1772 = vmatprep.subr.bf16.mxu1 %v2295_v46  ;;  %v194_v45 = vld [vmem:[%s3483_s1 + $0x560] sm:$0xff]  ;;  %v191_v46 = vld [vmem:[%s3483_s1 + $0x548] sm:$0xff] }
  0x38   :  { %v2357_v50 = vcombine.high %v190_v44, %v194_v45  ;;  %v2356_v57 = vcombine.low %v190_v44, %v194_v45  ;;  %v2358_v58 = vcombine.low %v191_v46, %v195_v47  ;;  %v251_v44 = vld [vmem:[%s3483_s1 + $0x728] sm:$0xff] }
  0x3a   :  { %1667 = vmatpush1.bf16.msra.mxu0 %v2292_v51  ;;  %1773 = vmatpush1.bf16.msra.mxu1 %v2294_v52  ;;  %v2359_v51 = vcombine.high %v191_v46, %v195_v47  ;;  %v198_v52 = vld [vmem:[%s3483_s1 + $0x580] sm:$0xff] }
  0x3b   :  { %1668 = vmatprep.subr.bf16.mxu0 %v2301_v53  ;;  %1774 = vmatprep.subr.bf16.mxu1 %v2303_v54  ;;  %v202_v53 = vld [vmem:[%s3483_s1 + $0x5a0] sm:$0xff]  ;;  %v199_v54 = vld [vmem:[%s3483_s1 + $0x588] sm:$0xff] }
  0x3c   :  { %v2365_v59 = vcombine.high %v198_v52, %v202_v53  ;;  %v2364_v1 = vcombine.low %v198_v52, %v202_v53  ;;  %v2366_v2 = vcombine.low %v199_v54, %v203_v55  ;;  %v259_v52 = vld [vmem:[%s3483_s1 + $0x768] sm:$0xff] }
  0x3e   :  { %1669 = vmatpush1.bf16.msra.mxu0 %v2300_v60  ;;  %1775 = vmatpush1.bf16.msra.mxu1 %v2302_v61  ;;  %v2367_v60 = vcombine.high %v199_v54, %v203_v55  ;;  %v206_v61 = vld [vmem:[%s3483_s1 + $0x5c0] sm:$0xff] }
  0x3f   :  { %1670 = vmatprep.subr.bf16.mxu0 %v2309_v62  ;;  %1776 = vmatprep.subr.bf16.mxu1 %v2311_v63  ;;  %v210_v62 = vld [vmem:[%s3483_s1 + $0x5e0] sm:$0xff]  ;;  %v207_v63 = vld [vmem:[%s3483_s1 + $0x5c8] sm:$0xff] }
  0x40   :  { %v2373_v3 = vcombine.high %v206_v61, %v210_v62  ;;  %v2372_v9 = vcombine.low %v206_v61, %v210_v62  ;;  %v2374_v11 = vcombine.low %v207_v63, %v211_v0  ;;  %v267_v61 = vld [vmem:[%s3483_s1 + $0x7a8] sm:$0xff] }
  0x42   :  { %1671 = vmatpush1.bf16.msra.mxu0 %v2308_v4  ;;  %1777 = vmatpush1.bf16.msra.mxu1 %v2310_v5  ;;  %v2375_v4 = vcombine.high %v207_v63, %v211_v0  ;;  %v214_v5 = vld [vmem:[%s3483_s1 + $0x600] sm:$0xff] }
  0x43   :  { %1693 = vmatprep.subr.bf16.mxu0 %v2317_v6  ;;  %1799 = vmatprep.subr.bf16.mxu1 %v2319_v7  ;;  %v218_v6 = vld [vmem:[%s3483_s1 + $0x620] sm:$0xff]  ;;  %v215_v7 = vld [vmem:[%s3483_s1 + $0x608] sm:$0xff] }
  0x44   :  { %v2381_v12 = vcombine.high %v214_v5, %v218_v6  ;;  %v2380_v18 = vcombine.low %v214_v5, %v218_v6  ;;  %v2382_v20 = vcombine.low %v215_v7, %v219_v8  ;;  %v275_v5 = vld [vmem:[%s3483_s1 + $0x7e8] sm:$0xff] }
  0x45   :  { %1673 = vmatmul.mubr.bf16.vlgmr.msra.gmra.mrb[0].mxu0 %v2792_v10  ;;  %1779 = vmatmul.mubr.bf16.vlgmr.msra.gmra.mrb[0].mxu1 %v2792_v10 }
  0x46   :  { %1694 = vmatpush1.bf16.msra.mxu0 %v2316_v13  ;;  %1800 = vmatpush1.bf16.msra.mxu1 %v2318_v14  ;;  %v2383_v13 = vcombine.high %v215_v7, %v219_v8  ;;  %v222_v14 = vld [vmem:[%s3483_s1 + $0x640] sm:$0xff] }
  0x47   :  { %1695 = vmatprep.subr.bf16.mxu0 %v2325_v15  ;;  %1801 = vmatprep.subr.bf16.mxu1 %v2327_v16  ;;  %v226_v15 = vld [vmem:[%s3483_s1 + $0x660] sm:$0xff]  ;;  %v223_v16 = vld [vmem:[%s3483_s1 + $0x648] sm:$0xff] }
  0x48   :  { %1682 = vmatprep.mubr.bf16.mxu0 %v2809_v19  ;;  %1788 = vmatprep.mubr.bf16.mxu1 %v2809_v19  ;;  %v2389_v21 = vcombine.high %v222_v14, %v226_v15  ;;  %v2388_v27 = vcombine.low %v222_v14, %v226_v15  ;;  %v2390_v28 = vcombine.low %v223_v16, %v227_v17  ;;  %v29_v14 = vld [vmem:[%s3483_s1 + $0x38] sm:$0xff] }
  0x4a   :  { %1696 = vmatpush1.bf16.msra.mxu0 %v2324_v22  ;;  %1802 = vmatpush1.bf16.msra.mxu1 %v2326_v23  ;;  %v2391_v22 = vcombine.high %v223_v16, %v227_v17  ;;  %v230_v23 = vld [vmem:[%s3483_s1 + $0x680] sm:$0xff] }
  0x4b   :  { %1697 = vmatprep.subr.bf16.mxu0 %v2333_v24  ;;  %1803 = vmatprep.subr.bf16.mxu1 %v2335_v25  ;;  %v234_v24 = vld [vmem:[%s3483_s1 + $0x6a0] sm:$0xff]  ;;  %v231_v25 = vld [vmem:[%s3483_s1 + $0x688] sm:$0xff] }
  0x4c   :  { %v2397_v29 = vcombine.high %v230_v23, %v234_v24  ;;  %v2396_v36 = vcombine.low %v230_v23, %v234_v24  ;;  %v2398_v38 = vcombine.low %v231_v25, %v235_v26  ;;  %v33_v23 = vld [vmem:[%s3483_s1 + $0x58] sm:$0xff] }
  0x4d   :  { %1683 = vmatmul.mubr.bf16.gmra.mrb[4].mxu0 %v2836_v30  ;;  %1789 = vmatmul.mubr.bf16.gmra.mrb[4].mxu1 %v2836_v30  ;;  %v37_v24 = vld [vmem:[%s3483_s1 + $0x78] sm:$0xff] }
  0x4e   :  { %1698 = vmatpush1.bf16.msra.mxu0 %v2332_v31  ;;  %1804 = vmatpush1.bf16.msra.mxu1 %v2334_v32  ;;  %v2399_v31 = vcombine.high %v231_v25, %v235_v26  ;;  %v238_v32 = vld [vmem:[%s3483_s1 + $0x6c0] sm:$0xff] }
  0x4f   :  { %1699 = vmatprep.subr.bf16.mxu0 %v2341_v33  ;;  %1805 = vmatprep.subr.bf16.mxu1 %v2343_v34  ;;  %v242_v33 = vld [vmem:[%s3483_s1 + $0x6e0] sm:$0xff]  ;;  %v239_v34 = vld [vmem:[%s3483_s1 + $0x6c8] sm:$0xff] }
  0x50   :  { %1725 = vmatprep.mubr.bf16.mxu0 %v2847_v37  ;;  %1831 = vmatprep.mubr.bf16.mxu1 %v2847_v37  ;;  %v2405_v39 = vcombine.high %v238_v32, %v242_v33  ;;  %v2404_v45 = vcombine.low %v238_v32, %v242_v33  ;;  %v2406_v46 = vcombine.low %v239_v34, %v243_v35  ;;  %v44_v32 = vld [vmem:[%s3483_s1 + $0xb0] sm:$0xff]  ;;  %v41_v33 = vld [vmem:[%s3483_s1 + $0x98] sm:$0xff] }
  0x52   :  { %1700 = vmatpush1.bf16.msra.mxu0 %v2340_v40  ;;  %1806 = vmatpush1.bf16.msra.mxu1 %v2342_v41  ;;  %v2407_v40 = vcombine.high %v239_v34, %v243_v35  ;;  %v246_v41 = vld [vmem:[%s3483_s1 + $0x700] sm:$0xff]  ;;  %v45_v34 = vld [vmem:[%s3483_s1 + $0xb8] sm:$0xff] }
  0x53   :  { %1701 = vmatprep.subr.bf16.mxu0 %v2349_v42  ;;  %1807 = vmatprep.subr.bf16.mxu1 %v2351_v43  ;;  %v250_v42 = vld [vmem:[%s3483_s1 + $0x720] sm:$0xff]  ;;  %v247_v43 = vld [vmem:[%s3483_s1 + $0x708] sm:$0xff] }
  0x54   :  { %v2413_v47 = vcombine.high %v246_v41, %v250_v42  ;;  %v2412_v53 = vcombine.low %v246_v41, %v250_v42  ;;  %v2414_v54 = vcombine.low %v247_v43, %v251_v44  ;;  %v52_v41 = vld [vmem:[%s3483_s1 + $0xf0] sm:$0xff]  ;;  %v3050_v42 = vld [vmem:[%s3484_s0 + $0x28] ss:$16 sps:$4 sm:$0xff]  }
  0x56   :  { %1702 = vmatpush1.bf16.msra.mxu0 %v2348_v48  ;;  %1808 = vmatpush1.bf16.msra.mxu1 %v2350_v49  ;;  %v2415_v48 = vcombine.high %v247_v43, %v251_v44  ;;  %v254_v49 = vld [vmem:[%s3483_s1 + $0x740] sm:$0xff]  ;;  %v49_v43 = vld [vmem:[%s3483_s1 + $0xd8] sm:$0xff] }
  0x57   :  { %1703 = vmatprep.subr.bf16.mxu0 %v2357_v50  ;;  %1809 = vmatprep.subr.bf16.mxu1 %v2359_v51  ;;  %v258_v50 = vld [vmem:[%s3483_s1 + $0x760] sm:$0xff]  ;;  %v255_v51 = vld [vmem:[%s3483_s1 + $0x748] sm:$0xff]  ;;  %v53_v44 = vld [vmem:[%s3483_s1 + $0xf8] sm:$0xff] }
  0x58   :  { %v2421_v55 = vcombine.high %v254_v49, %v258_v50  ;;  %v2420_v62 = vcombine.low %v254_v49, %v258_v50  ;;  %v2422_v63 = vcombine.low %v255_v51, %v259_v52  ;;  %v56_v49 = vld [vmem:[%s3483_s1 + $0x110] sm:$0xff] }
  0x59   :  { %v60_v50 = vld [vmem:[%s3483_s1 + $0x130] sm:$0xff] }
  0x5a   :  { %1704 = vmatpush1.bf16.msra.mxu0 %v2356_v57  ;;  %1810 = vmatpush1.bf16.msra.mxu1 %v2358_v58  ;;  %v2423_v57 = vcombine.high %v255_v51, %v259_v52  ;;  %v262_v58 = vld [vmem:[%s3483_s1 + $0x780] sm:$0xff]  ;;  %v57_v51 = vld [vmem:[%s3483_s1 + $0x118] sm:$0xff] }
  0x5b   :  { %1705 = vmatprep.subr.bf16.mxu0 %v2365_v59  ;;  %1811 = vmatprep.subr.bf16.mxu1 %v2367_v60  ;;  %v266_v59 = vld [vmem:[%s3483_s1 + $0x7a0] sm:$0xff]  ;;  %v263_v60 = vld [vmem:[%s3483_s1 + $0x788] sm:$0xff]  ;;  %v61_v52 = vld [vmem:[%s3483_s1 + $0x138] sm:$0xff] }
  0x5c   :  { %v2429_v0 = vcombine.high %v262_v58, %v266_v59  ;;  %v2428_v6 = vcombine.low %v262_v58, %v266_v59  ;;  %v2430_v7 = vcombine.low %v263_v60, %v267_v61  ;;  %v64_v58 = vld [vmem:[%s3483_s1 + $0x150] sm:$0xff] }
  0x5d   :  { %v68_v59 = vld [vmem:[%s3483_s1 + $0x170] sm:$0xff] }
  0x5e   :  { %1706 = vmatpush1.bf16.msra.mxu0 %v2364_v1  ;;  %1812 = vmatpush1.bf16.msra.mxu1 %v2366_v2  ;;  %v2431_v1 = vcombine.high %v263_v60, %v267_v61  ;;  %v270_v2 = vld [vmem:[%s3483_s1 + $0x7c0] sm:$0xff]  ;;  %v65_v60 = vld [vmem:[%s3483_s1 + $0x158] sm:$0xff] }
  0x5f   :  { %1707 = vmatprep.subr.bf16.mxu0 %v2373_v3  ;;  %1813 = vmatprep.subr.bf16.mxu1 %v2375_v4  ;;  %v274_v3 = vld [vmem:[%s3483_s1 + $0x7e0] sm:$0xff]  ;;  %v271_v4 = vld [vmem:[%s3483_s1 + $0x7c8] sm:$0xff]  ;;  %v69_v61 = vld [vmem:[%s3483_s1 + $0x178] sm:$0xff] }
  0x60   :  { %v2437_v8 = vcombine.high %v270_v2, %v274_v3  ;;  %v2436_v15 = vcombine.low %v270_v2, %v274_v3  ;;  %v2438_v16 = vcombine.low %v271_v4, %v275_v5  ;;  %v72_v2 = vld [vmem:[%s3483_s1 + $0x190] sm:$0xff] }
  0x61   :  { %v76_v3 = vld [vmem:[%s3483_s1 + $0x1b0] sm:$0xff] }
  0x62   :  { %1708 = vmatpush1.bf16.msra.mxu0 %v2372_v9  ;;  %1814 = vmatpush1.bf16.msra.mxu1 %v2374_v11  ;;  %v2439_v9 = vcombine.high %v271_v4, %v275_v5  ;;  %v24_v11 = vld [vmem:[%s3483_s1 + $0x10] sm:$0xff]  ;;  %v77_v4 = vld [vmem:[%s3483_s1 + $0x1b8] sm:$0xff]  ;;  %v2232_v5 = vcombine.low %v64_v58, %v68_v59 }
  0x63   :  { %1709 = vmatprep.subr.bf16.mxu0 %v2381_v12  ;;  %1815 = vmatprep.subr.bf16.mxu1 %v2383_v13  ;;  %v28_v12 = vld [vmem:[%s3483_s1 + $0x30] sm:$0xff]  ;;  %v25_v13 = vld [vmem:[%s3483_s1 + $0x18] sm:$0xff] }
  0x64   :  { %v2193_v17 = vcombine.high %v24_v11, %v28_v12  ;;  %v2192_v25 = vcombine.low %v24_v11, %v28_v12  ;;  %v2194_v26 = vcombine.low %v25_v13, %v29_v14  ;;  %v84_v11 = vld [vmem:[%s3483_s1 + $0x1f0] sm:$0xff]  ;;  %v81_v12 = vld [vmem:[%s3483_s1 + $0x1d8] sm:$0xff] }
  0x66   :  { %1710 = vmatpush1.bf16.msra.mxu0 %v2380_v18  ;;  %1816 = vmatpush1.bf16.msra.mxu1 %v2382_v20  ;;  %v2195_v18 = vcombine.high %v25_v13, %v29_v14  ;;  %v32_v20 = vld [vmem:[%s3483_s1 + $0x50] sm:$0xff]  ;;  %v85_v13 = vld [vmem:[%s3483_s1 + $0x1f8] sm:$0xff]  ;;  %v2240_v14 = vcombine.low %v72_v2, %v76_v3 }
  0x67   :  { %1711 = vmatprep.subr.bf16.mxu0 %v2389_v21  ;;  %1817 = vmatprep.subr.bf16.mxu1 %v2391_v22  ;;  %v36_v21 = vld [vmem:[%s3483_s1 + $0x70] sm:$0xff]  ;;  %v3012_v22 = vld [vmem:[%s3484_s0 + $0x8] ss:$16 sps:$4 sm:$0xff]  }
  0x68   :  { %v2200_v35 = vcombine.low %v32_v20, %v36_v21 }
  0x6a   :  { %1712 = vmatpush1.bf16.msra.mxu0 %v2388_v27  ;;  %1818 = vmatpush1.bf16.msra.mxu1 %v2390_v28  ;;  %v2201_v27 = vcombine.high %v32_v20, %v36_v21  ;;  %v2203_v28 = vcombine.high %v33_v23, %v37_v24  ;;  %v92_v20 = vld [vmem:[%s3483_s1 + $0x230] sm:$0xff]  ;;  %v89_v21 = vld [vmem:[%s3483_s1 + $0x218] sm:$0xff] }
  0x6b   :  { %1713 = vmatprep.subr.bf16.mxu0 %v2397_v29  ;;  %1819 = vmatprep.subr.bf16.mxu1 %v2399_v31  ;;  %v3023_v29 = vld [vmem:[%s3484_s0 + $0x2c] ss:$16 sps:$4 sm:$0xff]   ;;  %v40_v31 = vld [vmem:[%s3483_s1 + $0x90] sm:$0xff] }
  0x6e   :  { %1714 = vmatpush1.bf16.msra.mxu0 %v2396_v36  ;;  %1820 = vmatpush1.bf16.msra.mxu1 %v2398_v38  ;;  %v2202_v36 = vcombine.low %v33_v23, %v37_v24  ;;  %v2209_v38 = vcombine.high %v40_v31, %v44_v32  ;;  %v93_v23 = vld [vmem:[%s3483_s1 + $0x238] sm:$0xff] }
  0x6f   :  { %1715 = vmatprep.subr.bf16.mxu0 %v2405_v39  ;;  %1821 = vmatprep.subr.bf16.mxu1 %v2407_v40  ;;  %v2211_v39 = vcombine.high %v41_v33, %v45_v34  ;;  %v48_v40 = vld [vmem:[%s3483_s1 + $0xd0] sm:$0xff] }
  0x72   :  { %1716 = vmatpush1.bf16.msra.mxu0 %v2404_v45  ;;  %1822 = vmatpush1.bf16.msra.mxu1 %v2406_v46  ;;  %v2208_v45 = vcombine.low %v40_v31, %v44_v32  ;;  %v2210_v46 = vcombine.low %v41_v33, %v45_v34  ;;  %v100_v31 = vld [vmem:[%s3483_s1 + $0x270] sm:$0xff]  ;;  %v97_v32 = vld [vmem:[%s3483_s1 + $0x258] sm:$0xff] }
  0x73   :  { %1717 = vmatprep.subr.bf16.mxu0 %v2413_v47  ;;  %1823 = vmatprep.subr.bf16.mxu1 %v2415_v48  ;;  %v2217_v47 = vcombine.high %v48_v40, %v52_v41  ;;  %v2219_v48 = vcombine.high %v49_v43, %v53_v44  ;;  %v101_v33 = vld [vmem:[%s3483_s1 + $0x278] sm:$0xff] }
  0x76   :  { %1718 = vmatpush1.bf16.msra.mxu0 %v2412_v53  ;;  %1824 = vmatpush1.bf16.msra.mxu1 %v2414_v54  ;;  %v2216_v53 = vcombine.low %v48_v40, %v52_v41  ;;  %v2218_v54 = vcombine.low %v49_v43, %v53_v44  ;;  %v108_v40 = vld [vmem:[%s3483_s1 + $0x2b0] sm:$0xff]  ;;  %v105_v41 = vld [vmem:[%s3483_s1 + $0x298] sm:$0xff] }
  0x77   :  { %1719 = vmatprep.subr.bf16.mxu0 %v2421_v55  ;;  %1825 = vmatprep.subr.bf16.mxu1 %v2423_v57  ;;  %v2225_v55 = vcombine.high %v56_v49, %v60_v50  ;;  %v2227_v57 = vcombine.high %v57_v51, %v61_v52  ;;  %v109_v43 = vld [vmem:[%s3483_s1 + $0x2b8] sm:$0xff] }
  0x7a   :  { %1720 = vmatpush1.bf16.msra.mxu0 %v2420_v62  ;;  %1826 = vmatpush1.bf16.msra.mxu1 %v2422_v63  ;;  %v2224_v62 = vcombine.low %v56_v49, %v60_v50  ;;  %v2226_v63 = vcombine.low %v57_v51, %v61_v52  ;;  %v116_v49 = vld [vmem:[%s3483_s1 + $0x2f0] sm:$0xff]  ;;  %v113_v50 = vld [vmem:[%s3483_s1 + $0x2d8] sm:$0xff] }
  0x7b   :  { %1721 = vmatprep.subr.bf16.mxu0 %v2429_v0  ;;  %1827 = vmatprep.subr.bf16.mxu1 %v2431_v1  ;;  %v2233_v0 = vcombine.high %v64_v58, %v68_v59  ;;  %v2235_v1 = vcombine.high %v65_v60, %v69_v61  ;;  %v117_v51 = vld [vmem:[%s3483_s1 + $0x2f8] sm:$0xff]  ;;  %v124_v58 = vld [vmem:[%s3483_s1 + $0x330] sm:$0xff] }
  0x7c   :  { %v121_v59 = vld [vmem:[%s3483_s1 + $0x318] sm:$0xff] }
  0x7e   :  { %1722 = vmatpush1.bf16.msra.mxu0 %v2428_v6  ;;  %1828 = vmatpush1.bf16.msra.mxu1 %v2430_v7  ;;  %v2234_v6 = vcombine.low %v65_v60, %v69_v61  ;;  %v2241_v7 = vcombine.high %v72_v2, %v76_v3  ;;  %v125_v60 = vld [vmem:[%s3483_s1 + $0x338] sm:$0xff]  ;;  %v132_v2 = vld [vmem:[%s3483_s1 + $0x370] sm:$0xff] }
  0x7f   :  { %1723 = vmatprep.subr.bf16.mxu0 %v2437_v8  ;;  %1829 = vmatprep.subr.bf16.mxu1 %v2439_v9  ;;  %v80_v9 = vld [vmem:[%s3483_s1 + $0x1d0] sm:$0xff]  ;;  %v129_v3 = vld [vmem:[%s3483_s1 + $0x358] sm:$0xff] }
  0x80   :  { %v2248_v24 = vcombine.low %v80_v9, %v84_v11 }
  0x82   :  { %1724 = vmatpush1.bf16.msra.mxu0 %v2436_v15  ;;  %1830 = vmatpush1.bf16.msra.mxu1 %v2438_v16  ;;  %v2249_v16 = vcombine.high %v80_v9, %v84_v11  ;;  %v140_v9 = vld [vmem:[%s3483_s1 + $0x3b0] sm:$0xff]  ;;  %v137_v11 = vld [vmem:[%s3483_s1 + $0x398] sm:$0xff] }
  0x83   :  { %1852 = vmatprep.subr.bf16.mxu0 %v2193_v17  ;;  %1958 = vmatprep.subr.bf16.mxu1 %v2195_v18  ;;  %v2251_v17 = vcombine.high %v81_v12, %v85_v13  ;;  %v88_v18 = vld [vmem:[%s3483_s1 + $0x210] sm:$0xff] }
  0x84   :  { %v2256_v34 = vcombine.low %v88_v18, %v92_v20 }
  0x85   :  { %1726 = vmatmul.mubr.bf16.vlgmr.msra.gmra.mrb[0].mxu0 %v3012_v22  ;;  %1832 = vmatmul.mubr.bf16.vlgmr.msra.gmra.mrb[0].mxu1 %v3012_v22 }
  0x86   :  { %1853 = vmatpush1.bf16.msra.mxu0 %v2192_v25  ;;  %1959 = vmatpush1.bf16.msra.mxu1 %v2194_v26  ;;  %v2250_v25 = vcombine.low %v81_v12, %v85_v13  ;;  %v2257_v26 = vcombine.high %v88_v18, %v92_v20  ;;  %v141_v12 = vld [vmem:[%s3483_s1 + $0x3b8] sm:$0xff]  ;;  %v148_v18 = vld [vmem:[%s3483_s1 + $0x3f0] sm:$0xff] }
  0x87   :  { %1854 = vmatprep.subr.bf16.mxu0 %v2201_v27  ;;  %1960 = vmatprep.subr.bf16.mxu1 %v2203_v28  ;;  %v2259_v27 = vcombine.high %v89_v21, %v93_v23  ;;  %v96_v28 = vld [vmem:[%s3483_s1 + $0x250] sm:$0xff]  ;;  %v145_v20 = vld [vmem:[%s3483_s1 + $0x3d8] sm:$0xff] }
  0x88   :  { %1735 = vmatprep.mubr.bf16.mxu0 %v3023_v29  ;;  %1841 = vmatprep.mubr.bf16.mxu1 %v3023_v29  ;;  %v2264_v44 = vcombine.low %v96_v28, %v100_v31 }
  0x8a   :  { %1855 = vmatpush1.bf16.msra.mxu0 %v2200_v35  ;;  %1961 = vmatpush1.bf16.msra.mxu1 %v2202_v36  ;;  %v2258_v35 = vcombine.low %v89_v21, %v93_v23  ;;  %v2265_v36 = vcombine.high %v96_v28, %v100_v31  ;;  %v149_v21 = vld [vmem:[%s3483_s1 + $0x3f8] sm:$0xff]  ;;  %v156_v28 = vld [vmem:[%s3483_s1 + $0x430] sm:$0xff] }
  0x8b   :  { %1856 = vmatprep.subr.bf16.mxu0 %v2209_v38  ;;  %1962 = vmatprep.subr.bf16.mxu1 %v2211_v39  ;;  %v2267_v38 = vcombine.high %v97_v32, %v101_v33  ;;  %v104_v39 = vld [vmem:[%s3483_s1 + $0x290] sm:$0xff]  ;;  %v153_v31 = vld [vmem:[%s3483_s1 + $0x418] sm:$0xff] }
  0x8c   :  { %v2272_v52 = vcombine.low %v104_v39, %v108_v40 }
  0x8d   :  { %1736 = vmatmul.mubr.bf16.gmra.mrb[4].mxu0 %v3050_v42  ;;  %1842 = vmatmul.mubr.bf16.gmra.mrb[4].mxu1 %v3050_v42 }
  0x8e   :  { %1857 = vmatpush1.bf16.msra.mxu0 %v2208_v45  ;;  %1963 = vmatpush1.bf16.msra.mxu1 %v2210_v46  ;;  %v2266_v45 = vcombine.low %v97_v32, %v101_v33  ;;  %v2273_v46 = vcombine.high %v104_v39, %v108_v40  ;;  %v157_v32 = vld [vmem:[%s3483_s1 + $0x438] sm:$0xff]  ;;  %v164_v39 = vld [vmem:[%s3483_s1 + $0x470] sm:$0xff] }
  0x8f   :  { %1858 = vmatprep.subr.bf16.mxu0 %v2217_v47  ;;  %1964 = vmatprep.subr.bf16.mxu1 %v2219_v48  ;;  %v2275_v47 = vcombine.high %v105_v41, %v109_v43  ;;  %v112_v48 = vld [vmem:[%s3483_s1 + $0x2d0] sm:$0xff]  ;;  %v161_v40 = vld [vmem:[%s3483_s1 + $0x458] sm:$0xff] }
  0x90   :  { %1884 = vmatprep.mubr.bf16.mxu0 %v2665_v56  ;;  %1990 = vmatprep.mubr.bf16.mxu1 %v2665_v56  ;;  %v73_v56 = vld [vmem:[%s3483_s1 + $0x198] sm:$0xff]  ;;  %v2280_v61 = vcombine.low %v112_v48, %v116_v49 }
  0x91   :  { %v2243_v8 = vcombine.high %v73_v56, %v77_v4  ;;  %v2242_v15 = vcombine.low %v73_v56, %v77_v4  ;;  %v133_v56 = vld [vmem:[%s3483_s1 + $0x378] sm:$0xff] }
  0x92   :  { %1859 = vmatpush1.bf16.msra.mxu0 %v2216_v53  ;;  %1965 = vmatpush1.bf16.msra.mxu1 %v2218_v54  ;;  %v2274_v53 = vcombine.low %v105_v41, %v109_v43  ;;  %v2281_v54 = vcombine.high %v112_v48, %v116_v49  ;;  %v165_v41 = vld [vmem:[%s3483_s1 + $0x478] sm:$0xff]  ;;  %v172_v48 = vld [vmem:[%s3483_s1 + $0x4b0] sm:$0xff] }
  0x93   :  { %1860 = vmatprep.subr.bf16.mxu0 %v2225_v55  ;;  %1966 = vmatprep.subr.bf16.mxu1 %v2227_v57  ;;  %v2283_v55 = vcombine.high %v113_v50, %v117_v51  ;;  %v120_v57 = vld [vmem:[%s3483_s1 + $0x310] sm:$0xff]  ;;  %v169_v49 = vld [vmem:[%s3483_s1 + $0x498] sm:$0xff] }
  0x94   :  { %v2288_v4 = vcombine.low %v120_v57, %v124_v58 }
  0x96   :  { %1861 = vmatpush1.bf16.msra.mxu0 %v2224_v62  ;;  %1967 = vmatpush1.bf16.msra.mxu1 %v2226_v63  ;;  %v2282_v62 = vcombine.low %v113_v50, %v117_v51  ;;  %v2289_v63 = vcombine.high %v120_v57, %v124_v58  ;;  %v173_v50 = vld [vmem:[%s3483_s1 + $0x4b8] sm:$0xff]  ;;  %v180_v57 = vld [vmem:[%s3483_s1 + $0x4f0] sm:$0xff] }
  0x97   :  { %1862 = vmatprep.subr.bf16.mxu0 %v2233_v0  ;;  %1968 = vmatprep.subr.bf16.mxu1 %v2235_v1  ;;  %v2291_v0 = vcombine.high %v121_v59, %v125_v60  ;;  %v128_v1 = vld [vmem:[%s3483_s1 + $0x350] sm:$0xff]  ;;  %v181_v58 = vld [vmem:[%s3483_s1 + $0x4f8] sm:$0xff] }
  0x98   :  { %v2296_v13 = vcombine.low %v128_v1, %v132_v2 }
  0x9a   :  { %1863 = vmatpush1.bf16.msra.mxu0 %v2232_v5  ;;  %1969 = vmatpush1.bf16.msra.mxu1 %v2234_v6  ;;  %v2290_v5 = vcombine.low %v121_v59, %v125_v60  ;;  %v2297_v6 = vcombine.high %v128_v1, %v132_v2  ;;  %v2338_v60 = vcombine.low %v169_v49, %v173_v50  ;;  %v189_v1 = vld [vmem:[%s3483_s1 + $0x538] sm:$0xff] }
  0x9b   :  { %1864 = vmatprep.subr.bf16.mxu0 %v2241_v7  ;;  %1970 = vmatprep.subr.bf16.mxu1 %v2243_v8  ;;  %v2299_v7 = vcombine.high %v129_v3, %v133_v56  ;;  %v136_v8 = vld [vmem:[%s3483_s1 + $0x390] sm:$0xff] }
  0x9c   :  { %v2304_v23 = vcombine.low %v136_v8, %v140_v9 }
  0x9e   :  { %1865 = vmatpush1.bf16.msra.mxu0 %v2240_v14  ;;  %1971 = vmatpush1.bf16.msra.mxu1 %v2242_v15  ;;  %v2298_v14 = vcombine.low %v129_v3, %v133_v56  ;;  %v2305_v15 = vcombine.high %v136_v8, %v140_v9 }
  0x9f   :  { %1866 = vmatprep.subr.bf16.mxu0 %v2249_v16  ;;  %1972 = vmatprep.subr.bf16.mxu1 %v2251_v17  ;;  %v2307_v16 = vcombine.high %v137_v11, %v141_v12  ;;  %v144_v17 = vld [vmem:[%s3483_s1 + $0x3d0] sm:$0xff] }
  0xa0   :  { %v2312_v33 = vcombine.low %v144_v17, %v148_v18 }
  0xa2   :  { %1867 = vmatpush1.bf16.msra.mxu0 %v2248_v24  ;;  %1973 = vmatpush1.bf16.msra.mxu1 %v2250_v25  ;;  %v2306_v24 = vcombine.low %v137_v11, %v141_v12  ;;  %v2313_v25 = vcombine.high %v144_v17, %v148_v18 }
  0xa3   :  { %1868 = vmatprep.subr.bf16.mxu0 %v2257_v26  ;;  %1974 = vmatprep.subr.bf16.mxu1 %v2259_v27  ;;  %v2315_v26 = vcombine.high %v145_v20, %v149_v21  ;;  %v152_v27 = vld [vmem:[%s3483_s1 + $0x410] sm:$0xff] }
  0xa4   :  { %v2320_v43 = vcombine.low %v152_v27, %v156_v28 }
  0xa6   :  { %1869 = vmatpush1.bf16.msra.mxu0 %v2256_v34  ;;  %1975 = vmatpush1.bf16.msra.mxu1 %v2258_v35  ;;  %v2314_v34 = vcombine.low %v145_v20, %v149_v21  ;;  %v2321_v35 = vcombine.high %v152_v27, %v156_v28  ;;  %v208_v21 = vld [vmem:[%s3483_s1 + $0x5d0] sm:$0xff] }
  0xa7   :  { %1870 = vmatprep.subr.bf16.mxu0 %v2265_v36  ;;  %1976 = vmatprep.subr.bf16.mxu1 %v2267_v38  ;;  %v2323_v36 = vcombine.high %v153_v31, %v157_v32  ;;  %v160_v38 = vld [vmem:[%s3483_s1 + $0x450] sm:$0xff] }
  0xa8   :  { %v2328_v51 = vcombine.low %v160_v38, %v164_v39 }
  0xaa   :  { %1871 = vmatpush1.bf16.msra.mxu0 %v2264_v44  ;;  %1977 = vmatpush1.bf16.msra.mxu1 %v2266_v45  ;;  %v2322_v44 = vcombine.low %v153_v31, %v157_v32  ;;  %v2329_v45 = vcombine.high %v160_v38, %v164_v39  ;;  %v216_v32 = vld [vmem:[%s3483_s1 + $0x610] sm:$0xff] }
  0xab   :  { %1872 = vmatprep.subr.bf16.mxu0 %v2273_v46  ;;  %1978 = vmatprep.subr.bf16.mxu1 %v2275_v47  ;;  %v2331_v46 = vcombine.high %v161_v40, %v165_v41  ;;  %v168_v47 = vld [vmem:[%s3483_s1 + $0x490] sm:$0xff] }
  0xac   :  { %v2336_v59 = vcombine.low %v168_v47, %v172_v48 }
  0xae   :  { %1873 = vmatpush1.bf16.msra.mxu0 %v2272_v52  ;;  %1979 = vmatpush1.bf16.msra.mxu1 %v2274_v53  ;;  %v2330_v52 = vcombine.low %v161_v40, %v165_v41  ;;  %v2337_v53 = vcombine.high %v168_v47, %v172_v48  ;;  %v224_v41 = vld [vmem:[%s3483_s1 + $0x650] sm:$0xff] }
  0xaf   :  { %1874 = vmatprep.subr.bf16.mxu0 %v2281_v54  ;;  %1980 = vmatprep.subr.bf16.mxu1 %v2283_v55  ;;  %v2339_v54 = vcombine.high %v169_v49, %v173_v50  ;;  %v176_v55 = vld [vmem:[%s3483_s1 + $0x4d0] sm:$0xff] }
  0xb0   :  { %v2344_v2 = vcombine.low %v176_v55, %v180_v57  ;;  %v232_v50 = vld [vmem:[%s3483_s1 + $0x690] sm:$0xff] }
  0xb2   :  { %1875 = vmatpush1.bf16.msra.mxu0 %v2280_v61  ;;  %1981 = vmatpush1.bf16.msra.mxu1 %v2282_v62  ;;  %v2345_v61 = vcombine.high %v176_v55, %v180_v57 }
  0xb3   :  { %1876 = vmatprep.subr.bf16.mxu0 %v2289_v63  ;;  %1982 = vmatprep.subr.bf16.mxu1 %v2291_v0  ;;  %v184_v63 = vld [vmem:[%s3483_s1 + $0x510] sm:$0xff] }
  0xb4   :  { %v188_v0 = vld [vmem:[%s3483_s1 + $0x530] sm:$0xff] }
  0xb5   :  { %v2353_v56 = vcombine.high %v184_v63, %v188_v0  ;;  %v2352_v8 = vcombine.low %v184_v63, %v188_v0 }
  0xb6   :  { %1877 = vmatpush1.bf16.msra.mxu0 %v2288_v4  ;;  %1983 = vmatpush1.bf16.msra.mxu1 %v2290_v5  ;;  %v192_v5 = vld [vmem:[%s3483_s1 + $0x550] sm:$0xff] }
  0xb7   :  { %1878 = vmatprep.subr.bf16.mxu0 %v2297_v6  ;;  %1984 = vmatprep.subr.bf16.mxu1 %v2299_v7  ;;  %v196_v6 = vld [vmem:[%s3483_s1 + $0x570] sm:$0xff]  ;;  %v197_v7 = vld [vmem:[%s3483_s1 + $0x578] sm:$0xff] }
  0xb8   :  { %v2361_v11 = vcombine.high %v192_v5, %v196_v6 }
  0xba   :  { %1879 = vmatpush1.bf16.msra.mxu0 %v2296_v13  ;;  %1985 = vmatpush1.bf16.msra.mxu1 %v2298_v14  ;;  %v200_v13 = vld [vmem:[%s3483_s1 + $0x590] sm:$0xff] }
  0xbb   :  { %1880 = vmatprep.subr.bf16.mxu0 %v2305_v15  ;;  %1986 = vmatprep.subr.bf16.mxu1 %v2307_v16  ;;  %v204_v14 = vld [vmem:[%s3483_s1 + $0x5b0] sm:$0xff]  ;;  %v205_v15 = vld [vmem:[%s3483_s1 + $0x5b8] sm:$0xff]  ;;  %v2360_v16 = vcombine.low %v192_v5, %v196_v6 }
  0xbc   :  { %v2369_v18 = vcombine.high %v200_v13, %v204_v14 }
  0xbe   :  { %1881 = vmatpush1.bf16.msra.mxu0 %v2304_v23  ;;  %1987 = vmatpush1.bf16.msra.mxu1 %v2306_v24  ;;  %v212_v23 = vld [vmem:[%s3483_s1 + $0x5f0] sm:$0xff]  ;;  %v209_v24 = vld [vmem:[%s3483_s1 + $0x5d8] sm:$0xff] }
  0xbf   :  { %1882 = vmatprep.subr.bf16.mxu0 %v2313_v25  ;;  %1988 = vmatprep.subr.bf16.mxu1 %v2315_v26  ;;  %v213_v25 = vld [vmem:[%s3483_s1 + $0x5f8] sm:$0xff]  ;;  %v2368_v26 = vcombine.low %v200_v13, %v204_v14  ;;  %v2377_v28 = vcombine.high %v208_v21, %v212_v23 }
  0xc0   :  { %v2379_v31 = vcombine.high %v209_v24, %v213_v25  ;;  %v2378_v38 = vcombine.low %v209_v24, %v213_v25  ;;  %v272_v25 = vld [vmem:[%s3483_s1 + $0x7d0] sm:$0xff] }
  0xc2   :  { %1883 = vmatpush1.bf16.msra.mxu0 %v2312_v33  ;;  %1989 = vmatpush1.bf16.msra.mxu1 %v2314_v34  ;;  %v220_v33 = vld [vmem:[%s3483_s1 + $0x630] sm:$0xff]  ;;  %v217_v34 = vld [vmem:[%s3483_s1 + $0x618] sm:$0xff] }
  0xc3   :  { %1905 = vmatprep.subr.bf16.mxu0 %v2321_v35  ;;  %2011 = vmatprep.subr.bf16.mxu1 %v2323_v36  ;;  %v221_v35 = vld [vmem:[%s3483_s1 + $0x638] sm:$0xff]  ;;  %v2376_v36 = vcombine.low %v208_v21, %v212_v23  ;;  %v2385_v39 = vcombine.high %v216_v32, %v220_v33 }
  0xc4   :  { %v2387_v40 = vcombine.high %v217_v34, %v221_v35  ;;  %v2386_v47 = vcombine.low %v217_v34, %v221_v35 }
  0xc5   :  { %1885 = vmatmul.mubr.bf16.vlgmr.msra.gmra.mrb[8].mxu0 %v2792_v10  ;;  %1991 = vmatmul.mubr.bf16.vlgmr.msra.gmra.mrb[8].mxu1 %v2792_v10  ;;  %v177_v10 = vld [vmem:[%s3483_s1 + $0x4d8] sm:$0xff] }
  0xc6   :  { %1906 = vmatpush1.bf16.msra.mxu0 %v2320_v43  ;;  %2012 = vmatpush1.bf16.msra.mxu1 %v2322_v44  ;;  %v2347_v62 = vcombine.high %v177_v10, %v181_v58  ;;  %v2346_v3 = vcombine.low %v177_v10, %v181_v58  ;;  %v228_v43 = vld [vmem:[%s3483_s1 + $0x670] sm:$0xff]  ;;  %v225_v44 = vld [vmem:[%s3483_s1 + $0x658] sm:$0xff] }
  0xc7   :  { %1907 = vmatprep.subr.bf16.mxu0 %v2329_v45  ;;  %2013 = vmatprep.subr.bf16.mxu1 %v2331_v46  ;;  %v229_v45 = vld [vmem:[%s3483_s1 + $0x678] sm:$0xff]  ;;  %v2384_v46 = vcombine.low %v216_v32, %v220_v33  ;;  %v2393_v48 = vcombine.high %v224_v41, %v228_v43  ;;  %v240_v58 = vld [vmem:[%s3483_s1 + $0x6d0] sm:$0xff] }
  0xc8   :  { %1894 = vmatprep.mubr.bf16.mxu0 %v2809_v19  ;;  %2000 = vmatprep.mubr.bf16.mxu1 %v2809_v19  ;;  %v185_v19 = vld [vmem:[%s3483_s1 + $0x518] sm:$0xff]  ;;  %v2395_v49 = vcombine.high %v225_v44, %v229_v45  ;;  %v2394_v55 = vcombine.low %v225_v44, %v229_v45 }
  0xc9   :  { %v2355_v4 = vcombine.high %v185_v19, %v189_v1  ;;  %v2354_v9 = vcombine.low %v185_v19, %v189_v1  ;;  %v248_v1 = vld [vmem:[%s3483_s1 + $0x710] sm:$0xff] }
  0xca   :  { %1908 = vmatpush1.bf16.msra.mxu0 %v2328_v51  ;;  %2014 = vmatpush1.bf16.msra.mxu1 %v2330_v52  ;;  %v236_v51 = vld [vmem:[%s3483_s1 + $0x6b0] sm:$0xff]  ;;  %v233_v52 = vld [vmem:[%s3483_s1 + $0x698] sm:$0xff] }
  0xcb   :  { %1909 = vmatprep.subr.bf16.mxu0 %v2337_v53  ;;  %2015 = vmatprep.subr.bf16.mxu1 %v2339_v54  ;;  %v237_v53 = vld [vmem:[%s3483_s1 + $0x6b8] sm:$0xff]  ;;  %v2392_v54 = vcombine.low %v224_v41, %v228_v43  ;;  %v2401_v57 = vcombine.high %v232_v50, %v236_v51  ;;  %v3418_v41 = vld [vmem:[%s3485_s2] sm:$0xff] }
  0xcc   :  { %v2403_v10 = vcombine.high %v233_v52, %v237_v53  ;;  %v2402_v63 = vcombine.low %v233_v52, %v237_v53 }
  0xcd   :  { %1895 = vmatmul.mubr.bf16.gmra.mrb[12].mxu0 %v2836_v30  ;;  %2001 = vmatmul.mubr.bf16.gmra.mrb[12].mxu1 %v2836_v30  ;;  %v193_v30 = vld [vmem:[%s3483_s1 + $0x558] sm:$0xff] }
  0xce   :  { %1910 = vmatpush1.bf16.msra.mxu0 %v2336_v59  ;;  %2016 = vmatpush1.bf16.msra.mxu1 %v2338_v60  ;;  %v2363_v12 = vcombine.high %v193_v30, %v197_v7  ;;  %v2362_v17 = vcombine.low %v193_v30, %v197_v7  ;;  %v244_v59 = vld [vmem:[%s3483_s1 + $0x6f0] sm:$0xff]  ;;  %v241_v60 = vld [vmem:[%s3483_s1 + $0x6d8] sm:$0xff] }
  0xcf   :  { %1911 = vmatprep.subr.bf16.mxu0 %v2345_v61  ;;  %2017 = vmatprep.subr.bf16.mxu1 %v2347_v62  ;;  %v245_v61 = vld [vmem:[%s3483_s1 + $0x6f8] sm:$0xff]  ;;  %v2400_v62 = vcombine.low %v232_v50, %v236_v51  ;;  %v2409_v0 = vcombine.high %v240_v58, %v244_v59  ;;  %v256_v7 = vld [vmem:[%s3483_s1 + $0x750] sm:$0xff] }
  0xd0   :  { %1937 = vmatprep.mubr.bf16.mxu0 %v2847_v37  ;;  %2043 = vmatprep.mubr.bf16.mxu1 %v2847_v37  ;;  %v201_v37 = vld [vmem:[%s3483_s1 + $0x598] sm:$0xff]  ;;  %v2411_v19 = vcombine.high %v241_v60, %v245_v61  ;;  %v2410_v5 = vcombine.low %v241_v60, %v245_v61 }
  0xd1   :  { %v2371_v20 = vcombine.high %v201_v37, %v205_v15  ;;  %v2370_v27 = vcombine.low %v201_v37, %v205_v15  ;;  %v264_v15 = vld [vmem:[%s3483_s1 + $0x790] sm:$0xff] }
  0xd2   :  { %1912 = vmatpush1.bf16.msra.mxu0 %v2344_v2  ;;  %2018 = vmatpush1.bf16.msra.mxu1 %v2346_v3  ;;  %v252_v2 = vld [vmem:[%s3483_s1 + $0x730] sm:$0xff]  ;;  %v249_v3 = vld [vmem:[%s3483_s1 + $0x718] sm:$0xff] }
  0xd3   :  { %1913 = vmatprep.subr.bf16.mxu0 %v2353_v56  ;;  %2019 = vmatprep.subr.bf16.mxu1 %v2355_v4  ;;  %v253_v56 = vld [vmem:[%s3483_s1 + $0x738] sm:$0xff]  ;;  %v2408_v4 = vcombine.low %v240_v58, %v244_v59  ;;  %v2417_v6 = vcombine.high %v248_v1, %v252_v2 }
  0xd4   :  { %v2419_v30 = vcombine.high %v249_v3, %v253_v56  ;;  %v2418_v13 = vcombine.low %v249_v3, %v253_v56 }
  0xd6   :  { %1914 = vmatpush1.bf16.msra.mxu0 %v2352_v8  ;;  %2020 = vmatpush1.bf16.msra.mxu1 %v2354_v9  ;;  %v260_v8 = vld [vmem:[%s3483_s1 + $0x770] sm:$0xff]  ;;  %v257_v9 = vld [vmem:[%s3483_s1 + $0x758] sm:$0xff] }
  0xd7   :  { %1915 = vmatprep.subr.bf16.mxu0 %v2361_v11  ;;  %2021 = vmatprep.subr.bf16.mxu1 %v2363_v12  ;;  %v261_v11 = vld [vmem:[%s3483_s1 + $0x778] sm:$0xff]  ;;  %v2416_v12 = vcombine.low %v248_v1, %v252_v2  ;;  %v2425_v14 = vcombine.high %v256_v7, %v260_v8 }
  0xd8   :  { %v2427_v37 = vcombine.high %v257_v9, %v261_v11  ;;  %v2426_v21 = vcombine.low %v257_v9, %v261_v11 }
  0xda   :  { %1916 = vmatpush1.bf16.msra.mxu0 %v2360_v16  ;;  %2022 = vmatpush1.bf16.msra.mxu1 %v2362_v17  ;;  %v268_v16 = vld [vmem:[%s3483_s1 + $0x7b0] sm:$0xff]  ;;  %v265_v17 = vld [vmem:[%s3483_s1 + $0x798] sm:$0xff] }
  0xdb   :  { %1917 = vmatprep.subr.bf16.mxu0 %v2369_v18  ;;  %2023 = vmatprep.subr.bf16.mxu1 %v2371_v20  ;;  %v269_v18 = vld [vmem:[%s3483_s1 + $0x7b8] sm:$0xff]  ;;  %v2424_v20 = vcombine.low %v256_v7, %v260_v8  ;;  %v2433_v23 = vcombine.high %v264_v15, %v268_v16 }
  0xdc   :  { %v2435_v24 = vcombine.high %v265_v17, %v269_v18  ;;  %v2434_v32 = vcombine.low %v265_v17, %v269_v18 }
  0xde   :  { %1918 = vmatpush1.bf16.msra.mxu0 %v2368_v26  ;;  %2024 = vmatpush1.bf16.msra.mxu1 %v2370_v27  ;;  %v276_v26 = vld [vmem:[%s3483_s1 + $0x7f0] sm:$0xff]  ;;  %v273_v27 = vld [vmem:[%s3483_s1 + $0x7d8] sm:$0xff] }
  0xdf   :  { %1919 = vmatprep.subr.bf16.mxu0 %v2377_v28  ;;  %2025 = vmatprep.subr.bf16.mxu1 %v2379_v31  ;;  %v277_v28 = vld [vmem:[%s3483_s1 + $0x7f8] sm:$0xff]  ;;  %v2432_v31 = vcombine.low %v264_v15, %v268_v16  ;;  %v2441_v33 = vcombine.high %v272_v25, %v276_v26  ;;  %v2440_v35 = vcombine.low %v272_v25, %v276_v26 }
  0xe0   :  { %v2443_v34 = vcombine.high %v273_v27, %v277_v28 }
  0xe2   :  { %1920 = vmatpush1.bf16.msra.mxu0 %v2376_v36  ;;  %2026 = vmatpush1.bf16.msra.mxu1 %v2378_v38  ;;  %v2442_v36 = vcombine.low %v273_v27, %v277_v28  ;;  %v280_v38 = vlaneseq }
  0xe3   :  { %1921 = vmatprep.subr.bf16.mxu0 %v2385_v39  ;;  %2027 = vmatprep.subr.bf16.mxu1 %v2387_v40 }
  0xe4   :  { %v3412_v39 = vshrl.u32 %v280_v38, 7 }
  0xe6   :  { %1922 = vmatpush1.bf16.msra.mxu0 %v2384_v46  ;;  %2028 = vmatpush1.bf16.msra.mxu1 %v2386_v47  ;;  %v282_v40 = vsub.s32 0, %v3412_v39  ;;  %v286_v43 = vsub.s32 1, %v3412_v39  ;;  %v310_v25 = vsub.s32 7, %v3412_v39 }
  0xe7   :  { %1923 = vmatprep.subr.bf16.mxu0 %v2393_v48  ;;  %2029 = vmatprep.subr.bf16.mxu1 %v2395_v49 }
  0xe8   :  { %v283_v44 = vrot.slane %v3418_v41, %v282_v40  ;;  %v287_v45 = vrot.slane %v3418_v41, %v286_v43 }
  0xea   :  { %1924 = vmatpush1.bf16.msra.mxu0 %v2392_v54  ;;  %2030 = vmatpush1.bf16.msra.mxu1 %v2394_v55 }
  0xeb   :  { %1925 = vmatprep.subr.bf16.mxu0 %v2401_v57  ;;  %2031 = vmatprep.subr.bf16.mxu1 %v2403_v10 }
  0xee   :  { %1926 = vmatpush1.bf16.msra.mxu0 %v2400_v62  ;;  %2032 = vmatpush1.bf16.msra.mxu1 %v2402_v63 }
  0xef   :  { %1927 = vmatprep.subr.bf16.mxu0 %v2409_v0  ;;  %2033 = vmatprep.subr.bf16.mxu1 %v2411_v19 }
  0xf2   :  { %1928 = vmatpush1.bf16.msra.mxu0 %v2408_v4  ;;  %2034 = vmatpush1.bf16.msra.mxu1 %v2410_v5 }
  0xf3   :  { %1929 = vmatprep.subr.bf16.mxu0 %v2417_v6  ;;  %2035 = vmatprep.subr.bf16.mxu1 %v2419_v30 }
  0xf6   :  { %1930 = vmatpush1.bf16.msra.mxu0 %v2416_v12  ;;  %2036 = vmatpush1.bf16.msra.mxu1 %v2418_v13 }
  0xf7   :  { %1931 = vmatprep.subr.bf16.mxu0 %v2425_v14  ;;  %2037 = vmatprep.subr.bf16.mxu1 %v2427_v37 }
  0xfa   :  { %1932 = vmatpush1.bf16.msra.mxu0 %v2424_v20  ;;  %2038 = vmatpush1.bf16.msra.mxu1 %v2426_v21  ;;  %v298_v21 = vsub.s32 4, %v3412_v39 }
  0xfb   :  { %1933 = vmatprep.subr.bf16.mxu0 %v2433_v23  ;;  %2039 = vmatprep.subr.bf16.mxu1 %v2435_v24  ;;  %v306_v23 = vsub.s32 6, %v3412_v39  ;;  %v302_v24 = vsub.s32 5, %v3412_v39 }
  0xfc   :  { %v299_v26 = vrot.slane %v3418_v41, %v298_v21 }
  0xfd   :  { %v307_v27 = vrot.slane %v3418_v41, %v306_v23  ;;  %v303_v28 = vrot.slane %v3418_v41, %v302_v24 }
  0xfe   :  { %1934 = vmatpush1.bf16.msra.mxu0 %v2432_v31  ;;  %2040 = vmatpush1.bf16.msra.mxu1 %v2434_v32  ;;  %v311_v31 = vrot.slane %v3418_v41, %v310_v25 }
  0xff   :  { %1935 = vmatprep.subr.bf16.mxu0 %v2441_v33  ;;  %2041 = vmatprep.subr.bf16.mxu1 %v2443_v34 }
 0x102   :  { %1936 = vmatpush1.bf16.msra.mxu0 %v2440_v35  ;;  %2042 = vmatpush1.bf16.msra.mxu1 %v2442_v36 }
 0x105   :  { %1938 = vmatmul.mubr.bf16.vlgmr.msra.gmra.mrb[8].mxu0 %v3012_v22  ;;  %2044 = vmatmul.mubr.bf16.vlgmr.msra.gmra.mrb[8].mxu1 %v3012_v22  ;;  %v290_v22 = vsub.s32 2, %v3412_v39 }
 0x106   :  { %1947 = vmatprep.mubr.bf16.mxu0 %v3023_v29  ;;  %2053 = vmatprep.mubr.bf16.mxu1 %v3023_v29  ;;  %v294_v29 = vsub.s32 3, %v3412_v39 }
 0x108   :  { %v295_v46 = vrot.slane %v3418_v41, %v294_v29 }
 0x10d   :  { %1948 = vmatmul.mubr.bf16.gmra.mrb[12].mxu0 %v3050_v42  ;;  %2054 = vmatmul.mubr.bf16.gmra.mrb[12].mxu1 %v3050_v42  ;;  %v291_v42 = vrot.slane %v3418_v41, %v290_v22 }
 0x158   :  { %v1727_v47 = vpop.f32.mrb[0].mxu0  ;;  %v1833_v49 = vpop.f32.mrb[0].mxu1 }
 0x159   :  { %v2476_v48 = vadd.f32 %v1727_v47, %v283_v44  ;;  %v1729_v50 = vpop.f32.mrb[1].mxu0  ;;  %v2484_v51 = vadd.f32 %v1833_v49, %v291_v42  ;;  %v1835_v53 = vpop.f32.mrb[1].mxu1 }
 0x15a   :  { %v2477_v52 = vadd.f32 %v1729_v50, %v287_v45  ;;  %v1731_v54 = vpop.f32.mrb[2].mxu0  ;;  %v2485_v55 = vadd.f32 %v1835_v53, %v295_v46  ;;  %v1837_v10 = vpop.f32.mrb[2].mxu1 }
 0x15b   :  { %v2478_v57 = vadd.f32 %v1731_v54, %v283_v44  ;;  %v1733_v58 = vpop.f32.mrb[3].mxu0  ;;  %v2486_v60 = vadd.f32 %v1837_v10, %v291_v42  ;;  %v1839_v62 = vpop.f32.mrb[3].mxu1 }
 0x15c   :  { %v2460_v59 = vpack.c.bf16 %v2477_v52, %v2476_v48  ;;  %v2479_v61 = vadd.f32 %v1733_v58, %v287_v45  ;;  %v2461_v63 = vpack.c.bf16 %v2485_v55, %v2484_v51  ;;  %v2487_v0 = vadd.f32 %v1839_v62, %v295_v46 }
 0x15e   :  { %2160 = vst [vmem:[%s3486_s3] sm:$0xff] %v2460_v59  ;;  %v2464_v19 = vpack.c.bf16 %v2479_v61, %v2478_v57  ;;  %2161 = vst [vmem:[%s3486_s3 + $0x8] sm:$0xff] %v2461_v63  ;;  %v2465_v1 = vpack.c.bf16 %v2487_v0, %v2486_v60 }
 0x160   :  { %2164 = vst [vmem:[%s3486_s3 + $0x20] sm:$0xff] %v2464_v19  ;;  %v1737_v2 = vpop.f32.mrb[4].mxu0  ;;  %2165 = vst [vmem:[%s3486_s3 + $0x28] sm:$0xff] %v2465_v1  ;;  %v1843_v56 = vpop.f32.mrb[4].mxu1 }
 0x161   :  { %v2480_v3 = vadd.f32 %v1737_v2, %v283_v44  ;;  %v1739_v4 = vpop.f32.mrb[5].mxu0  ;;  %v2488_v5 = vadd.f32 %v1843_v56, %v291_v42  ;;  %v1845_v30 = vpop.f32.mrb[5].mxu1 }
 0x162   :  { %v2481_v6 = vadd.f32 %v1739_v4, %v287_v45  ;;  %v1741_v7 = vpop.f32.mrb[6].mxu0  ;;  %v2489_v8 = vadd.f32 %v1845_v30, %v295_v46  ;;  %v1847_v11 = vpop.f32.mrb[6].mxu1 }
 0x163   :  { %v2482_v9 = vadd.f32 %v1741_v7, %v283_v44  ;;  %v1743_v12 = vpop.f32.mrb[7].mxu0  ;;  %v2490_v14 = vadd.f32 %v1847_v11, %v291_v42  ;;  %v1849_v15 = vpop.f32.mrb[7].mxu1 }
 0x164   :  { %v2468_v13 = vpack.c.bf16 %v2481_v6, %v2480_v3  ;;  %v2483_v37 = vadd.f32 %v1743_v12, %v287_v45  ;;  %v2469_v16 = vpack.c.bf16 %v2489_v8, %v2488_v5  ;;  %v2491_v17 = vadd.f32 %v1849_v15, %v295_v46 }
 0x166   :  { %2168 = vst [vmem:[%s3486_s3 + $0x40] sm:$0xff] %v2468_v13  ;;  %v2472_v18 = vpack.c.bf16 %v2483_v37, %v2482_v9  ;;  %2169 = vst [vmem:[%s3486_s3 + $0x48] sm:$0xff] %v2469_v16  ;;  %v2473_v20 = vpack.c.bf16 %v2491_v17, %v2490_v14 }
 0x168   :  { %2172 = vst [vmem:[%s3486_s3 + $0x60] sm:$0xff] %v2472_v18  ;;  %2173 = vst [vmem:[%s3486_s3 + $0x68] sm:$0xff] %v2473_v20 }
 0x1d8   :  { %v1939_v32 = vpop.f32.mrb[8].mxu0  ;;  %v2045_v34 = vpop.f32.mrb[8].mxu1 }
 0x1d9   :  { %v2492_v33 = vadd.f32 %v1939_v32, %v299_v26  ;;  %v1941_v35 = vpop.f32.mrb[9].mxu0  ;;  %v2500_v36 = vadd.f32 %v2045_v34, %v307_v27  ;;  %v2047_v40 = vpop.f32.mrb[9].mxu1 }
 0x1da   :  { %v2493_v38 = vadd.f32 %v1941_v35, %v303_v28  ;;  %v1943_v22 = vpop.f32.mrb[10].mxu0  ;;  %v2501_v43 = vadd.f32 %v2047_v40, %v311_v31  ;;  %v2049_v44 = vpop.f32.mrb[10].mxu1 }
 0x1db   :  { %v2494_v29 = vadd.f32 %v1943_v22, %v299_v26  ;;  %v1945_v39 = vpop.f32.mrb[11].mxu0  ;;  %v2502_v45 = vadd.f32 %v2049_v44, %v307_v27  ;;  %v2051_v47 = vpop.f32.mrb[11].mxu1 }
 0x1dc   :  { %v2462_v42 = vpack.c.bf16 %v2493_v38, %v2492_v33  ;;  %v2495_v46 = vadd.f32 %v1945_v39, %v303_v28  ;;  %v2463_v48 = vpack.c.bf16 %v2501_v43, %v2500_v36  ;;  %v2503_v49 = vadd.f32 %v2051_v47, %v311_v31 }
 0x1de   :  { %2162 = vst [vmem:[%s3486_s3 + $0x10] sm:$0xff] %v2462_v42  ;;  %v2466_v41 = vpack.c.bf16 %v2495_v46, %v2494_v29  ;;  %2163 = vst [vmem:[%s3486_s3 + $0x18] sm:$0xff] %v2463_v48  ;;  %v2467_v50 = vpack.c.bf16 %v2503_v49, %v2502_v45 }
 0x1e0   :  { %2166 = vst [vmem:[%s3486_s3 + $0x30] sm:$0xff] %v2466_v41  ;;  %v1949_v51 = vpop.f32.mrb[12].mxu0  ;;  %2167 = vst [vmem:[%s3486_s3 + $0x38] sm:$0xff] %v2467_v50  ;;  %v2055_v53 = vpop.f32.mrb[12].mxu1 }
 0x1e1   :  { %v2496_v52 = vadd.f32 %v1949_v51, %v299_v26  ;;  %v1951_v54 = vpop.f32.mrb[13].mxu0  ;;  %v2504_v55 = vadd.f32 %v2055_v53, %v307_v27  ;;  %v2057_v10 = vpop.f32.mrb[13].mxu1 }
 0x1e2   :  { %v2497_v57 = vadd.f32 %v1951_v54, %v303_v28  ;;  %v1953_v58 = vpop.f32.mrb[14].mxu0  ;;  %v2505_v59 = vadd.f32 %v2057_v10, %v311_v31  ;;  %v2059_v61 = vpop.f32.mrb[14].mxu1 }
 0x1e3   :  { %v2498_v60 = vadd.f32 %v1953_v58, %v299_v26  ;;  %v1955_v62 = vpop.f32.mrb[15].mxu0  ;;  %v2506_v0 = vadd.f32 %v2059_v61, %v307_v27  ;;  %v2061_v1 = vpop.f32.mrb[15].mxu1 }
 0x1e4   :  { %v2470_v63 = vpack.c.bf16 %v2497_v57, %v2496_v52  ;;  %v2499_v19 = vadd.f32 %v1955_v62, %v303_v28  ;;  %v2471_v2 = vpack.c.bf16 %v2505_v59, %v2504_v55  ;;  %v2507_v3 = vadd.f32 %v2061_v1, %v311_v31 }
 0x1e6   :  { %2170 = vst [vmem:[%s3486_s3 + $0x50] sm:$0xff] %v2470_v63  ;;  %v2474_v56 = vpack.c.bf16 %v2499_v19, %v2498_v60  ;;  %2171 = vst [vmem:[%s3486_s3 + $0x58] sm:$0xff] %v2471_v2  ;;  %v2475_v4 = vpack.c.bf16 %v2507_v3, %v2506_v0 }
 0x1e8   :  { %2174 = vst [vmem:[%s3486_s3 + $0x70] sm:$0xff] %v2474_v56  ;;  %2175 = vst [vmem:[%s3486_s3 + $0x78] sm:$0xff] %v2475_v4 }

// kernel: _lambda_.70
= control target key start
LH: loop header
LB: loop body
LE: loop exit
PB: predicated region body
PF: predicated region fallthrough
CT: control target
= control target key end

     0   :  { %s2089_s1 = inlined_call_operand.vmem [shape: bf16[256,1024], index: 1, kind: input, shape index: {}]   ;;  %s2090_s0 = inlined_call_operand.vmem [shape: bf16[32,256], index: 0, kind: input, shape index: {}]   ;;  %s2091_s2 = inlined_call_operand.vmem [shape: f32[1,1024], index: 2, kind: input, shape index: {}]   ;;  %s2092_s3 = inlined_call_operand.vmem [shape: bf16[32,1024], index: 3, kind: input, shape index: {}]   ;;  %s2093_s4 = inlined_call_operand.vmem [shape: bf16[32,1024], index: 4, kind: output, shape index: {}]  }
   0x1   :  { %v21_v0 = vld [vmem:[%s2089_s1] sm:$0xff]  ;;  %v22_v2 = vld [vmem:[%s2089_s1 + $0x8] sm:$0xff] }
   0x2   :  { %v25_v1 = vld [vmem:[%s2089_s1 + $0x20] sm:$0xff]  ;;  %v26_v4 = vld [vmem:[%s2089_s1 + $0x28] sm:$0xff] }
   0x3   :  { %v1296_v3 = vcombine.high %v21_v0, %v25_v1  ;;  %v1295_v5 = vcombine.low %v21_v0, %v25_v1  ;;  %v29_v6 = vld [vmem:[%s2089_s1 + $0x40] sm:$0xff]  ;;  %v1298_v8 = vcombine.high %v22_v2, %v26_v4  ;;  %v1297_v9 = vcombine.low %v22_v2, %v26_v4  ;;  %v30_v11 = vld [vmem:[%s2089_s1 + $0x48] sm:$0xff] }
   0x4   :  { %v33_v7 = vld [vmem:[%s2089_s1 + $0x60] sm:$0xff]  ;;  %v34_v12 = vld [vmem:[%s2089_s1 + $0x68] sm:$0xff] }
   0x5   :  { %v1304_v10 = vcombine.high %v29_v6, %v33_v7  ;;  %v37_v13 = vld [vmem:[%s2089_s1 + $0x80] sm:$0xff]  ;;  %851 = vmatprep.subr.bf16.mxu0 %v1296_v3  ;;  %v1306_v14 = vcombine.high %v30_v11, %v34_v12  ;;  %v38_v16 = vld [vmem:[%s2089_s1 + $0x88] sm:$0xff]  ;;  %904 = vmatprep.subr.bf16.mxu1 %v1298_v8  ;;  %v1303_v18 = vcombine.low %v29_v6, %v33_v7 }
   0x6   :  { %v41_v15 = vld [vmem:[%s2089_s1 + $0xa0] sm:$0xff]  ;;  %v42_v17 = vld [vmem:[%s2089_s1 + $0xa8] sm:$0xff]  ;;  %852 = vmatpush1.bf16.msra.mxu0 %v1295_v5  ;;  %905 = vmatpush1.bf16.msra.mxu1 %v1297_v9  ;;  %v1305_v19 = vcombine.low %v30_v11, %v34_v12 }
   0x7   :  { %853 = vmatprep.subr.bf16.mxu0 %v1304_v10  ;;  %v1312_v20 = vcombine.high %v37_v13, %v41_v15  ;;  %906 = vmatprep.subr.bf16.mxu1 %v1306_v14  ;;  %v1314_v21 = vcombine.high %v38_v16, %v42_v17  ;;  %v45_v22 = vld [vmem:[%s2089_s1 + $0xc0] sm:$0xff]  ;;  %v46_v24 = vld [vmem:[%s2089_s1 + $0xc8] sm:$0xff]  ;;  %v1311_v26 = vcombine.low %v37_v13, %v41_v15 }
   0x8   :  { %v49_v23 = vld [vmem:[%s2089_s1 + $0xe0] sm:$0xff]  ;;  %v50_v25 = vld [vmem:[%s2089_s1 + $0xe8] sm:$0xff]  ;;  %v1313_v27 = vcombine.low %v38_v16, %v42_v17 }
   0x9   :  { %v1320_v28 = vcombine.high %v45_v22, %v49_v23  ;;  %v1322_v29 = vcombine.high %v46_v24, %v50_v25  ;;  %v53_v30 = vld [vmem:[%s2089_s1 + $0x100] sm:$0xff]  ;;  %v54_v32 = vld [vmem:[%s2089_s1 + $0x108] sm:$0xff]  ;;  %v1319_v34 = vcombine.low %v45_v22, %v49_v23  ;;  %v1321_v35 = vcombine.low %v46_v24, %v50_v25 }
   0xa   :  { %854 = vmatpush1.bf16.msra.mxu0 %v1303_v18  ;;  %907 = vmatpush1.bf16.msra.mxu1 %v1305_v19  ;;  %v57_v31 = vld [vmem:[%s2089_s1 + $0x120] sm:$0xff]  ;;  %v58_v33 = vld [vmem:[%s2089_s1 + $0x128] sm:$0xff] }
   0xb   :  { %855 = vmatprep.subr.bf16.mxu0 %v1312_v20  ;;  %908 = vmatprep.subr.bf16.mxu1 %v1314_v21  ;;  %v1328_v36 = vcombine.high %v53_v30, %v57_v31  ;;  %v1330_v37 = vcombine.high %v54_v32, %v58_v33  ;;  %v61_v38 = vld [vmem:[%s2089_s1 + $0x140] sm:$0xff]  ;;  %v62_v40 = vld [vmem:[%s2089_s1 + $0x148] sm:$0xff]  ;;  %v1327_v42 = vcombine.low %v53_v30, %v57_v31 }
   0xc   :  { %v65_v39 = vld [vmem:[%s2089_s1 + $0x160] sm:$0xff]  ;;  %v66_v41 = vld [vmem:[%s2089_s1 + $0x168] sm:$0xff]  ;;  %v1329_v43 = vcombine.low %v54_v32, %v58_v33 }
   0xd   :  { %v1336_v44 = vcombine.high %v61_v38, %v65_v39  ;;  %v1338_v45 = vcombine.high %v62_v40, %v66_v41  ;;  %v69_v46 = vld [vmem:[%s2089_s1 + $0x180] sm:$0xff]  ;;  %v70_v48 = vld [vmem:[%s2089_s1 + $0x188] sm:$0xff]  ;;  %v1335_v50 = vcombine.low %v61_v38, %v65_v39  ;;  %v1337_v51 = vcombine.low %v62_v40, %v66_v41 }
   0xe   :  { %856 = vmatpush1.bf16.msra.mxu0 %v1311_v26  ;;  %909 = vmatpush1.bf16.msra.mxu1 %v1313_v27  ;;  %v73_v47 = vld [vmem:[%s2089_s1 + $0x1a0] sm:$0xff]  ;;  %v74_v49 = vld [vmem:[%s2089_s1 + $0x1a8] sm:$0xff] }
   0xf   :  { %857 = vmatprep.subr.bf16.mxu0 %v1320_v28  ;;  %910 = vmatprep.subr.bf16.mxu1 %v1322_v29  ;;  %v1344_v52 = vcombine.high %v69_v46, %v73_v47  ;;  %v1346_v53 = vcombine.high %v70_v48, %v74_v49  ;;  %v77_v54 = vld [vmem:[%s2089_s1 + $0x1c0] sm:$0xff]  ;;  %v78_v57 = vld [vmem:[%s2089_s1 + $0x1c8] sm:$0xff]  ;;  %v1343_v59 = vcombine.low %v69_v46, %v73_v47 }
  0x10   :  { %v81_v55 = vld [vmem:[%s2089_s1 + $0x1e0] sm:$0xff]  ;;  %v82_v58 = vld [vmem:[%s2089_s1 + $0x1e8] sm:$0xff]  ;;  %v1345_v60 = vcombine.low %v70_v48, %v74_v49 }
  0x11   :  { %v1579_v56 = vld [vmem:[%s2090_s0 + $0x4] ss:$8 sps:$4 sm:$0xff]   ;;  %v1352_v61 = vcombine.high %v77_v54, %v81_v55  ;;  %v1354_v62 = vcombine.high %v78_v57, %v82_v58  ;;  %v1351_v3 = vcombine.low %v77_v54, %v81_v55  ;;  %v1353_v4 = vcombine.low %v78_v57, %v82_v58 }
  0x12   :  { %858 = vmatpush1.bf16.msra.mxu0 %v1319_v34  ;;  %911 = vmatpush1.bf16.msra.mxu1 %v1321_v35  ;;  %v85_v63 = vld [vmem:[%s2089_s1 + $0x200] sm:$0xff]  ;;  %v86_v1 = vld [vmem:[%s2089_s1 + $0x208] sm:$0xff] }
  0x13   :  { %859 = vmatprep.subr.bf16.mxu0 %v1328_v36  ;;  %912 = vmatprep.subr.bf16.mxu1 %v1330_v37  ;;  %v89_v0 = vld [vmem:[%s2089_s1 + $0x220] sm:$0xff]  ;;  %v90_v2 = vld [vmem:[%s2089_s1 + $0x228] sm:$0xff] }
  0x14   :  { %883 = vmatprep.mubr.bf16.mxu0 %v1579_v56  ;;  %936 = vmatprep.mubr.bf16.mxu1 %v1579_v56  ;;  %v1360_v5 = vcombine.high %v85_v63, %v89_v0  ;;  %v1362_v6 = vcombine.high %v86_v1, %v90_v2  ;;  %v93_v7 = vld [vmem:[%s2089_s1 + $0x240] sm:$0xff]  ;;  %v94_v9 = vld [vmem:[%s2089_s1 + $0x248] sm:$0xff]  ;;  %v1359_v11 = vcombine.low %v85_v63, %v89_v0  ;;  %v23_v0 = vld [vmem:[%s2089_s1 + $0x10] sm:$0xff] }
  0x15   :  { %v97_v8 = vld [vmem:[%s2089_s1 + $0x260] sm:$0xff]  ;;  %v98_v10 = vld [vmem:[%s2089_s1 + $0x268] sm:$0xff]  ;;  %v1361_v12 = vcombine.low %v86_v1, %v90_v2  ;;  %v27_v1 = vld [vmem:[%s2089_s1 + $0x30] sm:$0xff] }
  0x16   :  { %860 = vmatpush1.bf16.msra.mxu0 %v1327_v42  ;;  %913 = vmatpush1.bf16.msra.mxu1 %v1329_v43  ;;  %v1368_v13 = vcombine.high %v93_v7, %v97_v8  ;;  %v1370_v14 = vcombine.high %v94_v9, %v98_v10  ;;  %v101_v15 = vld [vmem:[%s2089_s1 + $0x280] sm:$0xff]  ;;  %v102_v17 = vld [vmem:[%s2089_s1 + $0x288] sm:$0xff]  ;;  %v1367_v19 = vcombine.low %v93_v7, %v97_v8  ;;  %v24_v2 = vld [vmem:[%s2089_s1 + $0x18] sm:$0xff] }
  0x17   :  { %861 = vmatprep.subr.bf16.mxu0 %v1336_v44  ;;  %914 = vmatprep.subr.bf16.mxu1 %v1338_v45  ;;  %v105_v16 = vld [vmem:[%s2089_s1 + $0x2a0] sm:$0xff]  ;;  %v106_v18 = vld [vmem:[%s2089_s1 + $0x2a8] sm:$0xff]  ;;  %v1369_v20 = vcombine.low %v94_v9, %v98_v10  ;;  %v31_v8 = vld [vmem:[%s2089_s1 + $0x50] sm:$0xff] }
  0x18   :  { %v1376_v21 = vcombine.high %v101_v15, %v105_v16  ;;  %v1378_v22 = vcombine.high %v102_v17, %v106_v18  ;;  %v109_v23 = vld [vmem:[%s2089_s1 + $0x2c0] sm:$0xff]  ;;  %v110_v25 = vld [vmem:[%s2089_s1 + $0x2c8] sm:$0xff]  ;;  %v1375_v27 = vcombine.low %v101_v15, %v105_v16  ;;  %v1377_v28 = vcombine.low %v102_v17, %v106_v18  ;;  %v35_v9 = vld [vmem:[%s2089_s1 + $0x70] sm:$0xff] }
  0x19   :  { %v113_v24 = vld [vmem:[%s2089_s1 + $0x2e0] sm:$0xff]  ;;  %v114_v26 = vld [vmem:[%s2089_s1 + $0x2e8] sm:$0xff]  ;;  %v1308_v15 = vcombine.high %v31_v8, %v35_v9  ;;  %v39_v17 = vld [vmem:[%s2089_s1 + $0x90] sm:$0xff] }
  0x1a   :  { %862 = vmatpush1.bf16.msra.mxu0 %v1335_v50  ;;  %915 = vmatpush1.bf16.msra.mxu1 %v1337_v51  ;;  %v1384_v29 = vcombine.high %v109_v23, %v113_v24  ;;  %v1386_v30 = vcombine.high %v110_v25, %v114_v26  ;;  %v117_v31 = vld [vmem:[%s2089_s1 + $0x300] sm:$0xff]  ;;  %v118_v33 = vld [vmem:[%s2089_s1 + $0x308] sm:$0xff]  ;;  %v1383_v35 = vcombine.low %v109_v23, %v113_v24  ;;  %v43_v18 = vld [vmem:[%s2089_s1 + $0xb0] sm:$0xff] }
  0x1b   :  { %863 = vmatprep.subr.bf16.mxu0 %v1344_v52  ;;  %916 = vmatprep.subr.bf16.mxu1 %v1346_v53  ;;  %v121_v32 = vld [vmem:[%s2089_s1 + $0x320] sm:$0xff]  ;;  %v122_v34 = vld [vmem:[%s2089_s1 + $0x328] sm:$0xff]  ;;  %v1385_v36 = vcombine.low %v110_v25, %v114_v26  ;;  %v1316_v24 = vcombine.high %v39_v17, %v43_v18  ;;  %v47_v26 = vld [vmem:[%s2089_s1 + $0xd0] sm:$0xff] }
  0x1c   :  { %v1392_v37 = vcombine.high %v117_v31, %v121_v32  ;;  %v1394_v38 = vcombine.high %v118_v33, %v122_v34  ;;  %v125_v39 = vld [vmem:[%s2089_s1 + $0x340] sm:$0xff]  ;;  %v126_v41 = vld [vmem:[%s2089_s1 + $0x348] sm:$0xff]  ;;  %v1391_v43 = vcombine.low %v117_v31, %v121_v32  ;;  %v1393_v44 = vcombine.low %v118_v33, %v122_v34 }
  0x1d   :  { %v129_v40 = vld [vmem:[%s2089_s1 + $0x360] sm:$0xff]  ;;  %v130_v42 = vld [vmem:[%s2089_s1 + $0x368] sm:$0xff]  ;;  %v1315_v31 = vcombine.low %v39_v17, %v43_v18 }
  0x1e   :  { %864 = vmatpush1.bf16.msra.mxu0 %v1343_v59  ;;  %917 = vmatpush1.bf16.msra.mxu1 %v1345_v60  ;;  %v1400_v45 = vcombine.high %v125_v39, %v129_v40  ;;  %v1402_v46 = vcombine.high %v126_v41, %v130_v42  ;;  %v133_v47 = vld [vmem:[%s2089_s1 + $0x380] sm:$0xff]  ;;  %v134_v49 = vld [vmem:[%s2089_s1 + $0x388] sm:$0xff]  ;;  %v1399_v51 = vcombine.low %v125_v39, %v129_v40 }
  0x1f   :  { %865 = vmatprep.subr.bf16.mxu0 %v1352_v61  ;;  %918 = vmatprep.subr.bf16.mxu1 %v1354_v62  ;;  %v137_v48 = vld [vmem:[%s2089_s1 + $0x3a0] sm:$0xff]  ;;  %v138_v50 = vld [vmem:[%s2089_s1 + $0x3a8] sm:$0xff]  ;;  %v1401_v52 = vcombine.low %v126_v41, %v130_v42 }
  0x20   :  { %v1408_v53 = vcombine.high %v133_v47, %v137_v48  ;;  %v1410_v54 = vcombine.high %v134_v49, %v138_v50  ;;  %v141_v55 = vld [vmem:[%s2089_s1 + $0x3c0] sm:$0xff]  ;;  %v142_v58 = vld [vmem:[%s2089_s1 + $0x3c8] sm:$0xff]  ;;  %v1407_v60 = vcombine.low %v133_v47, %v137_v48  ;;  %v1409_v61 = vcombine.low %v134_v49, %v138_v50 }
  0x21   :  { %v145_v57 = vld [vmem:[%s2089_s1 + $0x3e0] sm:$0xff]  ;;  %v146_v59 = vld [vmem:[%s2089_s1 + $0x3e8] sm:$0xff] }
  0x22   :  { %866 = vmatpush1.bf16.msra.mxu0 %v1351_v3  ;;  %919 = vmatpush1.bf16.msra.mxu1 %v1353_v4  ;;  %v1416_v62 = vcombine.high %v141_v55, %v145_v57  ;;  %v1418_v63 = vcombine.high %v142_v58, %v146_v59  ;;  %v28_v3 = vld [vmem:[%s2089_s1 + $0x38] sm:$0xff]  ;;  %v1415_v4 = vcombine.low %v141_v55, %v145_v57  ;;  %v1706_v10 = vld [vmem:[%s2090_s0] ss:$8 sps:$4 sm:$0xff]  }
  0x23   :  { %867 = vmatprep.subr.bf16.mxu0 %v1360_v5  ;;  %920 = vmatprep.subr.bf16.mxu1 %v1362_v6  ;;  %v1417_v5 = vcombine.low %v142_v58, %v146_v59  ;;  %v1300_v6 = vcombine.high %v23_v0, %v27_v1  ;;  %v1302_v7 = vcombine.high %v24_v2, %v28_v3  ;;  %v79_v59 = vld [vmem:[%s2089_s1 + $0x1d0] sm:$0xff] }
  0x26   :  { %868 = vmatpush1.bf16.msra.mxu0 %v1359_v11  ;;  %921 = vmatpush1.bf16.msra.mxu1 %v1361_v12  ;;  %v32_v11 = vld [vmem:[%s2089_s1 + $0x58] sm:$0xff] }
  0x27   :  { %869 = vmatprep.subr.bf16.mxu0 %v1368_v13  ;;  %922 = vmatprep.subr.bf16.mxu1 %v1370_v14  ;;  %v36_v12 = vld [vmem:[%s2089_s1 + $0x78] sm:$0xff]  ;;  %v1299_v13 = vcombine.low %v23_v0, %v27_v1  ;;  %v1301_v14 = vcombine.low %v24_v2, %v28_v3  ;;  %v87_v3 = vld [vmem:[%s2089_s1 + $0x210] sm:$0xff] }
  0x28   :  { %v1310_v16 = vcombine.high %v32_v11, %v36_v12  ;;  %v1309_v23 = vcombine.low %v32_v11, %v36_v12  ;;  %v95_v12 = vld [vmem:[%s2089_s1 + $0x250] sm:$0xff] }
  0x2a   :  { %870 = vmatpush1.bf16.msra.mxu0 %v1367_v19  ;;  %923 = vmatpush1.bf16.msra.mxu1 %v1369_v20  ;;  %v1723_v19 = vld [vmem:[%s2090_s0 + $0x14] ss:$8 sps:$4 sm:$0xff]  }
  0x2b   :  { %871 = vmatprep.subr.bf16.mxu0 %v1376_v21  ;;  %924 = vmatprep.subr.bf16.mxu1 %v1378_v22  ;;  %v40_v20 = vld [vmem:[%s2089_s1 + $0x98] sm:$0xff]  ;;  %v1307_v22 = vcombine.low %v31_v8, %v35_v9 }
  0x2c   :  { %v44_v21 = vld [vmem:[%s2089_s1 + $0xb8] sm:$0xff] }
  0x2d   :  { %v1318_v25 = vcombine.high %v40_v20, %v44_v21  ;;  %v1317_v32 = vcombine.low %v40_v20, %v44_v21  ;;  %v103_v21 = vld [vmem:[%s2089_s1 + $0x290] sm:$0xff] }
  0x2e   :  { %872 = vmatpush1.bf16.msra.mxu0 %v1375_v27  ;;  %925 = vmatpush1.bf16.msra.mxu1 %v1377_v28  ;;  %v51_v27 = vld [vmem:[%s2089_s1 + $0xf0] sm:$0xff]  ;;  %v48_v28 = vld [vmem:[%s2089_s1 + $0xd8] sm:$0xff] }
  0x2f   :  { %873 = vmatprep.subr.bf16.mxu0 %v1384_v29  ;;  %926 = vmatprep.subr.bf16.mxu1 %v1386_v30  ;;  %v52_v29 = vld [vmem:[%s2089_s1 + $0xf8] sm:$0xff]  ;;  %v1324_v33 = vcombine.high %v47_v26, %v51_v27  ;;  %v1323_v39 = vcombine.low %v47_v26, %v51_v27 }
  0x30   :  { %v1750_v30 = vld [vmem:[%s2090_s0 + $0x10] ss:$8 sps:$4 sm:$0xff]   ;;  %v1326_v34 = vcombine.high %v48_v28, %v52_v29  ;;  %v1325_v40 = vcombine.low %v48_v28, %v52_v29 }
  0x31   :  { %v111_v29 = vld [vmem:[%s2089_s1 + $0x2d0] sm:$0xff] }
  0x32   :  { %874 = vmatpush1.bf16.msra.mxu0 %v1383_v35  ;;  %927 = vmatpush1.bf16.msra.mxu1 %v1385_v36  ;;  %v55_v35 = vld [vmem:[%s2089_s1 + $0x110] sm:$0xff] }
  0x33   :  { %875 = vmatprep.subr.bf16.mxu0 %v1392_v37  ;;  %928 = vmatprep.subr.bf16.mxu1 %v1394_v38  ;;  %v59_v36 = vld [vmem:[%s2089_s1 + $0x130] sm:$0xff]  ;;  %v56_v37 = vld [vmem:[%s2089_s1 + $0x118] sm:$0xff] }
  0x34   :  { %v60_v38 = vld [vmem:[%s2089_s1 + $0x138] sm:$0xff]  ;;  %v1332_v41 = vcombine.high %v55_v35, %v59_v36  ;;  %v1331_v47 = vcombine.low %v55_v35, %v59_v36 }
  0x35   :  { %v1334_v42 = vcombine.high %v56_v37, %v60_v38  ;;  %v1333_v48 = vcombine.low %v56_v37, %v60_v38  ;;  %v119_v38 = vld [vmem:[%s2089_s1 + $0x310] sm:$0xff] }
  0x36   :  { %876 = vmatpush1.bf16.msra.mxu0 %v1391_v43  ;;  %929 = vmatpush1.bf16.msra.mxu1 %v1393_v44  ;;  %v63_v43 = vld [vmem:[%s2089_s1 + $0x150] sm:$0xff] }
  0x37   :  { %877 = vmatprep.subr.bf16.mxu0 %v1400_v45  ;;  %930 = vmatprep.subr.bf16.mxu1 %v1402_v46  ;;  %v67_v44 = vld [vmem:[%s2089_s1 + $0x170] sm:$0xff]  ;;  %v64_v45 = vld [vmem:[%s2089_s1 + $0x158] sm:$0xff] }
  0x38   :  { %v68_v46 = vld [vmem:[%s2089_s1 + $0x178] sm:$0xff]  ;;  %v1340_v49 = vcombine.high %v63_v43, %v67_v44 }
  0x39   :  { %v1342_v50 = vcombine.high %v64_v45, %v68_v46  ;;  %v1341_v55 = vcombine.low %v64_v45, %v68_v46  ;;  %v127_v46 = vld [vmem:[%s2089_s1 + $0x350] sm:$0xff] }
  0x3a   :  { %878 = vmatpush1.bf16.msra.mxu0 %v1399_v51  ;;  %931 = vmatpush1.bf16.msra.mxu1 %v1401_v52  ;;  %v71_v51 = vld [vmem:[%s2089_s1 + $0x190] sm:$0xff] }
  0x3b   :  { %879 = vmatprep.subr.bf16.mxu0 %v1408_v53  ;;  %932 = vmatprep.subr.bf16.mxu1 %v1410_v54  ;;  %v75_v52 = vld [vmem:[%s2089_s1 + $0x1b0] sm:$0xff]  ;;  %v76_v53 = vld [vmem:[%s2089_s1 + $0x1b8] sm:$0xff]  ;;  %v1339_v54 = vcombine.low %v63_v43, %v67_v44 }
  0x3c   :  { %v1348_v57 = vcombine.high %v71_v51, %v75_v52 }
  0x3e   :  { %880 = vmatpush1.bf16.msra.mxu0 %v1407_v60  ;;  %933 = vmatpush1.bf16.msra.mxu1 %v1409_v61  ;;  %v83_v60 = vld [vmem:[%s2089_s1 + $0x1f0] sm:$0xff]  ;;  %v80_v61 = vld [vmem:[%s2089_s1 + $0x1d8] sm:$0xff] }
  0x3f   :  { %881 = vmatprep.subr.bf16.mxu0 %v1416_v62  ;;  %934 = vmatprep.subr.bf16.mxu1 %v1418_v63  ;;  %v84_v62 = vld [vmem:[%s2089_s1 + $0x1f8] sm:$0xff]  ;;  %v1347_v63 = vcombine.low %v71_v51, %v75_v52  ;;  %v1356_v1 = vcombine.high %v79_v59, %v83_v60 }
  0x40   :  { %v1358_v2 = vcombine.high %v80_v61, %v84_v62  ;;  %v1357_v8 = vcombine.low %v80_v61, %v84_v62  ;;  %v143_v62 = vld [vmem:[%s2089_s1 + $0x3d0] sm:$0xff] }
  0x42   :  { %882 = vmatpush1.bf16.msra.mxu0 %v1415_v4  ;;  %935 = vmatpush1.bf16.msra.mxu1 %v1417_v5  ;;  %v91_v4 = vld [vmem:[%s2089_s1 + $0x230] sm:$0xff]  ;;  %v88_v5 = vld [vmem:[%s2089_s1 + $0x218] sm:$0xff] }
  0x43   :  { %957 = vmatprep.subr.bf16.mxu0 %v1300_v6  ;;  %1010 = vmatprep.subr.bf16.mxu1 %v1302_v7  ;;  %v92_v6 = vld [vmem:[%s2089_s1 + $0x238] sm:$0xff]  ;;  %v1355_v7 = vcombine.low %v79_v59, %v83_v60  ;;  %v1364_v9 = vcombine.high %v87_v3, %v91_v4 }
  0x44   :  { %v1366_v11 = vcombine.high %v88_v5, %v92_v6  ;;  %v1365_v17 = vcombine.low %v88_v5, %v92_v6 }
  0x45   :  { %884 = vmatmul.mubr.bf16.vlgmr.msra.gmra.mrb[0].mxu0 %v1706_v10  ;;  %937 = vmatmul.mubr.bf16.vlgmr.msra.gmra.mrb[0].mxu1 %v1706_v10 }
  0x46   :  { %958 = vmatpush1.bf16.msra.mxu0 %v1299_v13  ;;  %1011 = vmatpush1.bf16.msra.mxu1 %v1301_v14  ;;  %v99_v13 = vld [vmem:[%s2089_s1 + $0x270] sm:$0xff]  ;;  %v96_v14 = vld [vmem:[%s2089_s1 + $0x258] sm:$0xff] }
  0x47   :  { %959 = vmatprep.subr.bf16.mxu0 %v1308_v15  ;;  %1012 = vmatprep.subr.bf16.mxu1 %v1310_v16  ;;  %v100_v15 = vld [vmem:[%s2089_s1 + $0x278] sm:$0xff]  ;;  %v1363_v16 = vcombine.low %v87_v3, %v91_v4  ;;  %v1372_v18 = vcombine.high %v95_v12, %v99_v13 }
  0x48   :  { %893 = vmatprep.mubr.bf16.mxu0 %v1723_v19  ;;  %946 = vmatprep.mubr.bf16.mxu1 %v1723_v19  ;;  %v1374_v20 = vcombine.high %v96_v14, %v100_v15  ;;  %v1373_v26 = vcombine.low %v96_v14, %v100_v15  ;;  %v1064_v14 = vld [vmem:[%s2092_s3 + $0x8] sm:$0xff] }
  0x4a   :  { %960 = vmatpush1.bf16.msra.mxu0 %v1307_v22  ;;  %1013 = vmatpush1.bf16.msra.mxu1 %v1309_v23  ;;  %v107_v22 = vld [vmem:[%s2089_s1 + $0x2b0] sm:$0xff]  ;;  %v104_v23 = vld [vmem:[%s2089_s1 + $0x298] sm:$0xff] }
  0x4b   :  { %961 = vmatprep.subr.bf16.mxu0 %v1316_v24  ;;  %1014 = vmatprep.subr.bf16.mxu1 %v1318_v25  ;;  %v108_v24 = vld [vmem:[%s2089_s1 + $0x2b8] sm:$0xff]  ;;  %v1371_v25 = vcombine.low %v95_v12, %v99_v13  ;;  %v1380_v27 = vcombine.high %v103_v21, %v107_v22  ;;  %v1912_v12 = vld [vmem:[%s2091_s2] sm:$0xff] }
  0x4c   :  { %v1382_v28 = vcombine.high %v104_v23, %v108_v24  ;;  %v1381_v35 = vcombine.low %v104_v23, %v108_v24  ;;  %v1081_v23 = vunpack.c.l.bf16 %v1064_v14 }
  0x4d   :  { %894 = vmatmul.mubr.bf16.gmra.mrb[4].mxu0 %v1750_v30  ;;  %947 = vmatmul.mubr.bf16.gmra.mrb[4].mxu1 %v1750_v30 }
  0x4e   :  { %962 = vmatpush1.bf16.msra.mxu0 %v1315_v31  ;;  %1015 = vmatpush1.bf16.msra.mxu1 %v1317_v32  ;;  %v115_v31 = vld [vmem:[%s2089_s1 + $0x2f0] sm:$0xff]  ;;  %v112_v32 = vld [vmem:[%s2089_s1 + $0x2d8] sm:$0xff] }
  0x4f   :  { %963 = vmatprep.subr.bf16.mxu0 %v1324_v33  ;;  %1016 = vmatprep.subr.bf16.mxu1 %v1326_v34  ;;  %v116_v33 = vld [vmem:[%s2089_s1 + $0x2f8] sm:$0xff]  ;;  %v1379_v34 = vcombine.low %v103_v21, %v107_v22  ;;  %v1388_v36 = vcombine.high %v111_v29, %v115_v31  ;;  %v1941_v21 = vld [vmem:[%s2092_s3 + $0x40] sm:$0xff] }
  0x50   :  { %989 = vmatprep.mubr.bf16.mxu0 %v1579_v56  ;;  %1042 = vmatprep.mubr.bf16.mxu1 %v1579_v56  ;;  %v72_v56 = vld [vmem:[%s2089_s1 + $0x198] sm:$0xff]  ;;  %v1390_v37 = vcombine.high %v112_v32, %v116_v33  ;;  %v1389_v43 = vcombine.low %v112_v32, %v116_v33 }
  0x51   :  { %v1350_v58 = vcombine.high %v72_v56, %v76_v53  ;;  %v1349_v0 = vcombine.low %v72_v56, %v76_v53  ;;  %v135_v53 = vld [vmem:[%s2089_s1 + $0x390] sm:$0xff] }
  0x52   :  { %964 = vmatpush1.bf16.msra.mxu0 %v1323_v39  ;;  %1017 = vmatpush1.bf16.msra.mxu1 %v1325_v40  ;;  %v123_v39 = vld [vmem:[%s2089_s1 + $0x330] sm:$0xff]  ;;  %v120_v40 = vld [vmem:[%s2089_s1 + $0x318] sm:$0xff] }
  0x53   :  { %965 = vmatprep.subr.bf16.mxu0 %v1332_v41  ;;  %1018 = vmatprep.subr.bf16.mxu1 %v1334_v42  ;;  %v124_v41 = vld [vmem:[%s2089_s1 + $0x338] sm:$0xff]  ;;  %v1387_v42 = vcombine.low %v111_v29, %v115_v31  ;;  %v1396_v44 = vcombine.high %v119_v38, %v123_v39 }
  0x54   :  { %v1398_v45 = vcombine.high %v120_v40, %v124_v41  ;;  %v1397_v51 = vcombine.low %v120_v40, %v124_v41 }
  0x56   :  { %966 = vmatpush1.bf16.msra.mxu0 %v1331_v47  ;;  %1019 = vmatpush1.bf16.msra.mxu1 %v1333_v48  ;;  %v131_v47 = vld [vmem:[%s2089_s1 + $0x370] sm:$0xff]  ;;  %v128_v48 = vld [vmem:[%s2089_s1 + $0x358] sm:$0xff] }
  0x57   :  { %967 = vmatprep.subr.bf16.mxu0 %v1340_v49  ;;  %1020 = vmatprep.subr.bf16.mxu1 %v1342_v50  ;;  %v132_v49 = vld [vmem:[%s2089_s1 + $0x378] sm:$0xff]  ;;  %v1395_v50 = vcombine.low %v119_v38, %v123_v39  ;;  %v1404_v52 = vcombine.high %v127_v46, %v131_v47 }
  0x58   :  { %v1406_v56 = vcombine.high %v128_v48, %v132_v49  ;;  %v1405_v59 = vcombine.low %v128_v48, %v132_v49 }
  0x5a   :  { %968 = vmatpush1.bf16.msra.mxu0 %v1339_v54  ;;  %1021 = vmatpush1.bf16.msra.mxu1 %v1341_v55  ;;  %v139_v54 = vld [vmem:[%s2089_s1 + $0x3b0] sm:$0xff]  ;;  %v136_v55 = vld [vmem:[%s2089_s1 + $0x398] sm:$0xff] }
  0x5b   :  { %969 = vmatprep.subr.bf16.mxu0 %v1348_v57  ;;  %1022 = vmatprep.subr.bf16.mxu1 %v1350_v58  ;;  %v140_v57 = vld [vmem:[%s2089_s1 + $0x3b8] sm:$0xff]  ;;  %v1403_v58 = vcombine.low %v127_v46, %v131_v47  ;;  %v1412_v60 = vcombine.high %v135_v53, %v139_v54 }
  0x5c   :  { %v1414_v61 = vcombine.high %v136_v55, %v140_v57  ;;  %v1413_v3 = vcombine.low %v136_v55, %v140_v57 }
  0x5e   :  { %970 = vmatpush1.bf16.msra.mxu0 %v1347_v63  ;;  %1023 = vmatpush1.bf16.msra.mxu1 %v1349_v0  ;;  %v147_v63 = vld [vmem:[%s2089_s1 + $0x3f0] sm:$0xff]  ;;  %v144_v0 = vld [vmem:[%s2089_s1 + $0x3d8] sm:$0xff] }
  0x5f   :  { %971 = vmatprep.subr.bf16.mxu0 %v1356_v1  ;;  %1024 = vmatprep.subr.bf16.mxu1 %v1358_v2  ;;  %v148_v1 = vld [vmem:[%s2089_s1 + $0x3f8] sm:$0xff]  ;;  %v1411_v2 = vcombine.low %v135_v53, %v139_v54  ;;  %v1420_v4 = vcombine.high %v143_v62, %v147_v63  ;;  %v1419_v6 = vcombine.low %v143_v62, %v147_v63  ;;  %v1075_v54 = vld [vmem:[%s2092_s3 + $0x60] sm:$0xff] }
  0x60   :  { %v1422_v5 = vcombine.high %v144_v0, %v148_v1 }
  0x62   :  { %972 = vmatpush1.bf16.msra.mxu0 %v1355_v7  ;;  %1025 = vmatpush1.bf16.msra.mxu1 %v1357_v8  ;;  %v1421_v7 = vcombine.low %v144_v0, %v148_v1  ;;  %v151_v8 = vlaneseq }
  0x63   :  { %973 = vmatprep.subr.bf16.mxu0 %v1364_v9  ;;  %1026 = vmatprep.subr.bf16.mxu1 %v1366_v11 }
  0x64   :  { %v1906_v9 = vshrl.u32 %v151_v8, 7 }
  0x66   :  { %974 = vmatpush1.bf16.msra.mxu0 %v1363_v16  ;;  %1027 = vmatpush1.bf16.msra.mxu1 %v1365_v17  ;;  %v153_v11 = vsub.s32 0, %v1906_v9  ;;  %v157_v13 = vsub.s32 1, %v1906_v9  ;;  %v1067_v16 = vld [vmem:[%s2092_s3 + $0x20] sm:$0xff]  ;;  %v1068_v17 = vld [vmem:[%s2092_s3 + $0x28] sm:$0xff] }
  0x67   :  { %975 = vmatprep.subr.bf16.mxu0 %v1372_v18  ;;  %1028 = vmatprep.subr.bf16.mxu1 %v1374_v20  ;;  %v1087_v29 = vunpack.c.l.bf16 %v1067_v16  ;;  %v1089_v31 = vunpack.c.l.bf16 %v1068_v17 }
  0x68   :  { %v1924_v15 = vrot.slane %v1912_v12, %v153_v11  ;;  %v1936_v20 = vrot.slane %v1912_v12, %v157_v13 }
  0x6a   :  { %976 = vmatpush1.bf16.msra.mxu0 %v1371_v25  ;;  %1029 = vmatpush1.bf16.msra.mxu1 %v1373_v26  ;;  %v1949_v25 = vld [vmem:[%s2092_s3 + $0x48] sm:$0xff] }
  0x6b   :  { %977 = vmatprep.subr.bf16.mxu0 %v1380_v27  ;;  %1030 = vmatprep.subr.bf16.mxu1 %v1382_v28  ;;  %v1082_v28 = vunpack.c.h.bf16 %v1064_v14  ;;  %v1098_v49 = vunpack.c.h.bf16 %v1949_v25 }
  0x6e   :  { %978 = vmatpush1.bf16.msra.mxu0 %v1379_v34  ;;  %1031 = vmatpush1.bf16.msra.mxu1 %v1381_v35  ;;  %v1088_v35 = vunpack.c.h.bf16 %v1067_v16  ;;  %v1104_v16 = vunpack.c.h.bf16 %v1075_v54 }
  0x6f   :  { %979 = vmatprep.subr.bf16.mxu0 %v1388_v36  ;;  %1032 = vmatprep.subr.bf16.mxu1 %v1390_v37  ;;  %v1090_v36 = vunpack.c.h.bf16 %v1068_v17  ;;  %v1095_v37 = vunpack.c.l.bf16 %v1941_v21 }
  0x72   :  { %980 = vmatpush1.bf16.msra.mxu0 %v1387_v42  ;;  %1033 = vmatpush1.bf16.msra.mxu1 %v1389_v43  ;;  %v1097_v42 = vunpack.c.l.bf16 %v1949_v25  ;;  %v1096_v43 = vunpack.c.h.bf16 %v1941_v21 }
  0x73   :  { %981 = vmatprep.subr.bf16.mxu0 %v1396_v44  ;;  %1034 = vmatprep.subr.bf16.mxu1 %v1398_v45 }
  0x76   :  { %982 = vmatpush1.bf16.msra.mxu0 %v1395_v50  ;;  %1035 = vmatpush1.bf16.msra.mxu1 %v1397_v51 }
  0x77   :  { %983 = vmatprep.subr.bf16.mxu0 %v1404_v52  ;;  %1036 = vmatprep.subr.bf16.mxu1 %v1406_v56 }
  0x7a   :  { %984 = vmatpush1.bf16.msra.mxu0 %v1403_v58  ;;  %1037 = vmatpush1.bf16.msra.mxu1 %v1405_v59 }
  0x7b   :  { %985 = vmatprep.subr.bf16.mxu0 %v1412_v60  ;;  %1038 = vmatprep.subr.bf16.mxu1 %v1414_v61  ;;  %v1076_v60 = vld [vmem:[%s2092_s3 + $0x68] sm:$0xff] }
  0x7c   :  { %v1105_v11 = vunpack.c.l.bf16 %v1076_v60 }
  0x7e   :  { %986 = vmatpush1.bf16.msra.mxu0 %v1411_v2  ;;  %1039 = vmatpush1.bf16.msra.mxu1 %v1413_v3 }
  0x7f   :  { %987 = vmatprep.subr.bf16.mxu0 %v1420_v4  ;;  %1040 = vmatprep.subr.bf16.mxu1 %v1422_v5  ;;  %v1103_v4 = vunpack.c.l.bf16 %v1075_v54  ;;  %v173_v54 = vsub.s32 5, %v1906_v9 }
  0x82   :  { %988 = vmatpush1.bf16.msra.mxu0 %v1419_v6  ;;  %1041 = vmatpush1.bf16.msra.mxu1 %v1421_v7 }
  0x85   :  { %990 = vmatmul.mubr.bf16.vlgmr.msra.gmra.mrb[8].mxu0 %v1706_v10  ;;  %1043 = vmatmul.mubr.bf16.vlgmr.msra.gmra.mrb[8].mxu1 %v1706_v10  ;;  %v161_v10 = vsub.s32 2, %v1906_v9 }
  0x86   :  { %999 = vmatprep.mubr.bf16.mxu0 %v1723_v19  ;;  %1052 = vmatprep.mubr.bf16.mxu1 %v1723_v19  ;;  %v165_v19 = vsub.s32 3, %v1906_v9 }
  0x87   :  { %v1933_v18 = vrot.slane %v1912_v12, %v161_v10 }
  0x88   :  { %v1944_v24 = vrot.slane %v1912_v12, %v165_v19 }
  0x8d   :  { %1000 = vmatmul.mubr.bf16.gmra.mrb[12].mxu0 %v1750_v30  ;;  %1053 = vmatmul.mubr.bf16.gmra.mrb[12].mxu1 %v1750_v30  ;;  %v1063_v30 = vld [vmem:[%s2092_s3] sm:$0xff] }
  0x8e   :  { %v1079_v22 = vunpack.c.l.bf16 %v1063_v30  ;;  %v1080_v27 = vunpack.c.h.bf16 %v1063_v30 }
 0x118   :  { %v885_v26 = vpop.f32.mrb[0].mxu0  ;;  %v938_v33 = vpop.f32.mrb[0].mxu1 }
 0x119   :  { %v886_v32 = vadd.f32 %v885_v26, %v1924_v15  ;;  %v887_v34 = vpop.f32.mrb[1].mxu0  ;;  %v939_v38 = vadd.f32 %v938_v33, %v1933_v18  ;;  %v940_v40 = vpop.f32.mrb[1].mxu1  ;;  %v1106_v26 = vunpack.c.h.bf16 %v1076_v60  ;;  %v1069_v60 = vld [vmem:[%s2092_s3 + $0x30] sm:$0xff] }
 0x11a   :  { %v888_v39 = vadd.f32 %v887_v34, %v1936_v20  ;;  %v889_v41 = vpop.f32.mrb[2].mxu0  ;;  %v941_v45 = vadd.f32 %v940_v40, %v1944_v24  ;;  %v942_v47 = vpop.f32.mrb[2].mxu1 }
 0x11b   :  { %v1111_v44 = vadd.f32 %v1079_v22, %v886_v32  ;;  %v890_v46 = vadd.f32 %v889_v41, %v1924_v15  ;;  %v891_v48 = vpop.f32.mrb[3].mxu0  ;;  %v1113_v50 = vadd.f32 %v1081_v23, %v939_v38  ;;  %v943_v52 = vadd.f32 %v942_v47, %v1933_v18  ;;  %v944_v53 = vpop.f32.mrb[3].mxu1 }
 0x11c   :  { %v1112_v51 = vadd.f32 %v1080_v27, %v888_v39  ;;  %v892_v56 = vadd.f32 %v891_v48, %v1936_v20  ;;  %v1114_v57 = vadd.f32 %v1082_v28, %v941_v45  ;;  %v945_v59 = vadd.f32 %v944_v53, %v1944_v24 }
 0x11d   :  { %v1143_v55 = vmax.f32 %v1111_v44, 0.0  ;;  %v1119_v58 = vadd.f32 %v1087_v29, %v890_v46  ;;  %v1145_v61 = vmax.f32 %v1113_v50, 0.0  ;;  %v1121_v63 = vadd.f32 %v1089_v31, %v943_v52 }
 0x11e   :  { %v1144_v62 = vmax.f32 %v1112_v51, 0.0  ;;  %v1120_v0 = vadd.f32 %v1088_v35, %v892_v56  ;;  %v1146_v1 = vmax.f32 %v1114_v57, 0.0  ;;  %v1122_v3 = vadd.f32 %v1090_v36, %v945_v59  ;;  %v1065_v57 = vld [vmem:[%s2092_s3 + $0x10] sm:$0xff] }
 0x11f   :  { %v1151_v2 = vmax.f32 %v1119_v58, 0.0  ;;  %v1153_v6 = vmax.f32 %v1121_v63, 0.0  ;;  %v169_v56 = vsub.s32 4, %v1906_v9  ;;  %v177_v53 = vsub.s32 6, %v1906_v9  ;;  %v1066_v58 = vld [vmem:[%s2092_s3 + $0x18] sm:$0xff]  ;;  %v2029_v63 = vld [vmem:[%s2092_s3 + $0x50] sm:$0xff] }
 0x120   :  { %v1439_v5 = vpack.c.bf16 %v1144_v62, %v1143_v55  ;;  %v1152_v7 = vmax.f32 %v1120_v0, 0.0  ;;  %v895_v8 = vpop.f32.mrb[4].mxu0  ;;  %v1440_v10 = vpack.c.bf16 %v1146_v1, %v1145_v61  ;;  %v1154_v13 = vmax.f32 %v1122_v3, 0.0  ;;  %v948_v30 = vpop.f32.mrb[4].mxu1  ;;  %v1070_v61 = vld [vmem:[%s2092_s3 + $0x38] sm:$0xff] }
 0x121   :  { %v896_v19 = vadd.f32 %v895_v8, %v1924_v15  ;;  %v897_v14 = vpop.f32.mrb[5].mxu0  ;;  %v949_v21 = vadd.f32 %v948_v30, %v1933_v18  ;;  %v950_v23 = vpop.f32.mrb[5].mxu1  ;;  %v181_v55 = vsub.s32 7, %v1906_v9  ;;  %v2012_v59 = vrot.slane %v1912_v12, %v169_v56  ;;  %v2037_v3 = vld [vmem:[%s2092_s3 + $0x58] sm:$0xff] }
 0x122   :  { %1271 = vst [vmem:[%s2093_s4] sm:$0xff] %v1439_v5  ;;  %v1443_v17 = vpack.c.bf16 %v1152_v7, %v1151_v2  ;;  %v898_v22 = vadd.f32 %v897_v14, %v1936_v20  ;;  %v899_v25 = vpop.f32.mrb[6].mxu0  ;;  %1272 = vst [vmem:[%s2093_s4 + $0x8] sm:$0xff] %v1440_v10  ;;  %v1444_v27 = vpack.c.bf16 %v1154_v13, %v1153_v6  ;;  %v952_v32 = vpop.f32.mrb[6].mxu1  ;;  %v1083_v0 = vunpack.c.l.bf16 %v1065_v57 }
 0x123   :  { %v1127_v28 = vadd.f32 %v1095_v37, %v896_v19  ;;  %v951_v29 = vadd.f32 %v950_v23, %v1944_v24  ;;  %v900_v31 = vadd.f32 %v899_v25, %v1924_v15  ;;  %v901_v33 = vpop.f32.mrb[7].mxu0  ;;  %v1129_v34 = vadd.f32 %v1097_v42, %v949_v21  ;;  %v954_v39 = vpop.f32.mrb[7].mxu1 }
 0x124   :  { %1275 = vst [vmem:[%s2093_s4 + $0x20] sm:$0xff] %v1443_v17  ;;  %v1128_v35 = vadd.f32 %v1096_v43, %v898_v22  ;;  %v953_v36 = vadd.f32 %v952_v32, %v1933_v18  ;;  %v902_v38 = vadd.f32 %v901_v33, %v1936_v20  ;;  %1276 = vst [vmem:[%s2093_s4 + $0x28] sm:$0xff] %v1444_v27  ;;  %v1085_v1 = vunpack.c.l.bf16 %v1066_v58 }
 0x125   :  { %v1159_v37 = vmax.f32 %v1127_v28, 0.0  ;;  %v1130_v40 = vadd.f32 %v1098_v49, %v951_v29  ;;  %v1135_v15 = vadd.f32 %v1103_v4, %v900_v31  ;;  %v955_v41 = vadd.f32 %v954_v39, %v1944_v24 }
 0x126   :  { %v1161_v44 = vmax.f32 %v1129_v34, 0.0  ;;  %v1160_v45 = vmax.f32 %v1128_v35, 0.0  ;;  %v1137_v46 = vadd.f32 %v1105_v11, %v953_v36  ;;  %v1136_v47 = vadd.f32 %v1104_v16, %v902_v38  ;;  %v1077_v38 = vld [vmem:[%s2092_s3 + $0x70] sm:$0xff] }
 0x127   :  { %v1162_v42 = vmax.f32 %v1130_v40, 0.0  ;;  %v1167_v43 = vmax.f32 %v1135_v15, 0.0  ;;  %v1138_v48 = vadd.f32 %v1106_v26, %v955_v41  ;;  %v2021_v9 = vrot.slane %v1912_v12, %v177_v53  ;;  %v1078_v41 = vld [vmem:[%s2092_s3 + $0x78] sm:$0xff] }
 0x128   :  { %v1447_v18 = vpack.c.bf16 %v1160_v45, %v1159_v37  ;;  %v1169_v50 = vmax.f32 %v1137_v46, 0.0  ;;  %v1168_v20 = vmax.f32 %v1136_v47, 0.0  ;;  %v2024_v62 = vrot.slane %v1912_v12, %v173_v54 }
 0x129   :  { %v1448_v51 = vpack.c.bf16 %v1162_v42, %v1161_v44  ;;  %v1170_v52 = vmax.f32 %v1138_v48, 0.0  ;;  %v2032_v2 = vrot.slane %v1912_v12, %v181_v55  ;;  %v1084_v5 = vunpack.c.h.bf16 %v1065_v57 }
 0x12a   :  { %1279 = vst [vmem:[%s2093_s4 + $0x40] sm:$0xff] %v1447_v18  ;;  %v1451_v49 = vpack.c.bf16 %v1168_v20, %v1167_v43  ;;  %v1086_v6 = vunpack.c.h.bf16 %v1066_v58  ;;  %v1091_v7 = vunpack.c.l.bf16 %v1069_v60  ;;  %v1093_v8 = vunpack.c.l.bf16 %v1070_v61 }
 0x12b   :  { %1280 = vst [vmem:[%s2093_s4 + $0x48] sm:$0xff] %v1448_v51  ;;  %v1452_v24 = vpack.c.bf16 %v1170_v52, %v1169_v50  ;;  %v1092_v19 = vunpack.c.h.bf16 %v1069_v60  ;;  %v1094_v30 = vunpack.c.h.bf16 %v1070_v61  ;;  %v1099_v14 = vunpack.c.l.bf16 %v2029_v63 }
 0x12c   :  { %1283 = vst [vmem:[%s2093_s4 + $0x60] sm:$0xff] %v1451_v49  ;;  %v1101_v22 = vunpack.c.l.bf16 %v2037_v3  ;;  %v1100_v23 = vunpack.c.h.bf16 %v2029_v63  ;;  %v1102_v31 = vunpack.c.h.bf16 %v2037_v3  ;;  %v1107_v18 = vunpack.c.l.bf16 %v1077_v38 }
 0x12d   :  { %1284 = vst [vmem:[%s2093_s4 + $0x68] sm:$0xff] %v1452_v24  ;;  %v1109_v49 = vunpack.c.l.bf16 %v1078_v41  ;;  %v1108_v57 = vunpack.c.h.bf16 %v1077_v38 }
 0x158   :  { %v991_v4 = vpop.f32.mrb[8].mxu0  ;;  %v1044_v10 = vpop.f32.mrb[8].mxu1 }
 0x159   :  { %v992_v11 = vadd.f32 %v991_v4, %v2012_v59  ;;  %v993_v13 = vpop.f32.mrb[9].mxu0  ;;  %v1045_v12 = vadd.f32 %v1044_v10, %v2021_v9  ;;  %v1046_v17 = vpop.f32.mrb[9].mxu1 }
 0x15a   :  { %v994_v16 = vadd.f32 %v993_v13, %v2024_v62  ;;  %v995_v21 = vpop.f32.mrb[10].mxu0  ;;  %v1047_v26 = vadd.f32 %v1046_v17, %v2032_v2  ;;  %v1048_v28 = vpop.f32.mrb[10].mxu1 }
 0x15b   :  { %v1115_v25 = vadd.f32 %v1083_v0, %v992_v11  ;;  %v996_v27 = vadd.f32 %v995_v21, %v2012_v59  ;;  %v997_v29 = vpop.f32.mrb[11].mxu0  ;;  %v1117_v32 = vadd.f32 %v1085_v1, %v1045_v12  ;;  %v1049_v34 = vadd.f32 %v1048_v28, %v2021_v9  ;;  %v1050_v36 = vpop.f32.mrb[11].mxu1 }
 0x15c   :  { %v1116_v33 = vadd.f32 %v1084_v5, %v994_v16  ;;  %v998_v35 = vadd.f32 %v997_v29, %v2024_v62  ;;  %v1118_v37 = vadd.f32 %v1086_v6, %v1047_v26  ;;  %v1051_v15 = vadd.f32 %v1050_v36, %v2032_v2 }
 0x15d   :  { %v1147_v39 = vmax.f32 %v1115_v25, 0.0  ;;  %v1123_v40 = vadd.f32 %v1091_v7, %v996_v27  ;;  %v1149_v44 = vmax.f32 %v1117_v32, 0.0  ;;  %v1125_v46 = vadd.f32 %v1093_v8, %v1049_v34 }
 0x15e   :  { %v1148_v45 = vmax.f32 %v1116_v33, 0.0  ;;  %v1124_v47 = vadd.f32 %v1092_v19, %v998_v35  ;;  %v1150_v42 = vmax.f32 %v1118_v37, 0.0  ;;  %v1126_v48 = vadd.f32 %v1094_v30, %v1051_v15 }
 0x15f   :  { %v1155_v43 = vmax.f32 %v1123_v40, 0.0  ;;  %v1157_v20 = vmax.f32 %v1125_v46, 0.0  ;;  %v1110_v1 = vunpack.c.h.bf16 %v1078_v41 }
 0x160   :  { %v1441_v50 = vpack.c.bf16 %v1148_v45, %v1147_v39  ;;  %v1156_v51 = vmax.f32 %v1124_v47, 0.0  ;;  %v1001_v52 = vpop.f32.mrb[12].mxu0  ;;  %v1442_v24 = vpack.c.bf16 %v1150_v42, %v1149_v44  ;;  %v1158_v56 = vmax.f32 %v1126_v48, 0.0  ;;  %v1054_v54 = vpop.f32.mrb[12].mxu1 }
 0x161   :  { %v1002_v53 = vadd.f32 %v1001_v52, %v2012_v59  ;;  %v1003_v55 = vpop.f32.mrb[13].mxu0  ;;  %v1055_v60 = vadd.f32 %v1054_v54, %v2021_v9  ;;  %v1056_v63 = vpop.f32.mrb[13].mxu1 }
 0x162   :  { %1273 = vst [vmem:[%s2093_s4 + $0x10] sm:$0xff] %v1441_v50  ;;  %v1445_v58 = vpack.c.bf16 %v1156_v51, %v1155_v43  ;;  %v1004_v61 = vadd.f32 %v1003_v55, %v2024_v62  ;;  %v1005_v0 = vpop.f32.mrb[14].mxu0  ;;  %1274 = vst [vmem:[%s2093_s4 + $0x18] sm:$0xff] %v1442_v24  ;;  %v1446_v3 = vpack.c.bf16 %v1158_v56, %v1157_v20  ;;  %v1058_v7 = vpop.f32.mrb[14].mxu1 }
 0x163   :  { %v1131_v4 = vadd.f32 %v1099_v14, %v1002_v53  ;;  %v1057_v5 = vadd.f32 %v1056_v63, %v2032_v2  ;;  %v1006_v6 = vadd.f32 %v1005_v0, %v2012_v59  ;;  %v1007_v8 = vpop.f32.mrb[15].mxu0  ;;  %v1133_v11 = vadd.f32 %v1101_v22, %v1055_v60  ;;  %v1060_v30 = vpop.f32.mrb[15].mxu1 }
 0x164   :  { %1277 = vst [vmem:[%s2093_s4 + $0x30] sm:$0xff] %v1445_v58  ;;  %v1132_v10 = vadd.f32 %v1100_v23, %v1004_v61  ;;  %v1059_v13 = vadd.f32 %v1058_v7, %v2021_v9  ;;  %v1008_v19 = vadd.f32 %v1007_v8, %v2024_v62  ;;  %1278 = vst [vmem:[%s2093_s4 + $0x38] sm:$0xff] %v1446_v3 }
 0x165   :  { %v1163_v14 = vmax.f32 %v1131_v4, 0.0  ;;  %v1134_v12 = vadd.f32 %v1102_v31, %v1057_v5  ;;  %v1139_v59 = vadd.f32 %v1107_v18, %v1006_v6  ;;  %v1061_v16 = vadd.f32 %v1060_v30, %v2032_v2 }
 0x166   :  { %v1165_v17 = vmax.f32 %v1133_v11, 0.0  ;;  %v1164_v21 = vmax.f32 %v1132_v10, 0.0  ;;  %v1141_v25 = vadd.f32 %v1109_v49, %v1059_v13  ;;  %v1140_v26 = vadd.f32 %v1108_v57, %v1008_v19 }
 0x167   :  { %v1166_v22 = vmax.f32 %v1134_v12, 0.0  ;;  %v1171_v23 = vmax.f32 %v1139_v59, 0.0  ;;  %v1142_v27 = vadd.f32 %v1110_v1, %v1061_v16 }
 0x168   :  { %v1449_v9 = vpack.c.bf16 %v1164_v21, %v1163_v14  ;;  %v1173_v28 = vmax.f32 %v1141_v25, 0.0  ;;  %v1172_v62 = vmax.f32 %v1140_v26, 0.0 }
 0x169   :  { %v1450_v29 = vpack.c.bf16 %v1166_v22, %v1165_v17  ;;  %v1174_v32 = vmax.f32 %v1142_v27, 0.0 }
 0x16a   :  { %1281 = vst [vmem:[%s2093_s4 + $0x50] sm:$0xff] %v1449_v9  ;;  %v1453_v31 = vpack.c.bf16 %v1172_v62, %v1171_v23 }
 0x16b   :  { %1282 = vst [vmem:[%s2093_s4 + $0x58] sm:$0xff] %v1450_v29  ;;  %v1454_v2 = vpack.c.bf16 %v1174_v32, %v1173_v28 }
 0x16c   :  { %1285 = vst [vmem:[%s2093_s4 + $0x70] sm:$0xff] %v1453_v31 }
 0x16d   :  { %1286 = vst [vmem:[%s2093_s4 + $0x78] sm:$0xff] %v1454_v2 }

// kernel: _lambda_.71
= control target key start
LH: loop header
LB: loop body
LE: loop exit
PB: predicated region body
PF: predicated region fallthrough
CT: control target
= control target key end

     0   :  { %s2001_s1 = inlined_call_operand.vmem [shape: bf16[1024,256], index: 1, kind: input, shape index: {}]   ;;  %s2002_s0 = inlined_call_operand.vmem [shape: bf16[32,1024], index: 0, kind: input, shape index: {}]   ;;  %s2003_s2 = inlined_call_operand.vmem [shape: f32[1,256], index: 2, kind: input, shape index: {}]   ;;  %s2004_s3 = inlined_call_operand.vmem [shape: bf16[32,256], index: 3, kind: output, shape index: {}]  }
   0x1   :  { %v1326_v0 = vld [vmem:[%s2001_s1 + $0x4] ss:$8 sps:$4 sm:$0xff]   ;;  %v1330_v2 = vld [vmem:[%s2001_s1] ss:$8 sps:$4 sm:$0xff]   ;;  %v1332_v4 = vld [vmem:[%s2001_s1 + $0x14] ss:$8 sps:$4 sm:$0xff]  }
   0x2   :  { %v1328_v1 = vld [vmem:[%s2001_s1 + $0x204] ss:$8 sps:$4 sm:$0xff]   ;;  %890 = vmatprep.subr.bf16.mxu1 %v1326_v0  ;;  %v1331_v3 = vld [vmem:[%s2001_s1 + $0x200] ss:$8 sps:$4 sm:$0xff]   ;;  %v1334_v5 = vld [vmem:[%s2001_s1 + $0x214] ss:$8 sps:$4 sm:$0xff]  }
   0x3   :  { %996 = vmatprep.subr.bf16.mxu0 %v1328_v1  ;;  %891 = vmatpush1.bf16.msra.mxu1 %v1330_v2  ;;  %v1336_v6 = vld [vmem:[%s2001_s1 + $0x10] ss:$8 sps:$4 sm:$0xff]   ;;  %v1338_v8 = vld [vmem:[%s2001_s1 + $0x24] ss:$8 sps:$4 sm:$0xff]   ;;  %v1342_v10 = vld [vmem:[%s2001_s1 + $0x20] ss:$8 sps:$4 sm:$0xff]  }
   0x4   :  { %997 = vmatpush1.bf16.msra.mxu0 %v1331_v3  ;;  %892 = vmatprep.subr.bf16.mxu1 %v1332_v4  ;;  %v1337_v7 = vld [vmem:[%s2001_s1 + $0x210] ss:$8 sps:$4 sm:$0xff]   ;;  %v1340_v9 = vld [vmem:[%s2001_s1 + $0x224] ss:$8 sps:$4 sm:$0xff]   ;;  %v1343_v11 = vld [vmem:[%s2001_s1 + $0x220] ss:$8 sps:$4 sm:$0xff]  }
   0x5   :  { %998 = vmatprep.subr.bf16.mxu0 %v1334_v5  ;;  %v1344_v12 = vld [vmem:[%s2001_s1 + $0x34] ss:$8 sps:$4 sm:$0xff]   ;;  %v1348_v14 = vld [vmem:[%s2001_s1 + $0x30] ss:$8 sps:$4 sm:$0xff]   ;;  %v1350_v16 = vld [vmem:[%s2001_s1 + $0x44] ss:$8 sps:$4 sm:$0xff]  }
   0x6   :  { %v1346_v13 = vld [vmem:[%s2001_s1 + $0x234] ss:$8 sps:$4 sm:$0xff]   ;;  %v1349_v15 = vld [vmem:[%s2001_s1 + $0x230] ss:$8 sps:$4 sm:$0xff]   ;;  %v1352_v17 = vld [vmem:[%s2001_s1 + $0x244] ss:$8 sps:$4 sm:$0xff]  }
   0x7   :  { %893 = vmatpush1.bf16.msra.mxu1 %v1336_v6  ;;  %v1354_v18 = vld [vmem:[%s2001_s1 + $0x40] ss:$8 sps:$4 sm:$0xff]   ;;  %v1356_v20 = vld [vmem:[%s2001_s1 + $0x54] ss:$8 sps:$4 sm:$0xff]   ;;  %v1360_v22 = vld [vmem:[%s2001_s1 + $0x50] ss:$8 sps:$4 sm:$0xff]  }
   0x8   :  { %999 = vmatpush1.bf16.msra.mxu0 %v1337_v7  ;;  %894 = vmatprep.subr.bf16.mxu1 %v1338_v8  ;;  %v1355_v19 = vld [vmem:[%s2001_s1 + $0x240] ss:$8 sps:$4 sm:$0xff]   ;;  %v1358_v21 = vld [vmem:[%s2001_s1 + $0x254] ss:$8 sps:$4 sm:$0xff]   ;;  %v1361_v23 = vld [vmem:[%s2001_s1 + $0x250] ss:$8 sps:$4 sm:$0xff]  }
   0x9   :  { %1000 = vmatprep.subr.bf16.mxu0 %v1340_v9  ;;  %v1362_v24 = vld [vmem:[%s2001_s1 + $0x64] ss:$8 sps:$4 sm:$0xff]   ;;  %v1366_v26 = vld [vmem:[%s2001_s1 + $0x60] ss:$8 sps:$4 sm:$0xff]   ;;  %v1368_v28 = vld [vmem:[%s2001_s1 + $0x74] ss:$8 sps:$4 sm:$0xff]  }
   0xa   :  { %v1364_v25 = vld [vmem:[%s2001_s1 + $0x264] ss:$8 sps:$4 sm:$0xff]   ;;  %v1367_v27 = vld [vmem:[%s2001_s1 + $0x260] ss:$8 sps:$4 sm:$0xff]   ;;  %v1370_v29 = vld [vmem:[%s2001_s1 + $0x274] ss:$8 sps:$4 sm:$0xff]  }
   0xb   :  { %895 = vmatpush1.bf16.msra.mxu1 %v1342_v10  ;;  %v1372_v30 = vld [vmem:[%s2001_s1 + $0x70] ss:$8 sps:$4 sm:$0xff]   ;;  %v1374_v32 = vld [vmem:[%s2001_s1 + $0x84] ss:$8 sps:$4 sm:$0xff]   ;;  %v1378_v34 = vld [vmem:[%s2001_s1 + $0x80] ss:$8 sps:$4 sm:$0xff]  }
   0xc   :  { %1001 = vmatpush1.bf16.msra.mxu0 %v1343_v11  ;;  %896 = vmatprep.subr.bf16.mxu1 %v1344_v12  ;;  %v1373_v31 = vld [vmem:[%s2001_s1 + $0x270] ss:$8 sps:$4 sm:$0xff]   ;;  %v1376_v33 = vld [vmem:[%s2001_s1 + $0x284] ss:$8 sps:$4 sm:$0xff]   ;;  %v1379_v35 = vld [vmem:[%s2001_s1 + $0x280] ss:$8 sps:$4 sm:$0xff]  }
   0xd   :  { %1002 = vmatprep.subr.bf16.mxu0 %v1346_v13  ;;  %v1380_v36 = vld [vmem:[%s2001_s1 + $0x94] ss:$8 sps:$4 sm:$0xff]   ;;  %v1384_v38 = vld [vmem:[%s2001_s1 + $0x90] ss:$8 sps:$4 sm:$0xff]   ;;  %v1386_v40 = vld [vmem:[%s2001_s1 + $0xa4] ss:$8 sps:$4 sm:$0xff]  }
   0xe   :  { %v1382_v37 = vld [vmem:[%s2001_s1 + $0x294] ss:$8 sps:$4 sm:$0xff]   ;;  %v1385_v39 = vld [vmem:[%s2001_s1 + $0x290] ss:$8 sps:$4 sm:$0xff]   ;;  %v1388_v41 = vld [vmem:[%s2001_s1 + $0x2a4] ss:$8 sps:$4 sm:$0xff]  }
   0xf   :  { %897 = vmatpush1.bf16.msra.mxu1 %v1348_v14  ;;  %v1390_v42 = vld [vmem:[%s2001_s1 + $0xa0] ss:$8 sps:$4 sm:$0xff]   ;;  %v1392_v44 = vld [vmem:[%s2001_s1 + $0xb4] ss:$8 sps:$4 sm:$0xff]   ;;  %v1396_v46 = vld [vmem:[%s2001_s1 + $0xb0] ss:$8 sps:$4 sm:$0xff]  }
  0x10   :  { %1003 = vmatpush1.bf16.msra.mxu0 %v1349_v15  ;;  %898 = vmatprep.subr.bf16.mxu1 %v1350_v16  ;;  %v1391_v43 = vld [vmem:[%s2001_s1 + $0x2a0] ss:$8 sps:$4 sm:$0xff]   ;;  %v1394_v45 = vld [vmem:[%s2001_s1 + $0x2b4] ss:$8 sps:$4 sm:$0xff]   ;;  %v1397_v47 = vld [vmem:[%s2001_s1 + $0x2b0] ss:$8 sps:$4 sm:$0xff]  }
  0x11   :  { %1004 = vmatprep.subr.bf16.mxu0 %v1352_v17  ;;  %v14_v48 = vld [vmem:[%s2002_s0] sm:$0xff]  ;;  %v16_v53 = vld [vmem:[%s2002_s0 + $0x10] sm:$0xff] }
  0x12   :  { %v18_v49 = vld [vmem:[%s2002_s0 + $0x20] sm:$0xff]  ;;  %v20_v54 = vld [vmem:[%s2002_s0 + $0x30] sm:$0xff] }
  0x13   :  { %899 = vmatpush1.bf16.msra.mxu1 %v1354_v18  ;;  %v1398_v50 = vld [vmem:[%s2001_s1 + $0xc4] ss:$8 sps:$4 sm:$0xff]   ;;  %v1143_v52 = vcombine.high %v14_v48, %v18_v49  ;;  %v1147_v55 = vcombine.high %v16_v53, %v20_v54  ;;  %v1402_v56 = vld [vmem:[%s2001_s1 + $0xc0] ss:$8 sps:$4 sm:$0xff]   ;;  %v1404_v58 = vld [vmem:[%s2001_s1 + $0xd4] ss:$8 sps:$4 sm:$0xff]   ;;  %v1142_v8 = vcombine.low %v14_v48, %v18_v49  ;;  %v1146_v10 = vcombine.low %v16_v53, %v20_v54 }
  0x14   :  { %1005 = vmatpush1.bf16.msra.mxu0 %v1355_v19  ;;  %900 = vmatprep.subr.bf16.mxu1 %v1356_v20  ;;  %v1400_v51 = vld [vmem:[%s2001_s1 + $0x2c4] ss:$8 sps:$4 sm:$0xff]   ;;  %v1403_v57 = vld [vmem:[%s2001_s1 + $0x2c0] ss:$8 sps:$4 sm:$0xff]   ;;  %v1406_v59 = vld [vmem:[%s2001_s1 + $0x2d4] ss:$8 sps:$4 sm:$0xff]  }
  0x15   :  { %1006 = vmatprep.subr.bf16.mxu0 %v1358_v21  ;;  %922 = vmatprep.mubr.bf16.mxu1 %v1143_v52  ;;  %v1408_v60 = vld [vmem:[%s2001_s1 + $0xd0] ss:$8 sps:$4 sm:$0xff]   ;;  %v1410_v62 = vld [vmem:[%s2001_s1 + $0xe4] ss:$8 sps:$4 sm:$0xff]   ;;  %v1414_v0 = vld [vmem:[%s2001_s1 + $0xe0] ss:$8 sps:$4 sm:$0xff]  }
  0x16   :  { %1028 = vmatprep.mubr.bf16.mxu0 %v1147_v55  ;;  %v1409_v61 = vld [vmem:[%s2001_s1 + $0x2d0] ss:$8 sps:$4 sm:$0xff]   ;;  %v1412_v63 = vld [vmem:[%s2001_s1 + $0x2e4] ss:$8 sps:$4 sm:$0xff]   ;;  %v1415_v1 = vld [vmem:[%s2001_s1 + $0x2e0] ss:$8 sps:$4 sm:$0xff]  }
  0x17   :  { %901 = vmatpush1.bf16.msra.mxu1 %v1360_v22  ;;  %v1416_v2 = vld [vmem:[%s2001_s1 + $0xf4] ss:$8 sps:$4 sm:$0xff]   ;;  %v1420_v4 = vld [vmem:[%s2001_s1 + $0xf0] ss:$8 sps:$4 sm:$0xff]   ;;  %v1424_v6 = vld [vmem:[%s2001_s1 + $0x104] ss:$8 sps:$4 sm:$0xff]  }
  0x18   :  { %1007 = vmatpush1.bf16.msra.mxu0 %v1361_v23  ;;  %902 = vmatprep.subr.bf16.mxu1 %v1362_v24  ;;  %v1418_v3 = vld [vmem:[%s2001_s1 + $0x2f4] ss:$8 sps:$4 sm:$0xff]   ;;  %v1421_v5 = vld [vmem:[%s2001_s1 + $0x2f0] ss:$8 sps:$4 sm:$0xff]   ;;  %v1427_v7 = vld [vmem:[%s2001_s1 + $0x304] ss:$8 sps:$4 sm:$0xff]  }
  0x19   :  { %1008 = vmatprep.subr.bf16.mxu0 %v1364_v25  ;;  %v1422_v9 = vld [vmem:[%s2001_s1 + $0x100] ss:$8 sps:$4 sm:$0xff]   ;;  %v1430_v12 = vld [vmem:[%s2001_s1 + $0x114] ss:$8 sps:$4 sm:$0xff]   ;;  %v1428_v14 = vld [vmem:[%s2001_s1 + $0x110] ss:$8 sps:$4 sm:$0xff]  }
  0x1a   :  { %v1425_v11 = vld [vmem:[%s2001_s1 + $0x300] ss:$8 sps:$4 sm:$0xff]   ;;  %v1433_v13 = vld [vmem:[%s2001_s1 + $0x314] ss:$8 sps:$4 sm:$0xff]   ;;  %v1431_v15 = vld [vmem:[%s2001_s1 + $0x310] ss:$8 sps:$4 sm:$0xff]  }
  0x1b   :  { %903 = vmatpush1.bf16.msra.mxu1 %v1366_v26  ;;  %v1436_v16 = vld [vmem:[%s2001_s1 + $0x124] ss:$8 sps:$4 sm:$0xff]   ;;  %v1434_v18 = vld [vmem:[%s2001_s1 + $0x120] ss:$8 sps:$4 sm:$0xff]   ;;  %v1442_v20 = vld [vmem:[%s2001_s1 + $0x134] ss:$8 sps:$4 sm:$0xff]  }
  0x1c   :  { %1009 = vmatpush1.bf16.msra.mxu0 %v1367_v27  ;;  %904 = vmatprep.subr.bf16.mxu1 %v1368_v28  ;;  %v1439_v17 = vld [vmem:[%s2001_s1 + $0x324] ss:$8 sps:$4 sm:$0xff]   ;;  %v1437_v19 = vld [vmem:[%s2001_s1 + $0x320] ss:$8 sps:$4 sm:$0xff]   ;;  %v1445_v21 = vld [vmem:[%s2001_s1 + $0x334] ss:$8 sps:$4 sm:$0xff]  }
  0x1d   :  { %1010 = vmatprep.subr.bf16.mxu0 %v1370_v29  ;;  %v1440_v22 = vld [vmem:[%s2001_s1 + $0x130] ss:$8 sps:$4 sm:$0xff]   ;;  %v1448_v24 = vld [vmem:[%s2001_s1 + $0x144] ss:$8 sps:$4 sm:$0xff]   ;;  %v1446_v26 = vld [vmem:[%s2001_s1 + $0x140] ss:$8 sps:$4 sm:$0xff]  }
  0x1e   :  { %v1443_v23 = vld [vmem:[%s2001_s1 + $0x330] ss:$8 sps:$4 sm:$0xff]   ;;  %v1451_v25 = vld [vmem:[%s2001_s1 + $0x344] ss:$8 sps:$4 sm:$0xff]   ;;  %v1449_v27 = vld [vmem:[%s2001_s1 + $0x340] ss:$8 sps:$4 sm:$0xff]  }
  0x1f   :  { %905 = vmatpush1.bf16.msra.mxu1 %v1372_v30  ;;  %v1454_v28 = vld [vmem:[%s2001_s1 + $0x154] ss:$8 sps:$4 sm:$0xff]   ;;  %v22_v30 = vld [vmem:[%s2002_s0 + $0x40] sm:$0xff]  ;;  %v1464_v52 = vld [vmem:[%s2001_s1 + $0x170] ss:$8 sps:$4 sm:$0xff]  }
  0x20   :  { %1011 = vmatpush1.bf16.msra.mxu0 %v1373_v31  ;;  %906 = vmatprep.subr.bf16.mxu1 %v1374_v32  ;;  %v1457_v29 = vld [vmem:[%s2001_s1 + $0x354] ss:$8 sps:$4 sm:$0xff]   ;;  %v26_v31 = vld [vmem:[%s2002_s0 + $0x60] sm:$0xff]  ;;  %v1467_v53 = vld [vmem:[%s2001_s1 + $0x370] ss:$8 sps:$4 sm:$0xff]  }
  0x21   :  { %1012 = vmatprep.subr.bf16.mxu0 %v1376_v33  ;;  %v1151_v32 = vcombine.high %v22_v30, %v26_v31  ;;  %v24_v33 = vld [vmem:[%s2002_s0 + $0x50] sm:$0xff]  ;;  %v1472_v54 = vld [vmem:[%s2001_s1 + $0x184] ss:$8 sps:$4 sm:$0xff]  }
  0x22   :  { %v1469_v48 = vld [vmem:[%s2001_s1 + $0x374] ss:$8 sps:$4 sm:$0xff]   ;;  %v1475_v55 = vld [vmem:[%s2001_s1 + $0x384] ss:$8 sps:$4 sm:$0xff]  }
  0x23   :  { %907 = vmatpush1.bf16.msra.mxu1 %v1378_v34  ;;  %v28_v34 = vld [vmem:[%s2002_s0 + $0x70] sm:$0xff] }
  0x24   :  { %1013 = vmatpush1.bf16.msra.mxu0 %v1379_v35  ;;  %908 = vmatprep.subr.bf16.mxu1 %v1380_v36  ;;  %v1452_v35 = vld [vmem:[%s2001_s1 + $0x150] ss:$8 sps:$4 sm:$0xff]  }
  0x25   :  { %1014 = vmatprep.subr.bf16.mxu0 %v1382_v37  ;;  %v1455_v36 = vld [vmem:[%s2001_s1 + $0x350] ss:$8 sps:$4 sm:$0xff]   ;;  %v1155_v37 = vcombine.high %v24_v33, %v28_v34 }
  0x27   :  { %909 = vmatpush1.bf16.msra.mxu1 %v1384_v38  ;;  %v1150_v38 = vcombine.low %v22_v30, %v26_v31 }
  0x28   :  { %1015 = vmatpush1.bf16.msra.mxu0 %v1385_v39  ;;  %910 = vmatprep.subr.bf16.mxu1 %v1386_v40  ;;  %v1154_v39 = vcombine.low %v24_v33, %v28_v34  ;;  %v1460_v40 = vld [vmem:[%s2001_s1 + $0x164] ss:$8 sps:$4 sm:$0xff]  }
  0x29   :  { %1016 = vmatprep.subr.bf16.mxu0 %v1388_v41  ;;  %v1463_v41 = vld [vmem:[%s2001_s1 + $0x364] ss:$8 sps:$4 sm:$0xff]  }
  0x2b   :  { %911 = vmatpush1.bf16.msra.mxu1 %v1390_v42  ;;  %v1458_v42 = vld [vmem:[%s2001_s1 + $0x160] ss:$8 sps:$4 sm:$0xff]  }
  0x2c   :  { %1017 = vmatpush1.bf16.msra.mxu0 %v1391_v43  ;;  %912 = vmatprep.subr.bf16.mxu1 %v1392_v44  ;;  %v1461_v43 = vld [vmem:[%s2001_s1 + $0x360] ss:$8 sps:$4 sm:$0xff]  }
  0x2d   :  { %1018 = vmatprep.subr.bf16.mxu0 %v1394_v45  ;;  %v1841_v44 = vld [vmem:[%s2002_s0 + $0x8] sm:$0xff] }
  0x2e   :  { %v1846_v45 = vld [vmem:[%s2002_s0 + $0x28] sm:$0xff] }
  0x2f   :  { %913 = vmatpush1.bf16.msra.mxu1 %v1396_v46  ;;  %v1851_v46 = vld [vmem:[%s2002_s0 + $0x18] sm:$0xff]  ;;  %v1145_v49 = vcombine.high %v1841_v44, %v1846_v45 }
  0x30   :  { %1019 = vmatpush1.bf16.msra.mxu0 %v1397_v47  ;;  %914 = vmatprep.subr.bf16.mxu1 %v1398_v50  ;;  %v1466_v47 = vld [vmem:[%s2001_s1 + $0x174] ss:$8 sps:$4 sm:$0xff]  }
  0x31   :  { %1020 = vmatprep.subr.bf16.mxu0 %v1400_v51  ;;  %v1864_v50 = vld [vmem:[%s2002_s0 + $0x38] sm:$0xff] }
  0x32   :  { %v1149_v51 = vcombine.high %v1851_v46, %v1864_v50 }
  0x33   :  { %915 = vmatpush1.bf16.msra.mxu1 %v1402_v56  ;;  %v1470_v56 = vld [vmem:[%s2001_s1 + $0x180] ss:$8 sps:$4 sm:$0xff]  }
  0x34   :  { %1021 = vmatpush1.bf16.msra.mxu0 %v1403_v57  ;;  %916 = vmatprep.subr.bf16.mxu1 %v1404_v58  ;;  %v1473_v57 = vld [vmem:[%s2001_s1 + $0x380] ss:$8 sps:$4 sm:$0xff]   ;;  %v1478_v58 = vld [vmem:[%s2001_s1 + $0x194] ss:$8 sps:$4 sm:$0xff]  }
  0x35   :  { %1022 = vmatprep.subr.bf16.mxu0 %v1406_v59  ;;  %v1481_v59 = vld [vmem:[%s2001_s1 + $0x394] ss:$8 sps:$4 sm:$0xff]  }
  0x37   :  { %917 = vmatpush1.bf16.msra.mxu1 %v1408_v60  ;;  %v1476_v60 = vld [vmem:[%s2001_s1 + $0x190] ss:$8 sps:$4 sm:$0xff]  }
  0x38   :  { %1023 = vmatpush1.bf16.msra.mxu0 %v1409_v61  ;;  %918 = vmatprep.subr.bf16.mxu1 %v1410_v62  ;;  %v1479_v61 = vld [vmem:[%s2001_s1 + $0x390] ss:$8 sps:$4 sm:$0xff]   ;;  %v1484_v62 = vld [vmem:[%s2001_s1 + $0x1a4] ss:$8 sps:$4 sm:$0xff]  }
  0x39   :  { %1024 = vmatprep.subr.bf16.mxu0 %v1412_v63  ;;  %v1487_v63 = vld [vmem:[%s2001_s1 + $0x3a4] ss:$8 sps:$4 sm:$0xff]  }
  0x3b   :  { %919 = vmatpush1.bf16.msra.mxu1 %v1414_v0  ;;  %v1482_v0 = vld [vmem:[%s2001_s1 + $0x1a0] ss:$8 sps:$4 sm:$0xff]  }
  0x3c   :  { %1025 = vmatpush1.bf16.msra.mxu0 %v1415_v1  ;;  %920 = vmatprep.subr.bf16.mxu1 %v1416_v2  ;;  %v1485_v1 = vld [vmem:[%s2001_s1 + $0x3a0] ss:$8 sps:$4 sm:$0xff]   ;;  %v1490_v2 = vld [vmem:[%s2001_s1 + $0x1b4] ss:$8 sps:$4 sm:$0xff]  }
  0x3d   :  { %1026 = vmatprep.subr.bf16.mxu0 %v1418_v3  ;;  %v1493_v3 = vld [vmem:[%s2001_s1 + $0x3b4] ss:$8 sps:$4 sm:$0xff]  }
  0x3f   :  { %921 = vmatpush1.bf16.msra.mxu1 %v1420_v4  ;;  %v1488_v4 = vld [vmem:[%s2001_s1 + $0x1b0] ss:$8 sps:$4 sm:$0xff]  }
  0x40   :  { %1027 = vmatpush1.bf16.msra.mxu0 %v1421_v5  ;;  %943 = vmatprep.subr.bf16.mxu1 %v1424_v6  ;;  %v1491_v5 = vld [vmem:[%s2001_s1 + $0x3b0] ss:$8 sps:$4 sm:$0xff]   ;;  %v1496_v6 = vld [vmem:[%s2001_s1 + $0x1c4] ss:$8 sps:$4 sm:$0xff]  }
  0x41   :  { %1049 = vmatprep.subr.bf16.mxu0 %v1427_v7  ;;  %v1499_v7 = vld [vmem:[%s2001_s1 + $0x3c4] ss:$8 sps:$4 sm:$0xff]  }
  0x42   :  { %923 = vmatmul.mubr.bf16.vlgmr.msra.gmra.mrb[0].mxu1 %v1142_v8  ;;  %v1494_v8 = vld [vmem:[%s2001_s1 + $0x1c0] ss:$8 sps:$4 sm:$0xff]  }
  0x43   :  { %1029 = vmatmul.mubr.bf16.vlgmr.msra.gmra.mrb[0].mxu0 %v1146_v10  ;;  %944 = vmatpush1.bf16.msra.mxu1 %v1422_v9  ;;  %v1497_v9 = vld [vmem:[%s2001_s1 + $0x3c0] ss:$8 sps:$4 sm:$0xff]   ;;  %v1502_v10 = vld [vmem:[%s2001_s1 + $0x1d4] ss:$8 sps:$4 sm:$0xff]  }
  0x44   :  { %1050 = vmatpush1.bf16.msra.mxu0 %v1425_v11  ;;  %945 = vmatprep.subr.bf16.mxu1 %v1430_v12  ;;  %v1505_v11 = vld [vmem:[%s2001_s1 + $0x3d4] ss:$8 sps:$4 sm:$0xff]   ;;  %v1500_v12 = vld [vmem:[%s2001_s1 + $0x1d0] ss:$8 sps:$4 sm:$0xff]  }
  0x45   :  { %1051 = vmatprep.subr.bf16.mxu0 %v1433_v13  ;;  %932 = vmatprep.mubr.bf16.mxu1 %v1151_v32  ;;  %v1503_v13 = vld [vmem:[%s2001_s1 + $0x3d0] ss:$8 sps:$4 sm:$0xff]   ;;  %v160_v32 = vlaneseq }
  0x46   :  { %1038 = vmatprep.mubr.bf16.mxu0 %v1155_v37 }
  0x47   :  { %946 = vmatpush1.bf16.msra.mxu1 %v1428_v14  ;;  %v1508_v14 = vld [vmem:[%s2001_s1 + $0x1e4] ss:$8 sps:$4 sm:$0xff]   ;;  %v161_v33 = vshrl.u32 %v160_v32, 7 }
  0x48   :  { %1052 = vmatpush1.bf16.msra.mxu0 %v1431_v15  ;;  %947 = vmatprep.subr.bf16.mxu1 %v1436_v16  ;;  %v1511_v15 = vld [vmem:[%s2001_s1 + $0x3e4] ss:$8 sps:$4 sm:$0xff]   ;;  %v1506_v16 = vld [vmem:[%s2001_s1 + $0x1e0] ss:$8 sps:$4 sm:$0xff]  }
  0x49   :  { %1053 = vmatprep.subr.bf16.mxu0 %v1439_v17  ;;  %v1509_v17 = vld [vmem:[%s2001_s1 + $0x3e0] ss:$8 sps:$4 sm:$0xff]   ;;  %v162_v34 = vsub.s32 0, %v161_v33 }
  0x4a   :  { %933 = vmatmul.mubr.bf16.gmra.mrb[4].mxu1 %v1150_v38 }
  0x4b   :  { %948 = vmatpush1.bf16.msra.mxu1 %v1434_v18  ;;  %1039 = vmatmul.mubr.bf16.gmra.mrb[4].mxu0 %v1154_v39  ;;  %v1514_v18 = vld [vmem:[%s2001_s1 + $0x1f4] ss:$8 sps:$4 sm:$0xff]  }
  0x4c   :  { %1054 = vmatpush1.bf16.msra.mxu0 %v1437_v19  ;;  %949 = vmatprep.subr.bf16.mxu1 %v1442_v20  ;;  %v1517_v19 = vld [vmem:[%s2001_s1 + $0x3f4] ss:$8 sps:$4 sm:$0xff]   ;;  %v1512_v20 = vld [vmem:[%s2001_s1 + $0x1f0] ss:$8 sps:$4 sm:$0xff]  }
  0x4d   :  { %1055 = vmatprep.subr.bf16.mxu0 %v1445_v21  ;;  %975 = vmatprep.mubr.bf16.mxu1 %v1145_v49  ;;  %v1515_v21 = vld [vmem:[%s2001_s1 + $0x3f0] ss:$8 sps:$4 sm:$0xff]  }
  0x4e   :  { %1081 = vmatprep.mubr.bf16.mxu0 %v1149_v51 }
  0x4f   :  { %950 = vmatpush1.bf16.msra.mxu1 %v1440_v22  ;;  %v23_v22 = vld [vmem:[%s2002_s0 + $0x48] sm:$0xff] }
  0x50   :  { %1056 = vmatpush1.bf16.msra.mxu0 %v1443_v23  ;;  %951 = vmatprep.subr.bf16.mxu1 %v1448_v24  ;;  %v27_v23 = vld [vmem:[%s2002_s0 + $0x68] sm:$0xff]  ;;  %v25_v24 = vld [vmem:[%s2002_s0 + $0x58] sm:$0xff] }
  0x51   :  { %1057 = vmatprep.subr.bf16.mxu0 %v1451_v25  ;;  %v29_v25 = vld [vmem:[%s2002_s0 + $0x78] sm:$0xff]  ;;  %v1152_v30 = vcombine.low %v23_v22, %v27_v23 }
  0x52   :  { %v1156_v31 = vcombine.low %v25_v24, %v29_v25 }
  0x53   :  { %952 = vmatpush1.bf16.msra.mxu1 %v1446_v26  ;;  %v1144_v26 = vcombine.low %v1841_v44, %v1846_v45 }
  0x54   :  { %1058 = vmatpush1.bf16.msra.mxu0 %v1449_v27  ;;  %953 = vmatprep.subr.bf16.mxu1 %v1454_v28  ;;  %v1148_v27 = vcombine.low %v1851_v46, %v1864_v50  ;;  %v1153_v28 = vcombine.high %v23_v22, %v27_v23 }
  0x55   :  { %1059 = vmatprep.subr.bf16.mxu0 %v1457_v29  ;;  %v1157_v29 = vcombine.high %v25_v24, %v29_v25 }
  0x57   :  { %954 = vmatpush1.bf16.msra.mxu1 %v1452_v35  ;;  %v158_v35 = vld [vmem:[%s2003_s2] sm:$0x3] }
  0x58   :  { %1060 = vmatpush1.bf16.msra.mxu0 %v1455_v36  ;;  %955 = vmatprep.subr.bf16.mxu1 %v1460_v40  ;;  %v166_v36 = vsub.s32 1, %v161_v33  ;;  %v163_v37 = vrot.slane %v158_v35, %v162_v34 }
  0x59   :  { %1061 = vmatprep.subr.bf16.mxu0 %v1463_v41 }
  0x5a   :  { %v167_v38 = vrot.slane %v158_v35, %v166_v36 }
  0x5b   :  { %956 = vmatpush1.bf16.msra.mxu1 %v1458_v42 }
  0x5c   :  { %1062 = vmatpush1.bf16.msra.mxu0 %v1461_v43  ;;  %957 = vmatprep.subr.bf16.mxu1 %v1466_v47 }
  0x5d   :  { %1063 = vmatprep.subr.bf16.mxu0 %v1469_v48 }
  0x5f   :  { %958 = vmatpush1.bf16.msra.mxu1 %v1464_v52 }
  0x60   :  { %1064 = vmatpush1.bf16.msra.mxu0 %v1467_v53  ;;  %959 = vmatprep.subr.bf16.mxu1 %v1472_v54 }
  0x61   :  { %1065 = vmatprep.subr.bf16.mxu0 %v1475_v55 }
  0x63   :  { %960 = vmatpush1.bf16.msra.mxu1 %v1470_v56 }
  0x64   :  { %1066 = vmatpush1.bf16.msra.mxu0 %v1473_v57  ;;  %961 = vmatprep.subr.bf16.mxu1 %v1478_v58 }
  0x65   :  { %1067 = vmatprep.subr.bf16.mxu0 %v1481_v59 }
  0x67   :  { %962 = vmatpush1.bf16.msra.mxu1 %v1476_v60 }
  0x68   :  { %1068 = vmatpush1.bf16.msra.mxu0 %v1479_v61  ;;  %963 = vmatprep.subr.bf16.mxu1 %v1484_v62 }
  0x69   :  { %1069 = vmatprep.subr.bf16.mxu0 %v1487_v63 }
  0x6b   :  { %964 = vmatpush1.bf16.msra.mxu1 %v1482_v0 }
  0x6c   :  { %1070 = vmatpush1.bf16.msra.mxu0 %v1485_v1  ;;  %965 = vmatprep.subr.bf16.mxu1 %v1490_v2 }
  0x6d   :  { %1071 = vmatprep.subr.bf16.mxu0 %v1493_v3 }
  0x6f   :  { %966 = vmatpush1.bf16.msra.mxu1 %v1488_v4 }
  0x70   :  { %1072 = vmatpush1.bf16.msra.mxu0 %v1491_v5  ;;  %967 = vmatprep.subr.bf16.mxu1 %v1496_v6 }
  0x71   :  { %1073 = vmatprep.subr.bf16.mxu0 %v1499_v7 }
  0x73   :  { %968 = vmatpush1.bf16.msra.mxu1 %v1494_v8 }
  0x74   :  { %1074 = vmatpush1.bf16.msra.mxu0 %v1497_v9  ;;  %969 = vmatprep.subr.bf16.mxu1 %v1502_v10 }
  0x75   :  { %1075 = vmatprep.subr.bf16.mxu0 %v1505_v11 }
  0x77   :  { %970 = vmatpush1.bf16.msra.mxu1 %v1500_v12 }
  0x78   :  { %1076 = vmatpush1.bf16.msra.mxu0 %v1503_v13  ;;  %971 = vmatprep.subr.bf16.mxu1 %v1508_v14 }
  0x79   :  { %1077 = vmatprep.subr.bf16.mxu0 %v1511_v15 }
  0x7b   :  { %972 = vmatpush1.bf16.msra.mxu1 %v1506_v16 }
  0x7c   :  { %1078 = vmatpush1.bf16.msra.mxu0 %v1509_v17  ;;  %973 = vmatprep.subr.bf16.mxu1 %v1514_v18 }
  0x7d   :  { %1079 = vmatprep.subr.bf16.mxu0 %v1517_v19 }
  0x7f   :  { %974 = vmatpush1.bf16.msra.mxu1 %v1512_v20 }
  0x80   :  { %1080 = vmatpush1.bf16.msra.mxu0 %v1515_v21 }
  0x82   :  { %976 = vmatmul.mubr.bf16.vlgmr.msra.gmra.mrb[0].mxu1 %v1144_v26 }
  0x83   :  { %1082 = vmatmul.mubr.bf16.vlgmr.msra.gmra.mrb[0].mxu0 %v1148_v27  ;;  %985 = vmatprep.mubr.bf16.mxu1 %v1153_v28 }
  0x84   :  { %1091 = vmatprep.mubr.bf16.mxu0 %v1157_v29 }
  0x8a   :  { %986 = vmatmul.mubr.bf16.gmra.mrb[4].mxu1 %v1152_v30 }
  0x8b   :  { %1092 = vmatmul.mubr.bf16.gmra.mrb[4].mxu0 %v1156_v31 }
 0x155   :  { %v977_v39 = vpop.f32.mrb[0].mxu1 }
 0x156   :  { %v1083_v40 = vpop.f32.mrb[0].mxu0  ;;  %v1294_v41 = vadd.f32 %v977_v39, %v163_v37  ;;  %v979_v42 = vpop.f32.mrb[1].mxu1 }
 0x157   :  { %v1085_v43 = vpop.f32.mrb[1].mxu0  ;;  %v1296_v44 = vadd.f32 %v979_v42, %v167_v38  ;;  %v981_v45 = vpop.f32.mrb[2].mxu1 }
 0x158   :  { %v1087_v46 = vpop.f32.mrb[2].mxu0  ;;  %v1295_v47 = vadd.f32 %v1294_v41, %v1083_v40  ;;  %v1298_v48 = vadd.f32 %v981_v45, %v163_v37  ;;  %v983_v49 = vpop.f32.mrb[3].mxu1 }
 0x159   :  { %v1089_v50 = vpop.f32.mrb[3].mxu0  ;;  %v1297_v51 = vadd.f32 %v1296_v44, %v1085_v43  ;;  %v1300_v52 = vadd.f32 %v983_v49, %v167_v38 }
 0x15a   :  { %v1102_v53 = vmax.f32 %v1295_v47, 0.0  ;;  %v1299_v54 = vadd.f32 %v1298_v48, %v1087_v46 }
 0x15b   :  { %v1103_v55 = vmax.f32 %v1297_v51, 0.0  ;;  %v1301_v56 = vadd.f32 %v1300_v52, %v1089_v50 }
 0x15c   :  { %v1104_v57 = vmax.f32 %v1299_v54, 0.0 }
 0x15d   :  { %v1290_v58 = vpack.c.bf16 %v1103_v55, %v1102_v53  ;;  %v1105_v59 = vmax.f32 %v1301_v56, 0.0  ;;  %v987_v60 = vpop.f32.mrb[4].mxu1 }
 0x15e   :  { %v1093_v61 = vpop.f32.mrb[4].mxu0  ;;  %v1302_v62 = vadd.f32 %v987_v60, %v163_v37  ;;  %v989_v63 = vpop.f32.mrb[5].mxu1 }
 0x15f   :  { %v1095_v0 = vpop.f32.mrb[5].mxu0  ;;  %1134 = vst [vmem:[%s2004_s3] sm:$0xff] %v1290_v58  ;;  %v1291_v1 = vpack.c.bf16 %v1105_v59, %v1104_v57  ;;  %v1304_v2 = vadd.f32 %v989_v63, %v167_v38  ;;  %v991_v3 = vpop.f32.mrb[6].mxu1 }
 0x160   :  { %v1097_v4 = vpop.f32.mrb[6].mxu0  ;;  %v1303_v5 = vadd.f32 %v1302_v62, %v1093_v61  ;;  %v1306_v6 = vadd.f32 %v991_v3, %v163_v37  ;;  %v993_v7 = vpop.f32.mrb[7].mxu1 }
 0x161   :  { %v1099_v8 = vpop.f32.mrb[7].mxu0  ;;  %1135 = vst [vmem:[%s2004_s3 + $0x8] sm:$0xff] %v1291_v1  ;;  %v1305_v9 = vadd.f32 %v1304_v2, %v1095_v0  ;;  %v1308_v10 = vadd.f32 %v993_v7, %v167_v38 }
 0x162   :  { %v1106_v11 = vmax.f32 %v1303_v5, 0.0  ;;  %v1307_v12 = vadd.f32 %v1306_v6, %v1097_v4 }
 0x163   :  { %v1107_v13 = vmax.f32 %v1305_v9, 0.0  ;;  %v1309_v14 = vadd.f32 %v1308_v10, %v1099_v8 }
 0x164   :  { %v1108_v15 = vmax.f32 %v1307_v12, 0.0 }
 0x165   :  { %v1292_v16 = vpack.c.bf16 %v1107_v13, %v1106_v11  ;;  %v1109_v17 = vmax.f32 %v1309_v14, 0.0 }
 0x167   :  { %1136 = vst [vmem:[%s2004_s3 + $0x10] sm:$0xff] %v1292_v16  ;;  %v1293_v18 = vpack.c.bf16 %v1109_v17, %v1108_v15 }
 0x169   :  { %1137 = vst [vmem:[%s2004_s3 + $0x18] sm:$0xff] %v1293_v18 }

</bundles_post_ra>
